<compile_context>
chip_gen: v7x
topology: tpu7x:2x2x1
jax: 0.10.0
libtpu: 0.0.40
codegen_flags: <defaults>
</compile_context>

<pallas_src>
import jax
import jax.numpy as jnp
from jax import lax
from jax.experimental import pallas as pl
from jax.experimental.pallas import tpu as pltpu

NCHANNELS = 1
NDF = 64
LRELU_SLOPE = 0.2
BN_EPS = 1e-5


# ----------------------------------------------------------------------------
# Pallas kernel 1: implicit-GEMM 4x4 / stride-2 conv for one output-row group,
# emitting bf16 conv outputs plus f32 per-group [sum, sumsq] for BatchNorm.
# ----------------------------------------------------------------------------
def _conv_taps_kernel(x00_ref, x01_ref, x10_ref, x11_ref, w_ref, y_ref, stat_ref):
    # x{a}{b}_ref: (M, 4*Cin) bf16 space-to-depth operand of kernel tap (a, b),
    #              M = N * Wout output pixels of one output row.
    # w_ref:       (4, 4*Cin, Cout) bf16 weight taps, tap index t = 2*a + b.
    # y_ref:       (M, Cout) bf16 conv result (pre-BN).
    # stat_ref:    (2, Cout) f32: row 0 = column sum, row 1 = column sum of squares.
    acc = jnp.dot(x00_ref[...], w_ref[0], preferred_element_type=jnp.float32)
    acc = acc + jnp.dot(x01_ref[...], w_ref[1], preferred_element_type=jnp.float32)
    acc = acc + jnp.dot(x10_ref[...], w_ref[2], preferred_element_type=jnp.float32)
    acc = acc + jnp.dot(x11_ref[...], w_ref[3], preferred_element_type=jnp.float32)
    y_ref[...] = acc.astype(y_ref.dtype)
    stat_ref[0:1, :] = jnp.sum(acc, axis=0, keepdims=True)
    stat_ref[1:2, :] = jnp.sum(acc * acc, axis=0, keepdims=True)


def _row0_map(i):
    return (i, 0, 0)


def _row1_map(i):
    return (i + 1, 0, 0)


def _const3_map(i):
    return (0, 0, 0)


def conv2d_taps(xs0, xs1, w_taps, hout):
    """xs0/xs1: (Hq, M, 4Cin) bf16, w_taps: (4, 4Cin, Cout) bf16.

    Returns y (hout, M, Cout) bf16 and stats (hout, 2, Cout) f32.
    """
    hq, m, k4 = xs0.shape
    cout = w_taps.shape[-1]
    assert hq == hout + 1 and w_taps.shape == (4, k4, cout)

    # Explicit VMEM budget (review): everything below is double-buffered by the
    # BlockSpec pipeline.  TODO(synk): additionally tile M (= N * Wout) once the
    # batch grows enough that a single output-row group stops fitting.
    block_bytes = (
        4 * 2 * m * k4 * 2        # four lhs tap tiles, bf16
        + 2 * 4 * k4 * cout * 2   # weight taps, bf16 (constant block index)
        + 2 * m * cout * 2        # y tile, bf16
        + 2 * 2 * cout * 4        # stats tile, f32
    )
    vmem_limit = int(min(64 * 2**20, max(32 * 2**20, 2 * block_bytes)))

    return pl.pallas_call(
        _conv_taps_kernel,
        out_shape=(
            jax.ShapeDtypeStruct((hout, m, cout), jnp.bfloat16),
            jax.ShapeDtypeStruct((hout, 2, cout), jnp.float32),
        ),
        grid_spec=pltpu.PrefetchScalarGridSpec(
            num_scalar_prefetch=0,
            grid=(hout,),
            in_specs=[
                pl.BlockSpec((None, m, k4), _row0_map),   # tap (a=0, b=0)
                pl.BlockSpec((None, m, k4), _row0_map),   # tap (a=0, b=1)
                pl.BlockSpec((None, m, k4), _row1_map),   # tap (a=1, b=0)
                pl.BlockSpec((None, m, k4), _row1_map),   # tap (a=1, b=1)
                pl.BlockSpec((4, k4, cout), _const3_map),
            ],
            out_specs=[
                pl.BlockSpec((None, m, cout), _row0_map),
                pl.BlockSpec((None, 2, cout), _row0_map),
            ],
        ),
        compiler_params=pltpu.CompilerParams(
            dimension_semantics=("parallel",),   # hout >= 4 -> both v7x TCs
            vmem_limit_bytes=vmem_limit,
        ),
    )(xs0, xs1, xs0, xs1, w_taps)


# ----------------------------------------------------------------------------
# Pallas kernel 2: lane-dense BatchNorm affine + LeakyReLU epilogue (bf16 I/O).
# ----------------------------------------------------------------------------
def _bn_lrelu_kernel(y_ref, scale_ref, bias_ref, o_ref):
    z = y_ref[...].astype(jnp.float32) * scale_ref[...] + bias_ref[...]
    o_ref[...] = jnp.where(z > 0, z, LRELU_SLOPE * z).astype(o_ref.dtype)


def _pick_row_tile(rows):
    """A divisor of `rows` (multiple of 8) giving >=2 grid steps for v7x."""
    if rows % 16 == 0:
        tile = rows // 2
        while tile > 1024 and tile % 2 == 0 and (tile // 2) % 8 == 0:
            tile //= 2
        return tile
    return rows


def bn_lrelu(y2d, scale, bias):
    """y2d: (R, Cout) bf16; scale/bias: (1, Cout) f32 -> (R, Cout) bf16."""
    rows, cout = y2d.shape
    tile = _pick_row_tile(rows)
    return pl.pallas_call(
        _bn_lrelu_kernel,
        out_shape=jax.ShapeDtypeStruct((rows, cout), jnp.bfloat16),
        grid_spec=pltpu.PrefetchScalarGridSpec(
            num_scalar_prefetch=0,
            grid=(rows // tile,),
            in_specs=[
                pl.BlockSpec((tile, cout), lambda i: (i, 0)),
                pl.BlockSpec((1, cout), lambda i: (0, 0)),
                pl.BlockSpec((1, cout), lambda i: (0, 0)),
            ],
            out_specs=pl.BlockSpec((tile, cout), lambda i: (i, 0)),
        ),
        compiler_params=pltpu.CompilerParams(
            dimension_semantics=("parallel",),
        ),
    )(y2d, scale, bias)


# ----------------------------------------------------------------------------
# Wrapper-side glue (kept in bf16; no im2col materialization).
# ----------------------------------------------------------------------------
def _space_to_depth_taps(x_hnwc):
    """(H, N, W, C) bf16 -> two implicit-GEMM operands (Hq, N*Wout, 4C) bf16.

    xs_b[hq, n*Wout + ow, r*2C + s*C + c] = x_pad[2*hq + r, n, 2*(ow + b) + s, c]
    (kw-parity shift b in {0,1}); Hq = Hout + 1 rows cover the kh-parity shift.
    """
    h, n, w, c = x_hnwc.shape
    hout, wout = h // 2, w // 2
    hq, wq = hout + 1, wout + 1
    xp = jnp.pad(x_hnwc, ((1, 1), (0, 0), (1, 1), (0, 0)))
    xr = xp.reshape(hq, 2, n, wq, 2, c)
    xr = jnp.transpose(xr, (0, 2, 3, 1, 4, 5)).reshape(hq, n, wq, 4 * c)
    xs0 = xr[:, :, 0:wout, :].reshape(hq, n * wout, 4 * c)
    xs1 = xr[:, :, 1:wout + 1, :].reshape(hq, n * wout, 4 * c)
    return xs0, xs1, (hout, n, wout)


def conv_bn_lrelu_layer(x_hnwc, w_taps, gamma, beta):
    """Conv(k4,s2,p1,bias=False) + BatchNorm(batch stats) + LeakyReLU(0.2).

    x: (H, N, W, Cin) bf16 -> (Hout, N, Wout, Cout) bf16.
    """
    xs0, xs1, (hout, n, wout) = _space_to_depth_taps(x_hnwc)
    cout = w_taps.shape[-1]
    y, stats = conv2d_taps(xs0, xs1, w_taps, hout)

    count = float(hout * n * wout)
    total = jnp.sum(stats, axis=0)                           # (2, Cout) f32
    mean = total[0] / count
    var = jnp.maximum(total[1] / count - mean * mean, 0.0)   # biased (train-mode BN)
    scale = gamma * lax.rsqrt(var + BN_EPS)
    bias = beta - mean * scale

    z = bn_lrelu(y.reshape(hout * n * wout, cout),
                 scale.reshape(1, cout), bias.reshape(1, cout))
    return z.reshape(hout, n, wout, cout)


def conv_lrelu_layer1(x_nhwc, w1_hwio):
    """Conv(1->64, k4 s2 p1) + LeakyReLU; Cin=1 -> plain XLA conv (per review)."""
    y = lax.conv_general_dilated(
        x_nhwc, w1_hwio, window_strides=(2, 2), padding=((1, 1), (1, 1)),
        dimension_numbers=("NHWC", "HWIO", "NHWC"),
        preferred_element_type=jnp.float32)
    y = jnp.where(y > 0, y, LRELU_SLOPE * y).astype(jnp.bfloat16)
    return jnp.transpose(y, (1, 0, 2, 3))                    # (H, N, W, C)


def conv_sigmoid_layer5(x_hnwc, w5_mat):
    """Conv(512->1, k4 s1 p0) + Sigmoid; Cout=1 / ~32 KFLOP -> XLA dot (review)."""
    h, n, w, c = x_hnwc.shape
    patches = jnp.transpose(x_hnwc, (1, 0, 2, 3)).reshape(n, h * w * c)
    logits = jnp.dot(patches.astype(jnp.float32), w5_mat,
                     preferred_element_type=jnp.float32)
    return jax.nn.sigmoid(logits).reshape(n, 1, 1, 1)


# ----------------------------------------------------------------------------
# Parameters
# ----------------------------------------------------------------------------
def _conv_weight_taps(w_oihw):
    """(Cout, Cin, 4, 4) -> (4, 4*Cin, Cout); tap t = 2a + b covers kernel
    positions (kh, kw) = (2a + r, 2b + s), contraction order (r, s, cin)."""
    cout, cin = w_oihw.shape[:2]
    w = w_oihw.reshape(cout, cin, 2, 2, 2, 2)          # (co, c, a, r, b, s)
    w = jnp.transpose(w, (2, 4, 3, 5, 1, 0))           # (a, b, r, s, c, co)
    return w.reshape(4, 4 * cin, cout)


def init_raw_params(key):
    ks = jax.random.split(key, 5)
    std = 0.02  # DCGAN-style init, deterministic via PRNGKey
    return {
        "w1": jax.random.normal(ks[0], (NDF, NCHANNELS, 4, 4), jnp.float32) * std,
        "w2": jax.random.normal(ks[1], (NDF * 2, NDF, 4, 4), jnp.float32) * std,
        "w3": jax.random.normal(ks[2], (NDF * 4, NDF * 2, 4, 4), jnp.float32) * std,
        "w4": jax.random.normal(ks[3], (NDF * 8, NDF * 4, 4, 4), jnp.float32) * std,
        "w5": jax.random.normal(ks[4], (1, NDF * 8, 4, 4), jnp.float32) * std,
        "g2": jnp.ones((NDF * 2,), jnp.float32), "b2": jnp.zeros((NDF * 2,), jnp.float32),
        "g3": jnp.ones((NDF * 4,), jnp.float32), "b3": jnp.zeros((NDF * 4,), jnp.float32),
        "g4": jnp.ones((NDF * 8,), jnp.float32), "b4": jnp.zeros((NDF * 8,), jnp.float32),
    }


def prepare_params(raw):
    """Pre-layout the conv weights for the kernels (bf16 MXU operands)."""
    p = dict(raw)
    p["w1"] = jnp.transpose(raw["w1"], (2, 3, 1, 0)).astype(jnp.bfloat16)   # HWIO
    for k in ("w2", "w3", "w4"):
        p[k] = _conv_weight_taps(raw[k]).astype(jnp.bfloat16)
    p["w5"] = jnp.transpose(raw["w5"], (2, 3, 1, 0)).reshape(-1, 1)         # (h*w*c, 1)
    return p


# ----------------------------------------------------------------------------
# Forward pass
# ----------------------------------------------------------------------------
@jax.jit
def discriminator_forward(x_nchw, params):
    x = jnp.transpose(x_nchw, (0, 2, 3, 1)).astype(jnp.bfloat16)   # NHWC bf16

    # Layer 1: Conv(1->64, k4 s2 p1) + LeakyReLU (XLA conv per review); the
    # activation is then carried as (H, N, W, C) bf16 for the Pallas layers.
    x = conv_lrelu_layer1(x, params["w1"])

    # Layers 2-4: Pallas implicit-GEMM conv + BatchNorm(batch stats) + LeakyReLU.
    for wk, gk, bk in (("w2", "g2", "b2"), ("w3", "g3", "b3"), ("w4", "g4", "b4")):
        x = conv_bn_lrelu_layer(x, params[wk], params[gk], params[bk])

    # Layer 5: Conv(512->1, k4 s1 p0) + Sigmoid -> (N, 1, 1, 1).
    return conv_sigmoid_layer5(x, params["w5"])


# ----------------------------------------------------------------------------
# Pure-XLA f32 reference (train-mode BN) for a loose correctness check.
# ----------------------------------------------------------------------------
def reference_forward(x_nchw, raw):
    def conv(v, w, stride, pad):
        return lax.conv_general_dilated(
            v, jnp.transpose(w, (2, 3, 1, 0)), (stride, stride),
            ((pad, pad), (pad, pad)),
            dimension_numbers=("NHWC", "HWIO", "NHWC"))

    def lrelu(v):
        return jnp.where(v > 0, v, LRELU_SLOPE * v)

    def bn(v, g, b):
        mean = jnp.mean(v, axis=(0, 1, 2))
        var = jnp.mean(jnp.square(v - mean), axis=(0, 1, 2))
        return (v - mean) * lax.rsqrt(var + BN_EPS) * g + b

    v = jnp.transpose(x_nchw, (0, 2, 3, 1)).astype(jnp.bfloat16).astype(jnp.float32)
    v = lrelu(conv(v, raw["w1"], 2, 1))
    v = lrelu(bn(conv(v, raw["w2"], 2, 1), raw["g2"], raw["b2"]))
    v = lrelu(bn(conv(v, raw["w3"], 2, 1), raw["g3"], raw["b3"]))
    v = lrelu(bn(conv(v, raw["w4"], 2, 1), raw["g4"], raw["b4"]))
    v = jax.nn.sigmoid(conv(v, raw["w5"], 1, 0))
    return jnp.transpose(v, (0, 3, 1, 2))


if __name__ == "__main__":
    key = jax.random.PRNGKey(0)
    pkey, xkey = jax.random.split(key)
    raw = init_raw_params(pkey)
    params = prepare_params(raw)
    # DCGAN discriminator needs 64x64 spatial input to reach the 1x1 head.
    x = jax.random.normal(xkey, (2, NCHANNELS, 64, 64), jnp.float32)

    out = jax.block_until_ready(discriminator_forward(x, params))
    assert out.shape == (2, 1, 1, 1), out.shape
    assert bool(jnp.all(jnp.isfinite(out)))
    assert bool(jnp.all((out >= 0.0) & (out <= 1.0)))   # sigmoid range

    ref = jax.block_until_ready(jax.jit(reference_forward)(x, raw))
    err = float(jnp.max(jnp.abs(out.astype(jnp.float32) - ref.astype(jnp.float32))))
    assert err < 0.06, f"mismatch vs f32 reference: {err}"
    print("KERNEL_OK")
</pallas_src>

<mosaic_0001>
module attributes {stable_mosaic.version = 11 : i64} {
  func.func @_conv_taps_kernel(%arg0: i32, %arg1: memref<1x32x256xbf16, #tpu.memory_space<vmem>>, %arg2: memref<1x32x256xbf16, #tpu.memory_space<vmem>>, %arg3: memref<1x32x256xbf16, #tpu.memory_space<vmem>>, %arg4: memref<1x32x256xbf16, #tpu.memory_space<vmem>>, %arg5: memref<4x256x128xbf16, #tpu.memory_space<vmem>>, %arg6: memref<1x32x128xbf16, #tpu.memory_space<vmem>>, %arg7: memref<1x2x128xf32, #tpu.memory_space<vmem>>) attributes {dimension_semantics = [#tpu.dimension_semantics<parallel>], iteration_bounds = array<i64: 16>, scalar_prefetch = 0 : i64, scratch_operands = 0 : i64, tpu.core_type = #tpu.core_type<tc>, window_params = [{transform_indices = @transform_0, window_bounds = array<i64: 1, 32, 256>}, {transform_indices = @transform_1, window_bounds = array<i64: 1, 32, 256>}, {transform_indices = @transform_2, window_bounds = array<i64: 1, 32, 256>}, {transform_indices = @transform_3, window_bounds = array<i64: 1, 32, 256>}, {pipeline_mode = #tpu.pipeline_mode<synchronous>, transform_indices = @transform_4, window_bounds = array<i64: 4, 256, 128>}, {transform_indices = @transform_5, window_bounds = array<i64: 1, 32, 128>}, {transform_indices = @transform_6, window_bounds = array<i64: 1, 2, 128>}]} {
    %c0 = arith.constant 0 : index
    %c0_0 = arith.constant 0 : index
    %c0_1 = arith.constant 0 : index
    %0 = vector.load %arg1[%c0, %c0_0, %c0_1] : memref<1x32x256xbf16, #tpu.memory_space<vmem>>, vector<1x32x256xbf16>
    %1 = vector.shape_cast %0 : vector<1x32x256xbf16> to vector<32x256xbf16>
    %c0_2 = arith.constant 0 : index
    %c0_3 = arith.constant 0 : index
    %c0_4 = arith.constant 0 : index
    %2 = vector.load %arg5[%c0_2, %c0_3, %c0_4] : memref<4x256x128xbf16, #tpu.memory_space<vmem>>, vector<1x256x128xbf16>
    %3 = vector.shape_cast %2 : vector<1x256x128xbf16> to vector<256x128xbf16>
    %cst = arith.constant dense<0.000000e+00> : vector<32x128xf32>
    %4 = tpu.matmul %1, %3, %cst {dimension_numbers = #tpu.dot_dimension_numbers<[1], [0], [0], [1], [0, 0, 1, 1], [], []>} : vector<32x256xbf16>, vector<256x128xbf16>, vector<32x128xf32> -> vector<32x128xf32>
    %c0_5 = arith.constant 0 : index
    %c0_6 = arith.constant 0 : index
    %c0_7 = arith.constant 0 : index
    %5 = vector.load %arg2[%c0_5, %c0_6, %c0_7] : memref<1x32x256xbf16, #tpu.memory_space<vmem>>, vector<1x32x256xbf16>
    %6 = vector.shape_cast %5 : vector<1x32x256xbf16> to vector<32x256xbf16>
    %c1 = arith.constant 1 : index
    %c0_8 = arith.constant 0 : index
    %c0_9 = arith.constant 0 : index
    %7 = vector.load %arg5[%c1, %c0_8, %c0_9] : memref<4x256x128xbf16, #tpu.memory_space<vmem>>, vector<1x256x128xbf16>
    %8 = vector.shape_cast %7 : vector<1x256x128xbf16> to vector<256x128xbf16>
    %cst_10 = arith.constant dense<0.000000e+00> : vector<32x128xf32>
    %9 = tpu.matmul %6, %8, %cst_10 {dimension_numbers = #tpu.dot_dimension_numbers<[1], [0], [0], [1], [0, 0, 1, 1], [], []>} : vector<32x256xbf16>, vector<256x128xbf16>, vector<32x128xf32> -> vector<32x128xf32>
    %10 = arith.addf %4, %9 : vector<32x128xf32>
    %c0_11 = arith.constant 0 : index
    %c0_12 = arith.constant 0 : index
    %c0_13 = arith.constant 0 : index
    %11 = vector.load %arg3[%c0_11, %c0_12, %c0_13] : memref<1x32x256xbf16, #tpu.memory_space<vmem>>, vector<1x32x256xbf16>
    %12 = vector.shape_cast %11 : vector<1x32x256xbf16> to vector<32x256xbf16>
    %c2 = arith.constant 2 : index
    %c0_14 = arith.constant 0 : index
    %c0_15 = arith.constant 0 : index
    %13 = vector.load %arg5[%c2, %c0_14, %c0_15] : memref<4x256x128xbf16, #tpu.memory_space<vmem>>, vector<1x256x128xbf16>
    %14 = vector.shape_cast %13 : vector<1x256x128xbf16> to vector<256x128xbf16>
    %cst_16 = arith.constant dense<0.000000e+00> : vector<32x128xf32>
    %15 = tpu.matmul %12, %14, %cst_16 {dimension_numbers = #tpu.dot_dimension_numbers<[1], [0], [0], [1], [0, 0, 1, 1], [], []>} : vector<32x256xbf16>, vector<256x128xbf16>, vector<32x128xf32> -> vector<32x128xf32>
    %16 = arith.addf %10, %15 : vector<32x128xf32>
    %c0_17 = arith.constant 0 : index
    %c0_18 = arith.constant 0 : index
    %c0_19 = arith.constant 0 : index
    %17 = vector.load %arg4[%c0_17, %c0_18, %c0_19] : memref<1x32x256xbf16, #tpu.memory_space<vmem>>, vector<1x32x256xbf16>
    %18 = vector.shape_cast %17 : vector<1x32x256xbf16> to vector<32x256xbf16>
    %c3 = arith.constant 3 : index
    %c0_20 = arith.constant 0 : index
    %c0_21 = arith.constant 0 : index
    %19 = vector.load %arg5[%c3, %c0_20, %c0_21] : memref<4x256x128xbf16, #tpu.memory_space<vmem>>, vector<1x256x128xbf16>
    %20 = vector.shape_cast %19 : vector<1x256x128xbf16> to vector<256x128xbf16>
    %cst_22 = arith.constant dense<0.000000e+00> : vector<32x128xf32>
    %21 = tpu.matmul %18, %20, %cst_22 {dimension_numbers = #tpu.dot_dimension_numbers<[1], [0], [0], [1], [0, 0, 1, 1], [], []>} : vector<32x256xbf16>, vector<256x128xbf16>, vector<32x128xf32> -> vector<32x128xf32>
    %22 = arith.addf %16, %21 : vector<32x128xf32>
    %23 = arith.truncf %22 : vector<32x128xf32> to vector<32x128xbf16>
    %c0_23 = arith.constant 0 : index
    %c0_24 = arith.constant 0 : index
    %c0_25 = arith.constant 0 : index
    %24 = vector.load %arg6[%c0_23, %c0_24, %c0_25] : memref<1x32x128xbf16, #tpu.memory_space<vmem>>, vector<1x32x128xbf16>
    %25 = vector.shape_cast %24 : vector<1x32x128xbf16> to vector<32x128xbf16>
    %26 = vector.shape_cast %23 : vector<32x128xbf16> to vector<1x32x128xbf16>
    tpu.vector_store %arg6[%c0_23, %c0_24, %c0_25], %26 {strides = array<i32>} : memref<1x32x128xbf16, #tpu.memory_space<vmem>>, vector<1x32x128xbf16>,
    %cst_26 = arith.constant dense<0.000000e+00> : vector<128xf32>
    %27 = vector.multi_reduction <add>, %22, %cst_26 [0] : vector<32x128xf32> to vector<128xf32>
    %28 = vector.shape_cast %27 : vector<128xf32> to vector<1x128xf32>
    %c0_27 = arith.constant 0 : index
    %c0_28 = arith.constant 0 : index
    %c0_29 = arith.constant 0 : index
    %29 = vector.load %arg7[%c0_27, %c0_28, %c0_29] : memref<1x2x128xf32, #tpu.memory_space<vmem>>, vector<1x1x128xf32>
    %30 = vector.shape_cast %29 : vector<1x1x128xf32> to vector<1x128xf32>
    %31 = vector.shape_cast %28 : vector<1x128xf32> to vector<1x1x128xf32>
    tpu.vector_store %arg7[%c0_27, %c0_28, %c0_29], %31 {strides = array<i32>} : memref<1x2x128xf32, #tpu.memory_space<vmem>>, vector<1x1x128xf32>,
    %32 = arith.mulf %22, %22 : vector<32x128xf32>
    %cst_30 = arith.constant dense<0.000000e+00> : vector<128xf32>
    %33 = vector.multi_reduction <add>, %32, %cst_30 [0] : vector<32x128xf32> to vector<128xf32>
    %34 = vector.shape_cast %33 : vector<128xf32> to vector<1x128xf32>
    %c0_31 = arith.constant 0 : index
    %c1_32 = arith.constant 1 : index
    %c0_33 = arith.constant 0 : index
    %35 = vector.load %arg7[%c0_31, %c1_32, %c0_33] : memref<1x2x128xf32, #tpu.memory_space<vmem>>, vector<1x1x128xf32>
    %36 = vector.shape_cast %35 : vector<1x1x128xf32> to vector<1x128xf32>
    %37 = vector.shape_cast %34 : vector<1x128xf32> to vector<1x1x128xf32>
    tpu.vector_store %arg7[%c0_31, %c1_32, %c0_33], %37 {strides = array<i32>} : memref<1x2x128xf32, #tpu.memory_space<vmem>>, vector<1x1x128xf32>,
    return
  }
  func.func @transform_0(%arg0: i32) -> (i32, i32, i32) {
    %c0_i32 = arith.constant 0 : i32
    %c0_i32_0 = arith.constant 0 : i32
    %c0_i32_1 = arith.constant 0 : i32
    return %arg0, %c0_i32, %c0_i32_0 : i32, i32, i32
  }
  func.func @transform_1(%arg0: i32) -> (i32, i32, i32) {
    %c0_i32 = arith.constant 0 : i32
    %c0_i32_0 = arith.constant 0 : i32
    %c0_i32_1 = arith.constant 0 : i32
    return %arg0, %c0_i32, %c0_i32_0 : i32, i32, i32
  }
  func.func @transform_2(%arg0: i32) -> (i32, i32, i32) {
    %c1_i32 = arith.constant 1 : i32
    %0 = arith.addi %arg0, %c1_i32 : i32
    %c0_i32 = arith.constant 0 : i32
    %c0_i32_0 = arith.constant 0 : i32
    %c0_i32_1 = arith.constant 0 : i32
    return %0, %c0_i32, %c0_i32_0 : i32, i32, i32
  }
  func.func @transform_3(%arg0: i32) -> (i32, i32, i32) {
    %c1_i32 = arith.constant 1 : i32
    %0 = arith.addi %arg0, %c1_i32 : i32
    %c0_i32 = arith.constant 0 : i32
    %c0_i32_0 = arith.constant 0 : i32
    %c0_i32_1 = arith.constant 0 : i32
    return %0, %c0_i32, %c0_i32_0 : i32, i32, i32
  }
  func.func @transform_4(%arg0: i32) -> (i32, i32, i32) {
    %c0_i32 = arith.constant 0 : i32
    %c0_i32_0 = arith.constant 0 : i32
    %c0_i32_1 = arith.constant 0 : i32
    %c0_i32_2 = arith.constant 0 : i32
    return %c0_i32, %c0_i32_0, %c0_i32_1 : i32, i32, i32
  }
  func.func @transform_5(%arg0: i32) -> (i32, i32, i32) {
    %c0_i32 = arith.constant 0 : i32
    %c0_i32_0 = arith.constant 0 : i32
    %c0_i32_1 = arith.constant 0 : i32
    return %arg0, %c0_i32, %c0_i32_0 : i32, i32, i32
  }
  func.func @transform_6(%arg0: i32) -> (i32, i32, i32) {
    %c0_i32 = arith.constant 0 : i32
    %c0_i32_0 = arith.constant 0 : i32
    %c0_i32_1 = arith.constant 0 : i32
    return %arg0, %c0_i32, %c0_i32_0 : i32, i32, i32
  }
}

module attributes {stable_mosaic.version = 11 : i64} {
  func.func @_bn_lrelu_kernel(%arg0: i32, %arg1: memref<256x128xbf16, #tpu.memory_space<vmem>>, %arg2: memref<1x128xf32, #tpu.memory_space<vmem>>, %arg3: memref<1x128xf32, #tpu.memory_space<vmem>>, %arg4: memref<256x128xbf16, #tpu.memory_space<vmem>>) attributes {dimension_semantics = [#tpu.dimension_semantics<parallel>], iteration_bounds = array<i64: 2>, scalar_prefetch = 0 : i64, scratch_operands = 0 : i64, tpu.core_type = #tpu.core_type<tc>, window_params = [{transform_indices = @transform_0, window_bounds = array<i64: 256, 128>}, {pipeline_mode = #tpu.pipeline_mode<synchronous>, transform_indices = @transform_1, window_bounds = array<i64: 1, 128>}, {pipeline_mode = #tpu.pipeline_mode<synchronous>, transform_indices = @transform_2, window_bounds = array<i64: 1, 128>}, {transform_indices = @transform_3, window_bounds = array<i64: 256, 128>}]} {
    %c0 = arith.constant 0 : index
    %c0_0 = arith.constant 0 : index
    %0 = vector.load %arg1[%c0, %c0_0] : memref<256x128xbf16, #tpu.memory_space<vmem>>, vector<256x128xbf16>
    %1 = arith.extf %0 : vector<256x128xbf16> to vector<256x128xf32>
    %c0_1 = arith.constant 0 : index
    %c0_2 = arith.constant 0 : index
    %2 = vector.load %arg2[%c0_1, %c0_2] : memref<1x128xf32, #tpu.memory_space<vmem>>, vector<1x128xf32>
    %3 = vector.broadcast %2 : vector<1x128xf32> to vector<256x128xf32>
    %4 = arith.mulf %1, %3 : vector<256x128xf32>
    %c0_3 = arith.constant 0 : index
    %c0_4 = arith.constant 0 : index
    %5 = vector.load %arg3[%c0_3, %c0_4] : memref<1x128xf32, #tpu.memory_space<vmem>>, vector<1x128xf32>
    %6 = vector.broadcast %5 : vector<1x128xf32> to vector<256x128xf32>
    %7 = arith.addf %4, %6 : vector<256x128xf32>
    %cst = arith.constant 0.000000e+00 : f32
    %8 = vector.broadcast %cst : f32 to vector<256x128xf32>
    %9 = arith.cmpf ogt, %7, %8 : vector<256x128xf32>
    %cst_5 = arith.constant 2.000000e-01 : f32
    %10 = vector.broadcast %cst_5 : f32 to vector<256x128xf32>
    %11 = arith.mulf %10, %7 : vector<256x128xf32>
    %12 = arith.select %9, %7, %11 : vector<256x128xi1>, vector<256x128xf32>
    %13 = arith.truncf %12 : vector<256x128xf32> to vector<256x128xbf16>
    %c0_6 = arith.constant 0 : index
    %c0_7 = arith.constant 0 : index
    %14 = vector.load %arg4[%c0_6, %c0_7] : memref<256x128xbf16, #tpu.memory_space<vmem>>, vector<256x128xbf16>
    tpu.vector_store %arg4[%c0_6, %c0_7], %13 {strides = array<i32>} : memref<256x128xbf16, #tpu.memory_space<vmem>>, vector<256x128xbf16>,
    return
  }
  func.func @transform_0(%arg0: i32) -> (i32, i32) {
    %c0_i32 = arith.constant 0 : i32
    %c0_i32_0 = arith.constant 0 : i32
    return %arg0, %c0_i32 : i32, i32
  }
  func.func @transform_1(%arg0: i32) -> (i32, i32) {
    %c0_i32 = arith.constant 0 : i32
    %c0_i32_0 = arith.constant 0 : i32
    %c0_i32_1 = arith.constant 0 : i32
    return %c0_i32, %c0_i32_0 : i32, i32
  }
  func.func @transform_2(%arg0: i32) -> (i32, i32) {
    %c0_i32 = arith.constant 0 : i32
    %c0_i32_0 = arith.constant 0 : i32
    %c0_i32_1 = arith.constant 0 : i32
    return %c0_i32, %c0_i32_0 : i32, i32
  }
  func.func @transform_3(%arg0: i32) -> (i32, i32) {
    %c0_i32 = arith.constant 0 : i32
    %c0_i32_0 = arith.constant 0 : i32
    return %arg0, %c0_i32 : i32, i32
  }
}

module attributes {stable_mosaic.version = 11 : i64} {
  func.func @_conv_taps_kernel(%arg0: i32, %arg1: memref<1x16x512xbf16, #tpu.memory_space<vmem>>, %arg2: memref<1x16x512xbf16, #tpu.memory_space<vmem>>, %arg3: memref<1x16x512xbf16, #tpu.memory_space<vmem>>, %arg4: memref<1x16x512xbf16, #tpu.memory_space<vmem>>, %arg5: memref<4x512x256xbf16, #tpu.memory_space<vmem>>, %arg6: memref<1x16x256xbf16, #tpu.memory_space<vmem>>, %arg7: memref<1x2x256xf32, #tpu.memory_space<vmem>>) attributes {dimension_semantics = [#tpu.dimension_semantics<parallel>], iteration_bounds = array<i64: 8>, scalar_prefetch = 0 : i64, scratch_operands = 0 : i64, tpu.core_type = #tpu.core_type<tc>, window_params = [{transform_indices = @transform_0, window_bounds = array<i64: 1, 16, 512>}, {transform_indices = @transform_1, window_bounds = array<i64: 1, 16, 512>}, {transform_indices = @transform_2, window_bounds = array<i64: 1, 16, 512>}, {transform_indices = @transform_3, window_bounds = array<i64: 1, 16, 512>}, {pipeline_mode = #tpu.pipeline_mode<synchronous>, transform_indices = @transform_4, window_bounds = array<i64: 4, 512, 256>}, {transform_indices = @transform_5, window_bounds = array<i64: 1, 16, 256>}, {transform_indices = @transform_6, window_bounds = array<i64: 1, 2, 256>}]} {
    %c0 = arith.constant 0 : index
    %c0_0 = arith.constant 0 : index
    %c0_1 = arith.constant 0 : index
    %0 = vector.load %arg1[%c0, %c0_0, %c0_1] : memref<1x16x512xbf16, #tpu.memory_space<vmem>>, vector<1x16x512xbf16>
    %1 = vector.shape_cast %0 : vector<1x16x512xbf16> to vector<16x512xbf16>
    %c0_2 = arith.constant 0 : index
    %c0_3 = arith.constant 0 : index
    %c0_4 = arith.constant 0 : index
    %2 = vector.load %arg5[%c0_2, %c0_3, %c0_4] : memref<4x512x256xbf16, #tpu.memory_space<vmem>>, vector<1x512x256xbf16>
    %3 = vector.shape_cast %2 : vector<1x512x256xbf16> to vector<512x256xbf16>
    %cst = arith.constant dense<0.000000e+00> : vector<16x256xf32>
    %4 = tpu.matmul %1, %3, %cst {dimension_numbers = #tpu.dot_dimension_numbers<[1], [0], [0], [1], [0, 0, 1, 1], [], []>} : vector<16x512xbf16>, vector<512x256xbf16>, vector<16x256xf32> -> vector<16x256xf32>
    %c0_5 = arith.constant 0 : index
    %c0_6 = arith.constant 0 : index
    %c0_7 = arith.constant 0 : index
    %5 = vector.load %arg2[%c0_5, %c0_6, %c0_7] : memref<1x16x512xbf16, #tpu.memory_space<vmem>>, vector<1x16x512xbf16>
    %6 = vector.shape_cast %5 : vector<1x16x512xbf16> to vector<16x512xbf16>
    %c1 = arith.constant 1 : index
    %c0_8 = arith.constant 0 : index
    %c0_9 = arith.constant 0 : index
    %7 = vector.load %arg5[%c1, %c0_8, %c0_9] : memref<4x512x256xbf16, #tpu.memory_space<vmem>>, vector<1x512x256xbf16>
    %8 = vector.shape_cast %7 : vector<1x512x256xbf16> to vector<512x256xbf16>
    %cst_10 = arith.constant dense<0.000000e+00> : vector<16x256xf32>
    %9 = tpu.matmul %6, %8, %cst_10 {dimension_numbers = #tpu.dot_dimension_numbers<[1], [0], [0], [1], [0, 0, 1, 1], [], []>} : vector<16x512xbf16>, vector<512x256xbf16>, vector<16x256xf32> -> vector<16x256xf32>
    %10 = arith.addf %4, %9 : vector<16x256xf32>
    %c0_11 = arith.constant 0 : index
    %c0_12 = arith.constant 0 : index
    %c0_13 = arith.constant 0 : index
    %11 = vector.load %arg3[%c0_11, %c0_12, %c0_13] : memref<1x16x512xbf16, #tpu.memory_space<vmem>>, vector<1x16x512xbf16>
    %12 = vector.shape_cast %11 : vector<1x16x512xbf16> to vector<16x512xbf16>
    %c2 = arith.constant 2 : index
    %c0_14 = arith.constant 0 : index
    %c0_15 = arith.constant 0 : index
    %13 = vector.load %arg5[%c2, %c0_14, %c0_15] : memref<4x512x256xbf16, #tpu.memory_space<vmem>>, vector<1x512x256xbf16>
    %14 = vector.shape_cast %13 : vector<1x512x256xbf16> to vector<512x256xbf16>
    %cst_16 = arith.constant dense<0.000000e+00> : vector<16x256xf32>
    %15 = tpu.matmul %12, %14, %cst_16 {dimension_numbers = #tpu.dot_dimension_numbers<[1], [0], [0], [1], [0, 0, 1, 1], [], []>} : vector<16x512xbf16>, vector<512x256xbf16>, vector<16x256xf32> -> vector<16x256xf32>
    %16 = arith.addf %10, %15 : vector<16x256xf32>
    %c0_17 = arith.constant 0 : index
    %c0_18 = arith.constant 0 : index
    %c0_19 = arith.constant 0 : index
    %17 = vector.load %arg4[%c0_17, %c0_18, %c0_19] : memref<1x16x512xbf16, #tpu.memory_space<vmem>>, vector<1x16x512xbf16>
    %18 = vector.shape_cast %17 : vector<1x16x512xbf16> to vector<16x512xbf16>
    %c3 = arith.constant 3 : index
    %c0_20 = arith.constant 0 : index
    %c0_21 = arith.constant 0 : index
    %19 = vector.load %arg5[%c3, %c0_20, %c0_21] : memref<4x512x256xbf16, #tpu.memory_space<vmem>>, vector<1x512x256xbf16>
    %20 = vector.shape_cast %19 : vector<1x512x256xbf16> to vector<512x256xbf16>
    %cst_22 = arith.constant dense<0.000000e+00> : vector<16x256xf32>
    %21 = tpu.matmul %18, %20, %cst_22 {dimension_numbers = #tpu.dot_dimension_numbers<[1], [0], [0], [1], [0, 0, 1, 1], [], []>} : vector<16x512xbf16>, vector<512x256xbf16>, vector<16x256xf32> -> vector<16x256xf32>
    %22 = arith.addf %16, %21 : vector<16x256xf32>
    %23 = arith.truncf %22 : vector<16x256xf32> to vector<16x256xbf16>
    %c0_23 = arith.constant 0 : index
    %c0_24 = arith.constant 0 : index
    %c0_25 = arith.constant 0 : index
    %24 = vector.load %arg6[%c0_23, %c0_24, %c0_25] : memref<1x16x256xbf16, #tpu.memory_space<vmem>>, vector<1x16x256xbf16>
    %25 = vector.shape_cast %24 : vector<1x16x256xbf16> to vector<16x256xbf16>
    %26 = vector.shape_cast %23 : vector<16x256xbf16> to vector<1x16x256xbf16>
    tpu.vector_store %arg6[%c0_23, %c0_24, %c0_25], %26 {strides = array<i32>} : memref<1x16x256xbf16, #tpu.memory_space<vmem>>, vector<1x16x256xbf16>,
    %cst_26 = arith.constant dense<0.000000e+00> : vector<256xf32>
    %27 = vector.multi_reduction <add>, %22, %cst_26 [0] : vector<16x256xf32> to vector<256xf32>
    %28 = vector.shape_cast %27 : vector<256xf32> to vector<1x256xf32>
    %c0_27 = arith.constant 0 : index
    %c0_28 = arith.constant 0 : index
    %c0_29 = arith.constant 0 : index
    %29 = vector.load %arg7[%c0_27, %c0_28, %c0_29] : memref<1x2x256xf32, #tpu.memory_space<vmem>>, vector<1x1x256xf32>
    %30 = vector.shape_cast %29 : vector<1x1x256xf32> to vector<1x256xf32>
    %31 = vector.shape_cast %28 : vector<1x256xf32> to vector<1x1x256xf32>
    tpu.vector_store %arg7[%c0_27, %c0_28, %c0_29], %31 {strides = array<i32>} : memref<1x2x256xf32, #tpu.memory_space<vmem>>, vector<1x1x256xf32>,
    %32 = arith.mulf %22, %22 : vector<16x256xf32>
    %cst_30 = arith.constant dense<0.000000e+00> : vector<256xf32>
    %33 = vector.multi_reduction <add>, %32, %cst_30 [0] : vector<16x256xf32> to vector<256xf32>
    %34 = vector.shape_cast %33 : vector<256xf32> to vector<1x256xf32>
    %c0_31 = arith.constant 0 : index
    %c1_32 = arith.constant 1 : index
    %c0_33 = arith.constant 0 : index
    %35 = vector.load %arg7[%c0_31, %c1_32, %c0_33] : memref<1x2x256xf32, #tpu.memory_space<vmem>>, vector<1x1x256xf32>
    %36 = vector.shape_cast %35 : vector<1x1x256xf32> to vector<1x256xf32>
    %37 = vector.shape_cast %34 : vector<1x256xf32> to vector<1x1x256xf32>
    tpu.vector_store %arg7[%c0_31, %c1_32, %c0_33], %37 {strides = array<i32>} : memref<1x2x256xf32, #tpu.memory_space<vmem>>, vector<1x1x256xf32>,
    return
  }
  func.func @transform_0(%arg0: i32) -> (i32, i32, i32) {
    %c0_i32 = arith.constant 0 : i32
    %c0_i32_0 = arith.constant 0 : i32
    %c0_i32_1 = arith.constant 0 : i32
    return %arg0, %c0_i32, %c0_i32_0 : i32, i32, i32
  }
  func.func @transform_1(%arg0: i32) -> (i32, i32, i32) {
    %c0_i32 = arith.constant 0 : i32
    %c0_i32_0 = arith.constant 0 : i32
    %c0_i32_1 = arith.constant 0 : i32
    return %arg0, %c0_i32, %c0_i32_0 : i32, i32, i32
  }
  func.func @transform_2(%arg0: i32) -> (i32, i32, i32) {
    %c1_i32 = arith.constant 1 : i32
    %0 = arith.addi %arg0, %c1_i32 : i32
    %c0_i32 = arith.constant 0 : i32
    %c0_i32_0 = arith.constant 0 : i32
    %c0_i32_1 = arith.constant 0 : i32
    return %0, %c0_i32, %c0_i32_0 : i32, i32, i32
  }
  func.func @transform_3(%arg0: i32) -> (i32, i32, i32) {
    %c1_i32 = arith.constant 1 : i32
    %0 = arith.addi %arg0, %c1_i32 : i32
    %c0_i32 = arith.constant 0 : i32
    %c0_i32_0 = arith.constant 0 : i32
    %c0_i32_1 = arith.constant 0 : i32
    return %0, %c0_i32, %c0_i32_0 : i32, i32, i32
  }
  func.func @transform_4(%arg0: i32) -> (i32, i32, i32) {
    %c0_i32 = arith.constant 0 : i32
    %c0_i32_0 = arith.constant 0 : i32
    %c0_i32_1 = arith.constant 0 : i32
    %c0_i32_2 = arith.constant 0 : i32
    return %c0_i32, %c0_i32_0, %c0_i32_1 : i32, i32, i32
  }
  func.func @transform_5(%arg0: i32) -> (i32, i32, i32) {
    %c0_i32 = arith.constant 0 : i32
    %c0_i32_0 = arith.constant 0 : i32
    %c0_i32_1 = arith.constant 0 : i32
    return %arg0, %c0_i32, %c0_i32_0 : i32, i32, i32
  }
  func.func @transform_6(%arg0: i32) -> (i32, i32, i32) {
    %c0_i32 = arith.constant 0 : i32
    %c0_i32_0 = arith.constant 0 : i32
    %c0_i32_1 = arith.constant 0 : i32
    return %arg0, %c0_i32, %c0_i32_0 : i32, i32, i32
  }
}

module attributes {stable_mosaic.version = 11 : i64} {
  func.func @_bn_lrelu_kernel(%arg0: i32, %arg1: memref<64x256xbf16, #tpu.memory_space<vmem>>, %arg2: memref<1x256xf32, #tpu.memory_space<vmem>>, %arg3: memref<1x256xf32, #tpu.memory_space<vmem>>, %arg4: memref<64x256xbf16, #tpu.memory_space<vmem>>) attributes {dimension_semantics = [#tpu.dimension_semantics<parallel>], iteration_bounds = array<i64: 2>, scalar_prefetch = 0 : i64, scratch_operands = 0 : i64, tpu.core_type = #tpu.core_type<tc>, window_params = [{transform_indices = @transform_0, window_bounds = array<i64: 64, 256>}, {pipeline_mode = #tpu.pipeline_mode<synchronous>, transform_indices = @transform_1, window_bounds = array<i64: 1, 256>}, {pipeline_mode = #tpu.pipeline_mode<synchronous>, transform_indices = @transform_2, window_bounds = array<i64: 1, 256>}, {transform_indices = @transform_3, window_bounds = array<i64: 64, 256>}]} {
    %c0 = arith.constant 0 : index
    %c0_0 = arith.constant 0 : index
    %0 = vector.load %arg1[%c0, %c0_0] : memref<64x256xbf16, #tpu.memory_space<vmem>>, vector<64x256xbf16>
    %1 = arith.extf %0 : vector<64x256xbf16> to vector<64x256xf32>
    %c0_1 = arith.constant 0 : index
    %c0_2 = arith.constant 0 : index
    %2 = vector.load %arg2[%c0_1, %c0_2] : memref<1x256xf32, #tpu.memory_space<vmem>>, vector<1x256xf32>
    %3 = vector.broadcast %2 : vector<1x256xf32> to vector<64x256xf32>
    %4 = arith.mulf %1, %3 : vector<64x256xf32>
    %c0_3 = arith.constant 0 : index
    %c0_4 = arith.constant 0 : index
    %5 = vector.load %arg3[%c0_3, %c0_4] : memref<1x256xf32, #tpu.memory_space<vmem>>, vector<1x256xf32>
    %6 = vector.broadcast %5 : vector<1x256xf32> to vector<64x256xf32>
    %7 = arith.addf %4, %6 : vector<64x256xf32>
    %cst = arith.constant 0.000000e+00 : f32
    %8 = vector.broadcast %cst : f32 to vector<64x256xf32>
    %9 = arith.cmpf ogt, %7, %8 : vector<64x256xf32>
    %cst_5 = arith.constant 2.000000e-01 : f32
    %10 = vector.broadcast %cst_5 : f32 to vector<64x256xf32>
    %11 = arith.mulf %10, %7 : vector<64x256xf32>
    %12 = arith.select %9, %7, %11 : vector<64x256xi1>, vector<64x256xf32>
    %13 = arith.truncf %12 : vector<64x256xf32> to vector<64x256xbf16>
    %c0_6 = arith.constant 0 : index
    %c0_7 = arith.constant 0 : index
    %14 = vector.load %arg4[%c0_6, %c0_7] : memref<64x256xbf16, #tpu.memory_space<vmem>>, vector<64x256xbf16>
    tpu.vector_store %arg4[%c0_6, %c0_7], %13 {strides = array<i32>} : memref<64x256xbf16, #tpu.memory_space<vmem>>, vector<64x256xbf16>,
    return
  }
  func.func @transform_0(%arg0: i32) -> (i32, i32) {
    %c0_i32 = arith.constant 0 : i32
    %c0_i32_0 = arith.constant 0 : i32
    return %arg0, %c0_i32 : i32, i32
  }
  func.func @transform_1(%arg0: i32) -> (i32, i32) {
    %c0_i32 = arith.constant 0 : i32
    %c0_i32_0 = arith.constant 0 : i32
    %c0_i32_1 = arith.constant 0 : i32
    return %c0_i32, %c0_i32_0 : i32, i32
  }
  func.func @transform_2(%arg0: i32) -> (i32, i32) {
    %c0_i32 = arith.constant 0 : i32
    %c0_i32_0 = arith.constant 0 : i32
    %c0_i32_1 = arith.constant 0 : i32
    return %c0_i32, %c0_i32_0 : i32, i32
  }
  func.func @transform_3(%arg0: i32) -> (i32, i32) {
    %c0_i32 = arith.constant 0 : i32
    %c0_i32_0 = arith.constant 0 : i32
    return %arg0, %c0_i32 : i32, i32
  }
}

module attributes {stable_mosaic.version = 11 : i64} {
  func.func @_conv_taps_kernel(%arg0: i32, %arg1: memref<1x8x1024xbf16, #tpu.memory_space<vmem>>, %arg2: memref<1x8x1024xbf16, #tpu.memory_space<vmem>>, %arg3: memref<1x8x1024xbf16, #tpu.memory_space<vmem>>, %arg4: memref<1x8x1024xbf16, #tpu.memory_space<vmem>>, %arg5: memref<4x1024x512xbf16, #tpu.memory_space<vmem>>, %arg6: memref<1x8x512xbf16, #tpu.memory_space<vmem>>, %arg7: memref<1x2x512xf32, #tpu.memory_space<vmem>>) attributes {dimension_semantics = [#tpu.dimension_semantics<parallel>], iteration_bounds = array<i64: 4>, scalar_prefetch = 0 : i64, scratch_operands = 0 : i64, tpu.core_type = #tpu.core_type<tc>, window_params = [{transform_indices = @transform_0, window_bounds = array<i64: 1, 8, 1024>}, {transform_indices = @transform_1, window_bounds = array<i64: 1, 8, 1024>}, {transform_indices = @transform_2, window_bounds = array<i64: 1, 8, 1024>}, {transform_indices = @transform_3, window_bounds = array<i64: 1, 8, 1024>}, {pipeline_mode = #tpu.pipeline_mode<synchronous>, transform_indices = @transform_4, window_bounds = array<i64: 4, 1024, 512>}, {transform_indices = @transform_5, window_bounds = array<i64: 1, 8, 512>}, {transform_indices = @transform_6, window_bounds = array<i64: 1, 2, 512>}]} {
    %c0 = arith.constant 0 : index
    %c0_0 = arith.constant 0 : index
    %c0_1 = arith.constant 0 : index
    %0 = vector.load %arg1[%c0, %c0_0, %c0_1] : memref<1x8x1024xbf16, #tpu.memory_space<vmem>>, vector<1x8x1024xbf16>
    %1 = vector.shape_cast %0 : vector<1x8x1024xbf16> to vector<8x1024xbf16>
    %c0_2 = arith.constant 0 : index
    %c0_3 = arith.constant 0 : index
    %c0_4 = arith.constant 0 : index
    %2 = vector.load %arg5[%c0_2, %c0_3, %c0_4] : memref<4x1024x512xbf16, #tpu.memory_space<vmem>>, vector<1x1024x512xbf16>
    %3 = vector.shape_cast %2 : vector<1x1024x512xbf16> to vector<1024x512xbf16>
    %cst = arith.constant dense<0.000000e+00> : vector<8x512xf32>
    %4 = tpu.matmul %1, %3, %cst {dimension_numbers = #tpu.dot_dimension_numbers<[1], [0], [0], [1], [0, 0, 1, 1], [], []>} : vector<8x1024xbf16>, vector<1024x512xbf16>, vector<8x512xf32> -> vector<8x512xf32>
    %c0_5 = arith.constant 0 : index
    %c0_6 = arith.constant 0 : index
    %c0_7 = arith.constant 0 : index
    %5 = vector.load %arg2[%c0_5, %c0_6, %c0_7] : memref<1x8x1024xbf16, #tpu.memory_space<vmem>>, vector<1x8x1024xbf16>
    %6 = vector.shape_cast %5 : vector<1x8x1024xbf16> to vector<8x1024xbf16>
    %c1 = arith.constant 1 : index
    %c0_8 = arith.constant 0 : index
    %c0_9 = arith.constant 0 : index
    %7 = vector.load %arg5[%c1, %c0_8, %c0_9] : memref<4x1024x512xbf16, #tpu.memory_space<vmem>>, vector<1x1024x512xbf16>
    %8 = vector.shape_cast %7 : vector<1x1024x512xbf16> to vector<1024x512xbf16>
    %cst_10 = arith.constant dense<0.000000e+00> : vector<8x512xf32>
    %9 = tpu.matmul %6, %8, %cst_10 {dimension_numbers = #tpu.dot_dimension_numbers<[1], [0], [0], [1], [0, 0, 1, 1], [], []>} : vector<8x1024xbf16>, vector<1024x512xbf16>, vector<8x512xf32> -> vector<8x512xf32>
    %10 = arith.addf %4, %9 : vector<8x512xf32>
    %c0_11 = arith.constant 0 : index
    %c0_12 = arith.constant 0 : index
    %c0_13 = arith.constant 0 : index
    %11 = vector.load %arg3[%c0_11, %c0_12, %c0_13] : memref<1x8x1024xbf16, #tpu.memory_space<vmem>>, vector<1x8x1024xbf16>
    %12 = vector.shape_cast %11 : vector<1x8x1024xbf16> to vector<8x1024xbf16>
    %c2 = arith.constant 2 : index
    %c0_14 = arith.constant 0 : index
    %c0_15 = arith.constant 0 : index
    %13 = vector.load %arg5[%c2, %c0_14, %c0_15] : memref<4x1024x512xbf16, #tpu.memory_space<vmem>>, vector<1x1024x512xbf16>
    %14 = vector.shape_cast %13 : vector<1x1024x512xbf16> to vector<1024x512xbf16>
    %cst_16 = arith.constant dense<0.000000e+00> : vector<8x512xf32>
    %15 = tpu.matmul %12, %14, %cst_16 {dimension_numbers = #tpu.dot_dimension_numbers<[1], [0], [0], [1], [0, 0, 1, 1], [], []>} : vector<8x1024xbf16>, vector<1024x512xbf16>, vector<8x512xf32> -> vector<8x512xf32>
    %16 = arith.addf %10, %15 : vector<8x512xf32>
    %c0_17 = arith.constant 0 : index
    %c0_18 = arith.constant 0 : index
    %c0_19 = arith.constant 0 : index
    %17 = vector.load %arg4[%c0_17, %c0_18, %c0_19] : memref<1x8x1024xbf16, #tpu.memory_space<vmem>>, vector<1x8x1024xbf16>
    %18 = vector.shape_cast %17 : vector<1x8x1024xbf16> to vector<8x1024xbf16>
    %c3 = arith.constant 3 : index
    %c0_20 = arith.constant 0 : index
    %c0_21 = arith.constant 0 : index
    %19 = vector.load %arg5[%c3, %c0_20, %c0_21] : memref<4x1024x512xbf16, #tpu.memory_space<vmem>>, vector<1x1024x512xbf16>
    %20 = vector.shape_cast %19 : vector<1x1024x512xbf16> to vector<1024x512xbf16>
    %cst_22 = arith.constant dense<0.000000e+00> : vector<8x512xf32>
    %21 = tpu.matmul %18, %20, %cst_22 {dimension_numbers = #tpu.dot_dimension_numbers<[1], [0], [0], [1], [0, 0, 1, 1], [], []>} : vector<8x1024xbf16>, vector<1024x512xbf16>, vector<8x512xf32> -> vector<8x512xf32>
    %22 = arith.addf %16, %21 : vector<8x512xf32>
    %23 = arith.truncf %22 : vector<8x512xf32> to vector<8x512xbf16>
    %c0_23 = arith.constant 0 : index
    %c0_24 = arith.constant 0 : index
    %c0_25 = arith.constant 0 : index
    %24 = vector.load %arg6[%c0_23, %c0_24, %c0_25] : memref<1x8x512xbf16, #tpu.memory_space<vmem>>, vector<1x8x512xbf16>
    %25 = vector.shape_cast %24 : vector<1x8x512xbf16> to vector<8x512xbf16>
    %26 = vector.shape_cast %23 : vector<8x512xbf16> to vector<1x8x512xbf16>
    tpu.vector_store %arg6[%c0_23, %c0_24, %c0_25], %26 {strides = array<i32>} : memref<1x8x512xbf16, #tpu.memory_space<vmem>>, vector<1x8x512xbf16>,
    %cst_26 = arith.constant dense<0.000000e+00> : vector<512xf32>
    %27 = vector.multi_reduction <add>, %22, %cst_26 [0] : vector<8x512xf32> to vector<512xf32>
    %28 = vector.shape_cast %27 : vector<512xf32> to vector<1x512xf32>
    %c0_27 = arith.constant 0 : index
    %c0_28 = arith.constant 0 : index
    %c0_29 = arith.constant 0 : index
    %29 = vector.load %arg7[%c0_27, %c0_28, %c0_29] : memref<1x2x512xf32, #tpu.memory_space<vmem>>, vector<1x1x512xf32>
    %30 = vector.shape_cast %29 : vector<1x1x512xf32> to vector<1x512xf32>
    %31 = vector.shape_cast %28 : vector<1x512xf32> to vector<1x1x512xf32>
    tpu.vector_store %arg7[%c0_27, %c0_28, %c0_29], %31 {strides = array<i32>} : memref<1x2x512xf32, #tpu.memory_space<vmem>>, vector<1x1x512xf32>,
    %32 = arith.mulf %22, %22 : vector<8x512xf32>
    %cst_30 = arith.constant dense<0.000000e+00> : vector<512xf32>
    %33 = vector.multi_reduction <add>, %32, %cst_30 [0] : vector<8x512xf32> to vector<512xf32>
    %34 = vector.shape_cast %33 : vector<512xf32> to vector<1x512xf32>
    %c0_31 = arith.constant 0 : index
    %c1_32 = arith.constant 1 : index
    %c0_33 = arith.constant 0 : index
    %35 = vector.load %arg7[%c0_31, %c1_32, %c0_33] : memref<1x2x512xf32, #tpu.memory_space<vmem>>, vector<1x1x512xf32>
    %36 = vector.shape_cast %35 : vector<1x1x512xf32> to vector<1x512xf32>
    %37 = vector.shape_cast %34 : vector<1x512xf32> to vector<1x1x512xf32>
    tpu.vector_store %arg7[%c0_31, %c1_32, %c0_33], %37 {strides = array<i32>} : memref<1x2x512xf32, #tpu.memory_space<vmem>>, vector<1x1x512xf32>,
    return
  }
  func.func @transform_0(%arg0: i32) -> (i32, i32, i32) {
    %c0_i32 = arith.constant 0 : i32
    %c0_i32_0 = arith.constant 0 : i32
    %c0_i32_1 = arith.constant 0 : i32
    return %arg0, %c0_i32, %c0_i32_0 : i32, i32, i32
  }
  func.func @transform_1(%arg0: i32) -> (i32, i32, i32) {
    %c0_i32 = arith.constant 0 : i32
    %c0_i32_0 = arith.constant 0 : i32
    %c0_i32_1 = arith.constant 0 : i32
    return %arg0, %c0_i32, %c0_i32_0 : i32, i32, i32
  }
  func.func @transform_2(%arg0: i32) -> (i32, i32, i32) {
    %c1_i32 = arith.constant 1 : i32
    %0 = arith.addi %arg0, %c1_i32 : i32
    %c0_i32 = arith.constant 0 : i32
    %c0_i32_0 = arith.constant 0 : i32
    %c0_i32_1 = arith.constant 0 : i32
    return %0, %c0_i32, %c0_i32_0 : i32, i32, i32
  }
  func.func @transform_3(%arg0: i32) -> (i32, i32, i32) {
    %c1_i32 = arith.constant 1 : i32
    %0 = arith.addi %arg0, %c1_i32 : i32
    %c0_i32 = arith.constant 0 : i32
    %c0_i32_0 = arith.constant 0 : i32
    %c0_i32_1 = arith.constant 0 : i32
    return %0, %c0_i32, %c0_i32_0 : i32, i32, i32
  }
  func.func @transform_4(%arg0: i32) -> (i32, i32, i32) {
    %c0_i32 = arith.constant 0 : i32
    %c0_i32_0 = arith.constant 0 : i32
    %c0_i32_1 = arith.constant 0 : i32
    %c0_i32_2 = arith.constant 0 : i32
    return %c0_i32, %c0_i32_0, %c0_i32_1 : i32, i32, i32
  }
  func.func @transform_5(%arg0: i32) -> (i32, i32, i32) {
    %c0_i32 = arith.constant 0 : i32
    %c0_i32_0 = arith.constant 0 : i32
    %c0_i32_1 = arith.constant 0 : i32
    return %arg0, %c0_i32, %c0_i32_0 : i32, i32, i32
  }
  func.func @transform_6(%arg0: i32) -> (i32, i32, i32) {
    %c0_i32 = arith.constant 0 : i32
    %c0_i32_0 = arith.constant 0 : i32
    %c0_i32_1 = arith.constant 0 : i32
    return %arg0, %c0_i32, %c0_i32_0 : i32, i32, i32
  }
}

module attributes {stable_mosaic.version = 11 : i64} {
  func.func @_bn_lrelu_kernel(%arg0: i32, %arg1: memref<16x512xbf16, #tpu.memory_space<vmem>>, %arg2: memref<1x512xf32, #tpu.memory_space<vmem>>, %arg3: memref<1x512xf32, #tpu.memory_space<vmem>>, %arg4: memref<16x512xbf16, #tpu.memory_space<vmem>>) attributes {dimension_semantics = [#tpu.dimension_semantics<parallel>], iteration_bounds = array<i64: 2>, scalar_prefetch = 0 : i64, scratch_operands = 0 : i64, tpu.core_type = #tpu.core_type<tc>, window_params = [{transform_indices = @transform_0, window_bounds = array<i64: 16, 512>}, {pipeline_mode = #tpu.pipeline_mode<synchronous>, transform_indices = @transform_1, window_bounds = array<i64: 1, 512>}, {pipeline_mode = #tpu.pipeline_mode<synchronous>, transform_indices = @transform_2, window_bounds = array<i64: 1, 512>}, {transform_indices = @transform_3, window_bounds = array<i64: 16, 512>}]} {
    %c0 = arith.constant 0 : index
    %c0_0 = arith.constant 0 : index
    %0 = vector.load %arg1[%c0, %c0_0] : memref<16x512xbf16, #tpu.memory_space<vmem>>, vector<16x512xbf16>
    %1 = arith.extf %0 : vector<16x512xbf16> to vector<16x512xf32>
    %c0_1 = arith.constant 0 : index
    %c0_2 = arith.constant 0 : index
    %2 = vector.load %arg2[%c0_1, %c0_2] : memref<1x512xf32, #tpu.memory_space<vmem>>, vector<1x512xf32>
    %3 = vector.broadcast %2 : vector<1x512xf32> to vector<16x512xf32>
    %4 = arith.mulf %1, %3 : vector<16x512xf32>
    %c0_3 = arith.constant 0 : index
    %c0_4 = arith.constant 0 : index
    %5 = vector.load %arg3[%c0_3, %c0_4] : memref<1x512xf32, #tpu.memory_space<vmem>>, vector<1x512xf32>
    %6 = vector.broadcast %5 : vector<1x512xf32> to vector<16x512xf32>
    %7 = arith.addf %4, %6 : vector<16x512xf32>
    %cst = arith.constant 0.000000e+00 : f32
    %8 = vector.broadcast %cst : f32 to vector<16x512xf32>
    %9 = arith.cmpf ogt, %7, %8 : vector<16x512xf32>
    %cst_5 = arith.constant 2.000000e-01 : f32
    %10 = vector.broadcast %cst_5 : f32 to vector<16x512xf32>
    %11 = arith.mulf %10, %7 : vector<16x512xf32>
    %12 = arith.select %9, %7, %11 : vector<16x512xi1>, vector<16x512xf32>
    %13 = arith.truncf %12 : vector<16x512xf32> to vector<16x512xbf16>
    %c0_6 = arith.constant 0 : index
    %c0_7 = arith.constant 0 : index
    %14 = vector.load %arg4[%c0_6, %c0_7] : memref<16x512xbf16, #tpu.memory_space<vmem>>, vector<16x512xbf16>
    tpu.vector_store %arg4[%c0_6, %c0_7], %13 {strides = array<i32>} : memref<16x512xbf16, #tpu.memory_space<vmem>>, vector<16x512xbf16>,
    return
  }
  func.func @transform_0(%arg0: i32) -> (i32, i32) {
    %c0_i32 = arith.constant 0 : i32
    %c0_i32_0 = arith.constant 0 : i32
    return %arg0, %c0_i32 : i32, i32
  }
  func.func @transform_1(%arg0: i32) -> (i32, i32) {
    %c0_i32 = arith.constant 0 : i32
    %c0_i32_0 = arith.constant 0 : i32
    %c0_i32_1 = arith.constant 0 : i32
    return %c0_i32, %c0_i32_0 : i32, i32
  }
  func.func @transform_2(%arg0: i32) -> (i32, i32) {
    %c0_i32 = arith.constant 0 : i32
    %c0_i32_0 = arith.constant 0 : i32
    %c0_i32_1 = arith.constant 0 : i32
    return %c0_i32, %c0_i32_0 : i32, i32
  }
  func.func @transform_3(%arg0: i32) -> (i32, i32) {
    %c0_i32 = arith.constant 0 : i32
    %c0_i32_0 = arith.constant 0 : i32
    return %arg0, %c0_i32 : i32, i32
  }
}

</mosaic_0001>

<bundles_post_ra>
// kernel: discriminator_forward.7
= control target key start
LH: loop header
LB: loop body
LE: loop exit
PB: predicated region body
PF: predicated region fallthrough
CT: control target
= control target key end

     0   :  { %s915_s12 = smov 0   ;;  %s1050_s0 = inlined_call_operand.vmem [shape: bf16[512,128], index: 0, kind: input, shape index: {}]   ;;  %s1051_s1 = inlined_call_operand.vmem [shape: f32[1,128], index: 1, kind: input, shape index: {}]   ;;  %s1052_s2 = inlined_call_operand.vmem [shape: f32[1,128], index: 2, kind: input, shape index: {}]   ;;  %s1053_s3 = inlined_call_operand.vmem [shape: bf16[512,128], index: 3, kind: output, shape index: {}]  }
   0x1 LB: > { %s628_s13 = sadd.s32 4294967295, %s893_s12   ;;  %p632_p0 = scmp.ge.s32.totalorder %s893_s12, 1  ;;  %s893_s12 = sphi %s915_s12, %s13_s12  }
   0x2   : > { %p138_p1 = scmp.lt.s32.totalorder %s893_s12, 3 }
   0x4   : > { %p139_p2 = pnand %p632_p0, %p138_p1 }
   0x5   : > { %s633_s14 = sshll.u32 (!%p139_p2), %s628_s13, 5  ;;  %v936_v0 = vld [vmem:[%s1051_s1] ss:$0 sm:$0xff] (!%p139_p2) }
   0x6   : > { %142 = sbr.rel (%p139_p2) target bundleno = 76 (0x4c), region = 32  ;;  %p163_p3 = scmp.lt.s32.totalorder (!%p139_p2), %s633_s14, 63  ;;  %v945_v9 = vld [vmem:[%s1052_s2] ss:$0 sm:$0xff] (!%p139_p2) }
   0xd   : > { %s1055_s14 = smov (!%p163_p3, %s633_s14), 63 }
   0xe   : > { %s634_s15 = sshll.u32 %s1055_s14, 2 }
   0xf   : > { %s931_s18 = scalar_lea.vmem %s1050_s0, %s634_s15  ;;  %s968_s25 = scalar_lea.vmem %s1053_s3, %s634_s15 }
  0x10   : > { %v706_v1 = vld [vmem:[%s931_s18] sm:$0xff]   ;;  %v849_v2 = vld [vmem:[%s931_s18 + $0x8] sm:$0xff]   ;;  %v850_v3 = vld [vmem:[%s931_s18 + $0x10] sm:$0xff]  }
  0x11   : > { %v707_v4 = vunpack.c.l.bf16 %v706_v1  ;;  %v708_v5 = vunpack.c.h.bf16 %v706_v1  ;;  %v711_v6 = vunpack.c.l.bf16 %v849_v2  ;;  %v712_v7 = vunpack.c.h.bf16 %v849_v2  ;;  %v851_v8 = vld [vmem:[%s931_s18 + $0x18] sm:$0xff]   ;;  %v852_v36 = vld [vmem:[%s931_s18 + $0x20] sm:$0xff]   ;;  %v853_v41 = vld [vmem:[%s931_s18 + $0x28] sm:$0xff]  }
  0x12   : > { %v715_v10 = vunpack.c.l.bf16 %v850_v3  ;;  %v716_v11 = vunpack.c.h.bf16 %v850_v3  ;;  %v719_v12 = vunpack.c.l.bf16 %v851_v8  ;;  %v720_v13 = vunpack.c.h.bf16 %v851_v8  ;;  %v854_v52 = vld [vmem:[%s931_s18 + $0x30] sm:$0xff]   ;;  %v855_v53 = vld [vmem:[%s931_s18 + $0x38] sm:$0xff]  }
  0x13   : > { %v245_v14 = vmul.f32 %v707_v4, %v936_v0  ;;  %v246_v15 = vmul.f32 %v708_v5, %v936_v0  ;;  %v247_v16 = vmul.f32 %v711_v6, %v936_v0  ;;  %v248_v17 = vmul.f32 %v712_v7, %v936_v0 }
  0x14   : > { %v249_v18 = vmul.f32 %v715_v10, %v936_v0  ;;  %v250_v19 = vmul.f32 %v716_v11, %v936_v0  ;;  %v251_v20 = vmul.f32 %v719_v12, %v936_v0  ;;  %v252_v21 = vmul.f32 %v720_v13, %v936_v0 }
  0x15   : > { %v284_v22 = vadd.f32 %v945_v9, %v245_v14  ;;  %v285_v23 = vadd.f32 %v945_v9, %v246_v15  ;;  %v286_v24 = vadd.f32 %v945_v9, %v247_v16  ;;  %v287_v25 = vadd.f32 %v945_v9, %v248_v17 }
  0x16   : > { %v288_v26 = vadd.f32 %v945_v9, %v249_v18  ;;  %v289_v27 = vadd.f32 %v945_v9, %v250_v19  ;;  %v290_v28 = vadd.f32 %v945_v9, %v251_v20  ;;  %v291_v29 = vadd.f32 %v945_v9, %v252_v21  ;;  %v856_v20 = vld [vmem:[%s931_s18 + $0x40] sm:$0xff]  }
  0x17   : > { %vm316_vm0 = vcmp.gt.f32.partialorder %v284_v22, 0.0  ;;  %vm317_vm1 = vcmp.gt.f32.partialorder %v285_v23, 0.0  ;;  %v348_v30 = vmul.f32 0.2, %v284_v22  ;;  %v349_v31 = vmul.f32 0.2, %v285_v23 }
  0x18   : > { %vm318_vm2 = vcmp.gt.f32.partialorder %v286_v24, 0.0  ;;  %vm319_vm3 = vcmp.gt.f32.partialorder %v287_v25, 0.0  ;;  %v350_v32 = vmul.f32 0.2, %v286_v24  ;;  %v351_v33 = vmul.f32 0.2, %v287_v25 }
  0x19   : > { %v380_v34 = vsel %vm316_vm0, %v284_v22, %v348_v30  ;;  %v381_v35 = vsel %vm317_vm1, %v285_v23, %v349_v31  ;;  %vm320_vm4 = vcmp.gt.f32.partialorder %v288_v26, 0.0  ;;  %vm321_vm5 = vcmp.gt.f32.partialorder %v289_v27, 0.0 }
  0x1a   : > { %v772_v37 = vpack.c.bf16 %v381_v35, %v380_v34  ;;  %v382_v38 = vsel %vm318_vm2, %v286_v24, %v350_v32  ;;  %v383_v39 = vsel %vm319_vm3, %v287_v25, %v351_v33  ;;  %v352_v40 = vmul.f32 0.2, %v288_v26  ;;  %v857_v24 = vld [vmem:[%s931_s18 + $0x48] sm:$0xff]  }
  0x1b   : > { %v777_v42 = vpack.c.bf16 %v383_v39, %v382_v38  ;;  %v353_v43 = vmul.f32 0.2, %v289_v27  ;;  %vm322_vm6 = vcmp.gt.f32.partialorder %v290_v28, 0.0  ;;  %vm323_vm7 = vcmp.gt.f32.partialorder %v291_v29, 0.0 }
  0x1c   : > { %773 = vst [vmem:[%s968_s25] sm:$0xff] %v772_v37   ;;  %v384_v44 = vsel %vm320_vm4, %v288_v26, %v352_v40  ;;  %v354_v45 = vmul.f32 0.2, %v290_v28  ;;  %v355_v46 = vmul.f32 0.2, %v291_v29  ;;  %v723_v47 = vunpack.c.l.bf16 %v852_v36 }
  0x1d   : > { %864 = vst [vmem:[%s968_s25 + $0x8] sm:$0xff] %v777_v42   ;;  %v385_v48 = vsel %vm321_vm5, %v289_v27, %v353_v43  ;;  %v724_v49 = vunpack.c.h.bf16 %v852_v36  ;;  %v727_v50 = vunpack.c.l.bf16 %v853_v41  ;;  %v728_v51 = vunpack.c.h.bf16 %v853_v41  ;;  %v858_v36 = vld [vmem:[%s931_s18 + $0x50] sm:$0xff]  }
  0x1e   : > { %v782_v54 = vpack.c.bf16 %v385_v48, %v384_v44  ;;  %v386_v55 = vsel %vm322_vm6, %v290_v28, %v354_v45  ;;  %v387_v56 = vsel %vm323_vm7, %v291_v29, %v355_v46  ;;  %v253_v57 = vmul.f32 %v723_v47, %v936_v0 }
  0x1f   : > { %v787_v58 = vpack.c.bf16 %v387_v56, %v386_v55  ;;  %v254_v59 = vmul.f32 %v724_v49, %v936_v0  ;;  %v255_v60 = vmul.f32 %v727_v50, %v936_v0  ;;  %v256_v61 = vmul.f32 %v728_v51, %v936_v0  ;;  %v859_v55 = vld [vmem:[%s931_s18 + $0x58] sm:$0xff]  }
  0x20   : > { %865 = vst [vmem:[%s968_s25 + $0x10] sm:$0xff] %v782_v54   ;;  %v292_v62 = vadd.f32 %v945_v9, %v253_v57  ;;  %v731_v63 = vunpack.c.l.bf16 %v854_v52  ;;  %v732_v1 = vunpack.c.h.bf16 %v854_v52  ;;  %v735_v2 = vunpack.c.l.bf16 %v855_v53 }
  0x21   : > { %866 = vst [vmem:[%s968_s25 + $0x18] sm:$0xff] %v787_v58   ;;  %v293_v3 = vadd.f32 %v945_v9, %v254_v59  ;;  %v294_v4 = vadd.f32 %v945_v9, %v255_v60  ;;  %v295_v5 = vadd.f32 %v945_v9, %v256_v61  ;;  %v736_v6 = vunpack.c.h.bf16 %v855_v53 }
  0x22   : > { %vm324_vm8 = vcmp.gt.f32.partialorder %v292_v62, 0.0  ;;  %v356_v7 = vmul.f32 0.2, %v292_v62  ;;  %v257_v8 = vmul.f32 %v731_v63, %v936_v0  ;;  %v258_v10 = vmul.f32 %v732_v1, %v936_v0  ;;  %v860_v1 = vld [vmem:[%s931_s18 + $0x60] sm:$0xff]  }
  0x23   : > { %vm325_vm9 = vcmp.gt.f32.partialorder %v293_v3, 0.0  ;;  %v357_v11 = vmul.f32 0.2, %v293_v3  ;;  %vm326_vm10 = vcmp.gt.f32.partialorder %v294_v4, 0.0  ;;  %vm327_vm11 = vcmp.gt.f32.partialorder %v295_v5, 0.0 }
  0x24   : > { %v388_v12 = vsel %vm324_vm8, %v292_v62, %v356_v7  ;;  %v358_v13 = vmul.f32 0.2, %v294_v4  ;;  %v359_v14 = vmul.f32 0.2, %v295_v5  ;;  %v296_v15 = vadd.f32 %v945_v9, %v257_v8 }
  0x25   : > { %v389_v16 = vsel %vm325_vm9, %v293_v3, %v357_v11  ;;  %v297_v17 = vadd.f32 %v945_v9, %v258_v10  ;;  %v259_v18 = vmul.f32 %v735_v2, %v936_v0  ;;  %v260_v19 = vmul.f32 %v736_v6, %v936_v0  ;;  %v861_v6 = vld [vmem:[%s931_s18 + $0x68] sm:$0xff]  }
  0x26   : > { %v792_v21 = vpack.c.bf16 %v389_v16, %v388_v12  ;;  %v390_v22 = vsel %vm326_vm10, %v294_v4, %v358_v13  ;;  %v391_v23 = vsel %vm327_vm11, %v295_v5, %v359_v14  ;;  %vm328_vm12 = vcmp.gt.f32.partialorder %v296_v15, 0.0 }
  0x27   : > { %v797_v25 = vpack.c.bf16 %v391_v23, %v390_v22  ;;  %vm329_vm13 = vcmp.gt.f32.partialorder %v297_v17, 0.0  ;;  %v360_v26 = vmul.f32 0.2, %v296_v15  ;;  %v361_v27 = vmul.f32 0.2, %v297_v17  ;;  %v862_v22 = vld [vmem:[%s931_s18 + $0x70] sm:$0xff]  }
  0x28   : > { %867 = vst [vmem:[%s968_s25 + $0x20] sm:$0xff] %v792_v21   ;;  %v298_v28 = vadd.f32 %v945_v9, %v259_v18  ;;  %v299_v29 = vadd.f32 %v945_v9, %v260_v19  ;;  %v739_v30 = vunpack.c.l.bf16 %v856_v20  ;;  %v740_v31 = vunpack.c.h.bf16 %v856_v20 }
  0x29   : > { %868 = vst [vmem:[%s968_s25 + $0x28] sm:$0xff] %v797_v25   ;;  %v392_v32 = vsel %vm328_vm12, %v296_v15, %v360_v26  ;;  %v393_v33 = vsel %vm329_vm13, %v297_v17, %v361_v27  ;;  %v743_v34 = vunpack.c.l.bf16 %v857_v24  ;;  %v744_v35 = vunpack.c.h.bf16 %v857_v24 }
  0x2a   : > { %v802_v37 = vpack.c.bf16 %v393_v33, %v392_v32  ;;  %vm330_vm14 = vcmp.gt.f32.partialorder %v298_v28, 0.0  ;;  %vm331_vm15 = vcmp.gt.f32.partialorder %v299_v29, 0.0  ;;  %v362_v38 = vmul.f32 0.2, %v298_v28 }
  0x2b   : > { %v363_v39 = vmul.f32 0.2, %v299_v29  ;;  %v261_v40 = vmul.f32 %v739_v30, %v936_v0  ;;  %v262_v41 = vmul.f32 %v740_v31, %v936_v0  ;;  %v263_v42 = vmul.f32 %v743_v34, %v936_v0 }
  0x2c   : > { %869 = vst [vmem:[%s968_s25 + $0x30] sm:$0xff] %v802_v37   ;;  %v394_v43 = vsel %vm330_vm14, %v298_v28, %v362_v38  ;;  %v264_v44 = vmul.f32 %v744_v35, %v936_v0  ;;  %v747_v45 = vunpack.c.l.bf16 %v858_v36  ;;  %v748_v46 = vunpack.c.h.bf16 %v858_v36 }
  0x2d   : > { %v395_v47 = vsel %vm331_vm15, %v299_v29, %v363_v39  ;;  %v300_v48 = vadd.f32 %v945_v9, %v261_v40  ;;  %v301_v49 = vadd.f32 %v945_v9, %v262_v41  ;;  %v302_v50 = vadd.f32 %v945_v9, %v263_v42  ;;  %v863_v41 = vld [vmem:[%s931_s18 + $0x78] sm:$0xff]  }
  0x2e   : > { %v807_v51 = vpack.c.bf16 %v395_v47, %v394_v43  ;;  %v303_v52 = vadd.f32 %v945_v9, %v264_v44  ;;  %v265_v53 = vmul.f32 %v747_v45, %v936_v0  ;;  %v266_v54 = vmul.f32 %v748_v46, %v936_v0 }
  0x2f   : > { %vm332_vm0 = vcmp.gt.f32.partialorder %v300_v48, 0.0  ;;  %vm333_vm1 = vcmp.gt.f32.partialorder %v301_v49, 0.0  ;;  %v364_v56 = vmul.f32 0.2, %v300_v48  ;;  %v365_v57 = vmul.f32 0.2, %v301_v49 }
  0x30   : > { %870 = vst [vmem:[%s968_s25 + $0x38] sm:$0xff] %v807_v51   ;;  %vm334_vm2 = vcmp.gt.f32.partialorder %v302_v50, 0.0  ;;  %vm335_vm3 = vcmp.gt.f32.partialorder %v303_v52, 0.0  ;;  %v366_v58 = vmul.f32 0.2, %v302_v50  ;;  %v304_v62 = vadd.f32 %v945_v9, %v265_v53 }
  0x31   : > { %v367_v59 = vmul.f32 0.2, %v303_v52  ;;  %v396_v60 = vsel %vm332_vm0, %v300_v48, %v364_v56  ;;  %v397_v61 = vsel %vm333_vm1, %v301_v49, %v365_v57  ;;  %v305_v63 = vadd.f32 %v945_v9, %v266_v54 }
  0x32   : > { %v812_v2 = vpack.c.bf16 %v397_v61, %v396_v60  ;;  %v398_v3 = vsel %vm334_vm2, %v302_v50, %v366_v58  ;;  %v751_v5 = vunpack.c.l.bf16 %v859_v55  ;;  %vm336_vm4 = vcmp.gt.f32.partialorder %v304_v62, 0.0 }
  0x33   : > { %v399_v4 = vsel %vm335_vm3, %v303_v52, %v367_v59  ;;  %vm337_vm5 = vcmp.gt.f32.partialorder %v305_v63, 0.0  ;;  %v368_v8 = vmul.f32 0.2, %v304_v62  ;;  %v369_v10 = vmul.f32 0.2, %v305_v63 }
  0x34   : > { %v817_v7 = vpack.c.bf16 %v399_v4, %v398_v3  ;;  %871 = vst [vmem:[%s968_s25 + $0x40] sm:$0xff] %v812_v2   ;;  %v752_v11 = vunpack.c.h.bf16 %v859_v55  ;;  %v267_v12 = vmul.f32 %v751_v5, %v936_v0  ;;  %v755_v13 = vunpack.c.l.bf16 %v860_v1 }
  0x35   : > { %v400_v14 = vsel %vm336_vm4, %v304_v62, %v368_v8  ;;  %v756_v15 = vunpack.c.h.bf16 %v860_v1  ;;  %v759_v16 = vunpack.c.l.bf16 %v861_v6  ;;  %v760_v17 = vunpack.c.h.bf16 %v861_v6 }
  0x36   : > { %872 = vst [vmem:[%s968_s25 + $0x48] sm:$0xff] %v817_v7   ;;  %v401_v18 = vsel %vm337_vm5, %v305_v63, %v369_v10  ;;  %v268_v19 = vmul.f32 %v752_v11, %v936_v0  ;;  %v306_v20 = vadd.f32 %v945_v9, %v267_v12  ;;  %v269_v21 = vmul.f32 %v755_v13, %v936_v0 }
  0x37   : > { %v822_v23 = vpack.c.bf16 %v401_v18, %v400_v14  ;;  %v270_v24 = vmul.f32 %v756_v15, %v936_v0  ;;  %v271_v25 = vmul.f32 %v759_v16, %v936_v0  ;;  %v272_v26 = vmul.f32 %v760_v17, %v936_v0 }
  0x38   : > { %v307_v27 = vadd.f32 %v945_v9, %v268_v19  ;;  %vm338_vm6 = vcmp.gt.f32.partialorder %v306_v20, 0.0  ;;  %v370_v28 = vmul.f32 0.2, %v306_v20  ;;  %v308_v29 = vadd.f32 %v945_v9, %v269_v21 }
  0x39   : > { %873 = vst [vmem:[%s968_s25 + $0x50] sm:$0xff] %v822_v23   ;;  %v309_v30 = vadd.f32 %v945_v9, %v270_v24  ;;  %v310_v31 = vadd.f32 %v945_v9, %v271_v25  ;;  %v311_v32 = vadd.f32 %v945_v9, %v272_v26  ;;  %v763_v33 = vunpack.c.l.bf16 %v862_v22 }
  0x3a   : > { %vm339_vm7 = vcmp.gt.f32.partialorder %v307_v27, 0.0  ;;  %v371_v34 = vmul.f32 0.2, %v307_v27  ;;  %v402_v35 = vsel %vm338_vm6, %v306_v20, %v370_v28  ;;  %vm340_vm8 = vcmp.gt.f32.partialorder %v308_v29, 0.0 }
  0x3b   : > { %vm341_vm9 = vcmp.gt.f32.partialorder %v309_v30, 0.0  ;;  %v372_v36 = vmul.f32 0.2, %v308_v29  ;;  %v373_v37 = vmul.f32 0.2, %v309_v30  ;;  %vm342_vm10 = vcmp.gt.f32.partialorder %v310_v31, 0.0 }
  0x3c   : > { %v403_v38 = vsel %vm339_vm7, %v307_v27, %v371_v34  ;;  %vm343_vm11 = vcmp.gt.f32.partialorder %v311_v32, 0.0  ;;  %v374_v39 = vmul.f32 0.2, %v310_v31  ;;  %v375_v40 = vmul.f32 0.2, %v311_v32 }
  0x3d   : > { %v827_v42 = vpack.c.bf16 %v403_v38, %v402_v35  ;;  %v404_v43 = vsel %vm340_vm8, %v308_v29, %v372_v36  ;;  %v405_v44 = vsel %vm341_vm9, %v309_v30, %v373_v37  ;;  %v764_v45 = vunpack.c.h.bf16 %v862_v22 }
  0x3e   : > { %v832_v46 = vpack.c.bf16 %v405_v44, %v404_v43  ;;  %v406_v47 = vsel %vm342_vm10, %v310_v31, %v374_v39  ;;  %v407_v48 = vsel %vm343_vm11, %v311_v32, %v375_v40  ;;  %v273_v49 = vmul.f32 %v763_v33, %v936_v0 }
  0x3f   : > { %874 = vst [vmem:[%s968_s25 + $0x58] sm:$0xff] %v827_v42   ;;  %v837_v50 = vpack.c.bf16 %v407_v48, %v406_v47  ;;  %v274_v51 = vmul.f32 %v764_v45, %v936_v0  ;;  %v767_v52 = vunpack.c.l.bf16 %v863_v41  ;;  %v768_v53 = vunpack.c.h.bf16 %v863_v41 }
  0x40   : > { %875 = vst [vmem:[%s968_s25 + $0x60] sm:$0xff] %v832_v46   ;;  %v312_v54 = vadd.f32 %v945_v9, %v273_v49 }
  0x41   : > { %876 = vst [vmem:[%s968_s25 + $0x68] sm:$0xff] %v837_v50   ;;  %v313_v55 = vadd.f32 %v945_v9, %v274_v51  ;;  %v275_v56 = vmul.f32 %v767_v52, %v936_v0  ;;  %v276_v57 = vmul.f32 %v768_v53, %v936_v0 }
  0x42   : > { %vm344_vm12 = vcmp.gt.f32.partialorder %v312_v54, 0.0  ;;  %v376_v58 = vmul.f32 0.2, %v312_v54 }
  0x43   : > { %vm345_vm13 = vcmp.gt.f32.partialorder %v313_v55, 0.0  ;;  %v377_v59 = vmul.f32 0.2, %v313_v55  ;;  %v314_v60 = vadd.f32 %v945_v9, %v275_v56  ;;  %v315_v61 = vadd.f32 %v945_v9, %v276_v57 }
  0x44   : > { %v408_v62 = vsel %vm344_vm12, %v312_v54, %v376_v58 }
  0x45   : > { %v409_v63 = vsel %vm345_vm13, %v313_v55, %v377_v59  ;;  %vm346_vm14 = vcmp.gt.f32.partialorder %v314_v60, 0.0  ;;  %vm347_vm15 = vcmp.gt.f32.partialorder %v315_v61, 0.0  ;;  %v378_v1 = vmul.f32 0.2, %v314_v60 }
  0x46   : > { %v842_v2 = vpack.c.bf16 %v409_v63, %v408_v62  ;;  %v379_v3 = vmul.f32 0.2, %v315_v61 }
  0x47   : > { %v410_v4 = vsel %vm346_vm14, %v314_v60, %v378_v1 }
  0x48   : > { %877 = vst [vmem:[%s968_s25 + $0x70] sm:$0xff] %v842_v2   ;;  %v411_v5 = vsel %vm347_vm15, %v315_v61, %v379_v3 }
  0x49   : > { %v847_v0 = vpack.c.bf16 %v411_v5, %v410_v4 }
  0x4b   : > { %878 = vst [vmem:[%s968_s25 + $0x78] sm:$0xff] %v847_v0  }
  0x4c PF: > { %s13_s12 = sadd.s32 1, %s893_s12  }
  0x4d   : > { %p10_p4 = scmp.ge.s32.totalorder %s13_s12, 4  }
  0x4f   :  { %12 = sbr.rel (!%p10_p4) target bundleno = 1 (0x1), region = 62 }

// kernel: discriminator_forward.6
= control target key start
LH: loop header
LB: loop body
LE: loop exit
PB: predicated region body
PF: predicated region fallthrough
CT: control target
= control target key end

     0   :  { %s1788_s21 = smov 0   ;;  %s2032_s0 = inlined_call_operand.vmem [shape: bf16[17,32,256], index: 0, kind: input, shape index: {}, may-alias: {0,2}]   ;;  %s2033_s1 = inlined_call_operand.vmem [shape: bf16[17,32,256], index: 1, kind: input, shape index: {}, may-alias: {1,3}]   ;;  %s2034_s2 = inlined_call_operand.vmem [shape: bf16[17,32,256], index: 2, kind: input, shape index: {}, may-alias: {0,2}]   ;;  %s2035_s3 = inlined_call_operand.vmem [shape: bf16[17,32,256], index: 3, kind: input, shape index: {}, may-alias: {1,3}]   ;;  %s2036_s4 = inlined_call_operand.vmem [shape: bf16[4,256,128], index: 4, kind: input, shape index: {}]   ;;  %s2037_s5 = inlined_call_operand.vmem [shape: bf16[16,32,128], index: 5, kind: output, shape index: {0}]   ;;  %s2038_s6 = inlined_call_operand.vmem [shape: f32[16,2,128], index: 6, kind: output, shape index: {1}]  }
   0x1 LB: > { %s1794_s22 = sadd.s32 4294967295, %s1751_s21   ;;  %p1323_p0 = scmp.ge.s32.totalorder %s1751_s21, 1  ;;  %s1751_s21 = sphi %s1788_s21, %s17_s21  }
   0x2   : > { %p253_p1 = scmp.lt.s32.totalorder %s1751_s21, 17 }
   0x4   : > { %p254_p2 = pnand %p1323_p0, %p253_p1 }
   0x5   : > { %v1657_v0 = vld [vmem:[%s2036_s4 + $0xc0] sm:$0xff] (!%p254_p2)   ;;  %v1661_v4 = vld [vmem:[%s2036_s4 + $0xc8] sm:$0xff] (!%p254_p2)   ;;  %v1665_v8 = vld [vmem:[%s2036_s4 + $0xd0] sm:$0xff] (!%p254_p2)   ;;  %p304_p3 = scmp.lt.s32.totalorder (!%p254_p2), %s1794_s22, 16  ;;  %s314_s26 = sadd.s32 (!%p254_p2), 1, %s1794_s22 }
   0x6   : > { %257 = sbr.rel (%p254_p2) target bundleno = 317 (0x13d), region = 40  ;;  %v1658_v1 = vld [vmem:[%s2036_s4 + $0x40] sm:$0xff] (!%p254_p2)   ;;  %1537 = vmatprep.subr.bf16.mxu0 (!%p254_p2), %v1657_v0  ;;  %v1662_v5 = vld [vmem:[%s2036_s4 + $0x48] sm:$0xff] (!%p254_p2)   ;;  %v1666_v9 = vld [vmem:[%s2036_s4 + $0x50] sm:$0xff] (!%p254_p2)   ;;  %p315_p4 = scmp.lt.s32.totalorder (!%p254_p2), %s314_s26, 16 }
   0x7   : > { %v1659_v2 = vld [vmem:[%s2036_s4 + $0x80] sm:$0xff] (!%p254_p2)   ;;  %1565 = vmatprep.subr.bf16.mxu1 (!%p254_p2), %v1658_v1  ;;  %v1663_v6 = vld [vmem:[%s2036_s4 + $0x88] sm:$0xff] (!%p254_p2)   ;;  %v1667_v10 = vld [vmem:[%s2036_s4 + $0x90] sm:$0xff] (!%p254_p2)   ;;  %p328_p5 = scmp.lt.s32.totalorder (!%p254_p2), %s1794_s22, 15 }
   0x8   : > { %v1660_v3 = vld [vmem:[%s2036_s4] sm:$0xff] (!%p254_p2)   ;;  %1538 = vmatpush3.bf16.msra.mxu0 (!%p254_p2), %v1659_v2  ;;  %v1664_v7 = vld [vmem:[%s2036_s4 + $0x8] sm:$0xff] (!%p254_p2)   ;;  %v1668_v11 = vld [vmem:[%s2036_s4 + $0x10] sm:$0xff] (!%p254_p2)  }
   0x9   : > { %1566 = vmatpush3.bf16.msra.mxu1 (!%p254_p2), %v1660_v3  ;;  %1539 = vmatprep.subr.bf16.mxu0 (!%p254_p2), %v1661_v4  ;;  %v1669_v12 = vld [vmem:[%s2036_s4 + $0xd8] sm:$0xff] (!%p254_p2)   ;;  %v1673_v16 = vld [vmem:[%s2036_s4 + $0xe0] sm:$0xff] (!%p254_p2)   ;;  %v1677_v20 = vld [vmem:[%s2036_s4 + $0xe8] sm:$0xff] (!%p254_p2)  }
   0xa   : > { %1567 = vmatprep.subr.bf16.mxu1 (!%p254_p2), %v1662_v5  ;;  %v1670_v13 = vld [vmem:[%s2036_s4 + $0x58] sm:$0xff] (!%p254_p2)   ;;  %v1674_v17 = vld [vmem:[%s2036_s4 + $0x60] sm:$0xff] (!%p254_p2)   ;;  %v1678_v21 = vld [vmem:[%s2036_s4 + $0x68] sm:$0xff] (!%p254_p2)  }
   0xb   : > { %v1671_v14 = vld [vmem:[%s2036_s4 + $0x98] sm:$0xff] (!%p254_p2)   ;;  %v1675_v18 = vld [vmem:[%s2036_s4 + $0xa0] sm:$0xff] (!%p254_p2)   ;;  %v1679_v22 = vld [vmem:[%s2036_s4 + $0xa8] sm:$0xff] (!%p254_p2)  }
   0xc   : > { %1540 = vmatpush3.bf16.msra.mxu0 (!%p254_p2), %v1663_v6  ;;  %v1672_v15 = vld [vmem:[%s2036_s4 + $0x18] sm:$0xff] (!%p254_p2)   ;;  %v1676_v19 = vld [vmem:[%s2036_s4 + $0x20] sm:$0xff] (!%p254_p2)   ;;  %v1680_v23 = vld [vmem:[%s2036_s4 + $0x28] sm:$0xff] (!%p254_p2)  }
   0xd   : > { %1568 = vmatpush3.bf16.msra.mxu1 %v1664_v7  ;;  %1541 = vmatprep.subr.bf16.mxu0 %v1665_v8  ;;  %s305_s25 = scalar_select %p304_p3, %s1794_s22, 16  ;;  %v1681_v24 = vld [vmem:[%s2036_s4 + $0xf0] sm:$0xff]   ;;  %v1685_v28 = vld [vmem:[%s2036_s4 + $0xf8] sm:$0xff]   ;;  %v1695_v36 = vld [vmem:[%s2036_s4 + $0x140] sm:$0xff]  }
   0xe   : > { %1569 = vmatprep.subr.bf16.mxu1 %v1666_v9  ;;  %v1682_v25 = vld [vmem:[%s2036_s4 + $0x70] sm:$0xff]   ;;  %v1686_v29 = vld [vmem:[%s2036_s4 + $0x78] sm:$0xff]   ;;  %v1696_v37 = vld [vmem:[%s2036_s4 + $0x1c0] sm:$0xff]   ;;  %s2040_s26 = smov (!%p315_p4, %s314_s26), 16  ;;  %s2042_s22 = smov (!%p328_p5, %s1794_s22), 15 }
   0xf   : > { %v1683_v26 = vld [vmem:[%s2036_s4 + $0xb0] sm:$0xff]   ;;  %s1517_s10 = sshll.u32 %s305_s25, 5  ;;  %v1687_v30 = vld [vmem:[%s2036_s4 + $0xb8] sm:$0xff]   ;;  %v1697_v38 = vld [vmem:[%s2036_s4 + $0x100] sm:$0xff]   ;;  %s1519_s18 = sshll.u32 %s2040_s26, 5 }
  0x10   : > { %1542 = vmatpush3.bf16.msra.mxu0 %v1667_v10  ;;  %v1684_v27 = vld [vmem:[%s2036_s4 + $0x30] sm:$0xff]   ;;  %s1893_s19 = scalar_lea.vmem %s2033_s1, %s1517_s10  ;;  %v1688_v31 = vld [vmem:[%s2036_s4 + $0x38] sm:$0xff]   ;;  %s1904_s28 = scalar_lea.vmem %s2032_s0, %s1517_s10  ;;  %v1698_v39 = vld [vmem:[%s2036_s4 + $0x180] sm:$0xff]  }
  0x11   : > { %1570 = vmatpush3.bf16.msra.mxu1 %v1668_v11  ;;  %1543 = vmatprep.subr.bf16.mxu0 %v1669_v12  ;;  %v1689_v32 = vld [vmem:[%s1893_s19] ss:$8 sps:$4 sm:$0xff]   ;;  %v1691_v33 = vld [vmem:[%s1893_s19 + $0x4] ss:$8 sps:$4 sm:$0xff]   ;;  %v1703_v44 = vld [vmem:[%s2036_s4 + $0x150] sm:$0xff]   ;;  %s319_s8 = scalar_lea.vmem %s2034_s2, %s1519_s18  ;;  %s326_s12 = scalar_lea.vmem %s2035_s3, %s1519_s18 }
  0x12   : > { %1571 = vmatprep.subr.bf16.mxu1 %v1670_v13  ;;  %v1692_v34 = vld [vmem:[%s1904_s28] ss:$8 sps:$4 sm:$0xff]   ;;  %v1694_v35 = vld [vmem:[%s1904_s28 + $0x4] ss:$8 sps:$4 sm:$0xff]   ;;  %559 = vmatprep.mubr.bf16.mxu0 %v1691_v33  ;;  %v1704_v45 = vld [vmem:[%s2036_s4 + $0x1d0] sm:$0xff]   ;;  %s1521_s15 = sshll.u32 %s2042_s22, 4 }
  0x13   : > { %724 = vmatprep.mubr.bf16.mxu1 %v1694_v35  ;;  %v1699_v40 = vld [vmem:[%s2036_s4 + $0x148] sm:$0xff]   ;;  %v1705_v46 = vld [vmem:[%s2036_s4 + $0x110] sm:$0xff]   ;;  %v1707_v48 = vld [vmem:[%s2036_s4 + $0x158] sm:$0xff]   ;;  %s332_s16 = scalar_lea.vmem %s2037_s5, %s1521_s15  ;;  %s1334_s17 = sshll.u32 %s2042_s22, 1 }
  0x14   : > { %1544 = vmatpush3.bf16.msra.mxu0 %v1671_v14  ;;  %v1700_v41 = vld [vmem:[%s2036_s4 + $0x1c8] sm:$0xff]   ;;  %v1706_v47 = vld [vmem:[%s2036_s4 + $0x190] sm:$0xff]   ;;  %v1708_v49 = vld [vmem:[%s2036_s4 + $0x1d8] sm:$0xff]   ;;  %s336_s23 = scalar_lea.vmem %s2038_s6, %s1334_s17 }
  0x15   : > { %1572 = vmatpush3.bf16.msra.mxu1 %v1672_v15  ;;  %1545 = vmatprep.subr.bf16.mxu0 %v1673_v16  ;;  %v1701_v42 = vld [vmem:[%s2036_s4 + $0x108] sm:$0xff]   ;;  %v1709_v50 = vld [vmem:[%s2036_s4 + $0x118] sm:$0xff]   ;;  %v1711_v52 = vld [vmem:[%s2036_s4 + $0x160] sm:$0xff]  }
  0x16   : > { %1573 = vmatprep.subr.bf16.mxu1 %v1674_v17  ;;  %v1702_v43 = vld [vmem:[%s2036_s4 + $0x188] sm:$0xff]   ;;  %v1710_v51 = vld [vmem:[%s2036_s4 + $0x198] sm:$0xff]   ;;  %v1712_v53 = vld [vmem:[%s2036_s4 + $0x1e0] sm:$0xff]  }
  0x17   : > { %v1713_v54 = vld [vmem:[%s2036_s4 + $0x120] sm:$0xff]   ;;  %v1715_v56 = vld [vmem:[%s1893_s19 + $0x14] ss:$8 sps:$4 sm:$0xff]   ;;  %v1719_v58 = vld [vmem:[%s2036_s4 + $0x168] sm:$0xff]  }
  0x18   : > { %1546 = vmatpush3.bf16.msra.mxu0 %v1675_v18  ;;  %v1714_v55 = vld [vmem:[%s2036_s4 + $0x1a0] sm:$0xff]   ;;  %v1717_v57 = vld [vmem:[%s1904_s28 + $0x14] ss:$8 sps:$4 sm:$0xff]   ;;  %v1720_v59 = vld [vmem:[%s2036_s4 + $0x1e8] sm:$0xff]  }
  0x19   : > { %1574 = vmatpush3.bf16.msra.mxu1 %v1676_v19  ;;  %1547 = vmatprep.subr.bf16.mxu0 %v1677_v20  ;;  %v1721_v60 = vld [vmem:[%s1893_s19 + $0x10] ss:$8 sps:$4 sm:$0xff]   ;;  %v1723_v62 = vld [vmem:[%s2036_s4 + $0x128] sm:$0xff]   ;;  %v1739_v12 = vld [vmem:[%s319_s8 + $0x14] ss:$8 sps:$4 sm:$0xff]  }
  0x1a   : > { %1575 = vmatprep.subr.bf16.mxu1 %v1678_v21  ;;  %v1722_v61 = vld [vmem:[%s1904_s28 + $0x10] ss:$8 sps:$4 sm:$0xff]   ;;  %v1724_v63 = vld [vmem:[%s2036_s4 + $0x1a8] sm:$0xff]   ;;  %v1741_v13 = vld [vmem:[%s326_s12 + $0x14] ss:$8 sps:$4 sm:$0xff]  }
  0x1b   : > { %v1725_v0 = vld [vmem:[%s2036_s4 + $0x170] sm:$0xff]   ;;  %v1729_v4 = vld [vmem:[%s2036_s4 + $0x178] sm:$0xff]   ;;  %v1733_v8 = vld [vmem:[%s319_s8] ss:$8 sps:$4 sm:$0xff]  }
  0x1c   : > { %1548 = vmatpush3.bf16.msra.mxu0 %v1679_v22  ;;  %v1726_v1 = vld [vmem:[%s2036_s4 + $0x1f0] sm:$0xff]   ;;  %v1730_v5 = vld [vmem:[%s2036_s4 + $0x1f8] sm:$0xff]   ;;  %v1735_v9 = vld [vmem:[%s319_s8 + $0x4] ss:$8 sps:$4 sm:$0xff]  }
  0x1d   : > { %1576 = vmatpush3.bf16.msra.mxu1 %v1680_v23  ;;  %1549 = vmatprep.subr.bf16.mxu0 %v1681_v24  ;;  %v1727_v2 = vld [vmem:[%s2036_s4 + $0x130] sm:$0xff]   ;;  %v1731_v6 = vld [vmem:[%s2036_s4 + $0x138] sm:$0xff]   ;;  %v1736_v10 = vld [vmem:[%s326_s12] ss:$8 sps:$4 sm:$0xff]  }
  0x1e   : > { %1577 = vmatprep.subr.bf16.mxu1 %v1682_v25  ;;  %v1728_v3 = vld [vmem:[%s2036_s4 + $0x1b0] sm:$0xff]   ;;  %v1732_v7 = vld [vmem:[%s2036_s4 + $0x1b8] sm:$0xff]   ;;  %v1738_v11 = vld [vmem:[%s326_s12 + $0x4] ss:$8 sps:$4 sm:$0xff]  }
  0x1f   : > { %v1743_v14 = vld [vmem:[%s319_s8 + $0x10] ss:$8 sps:$4 sm:$0xff]  }
  0x20   : > { %1550 = vmatpush3.bf16.msra.mxu0 %v1683_v26  ;;  %v1744_v15 = vld [vmem:[%s326_s12 + $0x10] ss:$8 sps:$4 sm:$0xff]  }
  0x21   : > { %1578 = vmatpush3.bf16.msra.mxu1 %v1684_v27  ;;  %1551 = vmatprep.subr.bf16.mxu0 %v1685_v28 }
  0x22   : > { %1579 = vmatprep.subr.bf16.mxu1 %v1686_v29 }
  0x24   : > { %1552 = vmatpush3.bf16.msra.mxu0 %v1687_v30 }
  0x25   : > { %1580 = vmatpush3.bf16.msra.mxu1 %v1688_v31  ;;  %1593 = vmatprep.subr.bf16.mxu0 %v1695_v36 }
  0x26   : > { %1621 = vmatprep.subr.bf16.mxu1 %v1696_v37 }
  0x27   : > { %560 = vmatmul.mubr.bf16.vlgmr.msra.gmra.mrb[0].mxu0 %v1689_v32 }
  0x28   : > { %725 = vmatmul.mubr.bf16.vlgmr.msra.gmra.mrb[0].mxu1 %v1692_v34  ;;  %1594 = vmatpush3.bf16.msra.mxu0 %v1697_v38 }
  0x29   : > { %1622 = vmatpush3.bf16.msra.mxu1 %v1698_v39  ;;  %1595 = vmatprep.subr.bf16.mxu0 %v1699_v40 }
  0x2a   : > { %1623 = vmatprep.subr.bf16.mxu1 %v1700_v41  ;;  %567 = vmatprep.mubr.bf16.mxu0 %v1715_v56 }
  0x2b   : > { %732 = vmatprep.mubr.bf16.mxu1 %v1717_v57 }
  0x2c   : > { %1596 = vmatpush3.bf16.msra.mxu0 %v1701_v42 }
  0x2d   : > { %1624 = vmatpush3.bf16.msra.mxu1 %v1702_v43  ;;  %1597 = vmatprep.subr.bf16.mxu0 %v1703_v44 }
  0x2e   : > { %1625 = vmatprep.subr.bf16.mxu1 %v1704_v45 }
  0x2f   : > { %568 = vmatmul.mubr.bf16.gmra.mrb[4].mxu0 %v1721_v60 }
  0x30   : > { %1598 = vmatpush3.bf16.msra.mxu0 %v1705_v46  ;;  %733 = vmatmul.mubr.bf16.gmra.mrb[4].mxu1 %v1722_v61 }
  0x31   : > { %1626 = vmatpush3.bf16.msra.mxu1 %v1706_v47  ;;  %1599 = vmatprep.subr.bf16.mxu0 %v1707_v48 }
  0x32   : > { %1627 = vmatprep.subr.bf16.mxu1 %v1708_v49  ;;  %926 = vmatprep.mubr.bf16.mxu0 %v1735_v9 }
  0x33   : > { %1132 = vmatprep.mubr.bf16.mxu1 %v1738_v11 }
  0x34   : > { %1600 = vmatpush3.bf16.msra.mxu0 %v1709_v50 }
  0x35   : > { %1628 = vmatpush3.bf16.msra.mxu1 %v1710_v51  ;;  %1601 = vmatprep.subr.bf16.mxu0 %v1711_v52 }
  0x36   : > { %1629 = vmatprep.subr.bf16.mxu1 %v1712_v53 }
  0x38   : > { %1602 = vmatpush3.bf16.msra.mxu0 %v1713_v54 }
  0x39   : > { %1630 = vmatpush3.bf16.msra.mxu1 %v1714_v55  ;;  %1603 = vmatprep.subr.bf16.mxu0 %v1719_v58 }
  0x3a   : > { %1631 = vmatprep.subr.bf16.mxu1 %v1720_v59 }
  0x3c   : > { %1604 = vmatpush3.bf16.msra.mxu0 %v1723_v62 }
  0x3d   : > { %1632 = vmatpush3.bf16.msra.mxu1 %v1724_v63  ;;  %1605 = vmatprep.subr.bf16.mxu0 %v1725_v0 }
  0x3e   : > { %1633 = vmatprep.subr.bf16.mxu1 %v1726_v1 }
  0x40   : > { %1606 = vmatpush3.bf16.msra.mxu0 %v1727_v2 }
  0x41   : > { %1634 = vmatpush3.bf16.msra.mxu1 %v1728_v3  ;;  %1607 = vmatprep.subr.bf16.mxu0 %v1729_v4 }
  0x42   : > { %1635 = vmatprep.subr.bf16.mxu1 %v1730_v5 }
  0x44   : > { %1608 = vmatpush3.bf16.msra.mxu0 %v1731_v6 }
  0x45   : > { %1636 = vmatpush3.bf16.msra.mxu1 %v1732_v7 }
  0x47   : > { %927 = vmatmul.mubr.bf16.vlgmr.msra.gmra.mrb[8].mxu0 %v1733_v8 }
  0x48   : > { %1133 = vmatmul.mubr.bf16.vlgmr.msra.gmra.mrb[8].mxu1 %v1736_v10  ;;  %934 = vmatprep.mubr.bf16.mxu0 %v1739_v12 }
  0x49   : > { %1140 = vmatprep.mubr.bf16.mxu1 %v1741_v13 }
  0x4f   : > { %935 = vmatmul.mubr.bf16.gmra.mrb[12].mxu0 %v1743_v14 }
  0x50   : > { %1141 = vmatmul.mubr.bf16.gmra.mrb[12].mxu1 %v1744_v15 }
  0xfa   : > { %v1553_v16 = vpop.f32.mrb[0].mxu0 }
  0xfb   : > { %v1581_v17 = vpop.f32.mrb[0].mxu1  ;;  %v1554_v18 = vpop.f32.mrb[1].mxu0 }
  0xfc   : > { %v1555_v19 = vadd.f32 %v1554_v18, %v1553_v16  ;;  %v1582_v20 = vpop.f32.mrb[1].mxu1  ;;  %v1556_v21 = vpop.f32.mrb[2].mxu0 }
  0xfd   : > { %v1583_v22 = vadd.f32 %v1582_v20, %v1581_v17  ;;  %v1584_v23 = vpop.f32.mrb[2].mxu1  ;;  %v1557_v24 = vpop.f32.mrb[3].mxu0 }
  0xfe   : > { %v1558_v25 = vadd.f32 %v1557_v24, %v1556_v21  ;;  %v1585_v26 = vpop.f32.mrb[3].mxu1 }
  0xff   : > { %v727_v27 = vadd.f32 %v1583_v22, %v1555_v19  ;;  %v1586_v28 = vadd.f32 %v1585_v26, %v1584_v23 }
 0x101   : > { %v730_v29 = vadd.f32 %v1586_v28, %v1558_v25 }
 0x102   : > { %v1559_v30 = vpop.f32.mrb[4].mxu0 }
 0x103   : > { %v1587_v31 = vpop.f32.mrb[4].mxu1  ;;  %v1560_v32 = vpop.f32.mrb[5].mxu0 }
 0x104   : > { %v1561_v33 = vadd.f32 %v1560_v32, %v1559_v30  ;;  %v1588_v34 = vpop.f32.mrb[5].mxu1  ;;  %v1562_v35 = vpop.f32.mrb[6].mxu0 }
 0x105   : > { %v1589_v36 = vadd.f32 %v1588_v34, %v1587_v31  ;;  %v1590_v37 = vpop.f32.mrb[6].mxu1  ;;  %v1563_v38 = vpop.f32.mrb[7].mxu0 }
 0x106   : > { %v1564_v39 = vadd.f32 %v1563_v38, %v1562_v35  ;;  %v1591_v40 = vpop.f32.mrb[7].mxu1 }
 0x107   : > { %v735_v41 = vadd.f32 %v1589_v36, %v1561_v33  ;;  %v1592_v42 = vadd.f32 %v1591_v40, %v1590_v37 }
 0x109   : > { %v738_v43 = vadd.f32 %v1592_v42, %v1564_v39 }
 0x11a   : > { %v1609_v44 = vpop.f32.mrb[8].mxu0 }
 0x11b   : > { %v1637_v45 = vpop.f32.mrb[8].mxu1  ;;  %v1610_v46 = vpop.f32.mrb[9].mxu0 }
 0x11c   : > { %v1611_v47 = vadd.f32 %v1610_v46, %v1609_v44  ;;  %v1638_v48 = vpop.f32.mrb[9].mxu1  ;;  %v1612_v49 = vpop.f32.mrb[10].mxu0 }
 0x11d   : > { %v1639_v50 = vadd.f32 %v1638_v48, %v1637_v45  ;;  %v1640_v51 = vpop.f32.mrb[10].mxu1  ;;  %v1613_v52 = vpop.f32.mrb[11].mxu0 }
 0x11e   : > { %v943_v53 = vadd.f32 %v1611_v47, %v727_v27  ;;  %v1614_v54 = vadd.f32 %v1613_v52, %v1612_v49  ;;  %v1641_v55 = vpop.f32.mrb[11].mxu1 }
 0x11f   : > { %v1642_v56 = vadd.f32 %v1641_v55, %v1640_v51 }
 0x120   : > { %v1149_v57 = vadd.f32 %v1639_v50, %v943_v53  ;;  %v944_v58 = vadd.f32 %v1614_v54, %v730_v29 }
 0x122   : > { %v1150_v59 = vadd.f32 %v1642_v56, %v944_v58  ;;  %v1615_v60 = vpop.f32.mrb[12].mxu0  ;;  %v1183_v61 = vmul.f32 %v1149_v57, %v1149_v57 }
 0x123   : > { %v1643_v62 = vpop.f32.mrb[12].mxu1  ;;  %v1616_v63 = vpop.f32.mrb[13].mxu0 }
 0x124   : > { %v1529_v0 = vpack.c.bf16 %v1150_v59, %v1149_v57  ;;  %v1173_v1 = vadd.f32 %v1150_v59, %v1149_v57  ;;  %v1184_v2 = vmul.f32 %v1150_v59, %v1150_v59  ;;  %v1617_v3 = vadd.f32 %v1616_v63, %v1615_v60  ;;  %v1644_v4 = vpop.f32.mrb[13].mxu1  ;;  %v1618_v5 = vpop.f32.mrb[14].mxu0 }
 0x125   : > { %v1645_v6 = vadd.f32 %v1644_v4, %v1643_v62  ;;  %v1646_v7 = vpop.f32.mrb[14].mxu1  ;;  %v1619_v8 = vpop.f32.mrb[15].mxu0 }
 0x126   : > { %1530 = vst [vmem:[%s332_s16] sm:$0xff] %v1529_v0   ;;  %v1187_v9 = vadd.f32 %v1184_v2, %v1183_v61  ;;  %v945_v10 = vadd.f32 %v1617_v3, %v735_v41  ;;  %v1620_v11 = vadd.f32 %v1619_v8, %v1618_v5  ;;  %v1647_v12 = vpop.f32.mrb[15].mxu1 }
 0x127   : > { %v1648_v13 = vadd.f32 %v1647_v12, %v1646_v7 }
 0x128   : > { %v1151_v14 = vadd.f32 %v1645_v6, %v945_v10  ;;  %v946_v15 = vadd.f32 %v1620_v11, %v738_v43 }
 0x12a   : > { %v1174_v16 = vadd.f32 %v1173_v1, %v1151_v14  ;;  %v1185_v17 = vmul.f32 %v1151_v14, %v1151_v14  ;;  %v1152_v18 = vadd.f32 %v1648_v13, %v946_v15 }
 0x12c   : > { %v1188_v19 = vadd.f32 %v1187_v9, %v1185_v17  ;;  %v1534_v20 = vpack.c.bf16 %v1152_v18, %v1151_v14  ;;  %v1175_v21 = vadd.f32 %v1174_v16, %v1152_v18  ;;  %v1186_v22 = vmul.f32 %v1152_v18, %v1152_v18 }
 0x12e   : > { %1536 = vst [vmem:[%s332_s16 + $0x8] sm:$0xff] %v1534_v20   ;;  %v1176_v23 = vrot.slane %v1175_v21, 4  ;;  %v1189_v24 = vadd.f32 %v1188_v19, %v1186_v22 }
 0x130   : > { %v1177_v25 = vadd.f32 %v1176_v23, %v1175_v21  ;;  %v1190_v26 = vrot.slane %v1189_v24, 4 }
 0x132   : > { %v1178_v27 = vrot.slane %v1177_v25, 2  ;;  %v1191_v28 = vadd.f32 %v1190_v26, %v1189_v24 }
 0x134   : > { %v1179_v29 = vadd.f32 %v1178_v27, %v1177_v25  ;;  %v1192_v30 = vrot.slane %v1191_v28, 2 }
 0x136   : > { %v1180_v31 = vrot.slane %v1179_v29, 1  ;;  %v1193_v32 = vadd.f32 %v1192_v30, %v1191_v28 }
 0x138   : > { %v1181_v33 = vadd.f32 %v1180_v31, %v1179_v29  ;;  %v1194_v34 = vrot.slane %v1193_v32, 1 }
 0x13a   : > { %1182 = vst [vmem:[%s336_s23] sm:$0x1] %v1181_v33  ;;  %v1195_v35 = vadd.f32 %v1194_v34, %v1193_v32 }
 0x13c   : > { %1196 = vst [vmem:[%s336_s23 + $0x1] sm:$0x1] %v1195_v35 }
 0x13d PF: > { %s17_s21 = sadd.s32 1, %s1751_s21  }
 0x13e   : > { %p14_p6 = scmp.ge.s32.totalorder %s17_s21, 18  }
 0x140   :  { %16 = sbr.rel (!%p14_p6) target bundleno = 1 (0x1), region = 94 }

// kernel: discriminator_forward.9
= control target key start
LH: loop header
LB: loop body
LE: loop exit
PB: predicated region body
PF: predicated region fallthrough
CT: control target
= control target key end

     0   :  { %s488_s12 = smov 0   ;;  %s579_s0 = inlined_call_operand.vmem [shape: bf16[128,256], index: 0, kind: input, shape index: {}]   ;;  %s580_s1 = inlined_call_operand.vmem [shape: f32[1,256], index: 1, kind: input, shape index: {}]   ;;  %s581_s2 = inlined_call_operand.vmem [shape: f32[1,256], index: 2, kind: input, shape index: {}]   ;;  %s582_s3 = inlined_call_operand.vmem [shape: bf16[128,256], index: 3, kind: output, shape index: {}]  }
   0x1 LB: > { %s421_s13 = sadd.s32 4294967295, %s466_s12   ;;  %p425_p0 = scmp.ge.s32.totalorder %s466_s12, 1  ;;  %s466_s12 = sphi %s488_s12, %s13_s12  }
   0x2   : > { %p139_p1 = scmp.lt.s32.totalorder %s466_s12, 3 }
   0x4   : > { %p140_p2 = pnand %p425_p0, %p139_p1 }
   0x5   : > { %s426_s14 = sshll.u32 (!%p140_p2), %s421_s13, 3  ;;  %v205_v0 = vlaneseq (!%p140_p2)  ;;  %v203_v2 = vld [vmem:[%s580_s1] sm:$0x3] (!%p140_p2) }
   0x6   : > { %143 = sbr.rel (%p140_p2) target bundleno = 49 (0x31), region = 32  ;;  %p166_p3 = scmp.lt.s32.totalorder (!%p140_p2), %s426_s14, 15  ;;  %v231_v5 = vld [vmem:[%s581_s2] sm:$0x3] (!%p140_p2) }
   0x7   : > { %v206_v1 = vshrl.u32 (!%p140_p2), %v205_v0, 7 }
   0x9   : > { %v207_v3 = vsub.s32 (!%p140_p2), 0, %v206_v1  ;;  %v211_v4 = vsub.s32 (!%p140_p2), 1, %v206_v1 }
   0xb   : > { %v512_v6 = vrot.slane (!%p140_p2), %v203_v2, %v207_v3  ;;  %v514_v7 = vrot.slane (!%p140_p2), %v203_v2, %v211_v4  ;;  %v517_v9 = vrot.slane (!%p140_p2), %v231_v5, %v207_v3  ;;  %v519_v10 = vrot.slane (!%p140_p2), %v231_v5, %v211_v4 }
   0xd   : > { %s584_s14 = smov (!%p166_p3, %s426_s14), 15 }
   0xe   : > { %s442_s19 = sshll.u32 %s584_s14, 3 }
   0xf   : > { %s510_s22 = scalar_lea.vmem %s579_s0, %s442_s19  ;;  %s545_s25 = scalar_lea.vmem %s582_s3, %s442_s19 }
  0x10   : > { %v179_v8 = vld [vmem:[%s510_s22] sm:$0xff]  ;;  %v180_v11 = vld [vmem:[%s510_s22 + $0x8] sm:$0xff]  ;;  %v181_v12 = vld [vmem:[%s510_s22 + $0x10] sm:$0xff] }
  0x11   : > { %v187_v13 = vunpack.c.l.bf16 %v179_v8  ;;  %v188_v14 = vunpack.c.h.bf16 %v179_v8  ;;  %v189_v15 = vunpack.c.l.bf16 %v180_v11  ;;  %v190_v16 = vunpack.c.h.bf16 %v180_v11  ;;  %v182_v17 = vld [vmem:[%s510_s22 + $0x18] sm:$0xff]  ;;  %v183_v44 = vld [vmem:[%s510_s22 + $0x20] sm:$0xff]  ;;  %v184_v49 = vld [vmem:[%s510_s22 + $0x28] sm:$0xff] }
  0x12   : > { %v191_v18 = vunpack.c.l.bf16 %v181_v12  ;;  %v192_v19 = vunpack.c.h.bf16 %v181_v12  ;;  %v193_v20 = vunpack.c.l.bf16 %v182_v17  ;;  %v194_v21 = vunpack.c.h.bf16 %v182_v17  ;;  %v185_v60 = vld [vmem:[%s510_s22 + $0x30] sm:$0xff]  ;;  %v186_v61 = vld [vmem:[%s510_s22 + $0x38] sm:$0xff] }
  0x13   : > { %v215_v22 = vmul.f32 %v512_v6, %v187_v13  ;;  %v216_v23 = vmul.f32 %v514_v7, %v188_v14  ;;  %v217_v24 = vmul.f32 %v512_v6, %v189_v15  ;;  %v218_v25 = vmul.f32 %v514_v7, %v190_v16 }
  0x14   : > { %v219_v26 = vmul.f32 %v512_v6, %v191_v18  ;;  %v220_v27 = vmul.f32 %v514_v7, %v192_v19  ;;  %v221_v28 = vmul.f32 %v512_v6, %v193_v20  ;;  %v222_v29 = vmul.f32 %v514_v7, %v194_v21 }
  0x15   : > { %v243_v30 = vadd.f32 %v517_v9, %v215_v22  ;;  %v244_v31 = vadd.f32 %v519_v10, %v216_v23  ;;  %v245_v32 = vadd.f32 %v517_v9, %v217_v24  ;;  %v246_v33 = vadd.f32 %v519_v10, %v218_v25 }
  0x16   : > { %v247_v34 = vadd.f32 %v517_v9, %v219_v26  ;;  %v248_v35 = vadd.f32 %v519_v10, %v220_v27  ;;  %v249_v36 = vadd.f32 %v517_v9, %v221_v28  ;;  %v250_v37 = vadd.f32 %v519_v10, %v222_v29 }
  0x17   : > { %vm259_vm0 = vcmp.gt.f32.partialorder %v243_v30, 0.0  ;;  %vm260_vm1 = vcmp.gt.f32.partialorder %v244_v31, 0.0  ;;  %v275_v38 = vmul.f32 0.2, %v243_v30  ;;  %v276_v39 = vmul.f32 0.2, %v244_v31 }
  0x18   : > { %vm261_vm2 = vcmp.gt.f32.partialorder %v245_v32, 0.0  ;;  %vm262_vm3 = vcmp.gt.f32.partialorder %v246_v33, 0.0  ;;  %v277_v40 = vmul.f32 0.2, %v245_v32  ;;  %v278_v41 = vmul.f32 0.2, %v246_v33 }
  0x19   : > { %v291_v42 = vsel %vm259_vm0, %v243_v30, %v275_v38  ;;  %v292_v43 = vsel %vm260_vm1, %v244_v31, %v276_v39  ;;  %vm263_vm4 = vcmp.gt.f32.partialorder %v247_v34, 0.0  ;;  %vm264_vm5 = vcmp.gt.f32.partialorder %v248_v35, 0.0 }
  0x1a   : > { %v444_v45 = vpack.c.bf16 %v292_v43, %v291_v42  ;;  %v293_v46 = vsel %vm261_vm2, %v245_v32, %v277_v40  ;;  %v294_v47 = vsel %vm262_vm3, %v246_v33, %v278_v41  ;;  %v279_v48 = vmul.f32 0.2, %v247_v34 }
  0x1b   : > { %v445_v50 = vpack.c.bf16 %v294_v47, %v293_v46  ;;  %v280_v51 = vmul.f32 0.2, %v248_v35  ;;  %vm265_vm6 = vcmp.gt.f32.partialorder %v249_v36, 0.0  ;;  %vm266_vm7 = vcmp.gt.f32.partialorder %v250_v37, 0.0 }
  0x1c   : > { %355 = vst [vmem:[%s545_s25] sm:$0xff] %v444_v45  ;;  %v295_v52 = vsel %vm263_vm4, %v247_v34, %v279_v48  ;;  %v281_v53 = vmul.f32 0.2, %v249_v36  ;;  %v282_v54 = vmul.f32 0.2, %v250_v37  ;;  %v195_v55 = vunpack.c.l.bf16 %v183_v44 }
  0x1d   : > { %356 = vst [vmem:[%s545_s25 + $0x8] sm:$0xff] %v445_v50  ;;  %v296_v56 = vsel %vm264_vm5, %v248_v35, %v280_v51  ;;  %v196_v57 = vunpack.c.h.bf16 %v183_v44  ;;  %v197_v58 = vunpack.c.l.bf16 %v184_v49  ;;  %v198_v59 = vunpack.c.h.bf16 %v184_v49 }
  0x1e   : > { %v446_v62 = vpack.c.bf16 %v296_v56, %v295_v52  ;;  %v297_v63 = vsel %vm265_vm6, %v249_v36, %v281_v53  ;;  %v298_v0 = vsel %vm266_vm7, %v250_v37, %v282_v54  ;;  %v223_v1 = vmul.f32 %v512_v6, %v195_v55 }
  0x1f   : > { %v447_v2 = vpack.c.bf16 %v298_v0, %v297_v63  ;;  %v224_v3 = vmul.f32 %v514_v7, %v196_v57  ;;  %v225_v4 = vmul.f32 %v512_v6, %v197_v58  ;;  %v226_v5 = vmul.f32 %v514_v7, %v198_v59 }
  0x20   : > { %357 = vst [vmem:[%s545_s25 + $0x10] sm:$0xff] %v446_v62  ;;  %v251_v8 = vadd.f32 %v517_v9, %v223_v1  ;;  %v199_v11 = vunpack.c.l.bf16 %v185_v60  ;;  %v200_v12 = vunpack.c.h.bf16 %v185_v60  ;;  %v201_v13 = vunpack.c.l.bf16 %v186_v61 }
  0x21   : > { %358 = vst [vmem:[%s545_s25 + $0x18] sm:$0xff] %v447_v2  ;;  %v252_v14 = vadd.f32 %v519_v10, %v224_v3  ;;  %v253_v15 = vadd.f32 %v517_v9, %v225_v4  ;;  %v254_v16 = vadd.f32 %v519_v10, %v226_v5  ;;  %v202_v17 = vunpack.c.h.bf16 %v186_v61 }
  0x22   : > { %vm267_vm8 = vcmp.gt.f32.partialorder %v251_v8, 0.0  ;;  %v283_v18 = vmul.f32 0.2, %v251_v8  ;;  %v227_v19 = vmul.f32 %v512_v6, %v199_v11  ;;  %v228_v20 = vmul.f32 %v514_v7, %v200_v12 }
  0x23   : > { %vm268_vm9 = vcmp.gt.f32.partialorder %v252_v14, 0.0  ;;  %v284_v21 = vmul.f32 0.2, %v252_v14  ;;  %vm269_vm10 = vcmp.gt.f32.partialorder %v253_v15, 0.0  ;;  %vm270_vm11 = vcmp.gt.f32.partialorder %v254_v16, 0.0 }
  0x24   : > { %v299_v22 = vsel %vm267_vm8, %v251_v8, %v283_v18  ;;  %v285_v23 = vmul.f32 0.2, %v253_v15  ;;  %v286_v24 = vmul.f32 0.2, %v254_v16  ;;  %v255_v25 = vadd.f32 %v517_v9, %v227_v19 }
  0x25   : > { %v300_v26 = vsel %vm268_vm9, %v252_v14, %v284_v21  ;;  %v256_v27 = vadd.f32 %v519_v10, %v228_v20  ;;  %v229_v28 = vmul.f32 %v512_v6, %v201_v13  ;;  %v230_v29 = vmul.f32 %v514_v7, %v202_v17 }
  0x26   : > { %v448_v30 = vpack.c.bf16 %v300_v26, %v299_v22  ;;  %v301_v31 = vsel %vm269_vm10, %v253_v15, %v285_v23  ;;  %v302_v32 = vsel %vm270_vm11, %v254_v16, %v286_v24  ;;  %vm271_vm12 = vcmp.gt.f32.partialorder %v255_v25, 0.0 }
  0x27   : > { %v449_v33 = vpack.c.bf16 %v302_v32, %v301_v31  ;;  %vm272_vm13 = vcmp.gt.f32.partialorder %v256_v27, 0.0  ;;  %v287_v34 = vmul.f32 0.2, %v255_v25  ;;  %v288_v35 = vmul.f32 0.2, %v256_v27 }
  0x28   : > { %359 = vst [vmem:[%s545_s25 + $0x20] sm:$0xff] %v448_v30  ;;  %v257_v36 = vadd.f32 %v517_v9, %v229_v28  ;;  %v258_v37 = vadd.f32 %v519_v10, %v230_v29 }
  0x29   : > { %360 = vst [vmem:[%s545_s25 + $0x28] sm:$0xff] %v449_v33  ;;  %v303_v38 = vsel %vm271_vm12, %v255_v25, %v287_v34  ;;  %v304_v6 = vsel %vm272_vm13, %v256_v27, %v288_v35 }
  0x2a   : > { %v450_v39 = vpack.c.bf16 %v304_v6, %v303_v38  ;;  %vm273_vm14 = vcmp.gt.f32.partialorder %v257_v36, 0.0  ;;  %vm274_vm15 = vcmp.gt.f32.partialorder %v258_v37, 0.0  ;;  %v289_v7 = vmul.f32 0.2, %v257_v36 }
  0x2b   : > { %v290_v40 = vmul.f32 0.2, %v258_v37 }
  0x2c   : > { %361 = vst [vmem:[%s545_s25 + $0x30] sm:$0xff] %v450_v39  ;;  %v305_v41 = vsel %vm273_vm14, %v257_v36, %v289_v7 }
  0x2d   : > { %v306_v42 = vsel %vm274_vm15, %v258_v37, %v290_v40 }
  0x2e   : > { %v451_v43 = vpack.c.bf16 %v306_v42, %v305_v41 }
  0x30   : > { %362 = vst [vmem:[%s545_s25 + $0x38] sm:$0xff] %v451_v43 }
  0x31 PF: > { %s13_s12 = sadd.s32 1, %s466_s12  }
  0x32   : > { %p10_p4 = scmp.ge.s32.totalorder %s13_s12, 4  }
  0x34   :  { %12 = sbr.rel (!%p10_p4) target bundleno = 1 (0x1), region = 62 }

// kernel: discriminator_forward.8
= control target key start
LH: loop header
LB: loop body
LE: loop exit
PB: predicated region body
PF: predicated region fallthrough
CT: control target
= control target key end

     0   :  { %s3522_s21 = smov 0   ;;  %s4368_s0 = inlined_call_operand.vmem [shape: bf16[9,16,512], index: 0, kind: input, shape index: {}, may-alias: {0,2}]   ;;  %s4369_s1 = inlined_call_operand.vmem [shape: bf16[9,16,512], index: 1, kind: input, shape index: {}, may-alias: {1,3}]   ;;  %s4370_s2 = inlined_call_operand.vmem [shape: bf16[9,16,512], index: 2, kind: input, shape index: {}, may-alias: {0,2}]   ;;  %s4371_s3 = inlined_call_operand.vmem [shape: bf16[9,16,512], index: 3, kind: input, shape index: {}, may-alias: {1,3}]   ;;  %s4372_s4 = inlined_call_operand.vmem [shape: bf16[4,512,256], index: 4, kind: input, shape index: {}]   ;;  %s4373_s5 = inlined_call_operand.vmem [shape: bf16[8,16,256], index: 5, kind: output, shape index: {0}]   ;;  %s4374_s6 = inlined_call_operand.vmem [shape: f32[8,2,256], index: 6, kind: output, shape index: {1}]  }
   0x1 LB: > { %s3528_s22 = sadd.s32 4294967295, %s3484_s21   ;;  %p2543_p0 = scmp.ge.s32.totalorder %s3484_s21, 1  ;;  %s3484_s21 = sphi %s3522_s21, %s17_s21  }
   0x2   : > { %p253_p1 = scmp.lt.s32.totalorder %s3484_s21, 9 }
   0x4   : > { %p254_p2 = pnand %p2543_p0, %p253_p1 }
   0x5   : > { %v3070_v0 = vld [vmem:[%s4372_s4 + $0x204] ss:$8 sps:$4 sm:$0xff] (!%p254_p2)   ;;  %v3074_v2 = vld [vmem:[%s4372_s4 + $0x200] ss:$8 sps:$4 sm:$0xff] (!%p254_p2)   ;;  %v3076_v4 = vld [vmem:[%s4372_s4 + $0x214] ss:$8 sps:$4 sm:$0xff] (!%p254_p2)  }
   0x6   : > { %257 = sbr.rel (%p254_p2) target bundleno = 503 (0x1f7), region = 40  ;;  %v3072_v1 = vld [vmem:[%s4372_s4 + $0x404] ss:$8 sps:$4 sm:$0xff] (!%p254_p2)   ;;  %816 = vmatprep.subr.bf16.mxu1 (!%p254_p2), %v3070_v0  ;;  %v3075_v3 = vld [vmem:[%s4372_s4 + $0x400] ss:$8 sps:$4 sm:$0xff] (!%p254_p2)   ;;  %p305_p3 = scmp.lt.s32.totalorder (!%p254_p2), %s3528_s22, 8 }
   0x7   : > { %1737 = vmatprep.subr.bf16.mxu0 (!%p254_p2), %v3072_v1  ;;  %817 = vmatpush1.bf16.msra.mxu1 (!%p254_p2), %v3074_v2  ;;  %v3078_v5 = vld [vmem:[%s4372_s4 + $0x414] ss:$8 sps:$4 sm:$0xff] (!%p254_p2)   ;;  %v3080_v6 = vld [vmem:[%s4372_s4 + $0x210] ss:$8 sps:$4 sm:$0xff] (!%p254_p2)   ;;  %v3082_v8 = vld [vmem:[%s4372_s4 + $0x224] ss:$8 sps:$4 sm:$0xff] (!%p254_p2)  }
   0x8   : > { %1738 = vmatpush1.bf16.msra.mxu0 (!%p254_p2), %v3075_v3  ;;  %818 = vmatprep.subr.bf16.mxu1 (!%p254_p2), %v3076_v4  ;;  %v3081_v7 = vld [vmem:[%s4372_s4 + $0x410] ss:$8 sps:$4 sm:$0xff] (!%p254_p2)   ;;  %v3084_v9 = vld [vmem:[%s4372_s4 + $0x424] ss:$8 sps:$4 sm:$0xff] (!%p254_p2)   ;;  %v3086_v10 = vld [vmem:[%s4372_s4 + $0x220] ss:$8 sps:$4 sm:$0xff] (!%p254_p2)  }
   0x9   : > { %1739 = vmatprep.subr.bf16.mxu0 (!%p254_p2), %v3078_v5  ;;  %v3087_v11 = vld [vmem:[%s4372_s4 + $0x420] ss:$8 sps:$4 sm:$0xff] (!%p254_p2)   ;;  %v3088_v12 = vld [vmem:[%s4372_s4 + $0x234] ss:$8 sps:$4 sm:$0xff] (!%p254_p2)   ;;  %v3092_v14 = vld [vmem:[%s4372_s4 + $0x230] ss:$8 sps:$4 sm:$0xff] (!%p254_p2)  }
   0xa   : > { %v3090_v13 = vld [vmem:[%s4372_s4 + $0x434] ss:$8 sps:$4 sm:$0xff] (!%p254_p2)   ;;  %v3093_v15 = vld [vmem:[%s4372_s4 + $0x430] ss:$8 sps:$4 sm:$0xff] (!%p254_p2)   ;;  %v3094_v16 = vld [vmem:[%s4372_s4 + $0x244] ss:$8 sps:$4 sm:$0xff] (!%p254_p2)  }
   0xb   : > { %819 = vmatpush1.bf16.msra.mxu1 (!%p254_p2), %v3080_v6  ;;  %v3096_v17 = vld [vmem:[%s4372_s4 + $0x444] ss:$8 sps:$4 sm:$0xff] (!%p254_p2)   ;;  %v3098_v18 = vld [vmem:[%s4372_s4 + $0x240] ss:$8 sps:$4 sm:$0xff] (!%p254_p2)   ;;  %v3100_v20 = vld [vmem:[%s4372_s4 + $0x254] ss:$8 sps:$4 sm:$0xff] (!%p254_p2)  }
   0xc   : > { %1740 = vmatpush1.bf16.msra.mxu0 (!%p254_p2), %v3081_v7  ;;  %820 = vmatprep.subr.bf16.mxu1 (!%p254_p2), %v3082_v8  ;;  %v3099_v19 = vld [vmem:[%s4372_s4 + $0x440] ss:$8 sps:$4 sm:$0xff] (!%p254_p2)   ;;  %v3102_v21 = vld [vmem:[%s4372_s4 + $0x454] ss:$8 sps:$4 sm:$0xff] (!%p254_p2)   ;;  %v3104_v22 = vld [vmem:[%s4372_s4 + $0x250] ss:$8 sps:$4 sm:$0xff] (!%p254_p2)  }
   0xd   : > { %1741 = vmatprep.subr.bf16.mxu0 %v3084_v9  ;;  %v3105_v23 = vld [vmem:[%s4372_s4 + $0x450] ss:$8 sps:$4 sm:$0xff]   ;;  %v3106_v24 = vld [vmem:[%s4372_s4 + $0x264] ss:$8 sps:$4 sm:$0xff]   ;;  %v3110_v26 = vld [vmem:[%s4372_s4 + $0x260] ss:$8 sps:$4 sm:$0xff]  }
   0xe   : > { %v3108_v25 = vld [vmem:[%s4372_s4 + $0x464] ss:$8 sps:$4 sm:$0xff]   ;;  %v3111_v27 = vld [vmem:[%s4372_s4 + $0x460] ss:$8 sps:$4 sm:$0xff]   ;;  %v3112_v28 = vld [vmem:[%s4372_s4 + $0x274] ss:$8 sps:$4 sm:$0xff]  }
   0xf   : > { %821 = vmatpush1.bf16.msra.mxu1 %v3086_v10  ;;  %v3114_v29 = vld [vmem:[%s4372_s4 + $0x474] ss:$8 sps:$4 sm:$0xff]   ;;  %v3116_v30 = vld [vmem:[%s4372_s4 + $0x270] ss:$8 sps:$4 sm:$0xff]   ;;  %v3118_v32 = vld [vmem:[%s4372_s4 + $0x284] ss:$8 sps:$4 sm:$0xff]  }
  0x10   : > { %1742 = vmatpush1.bf16.msra.mxu0 %v3087_v11  ;;  %822 = vmatprep.subr.bf16.mxu1 %v3088_v12  ;;  %v3117_v31 = vld [vmem:[%s4372_s4 + $0x470] ss:$8 sps:$4 sm:$0xff]   ;;  %v3120_v33 = vld [vmem:[%s4372_s4 + $0x484] ss:$8 sps:$4 sm:$0xff]   ;;  %s315_s25 = sadd.s32 1, %s3528_s22  ;;  %p329_p5 = scmp.lt.s32.totalorder %s3528_s22, 7 }
  0x11   : > { %1743 = vmatprep.subr.bf16.mxu0 %v3090_v13  ;;  %v3122_v34 = vld [vmem:[%s4372_s4 + $0x280] ss:$8 sps:$4 sm:$0xff]   ;;  %v3124_v36 = vld [vmem:[%s4372_s4 + $0x294] ss:$8 sps:$4 sm:$0xff]   ;;  %p316_p4 = scmp.lt.s32.totalorder %s315_s25, 8 }
  0x12   : > { %v3123_v35 = vld [vmem:[%s4372_s4 + $0x480] ss:$8 sps:$4 sm:$0xff]   ;;  %v3126_v37 = vld [vmem:[%s4372_s4 + $0x494] ss:$8 sps:$4 sm:$0xff]   ;;  %s3649_s10 = scalar_select %p305_p3, %s3528_s22, 8 }
  0x13   : > { %823 = vmatpush1.bf16.msra.mxu1 %v3092_v14  ;;  %v3128_v38 = vld [vmem:[%s4372_s4 + $0x290] ss:$8 sps:$4 sm:$0xff]   ;;  %v3130_v40 = vld [vmem:[%s4372_s4 + $0x2a4] ss:$8 sps:$4 sm:$0xff]   ;;  %s4376_s25 = smov (!%p316_p4, %s315_s25), 8  ;;  %s4378_s22 = smov (!%p329_p5, %s3528_s22), 7 }
  0x14   : > { %1744 = vmatpush1.bf16.msra.mxu0 %v3093_v15  ;;  %824 = vmatprep.subr.bf16.mxu1 %v3094_v16  ;;  %v3129_v39 = vld [vmem:[%s4372_s4 + $0x490] ss:$8 sps:$4 sm:$0xff]   ;;  %v3132_v41 = vld [vmem:[%s4372_s4 + $0x4a4] ss:$8 sps:$4 sm:$0xff]   ;;  %s3025_s19 = sshll.u32 %s3649_s10, 5  ;;  %s3027_s8 = sshll.u32 %s4376_s25, 5 }
  0x15   : > { %1745 = vmatprep.subr.bf16.mxu0 %v3096_v17  ;;  %v3134_v42 = vld [vmem:[%s4372_s4 + $0x2a0] ss:$8 sps:$4 sm:$0xff]   ;;  %v3136_v44 = vld [vmem:[%s4372_s4 + $0x2b4] ss:$8 sps:$4 sm:$0xff]   ;;  %s3680_s7 = scalar_lea.vmem %s4369_s1, %s3025_s19  ;;  %v3140_v46 = vld [vmem:[%s4372_s4 + $0x2b0] ss:$8 sps:$4 sm:$0xff]   ;;  %s3698_s18 = scalar_lea.vmem %s4370_s2, %s3027_s8 }
  0x16   : > { %v3135_v43 = vld [vmem:[%s4372_s4 + $0x4a0] ss:$8 sps:$4 sm:$0xff]   ;;  %v3138_v45 = vld [vmem:[%s4372_s4 + $0x4b4] ss:$8 sps:$4 sm:$0xff]   ;;  %v3141_v47 = vld [vmem:[%s4372_s4 + $0x4b0] ss:$8 sps:$4 sm:$0xff]   ;;  %s3970_s14 = scalar_lea.vmem %s4368_s0, %s3025_s19  ;;  %s3989_s28 = scalar_lea.vmem %s4371_s3, %s3027_s8 }
  0x17   : > { %825 = vmatpush1.bf16.msra.mxu1 %v3098_v18  ;;  %v3168_v48 = vld [vmem:[%s3680_s7 + $0x4] ss:$16 sps:$4 sm:$0xff]   ;;  %v3146_v52 = vld [vmem:[%s4372_s4 + $0x2c0] ss:$8 sps:$4 sm:$0xff]   ;;  %v3152_v56 = vld [vmem:[%s4372_s4 + $0x2d0] ss:$8 sps:$4 sm:$0xff]  }
  0x18   : > { %1746 = vmatpush1.bf16.msra.mxu0 %v3099_v19  ;;  %826 = vmatprep.subr.bf16.mxu1 %v3100_v20  ;;  %v3142_v49 = vld [vmem:[%s4372_s4 + $0x2c4] ss:$8 sps:$4 sm:$0xff]   ;;  %v3147_v53 = vld [vmem:[%s4372_s4 + $0x4c0] ss:$8 sps:$4 sm:$0xff]   ;;  %v3148_v54 = vld [vmem:[%s4372_s4 + $0x2d4] ss:$8 sps:$4 sm:$0xff]  }
  0x19   : > { %1747 = vmatprep.subr.bf16.mxu0 %v3102_v21  ;;  %v3144_v50 = vld [vmem:[%s4372_s4 + $0x4c4] ss:$8 sps:$4 sm:$0xff]   ;;  %848 = vmatprep.mubr.bf16.mxu1 %v3168_v48  ;;  %v3150_v55 = vld [vmem:[%s4372_s4 + $0x4d4] ss:$8 sps:$4 sm:$0xff]   ;;  %v3153_v57 = vld [vmem:[%s4372_s4 + $0x4d0] ss:$8 sps:$4 sm:$0xff]  }
  0x1a   : > { %v3174_v51 = vld [vmem:[%s3698_s18 + $0x4] ss:$16 sps:$4 sm:$0xff]   ;;  %v3158_v60 = vld [vmem:[%s4372_s4 + $0x2e0] ss:$8 sps:$4 sm:$0xff]   ;;  %v3164_v0 = vld [vmem:[%s4372_s4 + $0x2f0] ss:$8 sps:$4 sm:$0xff]  }
  0x1b   : > { %827 = vmatpush1.bf16.msra.mxu1 %v3104_v22  ;;  %1769 = vmatprep.mubr.bf16.mxu0 %v3174_v51  ;;  %v3154_v58 = vld [vmem:[%s4372_s4 + $0x2e4] ss:$8 sps:$4 sm:$0xff]   ;;  %v3159_v61 = vld [vmem:[%s4372_s4 + $0x4e0] ss:$8 sps:$4 sm:$0xff]   ;;  %v3160_v62 = vld [vmem:[%s4372_s4 + $0x2f4] ss:$8 sps:$4 sm:$0xff]  }
  0x1c   : > { %1748 = vmatpush1.bf16.msra.mxu0 %v3105_v23  ;;  %828 = vmatprep.subr.bf16.mxu1 %v3106_v24  ;;  %v3156_v59 = vld [vmem:[%s4372_s4 + $0x4e4] ss:$8 sps:$4 sm:$0xff]   ;;  %v3162_v63 = vld [vmem:[%s4372_s4 + $0x4f4] ss:$8 sps:$4 sm:$0xff]   ;;  %v3165_v1 = vld [vmem:[%s4372_s4 + $0x4f0] ss:$8 sps:$4 sm:$0xff]  }
  0x1d   : > { %1749 = vmatprep.subr.bf16.mxu0 %v3108_v25  ;;  %v3171_v2 = vld [vmem:[%s4372_s4 + $0x304] ss:$8 sps:$4 sm:$0xff]   ;;  %v3166_v4 = vld [vmem:[%s3680_s7] ss:$16 sps:$4 sm:$0xff]   ;;  %v3180_v8 = vld [vmem:[%s4372_s4 + $0x314] ss:$8 sps:$4 sm:$0xff]  }
  0x1e   : > { %v3177_v3 = vld [vmem:[%s4372_s4 + $0x504] ss:$8 sps:$4 sm:$0xff]   ;;  %v3169_v5 = vld [vmem:[%s4372_s4 + $0x300] ss:$8 sps:$4 sm:$0xff]   ;;  %v3183_v9 = vld [vmem:[%s4372_s4 + $0x514] ss:$8 sps:$4 sm:$0xff]  }
  0x1f   : > { %829 = vmatpush1.bf16.msra.mxu1 %v3110_v26  ;;  %v3172_v6 = vld [vmem:[%s3698_s18] ss:$16 sps:$4 sm:$0xff]   ;;  %v3186_v12 = vld [vmem:[%s4372_s4 + $0x324] ss:$8 sps:$4 sm:$0xff]   ;;  %v3192_v16 = vld [vmem:[%s4372_s4 + $0x334] ss:$8 sps:$4 sm:$0xff]  }
  0x20   : > { %1750 = vmatpush1.bf16.msra.mxu0 %v3111_v27  ;;  %830 = vmatprep.subr.bf16.mxu1 %v3112_v28  ;;  %v3175_v7 = vld [vmem:[%s4372_s4 + $0x500] ss:$8 sps:$4 sm:$0xff]   ;;  %v3178_v10 = vld [vmem:[%s4372_s4 + $0x310] ss:$8 sps:$4 sm:$0xff]   ;;  %v3189_v13 = vld [vmem:[%s4372_s4 + $0x524] ss:$8 sps:$4 sm:$0xff]  }
  0x21   : > { %1751 = vmatprep.subr.bf16.mxu0 %v3114_v29  ;;  %v3181_v11 = vld [vmem:[%s4372_s4 + $0x510] ss:$8 sps:$4 sm:$0xff]   ;;  %v3184_v14 = vld [vmem:[%s4372_s4 + $0x320] ss:$8 sps:$4 sm:$0xff]   ;;  %v3195_v17 = vld [vmem:[%s4372_s4 + $0x534] ss:$8 sps:$4 sm:$0xff]  }
  0x22   : > { %v3187_v15 = vld [vmem:[%s4372_s4 + $0x520] ss:$8 sps:$4 sm:$0xff]   ;;  %v3190_v18 = vld [vmem:[%s4372_s4 + $0x330] ss:$8 sps:$4 sm:$0xff]   ;;  %v3198_v20 = vld [vmem:[%s4372_s4 + $0x344] ss:$8 sps:$4 sm:$0xff]  }
  0x23   : > { %831 = vmatpush1.bf16.msra.mxu1 %v3116_v30  ;;  %v3193_v19 = vld [vmem:[%s4372_s4 + $0x530] ss:$8 sps:$4 sm:$0xff]   ;;  %v3201_v21 = vld [vmem:[%s4372_s4 + $0x544] ss:$8 sps:$4 sm:$0xff]   ;;  %v3196_v22 = vld [vmem:[%s4372_s4 + $0x340] ss:$8 sps:$4 sm:$0xff]  }
  0x24   : > { %1752 = vmatpush1.bf16.msra.mxu0 %v3117_v31  ;;  %832 = vmatprep.subr.bf16.mxu1 %v3118_v32  ;;  %v3199_v23 = vld [vmem:[%s4372_s4 + $0x540] ss:$8 sps:$4 sm:$0xff]   ;;  %v3204_v24 = vld [vmem:[%s4372_s4 + $0x354] ss:$8 sps:$4 sm:$0xff]   ;;  %v3202_v26 = vld [vmem:[%s4372_s4 + $0x350] ss:$8 sps:$4 sm:$0xff]  }
  0x25   : > { %1753 = vmatprep.subr.bf16.mxu0 %v3120_v33  ;;  %v3207_v25 = vld [vmem:[%s4372_s4 + $0x554] ss:$8 sps:$4 sm:$0xff]   ;;  %v3205_v27 = vld [vmem:[%s4372_s4 + $0x550] ss:$8 sps:$4 sm:$0xff]   ;;  %v3210_v28 = vld [vmem:[%s4372_s4 + $0x364] ss:$8 sps:$4 sm:$0xff]  }
  0x26   : > { %v3213_v29 = vld [vmem:[%s4372_s4 + $0x564] ss:$8 sps:$4 sm:$0xff]   ;;  %v3208_v30 = vld [vmem:[%s4372_s4 + $0x360] ss:$8 sps:$4 sm:$0xff]   ;;  %v3216_v32 = vld [vmem:[%s4372_s4 + $0x374] ss:$8 sps:$4 sm:$0xff]  }
  0x27   : > { %833 = vmatpush1.bf16.msra.mxu1 %v3122_v34  ;;  %v3211_v31 = vld [vmem:[%s4372_s4 + $0x560] ss:$8 sps:$4 sm:$0xff]   ;;  %v3219_v33 = vld [vmem:[%s4372_s4 + $0x574] ss:$8 sps:$4 sm:$0xff]   ;;  %s3029_s19 = sshll.u32 %s4378_s22, 4  ;;  %s3030_s26 = sshll.u32 %s4378_s22, 2 }
  0x28   : > { %1754 = vmatpush1.bf16.msra.mxu0 %v3123_v35  ;;  %834 = vmatprep.subr.bf16.mxu1 %v3124_v36  ;;  %v3270_v34 = vld [vmem:[%s3680_s7 + $0xc] ss:$16 sps:$4 sm:$0xff]   ;;  %v3214_v35 = vld [vmem:[%s4372_s4 + $0x370] ss:$8 sps:$4 sm:$0xff]   ;;  %v3232_v48 = vld [vmem:[%s4372_s4 + $0x3a0] ss:$8 sps:$4 sm:$0xff]   ;;  %s338_s30 = scalar_lea.vmem %s4374_s6, %s3030_s26 }
  0x29   : > { %1755 = vmatprep.subr.bf16.mxu0 %v3126_v37  ;;  %v3217_v36 = vld [vmem:[%s4372_s4 + $0x570] ss:$8 sps:$4 sm:$0xff]   ;;  %v3276_v37 = vld [vmem:[%s3698_s18 + $0xc] ss:$16 sps:$4 sm:$0xff]  }
  0x2a   : > { %v3243_v51 = vld [vmem:[%s4372_s4 + $0x5b4] ss:$8 sps:$4 sm:$0xff]  }
  0x2b   : > { %835 = vmatpush1.bf16.msra.mxu1 %v3128_v38  ;;  %v3222_v38 = vld [vmem:[%s4372_s4 + $0x384] ss:$8 sps:$4 sm:$0xff]  }
  0x2c   : > { %1756 = vmatpush1.bf16.msra.mxu0 %v3129_v39  ;;  %836 = vmatprep.subr.bf16.mxu1 %v3130_v40  ;;  %v3225_v39 = vld [vmem:[%s4372_s4 + $0x584] ss:$8 sps:$4 sm:$0xff]   ;;  %v3220_v40 = vld [vmem:[%s4372_s4 + $0x380] ss:$8 sps:$4 sm:$0xff]  }
  0x2d   : > { %1757 = vmatprep.subr.bf16.mxu0 %v3132_v41  ;;  %v3223_v41 = vld [vmem:[%s4372_s4 + $0x580] ss:$8 sps:$4 sm:$0xff]  }
  0x2f   : > { %837 = vmatpush1.bf16.msra.mxu1 %v3134_v42  ;;  %v3228_v42 = vld [vmem:[%s4372_s4 + $0x394] ss:$8 sps:$4 sm:$0xff]  }
  0x30   : > { %1758 = vmatpush1.bf16.msra.mxu0 %v3135_v43  ;;  %838 = vmatprep.subr.bf16.mxu1 %v3136_v44  ;;  %v3231_v43 = vld [vmem:[%s4372_s4 + $0x594] ss:$8 sps:$4 sm:$0xff]   ;;  %v3226_v44 = vld [vmem:[%s4372_s4 + $0x390] ss:$8 sps:$4 sm:$0xff]  }
  0x31   : > { %1759 = vmatprep.subr.bf16.mxu0 %v3138_v45  ;;  %v3229_v45 = vld [vmem:[%s4372_s4 + $0x590] ss:$8 sps:$4 sm:$0xff]  }
  0x33   : > { %839 = vmatpush1.bf16.msra.mxu1 %v3140_v46  ;;  %v3234_v46 = vld [vmem:[%s4372_s4 + $0x3a4] ss:$8 sps:$4 sm:$0xff]  }
  0x34   : > { %1760 = vmatpush1.bf16.msra.mxu0 %v3141_v47  ;;  %840 = vmatprep.subr.bf16.mxu1 %v3142_v49  ;;  %v3237_v47 = vld [vmem:[%s4372_s4 + $0x5a4] ss:$8 sps:$4 sm:$0xff]   ;;  %v3235_v49 = vld [vmem:[%s4372_s4 + $0x5a0] ss:$8 sps:$4 sm:$0xff]  }
  0x35   : > { %1761 = vmatprep.subr.bf16.mxu0 %v3144_v50  ;;  %v3240_v50 = vld [vmem:[%s4372_s4 + $0x3b4] ss:$8 sps:$4 sm:$0xff]  }
  0x37   : > { %841 = vmatpush1.bf16.msra.mxu1 %v3146_v52  ;;  %v3238_v52 = vld [vmem:[%s4372_s4 + $0x3b0] ss:$8 sps:$4 sm:$0xff]  }
  0x38   : > { %1762 = vmatpush1.bf16.msra.mxu0 %v3147_v53  ;;  %842 = vmatprep.subr.bf16.mxu1 %v3148_v54  ;;  %v3241_v53 = vld [vmem:[%s4372_s4 + $0x5b0] ss:$8 sps:$4 sm:$0xff]   ;;  %v3246_v54 = vld [vmem:[%s4372_s4 + $0x3c4] ss:$8 sps:$4 sm:$0xff]  }
  0x39   : > { %1763 = vmatprep.subr.bf16.mxu0 %v3150_v55  ;;  %v3249_v55 = vld [vmem:[%s4372_s4 + $0x5c4] ss:$8 sps:$4 sm:$0xff]  }
  0x3b   : > { %843 = vmatpush1.bf16.msra.mxu1 %v3152_v56  ;;  %v3244_v56 = vld [vmem:[%s4372_s4 + $0x3c0] ss:$8 sps:$4 sm:$0xff]  }
  0x3c   : > { %1764 = vmatpush1.bf16.msra.mxu0 %v3153_v57  ;;  %844 = vmatprep.subr.bf16.mxu1 %v3154_v58  ;;  %v3247_v57 = vld [vmem:[%s4372_s4 + $0x5c0] ss:$8 sps:$4 sm:$0xff]   ;;  %v3252_v58 = vld [vmem:[%s4372_s4 + $0x3d4] ss:$8 sps:$4 sm:$0xff]  }
  0x3d   : > { %1765 = vmatprep.subr.bf16.mxu0 %v3156_v59  ;;  %v3255_v59 = vld [vmem:[%s4372_s4 + $0x5d4] ss:$8 sps:$4 sm:$0xff]  }
  0x3f   : > { %845 = vmatpush1.bf16.msra.mxu1 %v3158_v60  ;;  %v3250_v60 = vld [vmem:[%s4372_s4 + $0x3d0] ss:$8 sps:$4 sm:$0xff]  }
  0x40   : > { %1766 = vmatpush1.bf16.msra.mxu0 %v3159_v61  ;;  %846 = vmatprep.subr.bf16.mxu1 %v3160_v62  ;;  %v3253_v61 = vld [vmem:[%s4372_s4 + $0x5d0] ss:$8 sps:$4 sm:$0xff]   ;;  %v3258_v62 = vld [vmem:[%s4372_s4 + $0x3e4] ss:$8 sps:$4 sm:$0xff]  }
  0x41   : > { %1767 = vmatprep.subr.bf16.mxu0 %v3162_v63  ;;  %v3261_v63 = vld [vmem:[%s4372_s4 + $0x5e4] ss:$8 sps:$4 sm:$0xff]  }
  0x43   : > { %847 = vmatpush1.bf16.msra.mxu1 %v3164_v0  ;;  %v3256_v0 = vld [vmem:[%s4372_s4 + $0x3e0] ss:$8 sps:$4 sm:$0xff]  }
  0x44   : > { %1768 = vmatpush1.bf16.msra.mxu0 %v3165_v1  ;;  %859 = vmatprep.subr.bf16.mxu1 %v3171_v2  ;;  %v3259_v1 = vld [vmem:[%s4372_s4 + $0x5e0] ss:$8 sps:$4 sm:$0xff]   ;;  %v3264_v2 = vld [vmem:[%s4372_s4 + $0x3f4] ss:$8 sps:$4 sm:$0xff]  }
  0x45   : > { %1780 = vmatprep.subr.bf16.mxu0 %v3177_v3  ;;  %v3267_v3 = vld [vmem:[%s4372_s4 + $0x5f4] ss:$8 sps:$4 sm:$0xff]  }
  0x46   : > { %849 = vmatmul.mubr.bf16.vlgmr.msra.gmra.mrb[0].mxu1 %v3166_v4  ;;  %v3262_v4 = vld [vmem:[%s4372_s4 + $0x3f0] ss:$8 sps:$4 sm:$0xff]  }
  0x47   : > { %1770 = vmatmul.mubr.bf16.vlgmr.msra.gmra.mrb[0].mxu0 %v3172_v6  ;;  %860 = vmatpush1.bf16.msra.mxu1 %v3169_v5  ;;  %v3265_v5 = vld [vmem:[%s4372_s4 + $0x5f0] ss:$8 sps:$4 sm:$0xff]   ;;  %v3273_v6 = vld [vmem:[%s4372_s4 + $0x4] ss:$8 sps:$4 sm:$0xff]  }
  0x48   : > { %1781 = vmatpush1.bf16.msra.mxu0 %v3175_v7  ;;  %861 = vmatprep.subr.bf16.mxu1 %v3180_v8  ;;  %v3279_v7 = vld [vmem:[%s4372_s4 + $0x604] ss:$8 sps:$4 sm:$0xff]   ;;  %v3268_v8 = vld [vmem:[%s3680_s7 + $0x8] ss:$16 sps:$4 sm:$0xff]  }
  0x49   : > { %1782 = vmatprep.subr.bf16.mxu0 %v3183_v9  ;;  %891 = vmatprep.mubr.bf16.mxu1 %v3270_v34  ;;  %v3271_v9 = vld [vmem:[%s4372_s4] ss:$8 sps:$4 sm:$0xff]   ;;  %v3312_v34 = vld [vmem:[%s4372_s4 + $0x64] ss:$8 sps:$4 sm:$0xff]  }
  0x4a   : > { %1812 = vmatprep.mubr.bf16.mxu0 %v3276_v37  ;;  %v3313_v37 = vld [vmem:[%s4372_s4 + $0x660] ss:$8 sps:$4 sm:$0xff]  }
  0x4b   : > { %862 = vmatpush1.bf16.msra.mxu1 %v3178_v10  ;;  %v3274_v10 = vld [vmem:[%s3698_s18 + $0x8] ss:$16 sps:$4 sm:$0xff]  }
  0x4c   : > { %1783 = vmatpush1.bf16.msra.mxu0 %v3181_v11  ;;  %863 = vmatprep.subr.bf16.mxu1 %v3186_v12  ;;  %v3277_v11 = vld [vmem:[%s4372_s4 + $0x600] ss:$8 sps:$4 sm:$0xff]   ;;  %v3282_v12 = vld [vmem:[%s4372_s4 + $0x14] ss:$8 sps:$4 sm:$0xff]  }
  0x4d   : > { %1784 = vmatprep.subr.bf16.mxu0 %v3189_v13  ;;  %v3285_v13 = vld [vmem:[%s4372_s4 + $0x614] ss:$8 sps:$4 sm:$0xff]  }
  0x4f   : > { %864 = vmatpush1.bf16.msra.mxu1 %v3184_v14  ;;  %v3280_v14 = vld [vmem:[%s4372_s4 + $0x10] ss:$8 sps:$4 sm:$0xff]  }
  0x50   : > { %1785 = vmatpush1.bf16.msra.mxu0 %v3187_v15  ;;  %865 = vmatprep.subr.bf16.mxu1 %v3192_v16  ;;  %v3283_v15 = vld [vmem:[%s4372_s4 + $0x610] ss:$8 sps:$4 sm:$0xff]   ;;  %v3288_v16 = vld [vmem:[%s4372_s4 + $0x24] ss:$8 sps:$4 sm:$0xff]  }
  0x51   : > { %1786 = vmatprep.subr.bf16.mxu0 %v3195_v17  ;;  %v3291_v17 = vld [vmem:[%s4372_s4 + $0x624] ss:$8 sps:$4 sm:$0xff]  }
  0x53   : > { %866 = vmatpush1.bf16.msra.mxu1 %v3190_v18  ;;  %v3286_v18 = vld [vmem:[%s4372_s4 + $0x20] ss:$8 sps:$4 sm:$0xff]  }
  0x54   : > { %1787 = vmatpush1.bf16.msra.mxu0 %v3193_v19  ;;  %867 = vmatprep.subr.bf16.mxu1 %v3198_v20  ;;  %v3372_v19 = vld [vmem:[%s3970_s14 + $0x4] ss:$16 sps:$4 sm:$0xff]   ;;  %v3289_v20 = vld [vmem:[%s4372_s4 + $0x620] ss:$8 sps:$4 sm:$0xff]  }
  0x55   : > { %1788 = vmatprep.subr.bf16.mxu0 %v3201_v21  ;;  %v3294_v21 = vld [vmem:[%s4372_s4 + $0x34] ss:$8 sps:$4 sm:$0xff]  }
  0x57   : > { %868 = vmatpush1.bf16.msra.mxu1 %v3196_v22  ;;  %v3297_v22 = vld [vmem:[%s4372_s4 + $0x634] ss:$8 sps:$4 sm:$0xff]  }
  0x58   : > { %1789 = vmatpush1.bf16.msra.mxu0 %v3199_v23  ;;  %869 = vmatprep.subr.bf16.mxu1 %v3204_v24  ;;  %v3378_v23 = vld [vmem:[%s3989_s28 + $0x4] ss:$16 sps:$4 sm:$0xff]   ;;  %v3292_v24 = vld [vmem:[%s4372_s4 + $0x30] ss:$8 sps:$4 sm:$0xff]  }
  0x59   : > { %1790 = vmatprep.subr.bf16.mxu0 %v3207_v25  ;;  %v3295_v25 = vld [vmem:[%s4372_s4 + $0x630] ss:$8 sps:$4 sm:$0xff]  }
  0x5b   : > { %870 = vmatpush1.bf16.msra.mxu1 %v3202_v26  ;;  %v3300_v26 = vld [vmem:[%s4372_s4 + $0x44] ss:$8 sps:$4 sm:$0xff]  }
  0x5c   : > { %1791 = vmatpush1.bf16.msra.mxu0 %v3205_v27  ;;  %871 = vmatprep.subr.bf16.mxu1 %v3210_v28  ;;  %v3303_v27 = vld [vmem:[%s4372_s4 + $0x644] ss:$8 sps:$4 sm:$0xff]   ;;  %v3298_v28 = vld [vmem:[%s4372_s4 + $0x40] ss:$8 sps:$4 sm:$0xff]  }
  0x5d   : > { %1792 = vmatprep.subr.bf16.mxu0 %v3213_v29  ;;  %v3301_v29 = vld [vmem:[%s4372_s4 + $0x640] ss:$8 sps:$4 sm:$0xff]  }
  0x5f   : > { %872 = vmatpush1.bf16.msra.mxu1 %v3208_v30  ;;  %v3306_v30 = vld [vmem:[%s4372_s4 + $0x54] ss:$8 sps:$4 sm:$0xff]  }
  0x60   : > { %1793 = vmatpush1.bf16.msra.mxu0 %v3211_v31  ;;  %873 = vmatprep.subr.bf16.mxu1 %v3216_v32  ;;  %v3309_v31 = vld [vmem:[%s4372_s4 + $0x654] ss:$8 sps:$4 sm:$0xff]   ;;  %v3304_v32 = vld [vmem:[%s4372_s4 + $0x50] ss:$8 sps:$4 sm:$0xff]  }
  0x61   : > { %1794 = vmatprep.subr.bf16.mxu0 %v3219_v33  ;;  %v3307_v33 = vld [vmem:[%s4372_s4 + $0x650] ss:$8 sps:$4 sm:$0xff]  }
  0x63   : > { %874 = vmatpush1.bf16.msra.mxu1 %v3214_v35  ;;  %v3315_v35 = vld [vmem:[%s4372_s4 + $0x664] ss:$8 sps:$4 sm:$0xff]  }
  0x64   : > { %1795 = vmatpush1.bf16.msra.mxu0 %v3217_v36  ;;  %875 = vmatprep.subr.bf16.mxu1 %v3222_v38  ;;  %v3310_v36 = vld [vmem:[%s4372_s4 + $0x60] ss:$8 sps:$4 sm:$0xff]   ;;  %v3318_v38 = vld [vmem:[%s4372_s4 + $0x74] ss:$8 sps:$4 sm:$0xff]  }
  0x65   : > { %1796 = vmatprep.subr.bf16.mxu0 %v3225_v39  ;;  %v3321_v39 = vld [vmem:[%s4372_s4 + $0x674] ss:$8 sps:$4 sm:$0xff]  }
  0x67   : > { %876 = vmatpush1.bf16.msra.mxu1 %v3220_v40  ;;  %v3316_v40 = vld [vmem:[%s4372_s4 + $0x70] ss:$8 sps:$4 sm:$0xff]  }
  0x68   : > { %1797 = vmatpush1.bf16.msra.mxu0 %v3223_v41  ;;  %877 = vmatprep.subr.bf16.mxu1 %v3228_v42  ;;  %v3319_v41 = vld [vmem:[%s4372_s4 + $0x670] ss:$8 sps:$4 sm:$0xff]   ;;  %v3324_v42 = vld [vmem:[%s4372_s4 + $0x84] ss:$8 sps:$4 sm:$0xff]  }
  0x69   : > { %1798 = vmatprep.subr.bf16.mxu0 %v3231_v43  ;;  %v3327_v43 = vld [vmem:[%s4372_s4 + $0x684] ss:$8 sps:$4 sm:$0xff]  }
  0x6b   : > { %878 = vmatpush1.bf16.msra.mxu1 %v3226_v44  ;;  %v3322_v44 = vld [vmem:[%s4372_s4 + $0x80] ss:$8 sps:$4 sm:$0xff]  }
  0x6c   : > { %1799 = vmatpush1.bf16.msra.mxu0 %v3229_v45  ;;  %879 = vmatprep.subr.bf16.mxu1 %v3234_v46  ;;  %v3325_v45 = vld [vmem:[%s4372_s4 + $0x680] ss:$8 sps:$4 sm:$0xff]   ;;  %v3330_v46 = vld [vmem:[%s4372_s4 + $0x94] ss:$8 sps:$4 sm:$0xff]  }
  0x6d   : > { %1800 = vmatprep.subr.bf16.mxu0 %v3237_v47  ;;  %v3333_v47 = vld [vmem:[%s4372_s4 + $0x694] ss:$8 sps:$4 sm:$0xff]  }
  0x6f   : > { %880 = vmatpush1.bf16.msra.mxu1 %v3232_v48  ;;  %v3328_v48 = vld [vmem:[%s4372_s4 + $0x90] ss:$8 sps:$4 sm:$0xff]  }
  0x70   : > { %1801 = vmatpush1.bf16.msra.mxu0 %v3235_v49  ;;  %881 = vmatprep.subr.bf16.mxu1 %v3240_v50  ;;  %v3331_v49 = vld [vmem:[%s4372_s4 + $0x690] ss:$8 sps:$4 sm:$0xff]   ;;  %v3336_v50 = vld [vmem:[%s4372_s4 + $0xa4] ss:$8 sps:$4 sm:$0xff]  }
  0x71   : > { %1802 = vmatprep.subr.bf16.mxu0 %v3243_v51  ;;  %v3339_v51 = vld [vmem:[%s4372_s4 + $0x6a4] ss:$8 sps:$4 sm:$0xff]  }
  0x73   : > { %882 = vmatpush1.bf16.msra.mxu1 %v3238_v52  ;;  %v3334_v52 = vld [vmem:[%s4372_s4 + $0xa0] ss:$8 sps:$4 sm:$0xff]  }
  0x74   : > { %1803 = vmatpush1.bf16.msra.mxu0 %v3241_v53  ;;  %883 = vmatprep.subr.bf16.mxu1 %v3246_v54  ;;  %v3337_v53 = vld [vmem:[%s4372_s4 + $0x6a0] ss:$8 sps:$4 sm:$0xff]   ;;  %v3342_v54 = vld [vmem:[%s4372_s4 + $0xb4] ss:$8 sps:$4 sm:$0xff]  }
  0x75   : > { %1804 = vmatprep.subr.bf16.mxu0 %v3249_v55  ;;  %v3345_v55 = vld [vmem:[%s4372_s4 + $0x6b4] ss:$8 sps:$4 sm:$0xff]  }
  0x77   : > { %884 = vmatpush1.bf16.msra.mxu1 %v3244_v56  ;;  %v3340_v56 = vld [vmem:[%s4372_s4 + $0xb0] ss:$8 sps:$4 sm:$0xff]  }
  0x78   : > { %1805 = vmatpush1.bf16.msra.mxu0 %v3247_v57  ;;  %885 = vmatprep.subr.bf16.mxu1 %v3252_v58  ;;  %v3343_v57 = vld [vmem:[%s4372_s4 + $0x6b0] ss:$8 sps:$4 sm:$0xff]   ;;  %v3348_v58 = vld [vmem:[%s4372_s4 + $0xc4] ss:$8 sps:$4 sm:$0xff]  }
  0x79   : > { %1806 = vmatprep.subr.bf16.mxu0 %v3255_v59  ;;  %v3351_v59 = vld [vmem:[%s4372_s4 + $0x6c4] ss:$8 sps:$4 sm:$0xff]  }
  0x7b   : > { %886 = vmatpush1.bf16.msra.mxu1 %v3250_v60  ;;  %v3346_v60 = vld [vmem:[%s4372_s4 + $0xc0] ss:$8 sps:$4 sm:$0xff]  }
  0x7c   : > { %1807 = vmatpush1.bf16.msra.mxu0 %v3253_v61  ;;  %887 = vmatprep.subr.bf16.mxu1 %v3258_v62  ;;  %v3349_v61 = vld [vmem:[%s4372_s4 + $0x6c0] ss:$8 sps:$4 sm:$0xff]   ;;  %v3354_v62 = vld [vmem:[%s4372_s4 + $0xd4] ss:$8 sps:$4 sm:$0xff]  }
  0x7d   : > { %1808 = vmatprep.subr.bf16.mxu0 %v3261_v63  ;;  %v3357_v63 = vld [vmem:[%s4372_s4 + $0x6d4] ss:$8 sps:$4 sm:$0xff]  }
  0x7f   : > { %888 = vmatpush1.bf16.msra.mxu1 %v3256_v0  ;;  %v3352_v0 = vld [vmem:[%s4372_s4 + $0xd0] ss:$8 sps:$4 sm:$0xff]  }
  0x80   : > { %1809 = vmatpush1.bf16.msra.mxu0 %v3259_v1  ;;  %889 = vmatprep.subr.bf16.mxu1 %v3264_v2  ;;  %v3355_v1 = vld [vmem:[%s4372_s4 + $0x6d0] ss:$8 sps:$4 sm:$0xff]   ;;  %v3360_v2 = vld [vmem:[%s4372_s4 + $0xe4] ss:$8 sps:$4 sm:$0xff]  }
  0x81   : > { %1810 = vmatprep.subr.bf16.mxu0 %v3267_v3  ;;  %v3363_v3 = vld [vmem:[%s4372_s4 + $0x6e4] ss:$8 sps:$4 sm:$0xff]  }
  0x83   : > { %890 = vmatpush1.bf16.msra.mxu1 %v3262_v4  ;;  %v3358_v4 = vld [vmem:[%s4372_s4 + $0xe0] ss:$8 sps:$4 sm:$0xff]  }
  0x84   : > { %1811 = vmatpush1.bf16.msra.mxu0 %v3265_v5  ;;  %1242 = vmatprep.subr.bf16.mxu1 %v3273_v6  ;;  %v3361_v5 = vld [vmem:[%s4372_s4 + $0x6e0] ss:$8 sps:$4 sm:$0xff]   ;;  %v3366_v6 = vld [vmem:[%s4372_s4 + $0xf4] ss:$8 sps:$4 sm:$0xff]  }
  0x85   : > { %2236 = vmatprep.subr.bf16.mxu0 %v3279_v7  ;;  %v3369_v7 = vld [vmem:[%s4372_s4 + $0x6f4] ss:$8 sps:$4 sm:$0xff]  }
  0x86   : > { %892 = vmatmul.mubr.bf16.vlgmr.msra.gmra.mrb[0].mxu1 %v3268_v8  ;;  %v3364_v8 = vld [vmem:[%s4372_s4 + $0xf0] ss:$8 sps:$4 sm:$0xff]  }
  0x87   : > { %1813 = vmatmul.mubr.bf16.vlgmr.msra.gmra.mrb[0].mxu0 %v3274_v10  ;;  %1243 = vmatpush1.bf16.msra.mxu1 %v3271_v9  ;;  %v3367_v9 = vld [vmem:[%s4372_s4 + $0x6f0] ss:$8 sps:$4 sm:$0xff]   ;;  %v3375_v10 = vld [vmem:[%s4372_s4 + $0x104] ss:$8 sps:$4 sm:$0xff]  }
  0x88   : > { %2237 = vmatpush1.bf16.msra.mxu0 %v3277_v11  ;;  %1244 = vmatprep.subr.bf16.mxu1 %v3282_v12  ;;  %v3381_v11 = vld [vmem:[%s4372_s4 + $0x704] ss:$8 sps:$4 sm:$0xff]   ;;  %v3370_v12 = vld [vmem:[%s3970_s14] ss:$16 sps:$4 sm:$0xff]  }
  0x89   : > { %2238 = vmatprep.subr.bf16.mxu0 %v3285_v13  ;;  %1274 = vmatprep.mubr.bf16.mxu1 %v3372_v19  ;;  %v3376_v13 = vld [vmem:[%s3989_s28] ss:$16 sps:$4 sm:$0xff]   ;;  %v3477_v19 = vld [vmem:[%s3989_s28 + $0xc] ss:$16 sps:$4 sm:$0xff]  }
  0x8a   : > { %2268 = vmatprep.mubr.bf16.mxu0 %v3378_v23  ;;  %v3393_v23 = vld [vmem:[%s4372_s4 + $0x724] ss:$8 sps:$4 sm:$0xff]  }
  0x8b   : > { %1245 = vmatpush1.bf16.msra.mxu1 %v3280_v14  ;;  %v3373_v14 = vld [vmem:[%s4372_s4 + $0x100] ss:$8 sps:$4 sm:$0xff]  }
  0x8c   : > { %2239 = vmatpush1.bf16.msra.mxu0 %v3283_v15  ;;  %1246 = vmatprep.subr.bf16.mxu1 %v3288_v16  ;;  %v3379_v15 = vld [vmem:[%s4372_s4 + $0x700] ss:$8 sps:$4 sm:$0xff]   ;;  %v3384_v16 = vld [vmem:[%s4372_s4 + $0x114] ss:$8 sps:$4 sm:$0xff]  }
  0x8d   : > { %2240 = vmatprep.subr.bf16.mxu0 %v3291_v17  ;;  %v3387_v17 = vld [vmem:[%s4372_s4 + $0x714] ss:$8 sps:$4 sm:$0xff]  }
  0x8f   : > { %1247 = vmatpush1.bf16.msra.mxu1 %v3286_v18  ;;  %v3474_v18 = vld [vmem:[%s3970_s14 + $0xc] ss:$16 sps:$4 sm:$0xff]  }
  0x90   : > { %2241 = vmatpush1.bf16.msra.mxu0 %v3289_v20  ;;  %1248 = vmatprep.subr.bf16.mxu1 %v3294_v21  ;;  %v3382_v20 = vld [vmem:[%s4372_s4 + $0x110] ss:$8 sps:$4 sm:$0xff]  }
  0x91   : > { %2242 = vmatprep.subr.bf16.mxu0 %v3297_v22  ;;  %v3385_v21 = vld [vmem:[%s4372_s4 + $0x710] ss:$8 sps:$4 sm:$0xff]   ;;  %v3390_v22 = vld [vmem:[%s4372_s4 + $0x124] ss:$8 sps:$4 sm:$0xff]  }
  0x93   : > { %1249 = vmatpush1.bf16.msra.mxu1 %v3292_v24  ;;  %v3388_v24 = vld [vmem:[%s4372_s4 + $0x120] ss:$8 sps:$4 sm:$0xff]  }
  0x94   : > { %2243 = vmatpush1.bf16.msra.mxu0 %v3295_v25  ;;  %1250 = vmatprep.subr.bf16.mxu1 %v3300_v26  ;;  %v3391_v25 = vld [vmem:[%s4372_s4 + $0x720] ss:$8 sps:$4 sm:$0xff]   ;;  %v3396_v26 = vld [vmem:[%s4372_s4 + $0x134] ss:$8 sps:$4 sm:$0xff]  }
  0x95   : > { %2244 = vmatprep.subr.bf16.mxu0 %v3303_v27  ;;  %v3399_v27 = vld [vmem:[%s4372_s4 + $0x734] ss:$8 sps:$4 sm:$0xff]  }
  0x97   : > { %1251 = vmatpush1.bf16.msra.mxu1 %v3298_v28  ;;  %v3394_v28 = vld [vmem:[%s4372_s4 + $0x130] ss:$8 sps:$4 sm:$0xff]  }
  0x98   : > { %2245 = vmatpush1.bf16.msra.mxu0 %v3301_v29  ;;  %1252 = vmatprep.subr.bf16.mxu1 %v3306_v30  ;;  %v3397_v29 = vld [vmem:[%s4372_s4 + $0x730] ss:$8 sps:$4 sm:$0xff]   ;;  %v3402_v30 = vld [vmem:[%s4372_s4 + $0x144] ss:$8 sps:$4 sm:$0xff]  }
  0x99   : > { %2246 = vmatprep.subr.bf16.mxu0 %v3309_v31  ;;  %v3405_v31 = vld [vmem:[%s4372_s4 + $0x744] ss:$8 sps:$4 sm:$0xff]  }
  0x9b   : > { %1253 = vmatpush1.bf16.msra.mxu1 %v3304_v32  ;;  %v3400_v32 = vld [vmem:[%s4372_s4 + $0x140] ss:$8 sps:$4 sm:$0xff]  }
  0x9c   : > { %2247 = vmatpush1.bf16.msra.mxu0 %v3307_v33  ;;  %1254 = vmatprep.subr.bf16.mxu1 %v3312_v34  ;;  %v3403_v33 = vld [vmem:[%s4372_s4 + $0x740] ss:$8 sps:$4 sm:$0xff]   ;;  %v3408_v34 = vld [vmem:[%s4372_s4 + $0x154] ss:$8 sps:$4 sm:$0xff]  }
  0x9d   : > { %2248 = vmatprep.subr.bf16.mxu0 %v3315_v35  ;;  %v3411_v35 = vld [vmem:[%s4372_s4 + $0x754] ss:$8 sps:$4 sm:$0xff]  }
  0x9f   : > { %1255 = vmatpush1.bf16.msra.mxu1 %v3310_v36  ;;  %v3406_v36 = vld [vmem:[%s4372_s4 + $0x150] ss:$8 sps:$4 sm:$0xff]  }
  0xa0   : > { %2249 = vmatpush1.bf16.msra.mxu0 %v3313_v37  ;;  %1256 = vmatprep.subr.bf16.mxu1 %v3318_v38  ;;  %v3409_v37 = vld [vmem:[%s4372_s4 + $0x750] ss:$8 sps:$4 sm:$0xff]   ;;  %v3414_v38 = vld [vmem:[%s4372_s4 + $0x164] ss:$8 sps:$4 sm:$0xff]  }
  0xa1   : > { %2250 = vmatprep.subr.bf16.mxu0 %v3321_v39  ;;  %v3417_v39 = vld [vmem:[%s4372_s4 + $0x764] ss:$8 sps:$4 sm:$0xff]  }
  0xa3   : > { %1257 = vmatpush1.bf16.msra.mxu1 %v3316_v40  ;;  %v3412_v40 = vld [vmem:[%s4372_s4 + $0x160] ss:$8 sps:$4 sm:$0xff]  }
  0xa4   : > { %2251 = vmatpush1.bf16.msra.mxu0 %v3319_v41  ;;  %1258 = vmatprep.subr.bf16.mxu1 %v3324_v42  ;;  %v3415_v41 = vld [vmem:[%s4372_s4 + $0x760] ss:$8 sps:$4 sm:$0xff]   ;;  %v3420_v42 = vld [vmem:[%s4372_s4 + $0x174] ss:$8 sps:$4 sm:$0xff]  }
  0xa5   : > { %2252 = vmatprep.subr.bf16.mxu0 %v3327_v43  ;;  %v3423_v43 = vld [vmem:[%s4372_s4 + $0x774] ss:$8 sps:$4 sm:$0xff]  }
  0xa7   : > { %1259 = vmatpush1.bf16.msra.mxu1 %v3322_v44  ;;  %v3418_v44 = vld [vmem:[%s4372_s4 + $0x170] ss:$8 sps:$4 sm:$0xff]  }
  0xa8   : > { %2253 = vmatpush1.bf16.msra.mxu0 %v3325_v45  ;;  %1260 = vmatprep.subr.bf16.mxu1 %v3330_v46  ;;  %v3421_v45 = vld [vmem:[%s4372_s4 + $0x770] ss:$8 sps:$4 sm:$0xff]   ;;  %v3426_v46 = vld [vmem:[%s4372_s4 + $0x184] ss:$8 sps:$4 sm:$0xff]  }
  0xa9   : > { %2254 = vmatprep.subr.bf16.mxu0 %v3333_v47  ;;  %v3429_v47 = vld [vmem:[%s4372_s4 + $0x784] ss:$8 sps:$4 sm:$0xff]  }
  0xab   : > { %1261 = vmatpush1.bf16.msra.mxu1 %v3328_v48  ;;  %v3424_v48 = vld [vmem:[%s4372_s4 + $0x180] ss:$8 sps:$4 sm:$0xff]  }
  0xac   : > { %2255 = vmatpush1.bf16.msra.mxu0 %v3331_v49  ;;  %1262 = vmatprep.subr.bf16.mxu1 %v3336_v50  ;;  %v3427_v49 = vld [vmem:[%s4372_s4 + $0x780] ss:$8 sps:$4 sm:$0xff]   ;;  %v3432_v50 = vld [vmem:[%s4372_s4 + $0x194] ss:$8 sps:$4 sm:$0xff]  }
  0xad   : > { %2256 = vmatprep.subr.bf16.mxu0 %v3339_v51  ;;  %v3435_v51 = vld [vmem:[%s4372_s4 + $0x794] ss:$8 sps:$4 sm:$0xff]  }
  0xaf   : > { %1263 = vmatpush1.bf16.msra.mxu1 %v3334_v52  ;;  %v3430_v52 = vld [vmem:[%s4372_s4 + $0x190] ss:$8 sps:$4 sm:$0xff]  }
  0xb0   : > { %2257 = vmatpush1.bf16.msra.mxu0 %v3337_v53  ;;  %1264 = vmatprep.subr.bf16.mxu1 %v3342_v54  ;;  %v3433_v53 = vld [vmem:[%s4372_s4 + $0x790] ss:$8 sps:$4 sm:$0xff]   ;;  %v3438_v54 = vld [vmem:[%s4372_s4 + $0x1a4] ss:$8 sps:$4 sm:$0xff]  }
  0xb1   : > { %2258 = vmatprep.subr.bf16.mxu0 %v3345_v55  ;;  %v3441_v55 = vld [vmem:[%s4372_s4 + $0x7a4] ss:$8 sps:$4 sm:$0xff]  }
  0xb3   : > { %1265 = vmatpush1.bf16.msra.mxu1 %v3340_v56  ;;  %v3436_v56 = vld [vmem:[%s4372_s4 + $0x1a0] ss:$8 sps:$4 sm:$0xff]  }
  0xb4   : > { %2259 = vmatpush1.bf16.msra.mxu0 %v3343_v57  ;;  %1266 = vmatprep.subr.bf16.mxu1 %v3348_v58  ;;  %v3439_v57 = vld [vmem:[%s4372_s4 + $0x7a0] ss:$8 sps:$4 sm:$0xff]   ;;  %v3444_v58 = vld [vmem:[%s4372_s4 + $0x1b4] ss:$8 sps:$4 sm:$0xff]  }
  0xb5   : > { %2260 = vmatprep.subr.bf16.mxu0 %v3351_v59  ;;  %v3447_v59 = vld [vmem:[%s4372_s4 + $0x7b4] ss:$8 sps:$4 sm:$0xff]  }
  0xb7   : > { %1267 = vmatpush1.bf16.msra.mxu1 %v3346_v60  ;;  %v3442_v60 = vld [vmem:[%s4372_s4 + $0x1b0] ss:$8 sps:$4 sm:$0xff]  }
  0xb8   : > { %2261 = vmatpush1.bf16.msra.mxu0 %v3349_v61  ;;  %1268 = vmatprep.subr.bf16.mxu1 %v3354_v62  ;;  %v3445_v61 = vld [vmem:[%s4372_s4 + $0x7b0] ss:$8 sps:$4 sm:$0xff]   ;;  %v3450_v62 = vld [vmem:[%s4372_s4 + $0x1c4] ss:$8 sps:$4 sm:$0xff]  }
  0xb9   : > { %2262 = vmatprep.subr.bf16.mxu0 %v3357_v63  ;;  %v3453_v63 = vld [vmem:[%s4372_s4 + $0x7c4] ss:$8 sps:$4 sm:$0xff]  }
  0xbb   : > { %1269 = vmatpush1.bf16.msra.mxu1 %v3352_v0  ;;  %v3448_v0 = vld [vmem:[%s4372_s4 + $0x1c0] ss:$8 sps:$4 sm:$0xff]  }
  0xbc   : > { %2263 = vmatpush1.bf16.msra.mxu0 %v3355_v1  ;;  %1270 = vmatprep.subr.bf16.mxu1 %v3360_v2  ;;  %v3451_v1 = vld [vmem:[%s4372_s4 + $0x7c0] ss:$8 sps:$4 sm:$0xff]   ;;  %v3456_v2 = vld [vmem:[%s4372_s4 + $0x1d4] ss:$8 sps:$4 sm:$0xff]  }
  0xbd   : > { %2264 = vmatprep.subr.bf16.mxu0 %v3363_v3  ;;  %v3459_v3 = vld [vmem:[%s4372_s4 + $0x7d4] ss:$8 sps:$4 sm:$0xff]  }
  0xbf   : > { %1271 = vmatpush1.bf16.msra.mxu1 %v3358_v4  ;;  %v3454_v4 = vld [vmem:[%s4372_s4 + $0x1d0] ss:$8 sps:$4 sm:$0xff]  }
  0xc0   : > { %2265 = vmatpush1.bf16.msra.mxu0 %v3361_v5  ;;  %1272 = vmatprep.subr.bf16.mxu1 %v3366_v6  ;;  %v3457_v5 = vld [vmem:[%s4372_s4 + $0x7d0] ss:$8 sps:$4 sm:$0xff]   ;;  %v3462_v6 = vld [vmem:[%s4372_s4 + $0x1e4] ss:$8 sps:$4 sm:$0xff]  }
  0xc1   : > { %2266 = vmatprep.subr.bf16.mxu0 %v3369_v7  ;;  %v3465_v7 = vld [vmem:[%s4372_s4 + $0x7e4] ss:$8 sps:$4 sm:$0xff]  }
  0xc3   : > { %1273 = vmatpush1.bf16.msra.mxu1 %v3364_v8  ;;  %v3460_v8 = vld [vmem:[%s4372_s4 + $0x1e0] ss:$8 sps:$4 sm:$0xff]  }
  0xc4   : > { %2267 = vmatpush1.bf16.msra.mxu0 %v3367_v9  ;;  %1285 = vmatprep.subr.bf16.mxu1 %v3375_v10  ;;  %v3463_v9 = vld [vmem:[%s4372_s4 + $0x7e0] ss:$8 sps:$4 sm:$0xff]   ;;  %v3468_v10 = vld [vmem:[%s4372_s4 + $0x1f4] ss:$8 sps:$4 sm:$0xff]  }
  0xc5   : > { %2279 = vmatprep.subr.bf16.mxu0 %v3381_v11  ;;  %v3471_v11 = vld [vmem:[%s4372_s4 + $0x7f4] ss:$8 sps:$4 sm:$0xff]  }
  0xc6   : > { %1275 = vmatmul.mubr.bf16.vlgmr.msra.gmra.mrb[0].mxu1 %v3370_v12  ;;  %v3466_v12 = vld [vmem:[%s4372_s4 + $0x1f0] ss:$8 sps:$4 sm:$0xff]  }
  0xc7   : > { %2269 = vmatmul.mubr.bf16.vlgmr.msra.gmra.mrb[0].mxu0 %v3376_v13  ;;  %1286 = vmatpush1.bf16.msra.mxu1 %v3373_v14  ;;  %v3469_v13 = vld [vmem:[%s4372_s4 + $0x7f0] ss:$8 sps:$4 sm:$0xff]  }
  0xc8   : > { %2280 = vmatpush1.bf16.msra.mxu0 %v3379_v15  ;;  %1287 = vmatprep.subr.bf16.mxu1 %v3384_v16  ;;  %v3472_v14 = vld [vmem:[%s3970_s14 + $0x8] ss:$16 sps:$4 sm:$0xff]  }
  0xc9   : > { %2281 = vmatprep.subr.bf16.mxu0 %v3387_v17  ;;  %1317 = vmatprep.mubr.bf16.mxu1 %v3474_v18  ;;  %v3475_v15 = vld [vmem:[%s3989_s28 + $0x8] ss:$16 sps:$4 sm:$0xff]   ;;  %s333_s28 = scalar_lea.vmem %s4373_s5, %s3029_s19 }
  0xca   : > { %2311 = vmatprep.mubr.bf16.mxu0 %v3477_v19 }
  0xcb   : > { %1288 = vmatpush1.bf16.msra.mxu1 %v3382_v20 }
  0xcc   : > { %2282 = vmatpush1.bf16.msra.mxu0 %v3385_v21  ;;  %1289 = vmatprep.subr.bf16.mxu1 %v3390_v22 }
  0xcd   : > { %2283 = vmatprep.subr.bf16.mxu0 %v3393_v23 }
  0xcf   : > { %1290 = vmatpush1.bf16.msra.mxu1 %v3388_v24 }
  0xd0   : > { %2284 = vmatpush1.bf16.msra.mxu0 %v3391_v25  ;;  %1291 = vmatprep.subr.bf16.mxu1 %v3396_v26 }
  0xd1   : > { %2285 = vmatprep.subr.bf16.mxu0 %v3399_v27 }
  0xd3   : > { %1292 = vmatpush1.bf16.msra.mxu1 %v3394_v28 }
  0xd4   : > { %2286 = vmatpush1.bf16.msra.mxu0 %v3397_v29  ;;  %1293 = vmatprep.subr.bf16.mxu1 %v3402_v30 }
  0xd5   : > { %2287 = vmatprep.subr.bf16.mxu0 %v3405_v31 }
  0xd7   : > { %1294 = vmatpush1.bf16.msra.mxu1 %v3400_v32 }
  0xd8   : > { %2288 = vmatpush1.bf16.msra.mxu0 %v3403_v33  ;;  %1295 = vmatprep.subr.bf16.mxu1 %v3408_v34 }
  0xd9   : > { %2289 = vmatprep.subr.bf16.mxu0 %v3411_v35 }
  0xdb   : > { %1296 = vmatpush1.bf16.msra.mxu1 %v3406_v36 }
  0xdc   : > { %2290 = vmatpush1.bf16.msra.mxu0 %v3409_v37  ;;  %1297 = vmatprep.subr.bf16.mxu1 %v3414_v38 }
  0xdd   : > { %2291 = vmatprep.subr.bf16.mxu0 %v3417_v39 }
  0xdf   : > { %1298 = vmatpush1.bf16.msra.mxu1 %v3412_v40 }
  0xe0   : > { %2292 = vmatpush1.bf16.msra.mxu0 %v3415_v41  ;;  %1299 = vmatprep.subr.bf16.mxu1 %v3420_v42 }
  0xe1   : > { %2293 = vmatprep.subr.bf16.mxu0 %v3423_v43  ;;  %v3486_v43 = vmov 1966171168  }
  0xe3   : > { %1300 = vmatpush1.bf16.msra.mxu1 %v3418_v44  ;;  %v2358_v44 = vunpack.c.l.s4 %v3486_v43 }
  0xe4   : > { %2294 = vmatpush1.bf16.msra.mxu0 %v3421_v45  ;;  %1301 = vmatprep.subr.bf16.mxu1 %v3426_v46  ;;  %v2360_v45 = vlaneseq }
  0xe5   : > { %2295 = vmatprep.subr.bf16.mxu0 %v3429_v47 }
  0xe6   : > { %vm2374_vm0 = vcmp.lt.s32.totalorder %v2360_v45, 256 }
  0xe7   : > { %1302 = vmatpush1.bf16.msra.mxu1 %v3424_v48 }
  0xe8   : > { %2296 = vmatpush1.bf16.msra.mxu0 %v3427_v49  ;;  %1303 = vmatprep.subr.bf16.mxu1 %v3432_v50 }
  0xe9   : > { %2297 = vmatprep.subr.bf16.mxu0 %v3435_v51 }
  0xeb   : > { %1304 = vmatpush1.bf16.msra.mxu1 %v3430_v52 }
  0xec   : > { %2298 = vmatpush1.bf16.msra.mxu0 %v3433_v53  ;;  %1305 = vmatprep.subr.bf16.mxu1 %v3438_v54  ;;  %v2359_v54 = vunpack.c.0.s8 %v2358_v44 }
  0xed   : > { %2299 = vmatprep.subr.bf16.mxu0 %v3441_v55  ;;  %v2361_v55 = vshrl.u32 %v2360_v45, 7 }
  0xef   : > { %1306 = vmatpush1.bf16.msra.mxu1 %v3436_v56 }
  0xf0   : > { %2300 = vmatpush1.bf16.msra.mxu0 %v3439_v57  ;;  %1307 = vmatprep.subr.bf16.mxu1 %v3444_v58 }
  0xf1   : > { %2301 = vmatprep.subr.bf16.mxu0 %v3447_v59 }
  0xf3   : > { %1308 = vmatpush1.bf16.msra.mxu1 %v3442_v60 }
  0xf4   : > { %2302 = vmatpush1.bf16.msra.mxu0 %v3445_v61  ;;  %1309 = vmatprep.subr.bf16.mxu1 %v3450_v62 }
  0xf5   : > { %2303 = vmatprep.subr.bf16.mxu0 %v3453_v63 }
  0xf7   : > { %1310 = vmatpush1.bf16.msra.mxu1 %v3448_v0  ;;  %v2362_v0 = vsub.s32 %v2359_v54, %v2361_v55 }
  0xf8   : > { %2304 = vmatpush1.bf16.msra.mxu0 %v3451_v1  ;;  %1311 = vmatprep.subr.bf16.mxu1 %v3456_v2 }
  0xf9   : > { %2305 = vmatprep.subr.bf16.mxu0 %v3459_v3 }
  0xfb   : > { %1312 = vmatpush1.bf16.msra.mxu1 %v3454_v4 }
  0xfc   : > { %2306 = vmatpush1.bf16.msra.mxu0 %v3457_v5  ;;  %1313 = vmatprep.subr.bf16.mxu1 %v3462_v6 }
  0xfd   : > { %2307 = vmatprep.subr.bf16.mxu0 %v3465_v7 }
  0xff   : > { %1314 = vmatpush1.bf16.msra.mxu1 %v3460_v8 }
 0x100   : > { %2308 = vmatpush1.bf16.msra.mxu0 %v3463_v9  ;;  %1315 = vmatprep.subr.bf16.mxu1 %v3468_v10 }
 0x101   : > { %2309 = vmatprep.subr.bf16.mxu0 %v3471_v11 }
 0x103   : > { %1316 = vmatpush1.bf16.msra.mxu1 %v3466_v12 }
 0x104   : > { %2310 = vmatpush1.bf16.msra.mxu0 %v3469_v13 }
 0x106   : > { %1318 = vmatmul.mubr.bf16.vlgmr.msra.gmra.mrb[0].mxu1 %v3472_v14 }
 0x107   : > { %2312 = vmatmul.mubr.bf16.vlgmr.msra.gmra.mrb[0].mxu0 %v3475_v15 }
 0x1d9   : > { %v1319_v16 = vpop.f32.mrb[0].mxu1 }
 0x1da   : > { %v2313_v17 = vpop.f32.mrb[0].mxu0  ;;  %v1321_v19 = vpop.f32.mrb[1].mxu1 }
 0x1db   : > { %v3033_v18 = vadd.f32 %v2313_v17, %v1319_v16  ;;  %v2315_v20 = vpop.f32.mrb[1].mxu0  ;;  %v1323_v22 = vpop.f32.mrb[2].mxu1 }
 0x1dc   : > { %v3034_v21 = vadd.f32 %v2315_v20, %v1321_v19  ;;  %v2317_v23 = vpop.f32.mrb[2].mxu0  ;;  %v1325_v25 = vpop.f32.mrb[3].mxu1 }
 0x1dd   : > { %v3035_v24 = vadd.f32 %v2317_v23, %v1323_v22  ;;  %v2319_v26 = vpop.f32.mrb[3].mxu0  ;;  %v2377_v29 = vmul.f32 %v3033_v18, %v3033_v18 }
 0x1de   : > { %v3031_v27 = vpack.c.bf16 %v3034_v21, %v3033_v18  ;;  %v3036_v28 = vadd.f32 %v2319_v26, %v1325_v25  ;;  %v2378_v32 = vmul.f32 %v3034_v21, %v3034_v21 }
 0x1df   : > { %v2340_v30 = vadd.f32 %v3035_v24, %v3033_v18  ;;  %v2379_v31 = vmul.f32 %v3035_v24, %v3035_v24 }
 0x1e0   : > { %2338 = vst [vmem:[%s333_s28] sm:$0xff] %v3031_v27  ;;  %v3032_v33 = vpack.c.bf16 %v3036_v28, %v3035_v24  ;;  %v2347_v34 = vadd.f32 %v3036_v28, %v3034_v21  ;;  %v2380_v35 = vmul.f32 %v3036_v28, %v3036_v28 }
 0x1e1   : > { %v2341_v36 = vrot.slane %v2340_v30, 4  ;;  %v2381_v37 = vadd.f32 %v2379_v31, %v2377_v29 }
 0x1e2   : > { %2339 = vst [vmem:[%s333_s28 + $0x8] sm:$0xff] %v3032_v33  ;;  %v2348_v38 = vrot.slane %v2347_v34, 4  ;;  %v2388_v39 = vadd.f32 %v2380_v35, %v2378_v32 }
 0x1e3   : > { %v2342_v40 = vadd.f32 %v2341_v36, %v2340_v30  ;;  %v2382_v41 = vrot.slane %v2381_v37, 4 }
 0x1e4   : > { %v2349_v42 = vadd.f32 %v2348_v38, %v2347_v34  ;;  %v2389_v46 = vrot.slane %v2388_v39, 4 }
 0x1e5   : > { %v2343_v47 = vrot.slane %v2342_v40, 2  ;;  %v2383_v48 = vadd.f32 %v2382_v41, %v2381_v37 }
 0x1e6   : > { %v2350_v49 = vrot.slane %v2349_v42, 2  ;;  %v2390_v50 = vadd.f32 %v2389_v46, %v2388_v39 }
 0x1e7   : > { %v2344_v51 = vadd.f32 %v2343_v47, %v2342_v40  ;;  %v2384_v52 = vrot.slane %v2383_v48, 2 }
 0x1e8   : > { %v2351_v53 = vadd.f32 %v2350_v49, %v2349_v42  ;;  %v2391_v56 = vrot.slane %v2390_v50, 2 }
 0x1e9   : > { %v2345_v57 = vrot.slane %v2344_v51, 1  ;;  %v2385_v58 = vadd.f32 %v2384_v52, %v2383_v48 }
 0x1ea   : > { %v2352_v59 = vrot.slane %v2351_v53, 1  ;;  %v2392_v60 = vadd.f32 %v2391_v56, %v2390_v50 }
 0x1eb   : > { %v2346_v61 = vadd.f32 %v2345_v57, %v2344_v51  ;;  %v2386_v62 = vrot.slane %v2385_v58, 1 }
 0x1ec   : > { %v2353_v63 = vadd.f32 %v2352_v59, %v2351_v53  ;;  %v2393_v1 = vrot.slane %v2392_v60, 1 }
 0x1ed   : > { %v2387_v2 = vadd.f32 %v2386_v62, %v2385_v58 }
 0x1ee   : > { %v2356_v3 = vcombine.low %v2346_v61, %v2353_v63  ;;  %v2394_v4 = vadd.f32 %v2393_v1, %v2392_v60 }
 0x1f0   : > { %v2363_v5 = vrot.slane %v2356_v3, %v2362_v0  ;;  %v2397_v6 = vcombine.low %v2387_v2, %v2394_v4 }
 0x1f2   : > { %v2370_v7 = vrot.slane %v2363_v5, %v2362_v0  ;;  %v2404_v8 = vrot.slane %v2397_v6, %v2362_v0 }
 0x1f4   : > { %2376 = vst.msk [vmem:[%s338_s30] ss:$2 sm:$0x3] %vm2374_vm0, %v2370_v7  ;;  %v2411_v9 = vrot.slane %v2404_v8, %v2362_v0 }
 0x1f6   : > { %3022 = vst.msk [vmem:[%s338_s30 + $0x1] ss:$2 sm:$0x3] %vm2374_vm0, %v2411_v9 }
 0x1f7 PF: > { %s17_s21 = sadd.s32 1, %s3484_s21  }
 0x1f8   : > { %p14_p6 = scmp.ge.s32.totalorder %s17_s21, 10  }
 0x1fa   :  { %16 = sbr.rel (!%p14_p6) target bundleno = 1 (0x1), region = 95 }

// kernel: discriminator_forward.11
= control target key start
LH: loop header
LB: loop body
LE: loop exit
PB: predicated region body
PF: predicated region fallthrough
CT: control target
= control target key end

     0   :  { %s420_s12 = smov 0   ;;  %s450_s0 = inlined_call_operand.vmem [shape: bf16[32,512], index: 0, kind: input, shape index: {}]   ;;  %s451_s1 = inlined_call_operand.vmem [shape: f32[1,512], index: 1, kind: input, shape index: {}]   ;;  %s452_s2 = inlined_call_operand.vmem [shape: f32[1,512], index: 2, kind: input, shape index: {}]   ;;  %s453_s3 = inlined_call_operand.vmem [shape: bf16[32,512], index: 3, kind: output, shape index: {}]  }
   0x1 LB: > { %s361_s13 = sadd.s32 4294967295, %s398_s12   ;;  %p365_p0 = scmp.ge.s32.totalorder %s398_s12, 1  ;;  %s398_s12 = sphi %s420_s12, %s13_s12  }
   0x2   : > { %p139_p1 = scmp.lt.s32.totalorder %s398_s12, 3 }
   0x4   : > { %p140_p2 = pnand %p365_p0, %p139_p1 }
   0x5   : > { %s366_s14 = sshll.u32 (!%p140_p2), %s361_s13, 1  ;;  %v193_v0 = vlaneseq (!%p140_p2)  ;;  %v191_v2 = vld [vmem:[%s451_s1] sm:$0xf] (!%p140_p2) }
   0x6   : > { %143 = sbr.rel (%p140_p2) target bundleno = 34 (0x22), region = 32  ;;  %p166_p3 = scmp.lt.s32.totalorder (!%p140_p2), %s366_s14, 3  ;;  %v221_v3 = vld [vmem:[%s452_s2] sm:$0xf] (!%p140_p2) }
   0x7   : > { %v194_v1 = vshrl.u32 (!%p140_p2), %v193_v0, 7 }
   0x9   : > { %v195_v4 = vsub.s32 (!%p140_p2), 0, %v194_v1  ;;  %v199_v5 = vsub.s32 (!%p140_p2), 1, %v194_v1  ;;  %v203_v6 = vsub.s32 (!%p140_p2), 2, %v194_v1  ;;  %v207_v7 = vsub.s32 (!%p140_p2), 3, %v194_v1 }
   0xb   : > { %v196_v8 = vrot.slane (!%p140_p2), %v191_v2, %v195_v4  ;;  %v200_v9 = vrot.slane (!%p140_p2), %v191_v2, %v199_v5  ;;  %v226_v10 = vrot.slane (!%p140_p2), %v221_v3, %v195_v4  ;;  %v230_v11 = vrot.slane (!%p140_p2), %v221_v3, %v199_v5 }
   0xc   : > { %v204_v15 = vrot.slane (!%p140_p2), %v191_v2, %v203_v6  ;;  %v208_v16 = vrot.slane (!%p140_p2), %v191_v2, %v207_v7  ;;  %v234_v17 = vrot.slane (!%p140_p2), %v221_v3, %v203_v6  ;;  %v238_v18 = vrot.slane (!%p140_p2), %v221_v3, %v207_v7 }
   0xd   : > { %s455_s14 = smov (!%p166_p3, %s366_s14), 3 }
   0xe   : > { %s378_s19 = sshll.u32 %s455_s14, 4 }
   0xf   : > { %s170_s22 = scalar_lea.vmem %s450_s0, %s378_s19  ;;  %s177_s25 = scalar_lea.vmem %s453_s3, %s378_s19 }
  0x10   : > { %v179_v12 = vld [vmem:[%s170_s22] sm:$0xff]  ;;  %v180_v13 = vld [vmem:[%s170_s22 + $0x8] sm:$0xff]  ;;  %v181_v14 = vld [vmem:[%s170_s22 + $0x10] sm:$0xff] }
  0x11   : > { %v182_v19 = vld [vmem:[%s170_s22 + $0x18] sm:$0xff]  ;;  %v183_v20 = vunpack.c.l.bf16 %v179_v12  ;;  %v184_v21 = vunpack.c.h.bf16 %v179_v12  ;;  %v185_v22 = vunpack.c.l.bf16 %v180_v13  ;;  %v186_v23 = vunpack.c.h.bf16 %v180_v13 }
  0x12   : > { %v187_v24 = vunpack.c.l.bf16 %v181_v14  ;;  %v188_v25 = vunpack.c.h.bf16 %v181_v14  ;;  %v189_v26 = vunpack.c.l.bf16 %v182_v19  ;;  %v190_v27 = vunpack.c.h.bf16 %v182_v19 }
  0x13   : > { %v213_v28 = vmul.f32 %v196_v8, %v183_v20  ;;  %v214_v29 = vmul.f32 %v200_v9, %v184_v21  ;;  %v215_v30 = vmul.f32 %v204_v15, %v185_v22  ;;  %v216_v31 = vmul.f32 %v208_v16, %v186_v23 }
  0x14   : > { %v217_v32 = vmul.f32 %v196_v8, %v187_v24  ;;  %v218_v33 = vmul.f32 %v200_v9, %v188_v25  ;;  %v219_v34 = vmul.f32 %v204_v15, %v189_v26  ;;  %v220_v35 = vmul.f32 %v208_v16, %v190_v27 }
  0x15   : > { %v243_v36 = vadd.f32 %v226_v10, %v213_v28  ;;  %v244_v37 = vadd.f32 %v230_v11, %v214_v29  ;;  %v245_v38 = vadd.f32 %v234_v17, %v215_v30  ;;  %v246_v39 = vadd.f32 %v238_v18, %v216_v31 }
  0x16   : > { %v247_v40 = vadd.f32 %v226_v10, %v217_v32  ;;  %v248_v41 = vadd.f32 %v230_v11, %v218_v33  ;;  %v249_v42 = vadd.f32 %v234_v17, %v219_v34  ;;  %v250_v43 = vadd.f32 %v238_v18, %v220_v35 }
  0x17   : > { %vm251_vm0 = vcmp.gt.f32.partialorder %v243_v36, 0.0  ;;  %vm252_vm1 = vcmp.gt.f32.partialorder %v244_v37, 0.0  ;;  %v259_v44 = vmul.f32 0.2, %v243_v36  ;;  %v260_v45 = vmul.f32 0.2, %v244_v37 }
  0x18   : > { %vm253_vm2 = vcmp.gt.f32.partialorder %v245_v38, 0.0  ;;  %vm254_vm3 = vcmp.gt.f32.partialorder %v246_v39, 0.0  ;;  %v261_v46 = vmul.f32 0.2, %v245_v38  ;;  %v262_v47 = vmul.f32 0.2, %v246_v39 }
  0x19   : > { %v267_v48 = vsel %vm251_vm0, %v243_v36, %v259_v44  ;;  %v268_v49 = vsel %vm252_vm1, %v244_v37, %v260_v45  ;;  %vm255_vm4 = vcmp.gt.f32.partialorder %v247_v40, 0.0  ;;  %vm256_vm5 = vcmp.gt.f32.partialorder %v248_v41, 0.0 }
  0x1a   : > { %v380_v50 = vpack.c.bf16 %v268_v49, %v267_v48  ;;  %v269_v51 = vsel %vm253_vm2, %v245_v38, %v261_v46  ;;  %v270_v52 = vsel %vm254_vm3, %v246_v39, %v262_v47  ;;  %v263_v53 = vmul.f32 0.2, %v247_v40 }
  0x1b   : > { %v381_v54 = vpack.c.bf16 %v270_v52, %v269_v51  ;;  %v264_v55 = vmul.f32 0.2, %v248_v41  ;;  %vm257_vm6 = vcmp.gt.f32.partialorder %v249_v42, 0.0  ;;  %vm258_vm7 = vcmp.gt.f32.partialorder %v250_v43, 0.0 }
  0x1c   : > { %299 = vst [vmem:[%s177_s25] sm:$0xff] %v380_v50  ;;  %v271_v56 = vsel %vm255_vm4, %v247_v40, %v263_v53  ;;  %v265_v57 = vmul.f32 0.2, %v249_v42  ;;  %v266_v58 = vmul.f32 0.2, %v250_v43 }
  0x1d   : > { %300 = vst [vmem:[%s177_s25 + $0x8] sm:$0xff] %v381_v54  ;;  %v272_v59 = vsel %vm256_vm5, %v248_v41, %v264_v55 }
  0x1e   : > { %v382_v60 = vpack.c.bf16 %v272_v59, %v271_v56  ;;  %v273_v61 = vsel %vm257_vm6, %v249_v42, %v265_v57  ;;  %v274_v62 = vsel %vm258_vm7, %v250_v43, %v266_v58 }
  0x1f   : > { %v383_v63 = vpack.c.bf16 %v274_v62, %v273_v61 }
  0x20   : > { %301 = vst [vmem:[%s177_s25 + $0x10] sm:$0xff] %v382_v60 }
  0x21   : > { %302 = vst [vmem:[%s177_s25 + $0x18] sm:$0xff] %v383_v63 }
  0x22 PF: > { %s13_s12 = sadd.s32 1, %s398_s12  }
  0x23   : > { %p10_p4 = scmp.ge.s32.totalorder %s13_s12, 4  }
  0x25   :  { %12 = sbr.rel (!%p10_p4) target bundleno = 1 (0x1), region = 62 }

// kernel: discriminator_forward.10
= control target key start
LH: loop header
LB: loop body
LE: loop exit
PB: predicated region body
PF: predicated region fallthrough
CT: control target
= control target key end

     0   :  { %s11788_s21 = smov 0   ;;  %s15038_s0 = inlined_call_operand.vmem [shape: bf16[5,8,1024], index: 0, kind: input, shape index: {}, may-alias: {0,2}]   ;;  %s15039_s1 = inlined_call_operand.vmem [shape: bf16[5,8,1024], index: 1, kind: input, shape index: {}, may-alias: {1,3}]   ;;  %s15040_s2 = inlined_call_operand.vmem [shape: bf16[5,8,1024], index: 2, kind: input, shape index: {}, may-alias: {0,2}]   ;;  %s15041_s3 = inlined_call_operand.vmem [shape: bf16[5,8,1024], index: 3, kind: input, shape index: {}, may-alias: {1,3}]   ;;  %s15042_s4 = inlined_call_operand.vmem [shape: bf16[4,1024,512], index: 4, kind: input, shape index: {}]   ;;  %s15043_s5 = inlined_call_operand.vmem [shape: bf16[4,8,512], index: 5, kind: output, shape index: {0}]   ;;  %s15044_s6 = inlined_call_operand.vmem [shape: f32[4,2,512], index: 6, kind: output, shape index: {1}]  }
   0x1 LB: > { %s11794_s22 = sadd.s32 4294967295, %s11750_s21   ;;  %p8197_p0 = scmp.ge.s32.totalorder %s11750_s21, 1  ;;  %s11750_s21 = sphi %s11788_s21, %s17_s21  }
   0x2   : > { %p253_p1 = scmp.lt.s32.totalorder %s11750_s21, 5 }
   0x4   : > { %p254_p2 = pnand %p8197_p0, %p253_p1 }
   0x5   : > { %v10176_v0 = vld [vmem:[%s15042_s4 + $0x804] ss:$16 sps:$4 sm:$0xff] (!%p254_p2)   ;;  %v10178_v1 = vld [vmem:[%s15042_s4 + $0x80c] ss:$16 sps:$4 sm:$0xff] (!%p254_p2)   ;;  %v10180_v2 = vld [vmem:[%s15042_s4 + $0x800] ss:$16 sps:$4 sm:$0xff] (!%p254_p2)  }
   0x6   : > { %257 = sbr.rel (%p254_p2) target bundleno = 1268 (0x4f4), region = 40  ;;  %2168 = vmatprep.subr.bf16.mxu0 (!%p254_p2), %v10176_v0  ;;  %v10181_v3 = vld [vmem:[%s15042_s4 + $0x808] ss:$16 sps:$4 sm:$0xff] (!%p254_p2)   ;;  %2332 = vmatprep.subr.bf16.mxu1 (!%p254_p2), %v10178_v1  ;;  %v10182_v4 = vld [vmem:[%s15042_s4 + $0x824] ss:$16 sps:$4 sm:$0xff] (!%p254_p2)   ;;  %p305_p3 = scmp.lt.s32.totalorder (!%p254_p2), %s11794_s22, 4 }
   0x7   : > { %2169 = vmatpush1.bf16.msra.mxu0 (!%p254_p2), %v10180_v2  ;;  %2333 = vmatpush1.bf16.msra.mxu1 (!%p254_p2), %v10181_v3  ;;  %v10184_v5 = vld [vmem:[%s15042_s4 + $0x82c] ss:$16 sps:$4 sm:$0xff] (!%p254_p2)   ;;  %v10186_v6 = vld [vmem:[%s15042_s4 + $0x820] ss:$16 sps:$4 sm:$0xff] (!%p254_p2)   ;;  %v10187_v7 = vld [vmem:[%s15042_s4 + $0x828] ss:$16 sps:$4 sm:$0xff] (!%p254_p2)  }
   0x8   : > { %2170 = vmatprep.subr.bf16.mxu0 (!%p254_p2), %v10182_v4  ;;  %2334 = vmatprep.subr.bf16.mxu1 (!%p254_p2), %v10184_v5  ;;  %v10188_v8 = vld [vmem:[%s15042_s4 + $0x844] ss:$16 sps:$4 sm:$0xff] (!%p254_p2)   ;;  %v10190_v9 = vld [vmem:[%s15042_s4 + $0x84c] ss:$16 sps:$4 sm:$0xff] (!%p254_p2)   ;;  %v10192_v10 = vld [vmem:[%s15042_s4 + $0x840] ss:$16 sps:$4 sm:$0xff] (!%p254_p2)  }
   0x9   : > { %v10193_v11 = vld [vmem:[%s15042_s4 + $0x848] ss:$16 sps:$4 sm:$0xff] (!%p254_p2)   ;;  %v10194_v12 = vld [vmem:[%s15042_s4 + $0x864] ss:$16 sps:$4 sm:$0xff] (!%p254_p2)   ;;  %v10196_v13 = vld [vmem:[%s15042_s4 + $0x86c] ss:$16 sps:$4 sm:$0xff] (!%p254_p2)  }
   0xa   : > { %v10198_v14 = vld [vmem:[%s15042_s4 + $0x860] ss:$16 sps:$4 sm:$0xff] (!%p254_p2)   ;;  %v10199_v15 = vld [vmem:[%s15042_s4 + $0x868] ss:$16 sps:$4 sm:$0xff] (!%p254_p2)   ;;  %v10200_v16 = vld [vmem:[%s15042_s4 + $0x884] ss:$16 sps:$4 sm:$0xff] (!%p254_p2)  }
   0xb   : > { %2171 = vmatpush1.bf16.msra.mxu0 (!%p254_p2), %v10186_v6  ;;  %2335 = vmatpush1.bf16.msra.mxu1 (!%p254_p2), %v10187_v7  ;;  %v10202_v17 = vld [vmem:[%s15042_s4 + $0x88c] ss:$16 sps:$4 sm:$0xff] (!%p254_p2)   ;;  %v10204_v18 = vld [vmem:[%s15042_s4 + $0x880] ss:$16 sps:$4 sm:$0xff] (!%p254_p2)   ;;  %v10205_v19 = vld [vmem:[%s15042_s4 + $0x888] ss:$16 sps:$4 sm:$0xff] (!%p254_p2)  }
   0xc   : > { %2172 = vmatprep.subr.bf16.mxu0 (!%p254_p2), %v10188_v8  ;;  %2336 = vmatprep.subr.bf16.mxu1 (!%p254_p2), %v10190_v9  ;;  %v10206_v20 = vld [vmem:[%s15042_s4 + $0x8a4] ss:$16 sps:$4 sm:$0xff] (!%p254_p2)   ;;  %v10208_v21 = vld [vmem:[%s15042_s4 + $0x8ac] ss:$16 sps:$4 sm:$0xff] (!%p254_p2)   ;;  %v10210_v22 = vld [vmem:[%s15042_s4 + $0x8a0] ss:$16 sps:$4 sm:$0xff] (!%p254_p2)  }
   0xd   : > { %v10211_v23 = vld [vmem:[%s15042_s4 + $0x8a8] ss:$16 sps:$4 sm:$0xff]   ;;  %v10212_v24 = vld [vmem:[%s15042_s4 + $0x8c4] ss:$16 sps:$4 sm:$0xff]   ;;  %v10214_v25 = vld [vmem:[%s15042_s4 + $0x8cc] ss:$16 sps:$4 sm:$0xff]  }
   0xe   : > { %v10216_v26 = vld [vmem:[%s15042_s4 + $0x8c0] ss:$16 sps:$4 sm:$0xff]   ;;  %v10217_v27 = vld [vmem:[%s15042_s4 + $0x8c8] ss:$16 sps:$4 sm:$0xff]   ;;  %v10218_v28 = vld [vmem:[%s15042_s4 + $0x8e4] ss:$16 sps:$4 sm:$0xff]  }
   0xf   : > { %2173 = vmatpush1.bf16.msra.mxu0 %v10192_v10  ;;  %2337 = vmatpush1.bf16.msra.mxu1 %v10193_v11  ;;  %v10220_v29 = vld [vmem:[%s15042_s4 + $0x8ec] ss:$16 sps:$4 sm:$0xff]   ;;  %v10222_v30 = vld [vmem:[%s15042_s4 + $0x8e0] ss:$16 sps:$4 sm:$0xff]   ;;  %v10223_v31 = vld [vmem:[%s15042_s4 + $0x8e8] ss:$16 sps:$4 sm:$0xff]  }
  0x10   : > { %2174 = vmatprep.subr.bf16.mxu0 %v10194_v12  ;;  %2338 = vmatprep.subr.bf16.mxu1 %v10196_v13  ;;  %v10224_v32 = vld [vmem:[%s15042_s4 + $0x904] ss:$16 sps:$4 sm:$0xff]   ;;  %v10226_v33 = vld [vmem:[%s15042_s4 + $0x90c] ss:$16 sps:$4 sm:$0xff]   ;;  %v10228_v34 = vld [vmem:[%s15042_s4 + $0x900] ss:$16 sps:$4 sm:$0xff]  }
  0x11   : > { %v10229_v35 = vld [vmem:[%s15042_s4 + $0x908] ss:$16 sps:$4 sm:$0xff]   ;;  %v10230_v36 = vld [vmem:[%s15042_s4 + $0x924] ss:$16 sps:$4 sm:$0xff]   ;;  %s11911_s7 = scalar_select %p305_p3, %s11794_s22, 4 }
  0x12   : > { %v10232_v37 = vld [vmem:[%s15042_s4 + $0x92c] ss:$16 sps:$4 sm:$0xff]   ;;  %v10234_v38 = vld [vmem:[%s15042_s4 + $0x920] ss:$16 sps:$4 sm:$0xff]   ;;  %v10235_v39 = vld [vmem:[%s15042_s4 + $0x928] ss:$16 sps:$4 sm:$0xff]  }
  0x13   : > { %2175 = vmatpush1.bf16.msra.mxu0 %v10198_v14  ;;  %2339 = vmatpush1.bf16.msra.mxu1 %v10199_v15  ;;  %v10236_v40 = vld [vmem:[%s15042_s4 + $0x944] ss:$16 sps:$4 sm:$0xff]   ;;  %s10039_s16 = sshll.u32 %s11911_s7, 5  ;;  %v10238_v41 = vld [vmem:[%s15042_s4 + $0x94c] ss:$16 sps:$4 sm:$0xff]   ;;  %s315_s20 = sadd.s32 1, %s11794_s22 }
  0x14   : > { %2176 = vmatprep.subr.bf16.mxu0 %v10200_v16  ;;  %2340 = vmatprep.subr.bf16.mxu1 %v10202_v17  ;;  %v10240_v42 = vld [vmem:[%s15042_s4 + $0x940] ss:$16 sps:$4 sm:$0xff]   ;;  %v10241_v43 = vld [vmem:[%s15042_s4 + $0x948] ss:$16 sps:$4 sm:$0xff]   ;;  %s11940_s27 = scalar_lea.vmem %s15039_s1, %s10039_s16  ;;  %v10242_v44 = vld [vmem:[%s15042_s4 + $0x964] ss:$16 sps:$4 sm:$0xff]   ;;  %s12600_s28 = scalar_lea.vmem %s15038_s0, %s10039_s16 }
  0x15   : > { %v10244_v45 = vld [vmem:[%s15042_s4 + $0x96c] ss:$16 sps:$4 sm:$0xff]   ;;  %v599_v46 = vld [vmem:[%s11940_s27] sm:$0xff]  ;;  %v10247_v49 = vld [vmem:[%s15042_s4 + $0x968] ss:$16 sps:$4 sm:$0xff]   ;;  %p316_p4 = scmp.lt.s32.totalorder %s315_s20, 4 }
  0x16   : > { %v10246_v47 = vld [vmem:[%s15042_s4 + $0x960] ss:$16 sps:$4 sm:$0xff]   ;;  %v8467_v48 = vcombine.high %v599_v46, %v599_v46  ;;  %v10248_v50 = vld [vmem:[%s15042_s4 + $0x984] ss:$16 sps:$4 sm:$0xff]   ;;  %v10250_v51 = vld [vmem:[%s15042_s4 + $0x98c] ss:$16 sps:$4 sm:$0xff]   ;;  %v8466_v4 = vcombine.low %v599_v46, %v599_v46 }
  0x17   : > { %2177 = vmatpush1.bf16.msra.mxu0 %v10204_v18  ;;  %2341 = vmatpush1.bf16.msra.mxu1 %v10205_v19  ;;  %v10252_v52 = vld [vmem:[%s15042_s4 + $0x980] ss:$16 sps:$4 sm:$0xff]   ;;  %v10253_v53 = vld [vmem:[%s15042_s4 + $0x988] ss:$16 sps:$4 sm:$0xff]   ;;  %v10254_v54 = vld [vmem:[%s15042_s4 + $0x9a4] ss:$16 sps:$4 sm:$0xff]  }
  0x18   : > { %2178 = vmatprep.subr.bf16.mxu0 %v10206_v20  ;;  %2342 = vmatprep.subr.bf16.mxu1 %v10208_v21  ;;  %v10256_v55 = vld [vmem:[%s15042_s4 + $0x9ac] ss:$16 sps:$4 sm:$0xff]   ;;  %v10258_v56 = vld [vmem:[%s15042_s4 + $0x9a0] ss:$16 sps:$4 sm:$0xff]   ;;  %v10259_v57 = vld [vmem:[%s15042_s4 + $0x9a8] ss:$16 sps:$4 sm:$0xff]  }
  0x19   : > { %2200 = vmatprep.mubr.bf16.mxu0 %v8467_v48  ;;  %2364 = vmatprep.mubr.bf16.mxu1 %v8467_v48  ;;  %v10260_v58 = vld [vmem:[%s15042_s4 + $0x9c4] ss:$16 sps:$4 sm:$0xff]   ;;  %v10262_v59 = vld [vmem:[%s15042_s4 + $0x9cc] ss:$16 sps:$4 sm:$0xff]   ;;  %v10264_v60 = vld [vmem:[%s15042_s4 + $0x9c0] ss:$16 sps:$4 sm:$0xff]  }
  0x1a   : > { %v10265_v61 = vld [vmem:[%s15042_s4 + $0x9c8] ss:$16 sps:$4 sm:$0xff]   ;;  %v10266_v62 = vld [vmem:[%s15042_s4 + $0x9e4] ss:$16 sps:$4 sm:$0xff]   ;;  %v10268_v63 = vld [vmem:[%s15042_s4 + $0x9ec] ss:$16 sps:$4 sm:$0xff]  }
  0x1b   : > { %2179 = vmatpush1.bf16.msra.mxu0 %v10210_v22  ;;  %2343 = vmatpush1.bf16.msra.mxu1 %v10211_v23  ;;  %v10270_v0 = vld [vmem:[%s15042_s4 + $0x9e0] ss:$16 sps:$4 sm:$0xff]   ;;  %v10271_v1 = vld [vmem:[%s15042_s4 + $0x9e8] ss:$16 sps:$4 sm:$0xff]   ;;  %v10276_v2 = vld [vmem:[%s15042_s4 + $0xa04] ss:$16 sps:$4 sm:$0xff]  }
  0x1c   : > { %2180 = vmatprep.subr.bf16.mxu0 %v10212_v24  ;;  %2344 = vmatprep.subr.bf16.mxu1 %v10214_v25  ;;  %v10279_v3 = vld [vmem:[%s15042_s4 + $0xa0c] ss:$16 sps:$4 sm:$0xff]   ;;  %v10274_v5 = vld [vmem:[%s15042_s4 + $0xa00] ss:$16 sps:$4 sm:$0xff]   ;;  %v10277_v6 = vld [vmem:[%s15042_s4 + $0xa08] ss:$16 sps:$4 sm:$0xff]  }
  0x1d   : > { %v10282_v7 = vld [vmem:[%s15042_s4 + $0xa24] ss:$16 sps:$4 sm:$0xff]   ;;  %v10285_v8 = vld [vmem:[%s15042_s4 + $0xa2c] ss:$16 sps:$4 sm:$0xff]   ;;  %v10280_v9 = vld [vmem:[%s15042_s4 + $0xa20] ss:$16 sps:$4 sm:$0xff]  }
  0x1e   : > { %v10283_v10 = vld [vmem:[%s15042_s4 + $0xa28] ss:$16 sps:$4 sm:$0xff]   ;;  %v10288_v11 = vld [vmem:[%s15042_s4 + $0xa44] ss:$16 sps:$4 sm:$0xff]   ;;  %v10291_v12 = vld [vmem:[%s15042_s4 + $0xa4c] ss:$16 sps:$4 sm:$0xff]  }
  0x1f   : > { %2181 = vmatpush1.bf16.msra.mxu0 %v10216_v26  ;;  %2345 = vmatpush1.bf16.msra.mxu1 %v10217_v27  ;;  %v10286_v13 = vld [vmem:[%s15042_s4 + $0xa40] ss:$16 sps:$4 sm:$0xff]   ;;  %v10289_v14 = vld [vmem:[%s15042_s4 + $0xa48] ss:$16 sps:$4 sm:$0xff]   ;;  %v10294_v15 = vld [vmem:[%s15042_s4 + $0xa64] ss:$16 sps:$4 sm:$0xff]  }
  0x20   : > { %2182 = vmatprep.subr.bf16.mxu0 %v10218_v28  ;;  %2346 = vmatprep.subr.bf16.mxu1 %v10220_v29  ;;  %v10297_v16 = vld [vmem:[%s15042_s4 + $0xa6c] ss:$16 sps:$4 sm:$0xff]   ;;  %v10292_v17 = vld [vmem:[%s15042_s4 + $0xa60] ss:$16 sps:$4 sm:$0xff]   ;;  %v10295_v18 = vld [vmem:[%s15042_s4 + $0xa68] ss:$16 sps:$4 sm:$0xff]  }
  0x21   : > { %v10300_v19 = vld [vmem:[%s15042_s4 + $0xa84] ss:$16 sps:$4 sm:$0xff]   ;;  %v10303_v20 = vld [vmem:[%s15042_s4 + $0xa8c] ss:$16 sps:$4 sm:$0xff]   ;;  %v10298_v21 = vld [vmem:[%s15042_s4 + $0xa80] ss:$16 sps:$4 sm:$0xff]  }
  0x22   : > { %v10301_v22 = vld [vmem:[%s15042_s4 + $0xa88] ss:$16 sps:$4 sm:$0xff]   ;;  %v10306_v23 = vld [vmem:[%s15042_s4 + $0xaa4] ss:$16 sps:$4 sm:$0xff]   ;;  %v10309_v24 = vld [vmem:[%s15042_s4 + $0xaac] ss:$16 sps:$4 sm:$0xff]  }
  0x23   : > { %2183 = vmatpush1.bf16.msra.mxu0 %v10222_v30  ;;  %2347 = vmatpush1.bf16.msra.mxu1 %v10223_v31  ;;  %v10304_v25 = vld [vmem:[%s15042_s4 + $0xaa0] ss:$16 sps:$4 sm:$0xff]   ;;  %v10307_v26 = vld [vmem:[%s15042_s4 + $0xaa8] ss:$16 sps:$4 sm:$0xff]   ;;  %v10312_v27 = vld [vmem:[%s15042_s4 + $0xac4] ss:$16 sps:$4 sm:$0xff]  }
  0x24   : > { %2184 = vmatprep.subr.bf16.mxu0 %v10224_v32  ;;  %2348 = vmatprep.subr.bf16.mxu1 %v10226_v33  ;;  %v10315_v28 = vld [vmem:[%s15042_s4 + $0xacc] ss:$16 sps:$4 sm:$0xff]   ;;  %v10310_v31 = vld [vmem:[%s15042_s4 + $0xac0] ss:$16 sps:$4 sm:$0xff]   ;;  %v10313_v32 = vld [vmem:[%s15042_s4 + $0xac8] ss:$16 sps:$4 sm:$0xff]  }
  0x25   : > { %v12082_v29 = vld [vmem:[%s11940_s27 + $0x8] sm:$0xff]  ;;  %v10318_v33 = vld [vmem:[%s15042_s4 + $0xae4] ss:$16 sps:$4 sm:$0xff]   ;;  %s15046_s20 = smov (!%p316_p4, %s315_s20), 4  ;;  %p329_p5 = scmp.lt.s32.totalorder %s11794_s22, 3 }
  0x26   : > { %v8469_v30 = vcombine.high %v12082_v29, %v12082_v29  ;;  %v10339_v46 = vld [vmem:[%s15042_s4 + $0xb4c] ss:$16 sps:$4 sm:$0xff]   ;;  %v10337_v48 = vld [vmem:[%s15042_s4 + $0xb48] ss:$16 sps:$4 sm:$0xff]   ;;  %s10041_s19 = sshll.u32 %s15046_s20, 5 }
  0x27   : > { %2185 = vmatpush1.bf16.msra.mxu0 %v10228_v34  ;;  %2349 = vmatpush1.bf16.msra.mxu1 %v10229_v35  ;;  %v10321_v34 = vld [vmem:[%s15042_s4 + $0xaec] ss:$16 sps:$4 sm:$0xff]   ;;  %v10316_v35 = vld [vmem:[%s15042_s4 + $0xae0] ss:$16 sps:$4 sm:$0xff]   ;;  %s13407_s16 = scalar_lea.vmem %s15040_s2, %s10041_s19  ;;  %s15048_s22 = smov (!%p329_p5, %s11794_s22), 3 }
  0x28   : > { %2186 = vmatprep.subr.bf16.mxu0 %v10230_v36  ;;  %2350 = vmatprep.subr.bf16.mxu1 %v10232_v37  ;;  %v10319_v36 = vld [vmem:[%s15042_s4 + $0xae8] ss:$16 sps:$4 sm:$0xff]   ;;  %v10324_v37 = vld [vmem:[%s15042_s4 + $0xb04] ss:$16 sps:$4 sm:$0xff]   ;;  %s10043_s10 = sshll.u32 %s15048_s22, 4  ;;  %s10044_s12 = sshll.u32 %s15048_s22, 3 }
  0x29   : > { %s338_s15 = scalar_lea.vmem %s15044_s6, %s10044_s12 }
  0x2b   : > { %2187 = vmatpush1.bf16.msra.mxu0 %v10234_v38  ;;  %2351 = vmatpush1.bf16.msra.mxu1 %v10235_v39  ;;  %v10327_v38 = vld [vmem:[%s15042_s4 + $0xb0c] ss:$16 sps:$4 sm:$0xff]   ;;  %v10322_v39 = vld [vmem:[%s15042_s4 + $0xb00] ss:$16 sps:$4 sm:$0xff]  }
  0x2c   : > { %2188 = vmatprep.subr.bf16.mxu0 %v10236_v40  ;;  %2352 = vmatprep.subr.bf16.mxu1 %v10238_v41  ;;  %v10325_v40 = vld [vmem:[%s15042_s4 + $0xb08] ss:$16 sps:$4 sm:$0xff]   ;;  %v10330_v41 = vld [vmem:[%s15042_s4 + $0xb24] ss:$16 sps:$4 sm:$0xff]  }
  0x2f   : > { %2189 = vmatpush1.bf16.msra.mxu0 %v10240_v42  ;;  %2353 = vmatpush1.bf16.msra.mxu1 %v10241_v43  ;;  %v10333_v42 = vld [vmem:[%s15042_s4 + $0xb2c] ss:$16 sps:$4 sm:$0xff]   ;;  %v10328_v43 = vld [vmem:[%s15042_s4 + $0xb20] ss:$16 sps:$4 sm:$0xff]  }
  0x30   : > { %2190 = vmatprep.subr.bf16.mxu0 %v10242_v44  ;;  %2354 = vmatprep.subr.bf16.mxu1 %v10244_v45  ;;  %v10331_v44 = vld [vmem:[%s15042_s4 + $0xb28] ss:$16 sps:$4 sm:$0xff]   ;;  %v10336_v45 = vld [vmem:[%s15042_s4 + $0xb44] ss:$16 sps:$4 sm:$0xff]  }
  0x33   : > { %2191 = vmatpush1.bf16.msra.mxu0 %v10246_v47  ;;  %2355 = vmatpush1.bf16.msra.mxu1 %v10247_v49  ;;  %v10334_v47 = vld [vmem:[%s15042_s4 + $0xb40] ss:$16 sps:$4 sm:$0xff]   ;;  %v10342_v49 = vld [vmem:[%s15042_s4 + $0xb64] ss:$16 sps:$4 sm:$0xff]  }
  0x34   : > { %2192 = vmatprep.subr.bf16.mxu0 %v10248_v50  ;;  %2356 = vmatprep.subr.bf16.mxu1 %v10250_v51  ;;  %v10345_v50 = vld [vmem:[%s15042_s4 + $0xb6c] ss:$16 sps:$4 sm:$0xff]   ;;  %v10340_v51 = vld [vmem:[%s15042_s4 + $0xb60] ss:$16 sps:$4 sm:$0xff]  }
  0x37   : > { %2193 = vmatpush1.bf16.msra.mxu0 %v10252_v52  ;;  %2357 = vmatpush1.bf16.msra.mxu1 %v10253_v53  ;;  %v10343_v52 = vld [vmem:[%s15042_s4 + $0xb68] ss:$16 sps:$4 sm:$0xff]   ;;  %v10348_v53 = vld [vmem:[%s15042_s4 + $0xb84] ss:$16 sps:$4 sm:$0xff]  }
  0x38   : > { %2194 = vmatprep.subr.bf16.mxu0 %v10254_v54  ;;  %2358 = vmatprep.subr.bf16.mxu1 %v10256_v55  ;;  %v10351_v54 = vld [vmem:[%s15042_s4 + $0xb8c] ss:$16 sps:$4 sm:$0xff]   ;;  %v10346_v55 = vld [vmem:[%s15042_s4 + $0xb80] ss:$16 sps:$4 sm:$0xff]  }
  0x3b   : > { %2195 = vmatpush1.bf16.msra.mxu0 %v10258_v56  ;;  %2359 = vmatpush1.bf16.msra.mxu1 %v10259_v57  ;;  %v10349_v56 = vld [vmem:[%s15042_s4 + $0xb88] ss:$16 sps:$4 sm:$0xff]   ;;  %v10354_v57 = vld [vmem:[%s15042_s4 + $0xba4] ss:$16 sps:$4 sm:$0xff]  }
  0x3c   : > { %2196 = vmatprep.subr.bf16.mxu0 %v10260_v58  ;;  %2360 = vmatprep.subr.bf16.mxu1 %v10262_v59  ;;  %v10357_v58 = vld [vmem:[%s15042_s4 + $0xbac] ss:$16 sps:$4 sm:$0xff]   ;;  %v10352_v59 = vld [vmem:[%s15042_s4 + $0xba0] ss:$16 sps:$4 sm:$0xff]  }
  0x3f   : > { %2197 = vmatpush1.bf16.msra.mxu0 %v10264_v60  ;;  %2361 = vmatpush1.bf16.msra.mxu1 %v10265_v61  ;;  %v10355_v60 = vld [vmem:[%s15042_s4 + $0xba8] ss:$16 sps:$4 sm:$0xff]   ;;  %v10360_v61 = vld [vmem:[%s15042_s4 + $0xbc4] ss:$16 sps:$4 sm:$0xff]  }
  0x40   : > { %2198 = vmatprep.subr.bf16.mxu0 %v10266_v62  ;;  %2362 = vmatprep.subr.bf16.mxu1 %v10268_v63  ;;  %v10363_v62 = vld [vmem:[%s15042_s4 + $0xbcc] ss:$16 sps:$4 sm:$0xff]   ;;  %v10358_v63 = vld [vmem:[%s15042_s4 + $0xbc0] ss:$16 sps:$4 sm:$0xff]  }
  0x43   : > { %2199 = vmatpush1.bf16.msra.mxu0 %v10270_v0  ;;  %2363 = vmatpush1.bf16.msra.mxu1 %v10271_v1  ;;  %v10361_v0 = vld [vmem:[%s15042_s4 + $0xbc8] ss:$16 sps:$4 sm:$0xff]   ;;  %v10366_v1 = vld [vmem:[%s15042_s4 + $0xbe4] ss:$16 sps:$4 sm:$0xff]  }
  0x44   : > { %2209 = vmatprep.subr.bf16.mxu0 %v10276_v2  ;;  %2373 = vmatprep.subr.bf16.mxu1 %v10279_v3  ;;  %v10369_v2 = vld [vmem:[%s15042_s4 + $0xbec] ss:$16 sps:$4 sm:$0xff]   ;;  %v10364_v3 = vld [vmem:[%s15042_s4 + $0xbe0] ss:$16 sps:$4 sm:$0xff]  }
  0x46   : > { %2201 = vmatmul.mubr.bf16.vlgmr.msra.gmra.mrb[0].mxu0 %v8466_v4  ;;  %2365 = vmatmul.mubr.bf16.vlgmr.msra.gmra.mrb[0].mxu1 %v8466_v4  ;;  %v10367_v4 = vld [vmem:[%s15042_s4 + $0xbe8] ss:$16 sps:$4 sm:$0xff]  }
  0x47   : > { %2210 = vmatpush1.bf16.msra.mxu0 %v10274_v5  ;;  %2374 = vmatpush1.bf16.msra.mxu1 %v10277_v6  ;;  %v10374_v5 = vld [vmem:[%s15042_s4 + $0xc04] ss:$16 sps:$4 sm:$0xff]   ;;  %v10377_v6 = vld [vmem:[%s15042_s4 + $0xc0c] ss:$16 sps:$4 sm:$0xff]  }
  0x48   : > { %2211 = vmatprep.subr.bf16.mxu0 %v10282_v7  ;;  %2375 = vmatprep.subr.bf16.mxu1 %v10285_v8  ;;  %v8468_v7 = vcombine.low %v12082_v29, %v12082_v29  ;;  %v10372_v8 = vld [vmem:[%s15042_s4 + $0xc00] ss:$16 sps:$4 sm:$0xff]   ;;  %v10407_v29 = vld [vmem:[%s15042_s4 + $0xcac] ss:$16 sps:$4 sm:$0xff]  }
  0x49   : > { %2241 = vmatprep.mubr.bf16.mxu0 %v8469_v30  ;;  %2405 = vmatprep.mubr.bf16.mxu1 %v8469_v30  ;;  %v10402_v30 = vld [vmem:[%s15042_s4 + $0xca0] ss:$16 sps:$4 sm:$0xff]  }
  0x4b   : > { %2212 = vmatpush1.bf16.msra.mxu0 %v10280_v9  ;;  %2376 = vmatpush1.bf16.msra.mxu1 %v10283_v10  ;;  %v10375_v9 = vld [vmem:[%s15042_s4 + $0xc08] ss:$16 sps:$4 sm:$0xff]   ;;  %v10380_v10 = vld [vmem:[%s15042_s4 + $0xc24] ss:$16 sps:$4 sm:$0xff]  }
  0x4c   : > { %2213 = vmatprep.subr.bf16.mxu0 %v10288_v11  ;;  %2377 = vmatprep.subr.bf16.mxu1 %v10291_v12  ;;  %v12218_v11 = vld [vmem:[%s11940_s27 + $0x10] sm:$0xff]  ;;  %v10383_v12 = vld [vmem:[%s15042_s4 + $0xc2c] ss:$16 sps:$4 sm:$0xff]  }
  0x4f   : > { %2214 = vmatpush1.bf16.msra.mxu0 %v10286_v13  ;;  %2378 = vmatpush1.bf16.msra.mxu1 %v10289_v14  ;;  %v8471_v13 = vcombine.high %v12218_v11, %v12218_v11  ;;  %v10378_v14 = vld [vmem:[%s15042_s4 + $0xc20] ss:$16 sps:$4 sm:$0xff]  }
  0x50   : > { %2215 = vmatprep.subr.bf16.mxu0 %v10294_v15  ;;  %2379 = vmatprep.subr.bf16.mxu1 %v10297_v16  ;;  %v10381_v15 = vld [vmem:[%s15042_s4 + $0xc28] ss:$16 sps:$4 sm:$0xff]   ;;  %v10386_v16 = vld [vmem:[%s15042_s4 + $0xc44] ss:$16 sps:$4 sm:$0xff]  }
  0x53   : > { %2216 = vmatpush1.bf16.msra.mxu0 %v10292_v17  ;;  %2380 = vmatpush1.bf16.msra.mxu1 %v10295_v18  ;;  %v10389_v17 = vld [vmem:[%s15042_s4 + $0xc4c] ss:$16 sps:$4 sm:$0xff]   ;;  %v10384_v18 = vld [vmem:[%s15042_s4 + $0xc40] ss:$16 sps:$4 sm:$0xff]  }
  0x54   : > { %2217 = vmatprep.subr.bf16.mxu0 %v10300_v19  ;;  %2381 = vmatprep.subr.bf16.mxu1 %v10303_v20  ;;  %v10387_v19 = vld [vmem:[%s15042_s4 + $0xc48] ss:$16 sps:$4 sm:$0xff]   ;;  %v10392_v20 = vld [vmem:[%s15042_s4 + $0xc64] ss:$16 sps:$4 sm:$0xff]  }
  0x57   : > { %2218 = vmatpush1.bf16.msra.mxu0 %v10298_v21  ;;  %2382 = vmatpush1.bf16.msra.mxu1 %v10301_v22  ;;  %v10395_v21 = vld [vmem:[%s15042_s4 + $0xc6c] ss:$16 sps:$4 sm:$0xff]   ;;  %v10390_v22 = vld [vmem:[%s15042_s4 + $0xc60] ss:$16 sps:$4 sm:$0xff]  }
  0x58   : > { %2219 = vmatprep.subr.bf16.mxu0 %v10306_v23  ;;  %2383 = vmatprep.subr.bf16.mxu1 %v10309_v24  ;;  %v10393_v23 = vld [vmem:[%s15042_s4 + $0xc68] ss:$16 sps:$4 sm:$0xff]   ;;  %v10398_v24 = vld [vmem:[%s15042_s4 + $0xc84] ss:$16 sps:$4 sm:$0xff]  }
  0x5b   : > { %2220 = vmatpush1.bf16.msra.mxu0 %v10304_v25  ;;  %2384 = vmatpush1.bf16.msra.mxu1 %v10307_v26  ;;  %v10401_v25 = vld [vmem:[%s15042_s4 + $0xc8c] ss:$16 sps:$4 sm:$0xff]   ;;  %v10396_v26 = vld [vmem:[%s15042_s4 + $0xc80] ss:$16 sps:$4 sm:$0xff]  }
  0x5c   : > { %2221 = vmatprep.subr.bf16.mxu0 %v10312_v27  ;;  %2385 = vmatprep.subr.bf16.mxu1 %v10315_v28  ;;  %v10399_v27 = vld [vmem:[%s15042_s4 + $0xc88] ss:$16 sps:$4 sm:$0xff]   ;;  %v10404_v28 = vld [vmem:[%s15042_s4 + $0xca4] ss:$16 sps:$4 sm:$0xff]  }
  0x5f   : > { %2222 = vmatpush1.bf16.msra.mxu0 %v10310_v31  ;;  %2386 = vmatpush1.bf16.msra.mxu1 %v10313_v32  ;;  %v10405_v31 = vld [vmem:[%s15042_s4 + $0xca8] ss:$16 sps:$4 sm:$0xff]   ;;  %v10410_v32 = vld [vmem:[%s15042_s4 + $0xcc4] ss:$16 sps:$4 sm:$0xff]  }
  0x60   : > { %2223 = vmatprep.subr.bf16.mxu0 %v10318_v33  ;;  %2387 = vmatprep.subr.bf16.mxu1 %v10321_v34  ;;  %v10413_v33 = vld [vmem:[%s15042_s4 + $0xccc] ss:$16 sps:$4 sm:$0xff]   ;;  %v10408_v34 = vld [vmem:[%s15042_s4 + $0xcc0] ss:$16 sps:$4 sm:$0xff]  }
  0x63   : > { %2224 = vmatpush1.bf16.msra.mxu0 %v10316_v35  ;;  %2388 = vmatpush1.bf16.msra.mxu1 %v10319_v36  ;;  %v10411_v35 = vld [vmem:[%s15042_s4 + $0xcc8] ss:$16 sps:$4 sm:$0xff]   ;;  %v10416_v36 = vld [vmem:[%s15042_s4 + $0xce4] ss:$16 sps:$4 sm:$0xff]  }
  0x64   : > { %2225 = vmatprep.subr.bf16.mxu0 %v10324_v37  ;;  %2389 = vmatprep.subr.bf16.mxu1 %v10327_v38  ;;  %v10419_v37 = vld [vmem:[%s15042_s4 + $0xcec] ss:$16 sps:$4 sm:$0xff]   ;;  %v10414_v38 = vld [vmem:[%s15042_s4 + $0xce0] ss:$16 sps:$4 sm:$0xff]  }
  0x67   : > { %2226 = vmatpush1.bf16.msra.mxu0 %v10322_v39  ;;  %2390 = vmatpush1.bf16.msra.mxu1 %v10325_v40  ;;  %v10417_v39 = vld [vmem:[%s15042_s4 + $0xce8] ss:$16 sps:$4 sm:$0xff]   ;;  %v10422_v40 = vld [vmem:[%s15042_s4 + $0xd04] ss:$16 sps:$4 sm:$0xff]  }
  0x68   : > { %2227 = vmatprep.subr.bf16.mxu0 %v10330_v41  ;;  %2391 = vmatprep.subr.bf16.mxu1 %v10333_v42  ;;  %v10425_v41 = vld [vmem:[%s15042_s4 + $0xd0c] ss:$16 sps:$4 sm:$0xff]   ;;  %v10420_v42 = vld [vmem:[%s15042_s4 + $0xd00] ss:$16 sps:$4 sm:$0xff]  }
  0x6b   : > { %2228 = vmatpush1.bf16.msra.mxu0 %v10328_v43  ;;  %2392 = vmatpush1.bf16.msra.mxu1 %v10331_v44  ;;  %v10423_v43 = vld [vmem:[%s15042_s4 + $0xd08] ss:$16 sps:$4 sm:$0xff]   ;;  %v10428_v44 = vld [vmem:[%s15042_s4 + $0xd24] ss:$16 sps:$4 sm:$0xff]  }
  0x6c   : > { %2229 = vmatprep.subr.bf16.mxu0 %v10336_v45  ;;  %2393 = vmatprep.subr.bf16.mxu1 %v10339_v46  ;;  %v10431_v45 = vld [vmem:[%s15042_s4 + $0xd2c] ss:$16 sps:$4 sm:$0xff]   ;;  %v10426_v46 = vld [vmem:[%s15042_s4 + $0xd20] ss:$16 sps:$4 sm:$0xff]  }
  0x6f   : > { %2230 = vmatpush1.bf16.msra.mxu0 %v10334_v47  ;;  %2394 = vmatpush1.bf16.msra.mxu1 %v10337_v48  ;;  %v10429_v47 = vld [vmem:[%s15042_s4 + $0xd28] ss:$16 sps:$4 sm:$0xff]   ;;  %v10434_v48 = vld [vmem:[%s15042_s4 + $0xd44] ss:$16 sps:$4 sm:$0xff]  }
  0x70   : > { %2231 = vmatprep.subr.bf16.mxu0 %v10342_v49  ;;  %2395 = vmatprep.subr.bf16.mxu1 %v10345_v50  ;;  %v10437_v49 = vld [vmem:[%s15042_s4 + $0xd4c] ss:$16 sps:$4 sm:$0xff]   ;;  %v10432_v50 = vld [vmem:[%s15042_s4 + $0xd40] ss:$16 sps:$4 sm:$0xff]  }
  0x73   : > { %2232 = vmatpush1.bf16.msra.mxu0 %v10340_v51  ;;  %2396 = vmatpush1.bf16.msra.mxu1 %v10343_v52  ;;  %v10435_v51 = vld [vmem:[%s15042_s4 + $0xd48] ss:$16 sps:$4 sm:$0xff]   ;;  %v10440_v52 = vld [vmem:[%s15042_s4 + $0xd64] ss:$16 sps:$4 sm:$0xff]  }
  0x74   : > { %2233 = vmatprep.subr.bf16.mxu0 %v10348_v53  ;;  %2397 = vmatprep.subr.bf16.mxu1 %v10351_v54  ;;  %v10443_v53 = vld [vmem:[%s15042_s4 + $0xd6c] ss:$16 sps:$4 sm:$0xff]   ;;  %v10438_v54 = vld [vmem:[%s15042_s4 + $0xd60] ss:$16 sps:$4 sm:$0xff]  }
  0x77   : > { %2234 = vmatpush1.bf16.msra.mxu0 %v10346_v55  ;;  %2398 = vmatpush1.bf16.msra.mxu1 %v10349_v56  ;;  %v10441_v55 = vld [vmem:[%s15042_s4 + $0xd68] ss:$16 sps:$4 sm:$0xff]   ;;  %v10446_v56 = vld [vmem:[%s15042_s4 + $0xd84] ss:$16 sps:$4 sm:$0xff]  }
  0x78   : > { %2235 = vmatprep.subr.bf16.mxu0 %v10354_v57  ;;  %2399 = vmatprep.subr.bf16.mxu1 %v10357_v58  ;;  %v10449_v57 = vld [vmem:[%s15042_s4 + $0xd8c] ss:$16 sps:$4 sm:$0xff]   ;;  %v10444_v58 = vld [vmem:[%s15042_s4 + $0xd80] ss:$16 sps:$4 sm:$0xff]  }
  0x7b   : > { %2236 = vmatpush1.bf16.msra.mxu0 %v10352_v59  ;;  %2400 = vmatpush1.bf16.msra.mxu1 %v10355_v60  ;;  %v10447_v59 = vld [vmem:[%s15042_s4 + $0xd88] ss:$16 sps:$4 sm:$0xff]   ;;  %v10452_v60 = vld [vmem:[%s15042_s4 + $0xda4] ss:$16 sps:$4 sm:$0xff]  }
  0x7c   : > { %2237 = vmatprep.subr.bf16.mxu0 %v10360_v61  ;;  %2401 = vmatprep.subr.bf16.mxu1 %v10363_v62  ;;  %v10455_v61 = vld [vmem:[%s15042_s4 + $0xdac] ss:$16 sps:$4 sm:$0xff]   ;;  %v10450_v62 = vld [vmem:[%s15042_s4 + $0xda0] ss:$16 sps:$4 sm:$0xff]  }
  0x7f   : > { %2238 = vmatpush1.bf16.msra.mxu0 %v10358_v63  ;;  %2402 = vmatpush1.bf16.msra.mxu1 %v10361_v0  ;;  %v10453_v63 = vld [vmem:[%s15042_s4 + $0xda8] ss:$16 sps:$4 sm:$0xff]   ;;  %v10458_v0 = vld [vmem:[%s15042_s4 + $0xdc4] ss:$16 sps:$4 sm:$0xff]  }
  0x80   : > { %2239 = vmatprep.subr.bf16.mxu0 %v10366_v1  ;;  %2403 = vmatprep.subr.bf16.mxu1 %v10369_v2  ;;  %v10461_v1 = vld [vmem:[%s15042_s4 + $0xdcc] ss:$16 sps:$4 sm:$0xff]   ;;  %v10456_v2 = vld [vmem:[%s15042_s4 + $0xdc0] ss:$16 sps:$4 sm:$0xff]  }
  0x83   : > { %2240 = vmatpush1.bf16.msra.mxu0 %v10364_v3  ;;  %2404 = vmatpush1.bf16.msra.mxu1 %v10367_v4  ;;  %v10459_v3 = vld [vmem:[%s15042_s4 + $0xdc8] ss:$16 sps:$4 sm:$0xff]   ;;  %v10464_v4 = vld [vmem:[%s15042_s4 + $0xde4] ss:$16 sps:$4 sm:$0xff]  }
  0x84   : > { %2250 = vmatprep.subr.bf16.mxu0 %v10374_v5  ;;  %2414 = vmatprep.subr.bf16.mxu1 %v10377_v6  ;;  %v10467_v5 = vld [vmem:[%s15042_s4 + $0xdec] ss:$16 sps:$4 sm:$0xff]   ;;  %v10462_v6 = vld [vmem:[%s15042_s4 + $0xde0] ss:$16 sps:$4 sm:$0xff]  }
  0x86   : > { %2242 = vmatmul.mubr.bf16.vlgmr.msra.gmra.mrb[0].mxu0 %v8468_v7  ;;  %2406 = vmatmul.mubr.bf16.vlgmr.msra.gmra.mrb[0].mxu1 %v8468_v7  ;;  %v10465_v7 = vld [vmem:[%s15042_s4 + $0xde8] ss:$16 sps:$4 sm:$0xff]  }
  0x87   : > { %2251 = vmatpush1.bf16.msra.mxu0 %v10372_v8  ;;  %2415 = vmatpush1.bf16.msra.mxu1 %v10375_v9  ;;  %v10472_v8 = vld [vmem:[%s15042_s4 + $0xe04] ss:$16 sps:$4 sm:$0xff]   ;;  %v10475_v9 = vld [vmem:[%s15042_s4 + $0xe0c] ss:$16 sps:$4 sm:$0xff]  }
  0x88   : > { %2252 = vmatprep.subr.bf16.mxu0 %v10380_v10  ;;  %2416 = vmatprep.subr.bf16.mxu1 %v10383_v12  ;;  %v10470_v10 = vld [vmem:[%s15042_s4 + $0xe00] ss:$16 sps:$4 sm:$0xff]   ;;  %v8470_v12 = vcombine.low %v12218_v11, %v12218_v11 }
  0x89   : > { %2282 = vmatprep.mubr.bf16.mxu0 %v8471_v13  ;;  %2446 = vmatprep.mubr.bf16.mxu1 %v8471_v13  ;;  %v10473_v13 = vld [vmem:[%s15042_s4 + $0xe08] ss:$16 sps:$4 sm:$0xff]  }
  0x8b   : > { %2253 = vmatpush1.bf16.msra.mxu0 %v10378_v14  ;;  %2417 = vmatpush1.bf16.msra.mxu1 %v10381_v15  ;;  %v12414_v14 = vld [vmem:[%s11940_s27 + $0x18] sm:$0xff]  ;;  %v10478_v15 = vld [vmem:[%s15042_s4 + $0xe24] ss:$16 sps:$4 sm:$0xff]   ;;  %s14213_s27 = scalar_lea.vmem %s15041_s3, %s10041_s19  ;;  %s333_s19 = scalar_lea.vmem %s15043_s5, %s10043_s10 }
  0x8c   : > { %2254 = vmatprep.subr.bf16.mxu0 %v10386_v16  ;;  %2418 = vmatprep.subr.bf16.mxu1 %v10389_v17  ;;  %v10481_v16 = vld [vmem:[%s15042_s4 + $0xe2c] ss:$16 sps:$4 sm:$0xff]   ;;  %v8473_v11 = vcombine.high %v12414_v14, %v12414_v14  ;;  %v10476_v17 = vld [vmem:[%s15042_s4 + $0xe20] ss:$16 sps:$4 sm:$0xff]  }
  0x8f   : > { %2255 = vmatpush1.bf16.msra.mxu0 %v10384_v18  ;;  %2419 = vmatpush1.bf16.msra.mxu1 %v10387_v19  ;;  %v10479_v18 = vld [vmem:[%s15042_s4 + $0xe28] ss:$16 sps:$4 sm:$0xff]   ;;  %v10484_v19 = vld [vmem:[%s15042_s4 + $0xe44] ss:$16 sps:$4 sm:$0xff]  }
  0x90   : > { %2256 = vmatprep.subr.bf16.mxu0 %v10392_v20  ;;  %2420 = vmatprep.subr.bf16.mxu1 %v10395_v21  ;;  %v10487_v20 = vld [vmem:[%s15042_s4 + $0xe4c] ss:$16 sps:$4 sm:$0xff]   ;;  %v10482_v21 = vld [vmem:[%s15042_s4 + $0xe40] ss:$16 sps:$4 sm:$0xff]  }
  0x93   : > { %2257 = vmatpush1.bf16.msra.mxu0 %v10390_v22  ;;  %2421 = vmatpush1.bf16.msra.mxu1 %v10393_v23  ;;  %v10485_v22 = vld [vmem:[%s15042_s4 + $0xe48] ss:$16 sps:$4 sm:$0xff]   ;;  %v10490_v23 = vld [vmem:[%s15042_s4 + $0xe64] ss:$16 sps:$4 sm:$0xff]  }
  0x94   : > { %2258 = vmatprep.subr.bf16.mxu0 %v10398_v24  ;;  %2422 = vmatprep.subr.bf16.mxu1 %v10401_v25  ;;  %v10493_v24 = vld [vmem:[%s15042_s4 + $0xe6c] ss:$16 sps:$4 sm:$0xff]   ;;  %v10488_v25 = vld [vmem:[%s15042_s4 + $0xe60] ss:$16 sps:$4 sm:$0xff]  }
  0x97   : > { %2259 = vmatpush1.bf16.msra.mxu0 %v10396_v26  ;;  %2423 = vmatpush1.bf16.msra.mxu1 %v10399_v27  ;;  %v10491_v26 = vld [vmem:[%s15042_s4 + $0xe68] ss:$16 sps:$4 sm:$0xff]   ;;  %v10496_v27 = vld [vmem:[%s15042_s4 + $0xe84] ss:$16 sps:$4 sm:$0xff]  }
  0x98   : > { %2260 = vmatprep.subr.bf16.mxu0 %v10404_v28  ;;  %2424 = vmatprep.subr.bf16.mxu1 %v10407_v29  ;;  %v10499_v28 = vld [vmem:[%s15042_s4 + $0xe8c] ss:$16 sps:$4 sm:$0xff]   ;;  %v10494_v29 = vld [vmem:[%s15042_s4 + $0xe80] ss:$16 sps:$4 sm:$0xff]  }
  0x9b   : > { %2261 = vmatpush1.bf16.msra.mxu0 %v10402_v30  ;;  %2425 = vmatpush1.bf16.msra.mxu1 %v10405_v31  ;;  %v10497_v30 = vld [vmem:[%s15042_s4 + $0xe88] ss:$16 sps:$4 sm:$0xff]   ;;  %v10502_v31 = vld [vmem:[%s15042_s4 + $0xea4] ss:$16 sps:$4 sm:$0xff]  }
  0x9c   : > { %2262 = vmatprep.subr.bf16.mxu0 %v10410_v32  ;;  %2426 = vmatprep.subr.bf16.mxu1 %v10413_v33  ;;  %v10505_v32 = vld [vmem:[%s15042_s4 + $0xeac] ss:$16 sps:$4 sm:$0xff]   ;;  %v10500_v33 = vld [vmem:[%s15042_s4 + $0xea0] ss:$16 sps:$4 sm:$0xff]  }
  0x9f   : > { %2263 = vmatpush1.bf16.msra.mxu0 %v10408_v34  ;;  %2427 = vmatpush1.bf16.msra.mxu1 %v10411_v35  ;;  %v10503_v34 = vld [vmem:[%s15042_s4 + $0xea8] ss:$16 sps:$4 sm:$0xff]   ;;  %v10508_v35 = vld [vmem:[%s15042_s4 + $0xec4] ss:$16 sps:$4 sm:$0xff]  }
  0xa0   : > { %2264 = vmatprep.subr.bf16.mxu0 %v10416_v36  ;;  %2428 = vmatprep.subr.bf16.mxu1 %v10419_v37  ;;  %v10511_v36 = vld [vmem:[%s15042_s4 + $0xecc] ss:$16 sps:$4 sm:$0xff]   ;;  %v10506_v37 = vld [vmem:[%s15042_s4 + $0xec0] ss:$16 sps:$4 sm:$0xff]  }
  0xa3   : > { %2265 = vmatpush1.bf16.msra.mxu0 %v10414_v38  ;;  %2429 = vmatpush1.bf16.msra.mxu1 %v10417_v39  ;;  %v10509_v38 = vld [vmem:[%s15042_s4 + $0xec8] ss:$16 sps:$4 sm:$0xff]   ;;  %v10514_v39 = vld [vmem:[%s15042_s4 + $0xee4] ss:$16 sps:$4 sm:$0xff]  }
  0xa4   : > { %2266 = vmatprep.subr.bf16.mxu0 %v10422_v40  ;;  %2430 = vmatprep.subr.bf16.mxu1 %v10425_v41  ;;  %v10517_v40 = vld [vmem:[%s15042_s4 + $0xeec] ss:$16 sps:$4 sm:$0xff]   ;;  %v10512_v41 = vld [vmem:[%s15042_s4 + $0xee0] ss:$16 sps:$4 sm:$0xff]  }
  0xa7   : > { %2267 = vmatpush1.bf16.msra.mxu0 %v10420_v42  ;;  %2431 = vmatpush1.bf16.msra.mxu1 %v10423_v43  ;;  %v10515_v42 = vld [vmem:[%s15042_s4 + $0xee8] ss:$16 sps:$4 sm:$0xff]   ;;  %v10520_v43 = vld [vmem:[%s15042_s4 + $0xf04] ss:$16 sps:$4 sm:$0xff]  }
  0xa8   : > { %2268 = vmatprep.subr.bf16.mxu0 %v10428_v44  ;;  %2432 = vmatprep.subr.bf16.mxu1 %v10431_v45  ;;  %v10523_v44 = vld [vmem:[%s15042_s4 + $0xf0c] ss:$16 sps:$4 sm:$0xff]   ;;  %v10518_v45 = vld [vmem:[%s15042_s4 + $0xf00] ss:$16 sps:$4 sm:$0xff]  }
  0xab   : > { %2269 = vmatpush1.bf16.msra.mxu0 %v10426_v46  ;;  %2433 = vmatpush1.bf16.msra.mxu1 %v10429_v47  ;;  %v10521_v46 = vld [vmem:[%s15042_s4 + $0xf08] ss:$16 sps:$4 sm:$0xff]   ;;  %v10526_v47 = vld [vmem:[%s15042_s4 + $0xf24] ss:$16 sps:$4 sm:$0xff]  }
  0xac   : > { %2270 = vmatprep.subr.bf16.mxu0 %v10434_v48  ;;  %2434 = vmatprep.subr.bf16.mxu1 %v10437_v49  ;;  %v10529_v48 = vld [vmem:[%s15042_s4 + $0xf2c] ss:$16 sps:$4 sm:$0xff]   ;;  %v10524_v49 = vld [vmem:[%s15042_s4 + $0xf20] ss:$16 sps:$4 sm:$0xff]  }
  0xaf   : > { %2271 = vmatpush1.bf16.msra.mxu0 %v10432_v50  ;;  %2435 = vmatpush1.bf16.msra.mxu1 %v10435_v51  ;;  %v10527_v50 = vld [vmem:[%s15042_s4 + $0xf28] ss:$16 sps:$4 sm:$0xff]   ;;  %v10532_v51 = vld [vmem:[%s15042_s4 + $0xf44] ss:$16 sps:$4 sm:$0xff]  }
  0xb0   : > { %2272 = vmatprep.subr.bf16.mxu0 %v10440_v52  ;;  %2436 = vmatprep.subr.bf16.mxu1 %v10443_v53  ;;  %v10535_v52 = vld [vmem:[%s15042_s4 + $0xf4c] ss:$16 sps:$4 sm:$0xff]   ;;  %v10530_v53 = vld [vmem:[%s15042_s4 + $0xf40] ss:$16 sps:$4 sm:$0xff]  }
  0xb3   : > { %2273 = vmatpush1.bf16.msra.mxu0 %v10438_v54  ;;  %2437 = vmatpush1.bf16.msra.mxu1 %v10441_v55  ;;  %v10533_v54 = vld [vmem:[%s15042_s4 + $0xf48] ss:$16 sps:$4 sm:$0xff]   ;;  %v10538_v55 = vld [vmem:[%s15042_s4 + $0xf64] ss:$16 sps:$4 sm:$0xff]  }
  0xb4   : > { %2274 = vmatprep.subr.bf16.mxu0 %v10446_v56  ;;  %2438 = vmatprep.subr.bf16.mxu1 %v10449_v57  ;;  %v10541_v56 = vld [vmem:[%s15042_s4 + $0xf6c] ss:$16 sps:$4 sm:$0xff]   ;;  %v10536_v57 = vld [vmem:[%s15042_s4 + $0xf60] ss:$16 sps:$4 sm:$0xff]  }
  0xb7   : > { %2275 = vmatpush1.bf16.msra.mxu0 %v10444_v58  ;;  %2439 = vmatpush1.bf16.msra.mxu1 %v10447_v59  ;;  %v10539_v58 = vld [vmem:[%s15042_s4 + $0xf68] ss:$16 sps:$4 sm:$0xff]   ;;  %v10544_v59 = vld [vmem:[%s15042_s4 + $0xf84] ss:$16 sps:$4 sm:$0xff]  }
  0xb8   : > { %2276 = vmatprep.subr.bf16.mxu0 %v10452_v60  ;;  %2440 = vmatprep.subr.bf16.mxu1 %v10455_v61  ;;  %v10547_v60 = vld [vmem:[%s15042_s4 + $0xf8c] ss:$16 sps:$4 sm:$0xff]   ;;  %v10542_v61 = vld [vmem:[%s15042_s4 + $0xf80] ss:$16 sps:$4 sm:$0xff]  }
  0xbb   : > { %2277 = vmatpush1.bf16.msra.mxu0 %v10450_v62  ;;  %2441 = vmatpush1.bf16.msra.mxu1 %v10453_v63  ;;  %v10545_v62 = vld [vmem:[%s15042_s4 + $0xf88] ss:$16 sps:$4 sm:$0xff]   ;;  %v10550_v63 = vld [vmem:[%s15042_s4 + $0xfa4] ss:$16 sps:$4 sm:$0xff]  }
  0xbc   : > { %2278 = vmatprep.subr.bf16.mxu0 %v10458_v0  ;;  %2442 = vmatprep.subr.bf16.mxu1 %v10461_v1  ;;  %v10553_v0 = vld [vmem:[%s15042_s4 + $0xfac] ss:$16 sps:$4 sm:$0xff]   ;;  %v10548_v1 = vld [vmem:[%s15042_s4 + $0xfa0] ss:$16 sps:$4 sm:$0xff]  }
  0xbf   : > { %2279 = vmatpush1.bf16.msra.mxu0 %v10456_v2  ;;  %2443 = vmatpush1.bf16.msra.mxu1 %v10459_v3  ;;  %v10551_v2 = vld [vmem:[%s15042_s4 + $0xfa8] ss:$16 sps:$4 sm:$0xff]   ;;  %v10556_v3 = vld [vmem:[%s15042_s4 + $0xfc4] ss:$16 sps:$4 sm:$0xff]  }
  0xc0   : > { %2280 = vmatprep.subr.bf16.mxu0 %v10464_v4  ;;  %2444 = vmatprep.subr.bf16.mxu1 %v10467_v5  ;;  %v10559_v4 = vld [vmem:[%s15042_s4 + $0xfcc] ss:$16 sps:$4 sm:$0xff]   ;;  %v10554_v5 = vld [vmem:[%s15042_s4 + $0xfc0] ss:$16 sps:$4 sm:$0xff]  }
  0xc3   : > { %2281 = vmatpush1.bf16.msra.mxu0 %v10462_v6  ;;  %2445 = vmatpush1.bf16.msra.mxu1 %v10465_v7  ;;  %v10557_v6 = vld [vmem:[%s15042_s4 + $0xfc8] ss:$16 sps:$4 sm:$0xff]   ;;  %v10562_v7 = vld [vmem:[%s15042_s4 + $0xfe4] ss:$16 sps:$4 sm:$0xff]  }
  0xc4   : > { %2291 = vmatprep.subr.bf16.mxu0 %v10472_v8  ;;  %2455 = vmatprep.subr.bf16.mxu1 %v10475_v9  ;;  %v10565_v8 = vld [vmem:[%s15042_s4 + $0xfec] ss:$16 sps:$4 sm:$0xff]   ;;  %v10560_v9 = vld [vmem:[%s15042_s4 + $0xfe0] ss:$16 sps:$4 sm:$0xff]  }
  0xc6   : > { %2283 = vmatmul.mubr.bf16.vlgmr.msra.gmra.mrb[0].mxu0 %v8470_v12  ;;  %2447 = vmatmul.mubr.bf16.vlgmr.msra.gmra.mrb[0].mxu1 %v8470_v12  ;;  %v10570_v12 = vld [vmem:[%s15042_s4 + $0x4] ss:$16 sps:$4 sm:$0xff]  }
  0xc7   : > { %2292 = vmatpush1.bf16.msra.mxu0 %v10470_v10  ;;  %2456 = vmatpush1.bf16.msra.mxu1 %v10473_v13  ;;  %v10563_v10 = vld [vmem:[%s15042_s4 + $0xfe8] ss:$16 sps:$4 sm:$0xff]   ;;  %v10573_v13 = vld [vmem:[%s15042_s4 + $0xc] ss:$16 sps:$4 sm:$0xff]  }
  0xc8   : > { %2293 = vmatprep.subr.bf16.mxu0 %v10478_v15  ;;  %2457 = vmatprep.subr.bf16.mxu1 %v10481_v16  ;;  %v10568_v15 = vld [vmem:[%s15042_s4] ss:$16 sps:$4 sm:$0xff]   ;;  %v8472_v16 = vcombine.low %v12414_v14, %v12414_v14 }
  0xc9   : > { %2323 = vmatprep.mubr.bf16.mxu0 %v8473_v11  ;;  %2487 = vmatprep.mubr.bf16.mxu1 %v8473_v11  ;;  %v12617_v11 = vld [vmem:[%s12600_s28] sm:$0xff] }
  0xca   : > { %v8731_v14 = vcombine.high %v12617_v11, %v12617_v11 }
  0xcb   : > { %2294 = vmatpush1.bf16.msra.mxu0 %v10476_v17  ;;  %2458 = vmatpush1.bf16.msra.mxu1 %v10479_v18  ;;  %v10571_v17 = vld [vmem:[%s15042_s4 + $0x8] ss:$16 sps:$4 sm:$0xff]   ;;  %v10576_v18 = vld [vmem:[%s15042_s4 + $0x24] ss:$16 sps:$4 sm:$0xff]  }
  0xcc   : > { %2295 = vmatprep.subr.bf16.mxu0 %v10484_v19  ;;  %2459 = vmatprep.subr.bf16.mxu1 %v10487_v20  ;;  %v10579_v19 = vld [vmem:[%s15042_s4 + $0x2c] ss:$16 sps:$4 sm:$0xff]   ;;  %v10574_v20 = vld [vmem:[%s15042_s4 + $0x20] ss:$16 sps:$4 sm:$0xff]  }
  0xcf   : > { %2296 = vmatpush1.bf16.msra.mxu0 %v10482_v21  ;;  %2460 = vmatpush1.bf16.msra.mxu1 %v10485_v22  ;;  %v10577_v21 = vld [vmem:[%s15042_s4 + $0x28] ss:$16 sps:$4 sm:$0xff]   ;;  %v10582_v22 = vld [vmem:[%s15042_s4 + $0x44] ss:$16 sps:$4 sm:$0xff]  }
  0xd0   : > { %2297 = vmatprep.subr.bf16.mxu0 %v10490_v23  ;;  %2461 = vmatprep.subr.bf16.mxu1 %v10493_v24  ;;  %v10585_v23 = vld [vmem:[%s15042_s4 + $0x4c] ss:$16 sps:$4 sm:$0xff]   ;;  %v10580_v24 = vld [vmem:[%s15042_s4 + $0x40] ss:$16 sps:$4 sm:$0xff]  }
  0xd3   : > { %2298 = vmatpush1.bf16.msra.mxu0 %v10488_v25  ;;  %2462 = vmatpush1.bf16.msra.mxu1 %v10491_v26  ;;  %v10583_v25 = vld [vmem:[%s15042_s4 + $0x48] ss:$16 sps:$4 sm:$0xff]   ;;  %v10588_v26 = vld [vmem:[%s15042_s4 + $0x64] ss:$16 sps:$4 sm:$0xff]  }
  0xd4   : > { %2299 = vmatprep.subr.bf16.mxu0 %v10496_v27  ;;  %2463 = vmatprep.subr.bf16.mxu1 %v10499_v28  ;;  %v10591_v27 = vld [vmem:[%s15042_s4 + $0x6c] ss:$16 sps:$4 sm:$0xff]   ;;  %v10586_v28 = vld [vmem:[%s15042_s4 + $0x60] ss:$16 sps:$4 sm:$0xff]  }
  0xd7   : > { %2300 = vmatpush1.bf16.msra.mxu0 %v10494_v29  ;;  %2464 = vmatpush1.bf16.msra.mxu1 %v10497_v30  ;;  %v10589_v29 = vld [vmem:[%s15042_s4 + $0x68] ss:$16 sps:$4 sm:$0xff]   ;;  %v10594_v30 = vld [vmem:[%s15042_s4 + $0x84] ss:$16 sps:$4 sm:$0xff]  }
  0xd8   : > { %2301 = vmatprep.subr.bf16.mxu0 %v10502_v31  ;;  %2465 = vmatprep.subr.bf16.mxu1 %v10505_v32  ;;  %v10597_v31 = vld [vmem:[%s15042_s4 + $0x8c] ss:$16 sps:$4 sm:$0xff]   ;;  %v10592_v32 = vld [vmem:[%s15042_s4 + $0x80] ss:$16 sps:$4 sm:$0xff]  }
  0xdb   : > { %2302 = vmatpush1.bf16.msra.mxu0 %v10500_v33  ;;  %2466 = vmatpush1.bf16.msra.mxu1 %v10503_v34  ;;  %v10595_v33 = vld [vmem:[%s15042_s4 + $0x88] ss:$16 sps:$4 sm:$0xff]   ;;  %v10600_v34 = vld [vmem:[%s15042_s4 + $0xa4] ss:$16 sps:$4 sm:$0xff]  }
  0xdc   : > { %2303 = vmatprep.subr.bf16.mxu0 %v10508_v35  ;;  %2467 = vmatprep.subr.bf16.mxu1 %v10511_v36  ;;  %v10603_v35 = vld [vmem:[%s15042_s4 + $0xac] ss:$16 sps:$4 sm:$0xff]   ;;  %v10598_v36 = vld [vmem:[%s15042_s4 + $0xa0] ss:$16 sps:$4 sm:$0xff]  }
  0xdf   : > { %2304 = vmatpush1.bf16.msra.mxu0 %v10506_v37  ;;  %2468 = vmatpush1.bf16.msra.mxu1 %v10509_v38  ;;  %v10601_v37 = vld [vmem:[%s15042_s4 + $0xa8] ss:$16 sps:$4 sm:$0xff]   ;;  %v10606_v38 = vld [vmem:[%s15042_s4 + $0xc4] ss:$16 sps:$4 sm:$0xff]  }
  0xe0   : > { %2305 = vmatprep.subr.bf16.mxu0 %v10514_v39  ;;  %2469 = vmatprep.subr.bf16.mxu1 %v10517_v40  ;;  %v10609_v39 = vld [vmem:[%s15042_s4 + $0xcc] ss:$16 sps:$4 sm:$0xff]   ;;  %v10604_v40 = vld [vmem:[%s15042_s4 + $0xc0] ss:$16 sps:$4 sm:$0xff]  }
  0xe3   : > { %2306 = vmatpush1.bf16.msra.mxu0 %v10512_v41  ;;  %2470 = vmatpush1.bf16.msra.mxu1 %v10515_v42  ;;  %v10607_v41 = vld [vmem:[%s15042_s4 + $0xc8] ss:$16 sps:$4 sm:$0xff]   ;;  %v10612_v42 = vld [vmem:[%s15042_s4 + $0xe4] ss:$16 sps:$4 sm:$0xff]  }
  0xe4   : > { %2307 = vmatprep.subr.bf16.mxu0 %v10520_v43  ;;  %2471 = vmatprep.subr.bf16.mxu1 %v10523_v44  ;;  %v10615_v43 = vld [vmem:[%s15042_s4 + $0xec] ss:$16 sps:$4 sm:$0xff]   ;;  %v10610_v44 = vld [vmem:[%s15042_s4 + $0xe0] ss:$16 sps:$4 sm:$0xff]  }
  0xe7   : > { %2308 = vmatpush1.bf16.msra.mxu0 %v10518_v45  ;;  %2472 = vmatpush1.bf16.msra.mxu1 %v10521_v46  ;;  %v10613_v45 = vld [vmem:[%s15042_s4 + $0xe8] ss:$16 sps:$4 sm:$0xff]   ;;  %v10618_v46 = vld [vmem:[%s15042_s4 + $0x104] ss:$16 sps:$4 sm:$0xff]  }
  0xe8   : > { %2309 = vmatprep.subr.bf16.mxu0 %v10526_v47  ;;  %2473 = vmatprep.subr.bf16.mxu1 %v10529_v48  ;;  %v10621_v47 = vld [vmem:[%s15042_s4 + $0x10c] ss:$16 sps:$4 sm:$0xff]   ;;  %v10616_v48 = vld [vmem:[%s15042_s4 + $0x100] ss:$16 sps:$4 sm:$0xff]  }
  0xeb   : > { %2310 = vmatpush1.bf16.msra.mxu0 %v10524_v49  ;;  %2474 = vmatpush1.bf16.msra.mxu1 %v10527_v50  ;;  %v10619_v49 = vld [vmem:[%s15042_s4 + $0x108] ss:$16 sps:$4 sm:$0xff]   ;;  %v10624_v50 = vld [vmem:[%s15042_s4 + $0x124] ss:$16 sps:$4 sm:$0xff]  }
  0xec   : > { %2311 = vmatprep.subr.bf16.mxu0 %v10532_v51  ;;  %2475 = vmatprep.subr.bf16.mxu1 %v10535_v52  ;;  %v10627_v51 = vld [vmem:[%s15042_s4 + $0x12c] ss:$16 sps:$4 sm:$0xff]   ;;  %v10622_v52 = vld [vmem:[%s15042_s4 + $0x120] ss:$16 sps:$4 sm:$0xff]  }
  0xef   : > { %2312 = vmatpush1.bf16.msra.mxu0 %v10530_v53  ;;  %2476 = vmatpush1.bf16.msra.mxu1 %v10533_v54  ;;  %v10625_v53 = vld [vmem:[%s15042_s4 + $0x128] ss:$16 sps:$4 sm:$0xff]   ;;  %v10630_v54 = vld [vmem:[%s15042_s4 + $0x144] ss:$16 sps:$4 sm:$0xff]  }
  0xf0   : > { %2313 = vmatprep.subr.bf16.mxu0 %v10538_v55  ;;  %2477 = vmatprep.subr.bf16.mxu1 %v10541_v56  ;;  %v10633_v55 = vld [vmem:[%s15042_s4 + $0x14c] ss:$16 sps:$4 sm:$0xff]   ;;  %v10628_v56 = vld [vmem:[%s15042_s4 + $0x140] ss:$16 sps:$4 sm:$0xff]  }
  0xf3   : > { %2314 = vmatpush1.bf16.msra.mxu0 %v10536_v57  ;;  %2478 = vmatpush1.bf16.msra.mxu1 %v10539_v58  ;;  %v10631_v57 = vld [vmem:[%s15042_s4 + $0x148] ss:$16 sps:$4 sm:$0xff]   ;;  %v10636_v58 = vld [vmem:[%s15042_s4 + $0x164] ss:$16 sps:$4 sm:$0xff]  }
  0xf4   : > { %2315 = vmatprep.subr.bf16.mxu0 %v10544_v59  ;;  %2479 = vmatprep.subr.bf16.mxu1 %v10547_v60  ;;  %v10639_v59 = vld [vmem:[%s15042_s4 + $0x16c] ss:$16 sps:$4 sm:$0xff]   ;;  %v10634_v60 = vld [vmem:[%s15042_s4 + $0x160] ss:$16 sps:$4 sm:$0xff]  }
  0xf7   : > { %2316 = vmatpush1.bf16.msra.mxu0 %v10542_v61  ;;  %2480 = vmatpush1.bf16.msra.mxu1 %v10545_v62  ;;  %v10637_v61 = vld [vmem:[%s15042_s4 + $0x168] ss:$16 sps:$4 sm:$0xff]   ;;  %v10642_v62 = vld [vmem:[%s15042_s4 + $0x184] ss:$16 sps:$4 sm:$0xff]  }
  0xf8   : > { %2317 = vmatprep.subr.bf16.mxu0 %v10550_v63  ;;  %2481 = vmatprep.subr.bf16.mxu1 %v10553_v0  ;;  %v10645_v63 = vld [vmem:[%s15042_s4 + $0x18c] ss:$16 sps:$4 sm:$0xff]   ;;  %v10640_v0 = vld [vmem:[%s15042_s4 + $0x180] ss:$16 sps:$4 sm:$0xff]  }
  0xfb   : > { %2318 = vmatpush1.bf16.msra.mxu0 %v10548_v1  ;;  %2482 = vmatpush1.bf16.msra.mxu1 %v10551_v2  ;;  %v10643_v1 = vld [vmem:[%s15042_s4 + $0x188] ss:$16 sps:$4 sm:$0xff]   ;;  %v10648_v2 = vld [vmem:[%s15042_s4 + $0x1a4] ss:$16 sps:$4 sm:$0xff]  }
  0xfc   : > { %2319 = vmatprep.subr.bf16.mxu0 %v10556_v3  ;;  %2483 = vmatprep.subr.bf16.mxu1 %v10559_v4  ;;  %v10651_v3 = vld [vmem:[%s15042_s4 + $0x1ac] ss:$16 sps:$4 sm:$0xff]   ;;  %v10646_v4 = vld [vmem:[%s15042_s4 + $0x1a0] ss:$16 sps:$4 sm:$0xff]  }
  0xff   : > { %2320 = vmatpush1.bf16.msra.mxu0 %v10554_v5  ;;  %2484 = vmatpush1.bf16.msra.mxu1 %v10557_v6  ;;  %v10649_v5 = vld [vmem:[%s15042_s4 + $0x1a8] ss:$16 sps:$4 sm:$0xff]   ;;  %v10654_v6 = vld [vmem:[%s15042_s4 + $0x1c4] ss:$16 sps:$4 sm:$0xff]  }
 0x100   : > { %2321 = vmatprep.subr.bf16.mxu0 %v10562_v7  ;;  %2485 = vmatprep.subr.bf16.mxu1 %v10565_v8  ;;  %v10657_v7 = vld [vmem:[%s15042_s4 + $0x1cc] ss:$16 sps:$4 sm:$0xff]   ;;  %v10652_v8 = vld [vmem:[%s15042_s4 + $0x1c0] ss:$16 sps:$4 sm:$0xff]  }
 0x103   : > { %2322 = vmatpush1.bf16.msra.mxu0 %v10560_v9  ;;  %2486 = vmatpush1.bf16.msra.mxu1 %v10563_v10  ;;  %v10655_v9 = vld [vmem:[%s15042_s4 + $0x1c8] ss:$16 sps:$4 sm:$0xff]   ;;  %v10660_v10 = vld [vmem:[%s15042_s4 + $0x1e4] ss:$16 sps:$4 sm:$0xff]  }
 0x104   : > { %3804 = vmatprep.subr.bf16.mxu0 %v10570_v12  ;;  %3968 = vmatprep.subr.bf16.mxu1 %v10573_v13  ;;  %v10663_v12 = vld [vmem:[%s15042_s4 + $0x1ec] ss:$16 sps:$4 sm:$0xff]   ;;  %v10658_v13 = vld [vmem:[%s15042_s4 + $0x1e0] ss:$16 sps:$4 sm:$0xff]  }
 0x106   : > { %2324 = vmatmul.mubr.bf16.vlgmr.msra.gmra.mrb[0].mxu0 %v8472_v16  ;;  %2488 = vmatmul.mubr.bf16.vlgmr.msra.gmra.mrb[0].mxu1 %v8472_v16  ;;  %v10668_v16 = vld [vmem:[%s15042_s4 + $0x204] ss:$16 sps:$4 sm:$0xff]  }
 0x107   : > { %3805 = vmatpush1.bf16.msra.mxu0 %v10568_v15  ;;  %3969 = vmatpush1.bf16.msra.mxu1 %v10571_v17  ;;  %v10661_v15 = vld [vmem:[%s15042_s4 + $0x1e8] ss:$16 sps:$4 sm:$0xff]   ;;  %v10671_v17 = vld [vmem:[%s15042_s4 + $0x20c] ss:$16 sps:$4 sm:$0xff]  }
 0x108   : > { %3806 = vmatprep.subr.bf16.mxu0 %v10576_v18  ;;  %3970 = vmatprep.subr.bf16.mxu1 %v10579_v19  ;;  %v12811_v18 = vld [vmem:[%s12600_s28 + $0x8] sm:$0xff]  ;;  %v8730_v19 = vcombine.low %v12617_v11, %v12617_v11 }
 0x109   : > { %3836 = vmatprep.mubr.bf16.mxu0 %v8731_v14  ;;  %4000 = vmatprep.mubr.bf16.mxu1 %v8731_v14  ;;  %v10666_v14 = vld [vmem:[%s15042_s4 + $0x200] ss:$16 sps:$4 sm:$0xff]   ;;  %v10677_v11 = vld [vmem:[%s15042_s4 + $0x22c] ss:$16 sps:$4 sm:$0xff]  }
 0x10b   : > { %3807 = vmatpush1.bf16.msra.mxu0 %v10574_v20  ;;  %3971 = vmatpush1.bf16.msra.mxu1 %v10577_v21  ;;  %v10669_v20 = vld [vmem:[%s15042_s4 + $0x208] ss:$16 sps:$4 sm:$0xff]   ;;  %v10674_v21 = vld [vmem:[%s15042_s4 + $0x224] ss:$16 sps:$4 sm:$0xff]  }
 0x10c   : > { %3808 = vmatprep.subr.bf16.mxu0 %v10582_v22  ;;  %3972 = vmatprep.subr.bf16.mxu1 %v10585_v23  ;;  %v8733_v22 = vcombine.high %v12811_v18, %v12811_v18  ;;  %v10672_v23 = vld [vmem:[%s15042_s4 + $0x220] ss:$16 sps:$4 sm:$0xff]  }
 0x10f   : > { %3809 = vmatpush1.bf16.msra.mxu0 %v10580_v24  ;;  %3973 = vmatpush1.bf16.msra.mxu1 %v10583_v25  ;;  %v10675_v24 = vld [vmem:[%s15042_s4 + $0x228] ss:$16 sps:$4 sm:$0xff]   ;;  %v10680_v25 = vld [vmem:[%s15042_s4 + $0x244] ss:$16 sps:$4 sm:$0xff]  }
 0x110   : > { %3810 = vmatprep.subr.bf16.mxu0 %v10588_v26  ;;  %3974 = vmatprep.subr.bf16.mxu1 %v10591_v27  ;;  %v10683_v26 = vld [vmem:[%s15042_s4 + $0x24c] ss:$16 sps:$4 sm:$0xff]   ;;  %v10678_v27 = vld [vmem:[%s15042_s4 + $0x240] ss:$16 sps:$4 sm:$0xff]  }
 0x113   : > { %3811 = vmatpush1.bf16.msra.mxu0 %v10586_v28  ;;  %3975 = vmatpush1.bf16.msra.mxu1 %v10589_v29  ;;  %v10681_v28 = vld [vmem:[%s15042_s4 + $0x248] ss:$16 sps:$4 sm:$0xff]   ;;  %v10686_v29 = vld [vmem:[%s15042_s4 + $0x264] ss:$16 sps:$4 sm:$0xff]  }
 0x114   : > { %3812 = vmatprep.subr.bf16.mxu0 %v10594_v30  ;;  %3976 = vmatprep.subr.bf16.mxu1 %v10597_v31  ;;  %v10689_v30 = vld [vmem:[%s15042_s4 + $0x26c] ss:$16 sps:$4 sm:$0xff]   ;;  %v10684_v31 = vld [vmem:[%s15042_s4 + $0x260] ss:$16 sps:$4 sm:$0xff]  }
 0x117   : > { %3813 = vmatpush1.bf16.msra.mxu0 %v10592_v32  ;;  %3977 = vmatpush1.bf16.msra.mxu1 %v10595_v33  ;;  %v10687_v32 = vld [vmem:[%s15042_s4 + $0x268] ss:$16 sps:$4 sm:$0xff]   ;;  %v10692_v33 = vld [vmem:[%s15042_s4 + $0x284] ss:$16 sps:$4 sm:$0xff]  }
 0x118   : > { %3814 = vmatprep.subr.bf16.mxu0 %v10600_v34  ;;  %3978 = vmatprep.subr.bf16.mxu1 %v10603_v35  ;;  %v10695_v34 = vld [vmem:[%s15042_s4 + $0x28c] ss:$16 sps:$4 sm:$0xff]   ;;  %v10690_v35 = vld [vmem:[%s15042_s4 + $0x280] ss:$16 sps:$4 sm:$0xff]  }
 0x11b   : > { %3815 = vmatpush1.bf16.msra.mxu0 %v10598_v36  ;;  %3979 = vmatpush1.bf16.msra.mxu1 %v10601_v37  ;;  %v10693_v36 = vld [vmem:[%s15042_s4 + $0x288] ss:$16 sps:$4 sm:$0xff]   ;;  %v10698_v37 = vld [vmem:[%s15042_s4 + $0x2a4] ss:$16 sps:$4 sm:$0xff]  }
 0x11c   : > { %3816 = vmatprep.subr.bf16.mxu0 %v10606_v38  ;;  %3980 = vmatprep.subr.bf16.mxu1 %v10609_v39  ;;  %v10701_v38 = vld [vmem:[%s15042_s4 + $0x2ac] ss:$16 sps:$4 sm:$0xff]   ;;  %v10696_v39 = vld [vmem:[%s15042_s4 + $0x2a0] ss:$16 sps:$4 sm:$0xff]  }
 0x11f   : > { %3817 = vmatpush1.bf16.msra.mxu0 %v10604_v40  ;;  %3981 = vmatpush1.bf16.msra.mxu1 %v10607_v41  ;;  %v10699_v40 = vld [vmem:[%s15042_s4 + $0x2a8] ss:$16 sps:$4 sm:$0xff]   ;;  %v10704_v41 = vld [vmem:[%s15042_s4 + $0x2c4] ss:$16 sps:$4 sm:$0xff]  }
 0x120   : > { %3818 = vmatprep.subr.bf16.mxu0 %v10612_v42  ;;  %3982 = vmatprep.subr.bf16.mxu1 %v10615_v43  ;;  %v10707_v42 = vld [vmem:[%s15042_s4 + $0x2cc] ss:$16 sps:$4 sm:$0xff]   ;;  %v10702_v43 = vld [vmem:[%s15042_s4 + $0x2c0] ss:$16 sps:$4 sm:$0xff]  }
 0x123   : > { %3819 = vmatpush1.bf16.msra.mxu0 %v10610_v44  ;;  %3983 = vmatpush1.bf16.msra.mxu1 %v10613_v45  ;;  %v10705_v44 = vld [vmem:[%s15042_s4 + $0x2c8] ss:$16 sps:$4 sm:$0xff]   ;;  %v10710_v45 = vld [vmem:[%s15042_s4 + $0x2e4] ss:$16 sps:$4 sm:$0xff]  }
 0x124   : > { %3820 = vmatprep.subr.bf16.mxu0 %v10618_v46  ;;  %3984 = vmatprep.subr.bf16.mxu1 %v10621_v47  ;;  %v10713_v46 = vld [vmem:[%s15042_s4 + $0x2ec] ss:$16 sps:$4 sm:$0xff]   ;;  %v10708_v47 = vld [vmem:[%s15042_s4 + $0x2e0] ss:$16 sps:$4 sm:$0xff]  }
 0x127   : > { %3821 = vmatpush1.bf16.msra.mxu0 %v10616_v48  ;;  %3985 = vmatpush1.bf16.msra.mxu1 %v10619_v49  ;;  %v10711_v48 = vld [vmem:[%s15042_s4 + $0x2e8] ss:$16 sps:$4 sm:$0xff]   ;;  %v10716_v49 = vld [vmem:[%s15042_s4 + $0x304] ss:$16 sps:$4 sm:$0xff]  }
 0x128   : > { %3822 = vmatprep.subr.bf16.mxu0 %v10624_v50  ;;  %3986 = vmatprep.subr.bf16.mxu1 %v10627_v51  ;;  %v10719_v50 = vld [vmem:[%s15042_s4 + $0x30c] ss:$16 sps:$4 sm:$0xff]   ;;  %v10714_v51 = vld [vmem:[%s15042_s4 + $0x300] ss:$16 sps:$4 sm:$0xff]  }
 0x12b   : > { %3823 = vmatpush1.bf16.msra.mxu0 %v10622_v52  ;;  %3987 = vmatpush1.bf16.msra.mxu1 %v10625_v53  ;;  %v10717_v52 = vld [vmem:[%s15042_s4 + $0x308] ss:$16 sps:$4 sm:$0xff]   ;;  %v10722_v53 = vld [vmem:[%s15042_s4 + $0x324] ss:$16 sps:$4 sm:$0xff]  }
 0x12c   : > { %3824 = vmatprep.subr.bf16.mxu0 %v10630_v54  ;;  %3988 = vmatprep.subr.bf16.mxu1 %v10633_v55  ;;  %v10725_v54 = vld [vmem:[%s15042_s4 + $0x32c] ss:$16 sps:$4 sm:$0xff]   ;;  %v10720_v55 = vld [vmem:[%s15042_s4 + $0x320] ss:$16 sps:$4 sm:$0xff]  }
 0x12f   : > { %3825 = vmatpush1.bf16.msra.mxu0 %v10628_v56  ;;  %3989 = vmatpush1.bf16.msra.mxu1 %v10631_v57  ;;  %v10723_v56 = vld [vmem:[%s15042_s4 + $0x328] ss:$16 sps:$4 sm:$0xff]   ;;  %v10728_v57 = vld [vmem:[%s15042_s4 + $0x344] ss:$16 sps:$4 sm:$0xff]  }
 0x130   : > { %3826 = vmatprep.subr.bf16.mxu0 %v10636_v58  ;;  %3990 = vmatprep.subr.bf16.mxu1 %v10639_v59  ;;  %v10731_v58 = vld [vmem:[%s15042_s4 + $0x34c] ss:$16 sps:$4 sm:$0xff]   ;;  %v10726_v59 = vld [vmem:[%s15042_s4 + $0x340] ss:$16 sps:$4 sm:$0xff]  }
 0x133   : > { %3827 = vmatpush1.bf16.msra.mxu0 %v10634_v60  ;;  %3991 = vmatpush1.bf16.msra.mxu1 %v10637_v61  ;;  %v10729_v60 = vld [vmem:[%s15042_s4 + $0x348] ss:$16 sps:$4 sm:$0xff]   ;;  %v10734_v61 = vld [vmem:[%s15042_s4 + $0x364] ss:$16 sps:$4 sm:$0xff]  }
 0x134   : > { %3828 = vmatprep.subr.bf16.mxu0 %v10642_v62  ;;  %3992 = vmatprep.subr.bf16.mxu1 %v10645_v63  ;;  %v10737_v62 = vld [vmem:[%s15042_s4 + $0x36c] ss:$16 sps:$4 sm:$0xff]   ;;  %v10732_v63 = vld [vmem:[%s15042_s4 + $0x360] ss:$16 sps:$4 sm:$0xff]  }
 0x137   : > { %3829 = vmatpush1.bf16.msra.mxu0 %v10640_v0  ;;  %3993 = vmatpush1.bf16.msra.mxu1 %v10643_v1  ;;  %v10735_v0 = vld [vmem:[%s15042_s4 + $0x368] ss:$16 sps:$4 sm:$0xff]   ;;  %v10740_v1 = vld [vmem:[%s15042_s4 + $0x384] ss:$16 sps:$4 sm:$0xff]  }
 0x138   : > { %3830 = vmatprep.subr.bf16.mxu0 %v10648_v2  ;;  %3994 = vmatprep.subr.bf16.mxu1 %v10651_v3  ;;  %v10743_v2 = vld [vmem:[%s15042_s4 + $0x38c] ss:$16 sps:$4 sm:$0xff]   ;;  %v10738_v3 = vld [vmem:[%s15042_s4 + $0x380] ss:$16 sps:$4 sm:$0xff]  }
 0x13b   : > { %3831 = vmatpush1.bf16.msra.mxu0 %v10646_v4  ;;  %3995 = vmatpush1.bf16.msra.mxu1 %v10649_v5  ;;  %v10741_v4 = vld [vmem:[%s15042_s4 + $0x388] ss:$16 sps:$4 sm:$0xff]   ;;  %v10746_v5 = vld [vmem:[%s15042_s4 + $0x3a4] ss:$16 sps:$4 sm:$0xff]  }
 0x13c   : > { %3832 = vmatprep.subr.bf16.mxu0 %v10654_v6  ;;  %3996 = vmatprep.subr.bf16.mxu1 %v10657_v7  ;;  %v10749_v6 = vld [vmem:[%s15042_s4 + $0x3ac] ss:$16 sps:$4 sm:$0xff]   ;;  %v10744_v7 = vld [vmem:[%s15042_s4 + $0x3a0] ss:$16 sps:$4 sm:$0xff]  }
 0x13f   : > { %3833 = vmatpush1.bf16.msra.mxu0 %v10652_v8  ;;  %3997 = vmatpush1.bf16.msra.mxu1 %v10655_v9  ;;  %v10747_v8 = vld [vmem:[%s15042_s4 + $0x3a8] ss:$16 sps:$4 sm:$0xff]   ;;  %v10752_v9 = vld [vmem:[%s15042_s4 + $0x3c4] ss:$16 sps:$4 sm:$0xff]  }
 0x140   : > { %3834 = vmatprep.subr.bf16.mxu0 %v10660_v10  ;;  %3998 = vmatprep.subr.bf16.mxu1 %v10663_v12  ;;  %v10755_v10 = vld [vmem:[%s15042_s4 + $0x3cc] ss:$16 sps:$4 sm:$0xff]   ;;  %v10750_v12 = vld [vmem:[%s15042_s4 + $0x3c0] ss:$16 sps:$4 sm:$0xff]  }
 0x143   : > { %3835 = vmatpush1.bf16.msra.mxu0 %v10658_v13  ;;  %3999 = vmatpush1.bf16.msra.mxu1 %v10661_v15  ;;  %v10753_v13 = vld [vmem:[%s15042_s4 + $0x3c8] ss:$16 sps:$4 sm:$0xff]   ;;  %v10758_v15 = vld [vmem:[%s15042_s4 + $0x3e4] ss:$16 sps:$4 sm:$0xff]  }
 0x144   : > { %3845 = vmatprep.subr.bf16.mxu0 %v10668_v16  ;;  %4009 = vmatprep.subr.bf16.mxu1 %v10671_v17  ;;  %v10761_v16 = vld [vmem:[%s15042_s4 + $0x3ec] ss:$16 sps:$4 sm:$0xff]   ;;  %v10756_v17 = vld [vmem:[%s15042_s4 + $0x3e0] ss:$16 sps:$4 sm:$0xff]  }
 0x146   : > { %3837 = vmatmul.mubr.bf16.vlgmr.msra.gmra.mrb[0].mxu0 %v8730_v19  ;;  %4001 = vmatmul.mubr.bf16.vlgmr.msra.gmra.mrb[0].mxu1 %v8730_v19  ;;  %v10759_v19 = vld [vmem:[%s15042_s4 + $0x3e8] ss:$16 sps:$4 sm:$0xff]  }
 0x147   : > { %3846 = vmatpush1.bf16.msra.mxu0 %v10666_v14  ;;  %4010 = vmatpush1.bf16.msra.mxu1 %v10669_v20  ;;  %v10766_v14 = vld [vmem:[%s15042_s4 + $0x404] ss:$16 sps:$4 sm:$0xff]   ;;  %v10769_v20 = vld [vmem:[%s15042_s4 + $0x40c] ss:$16 sps:$4 sm:$0xff]  }
 0x148   : > { %3847 = vmatprep.subr.bf16.mxu0 %v10674_v21  ;;  %4011 = vmatprep.subr.bf16.mxu1 %v10677_v11  ;;  %v13010_v21 = vld [vmem:[%s12600_s28 + $0x10] sm:$0xff]  ;;  %v8732_v11 = vcombine.low %v12811_v18, %v12811_v18  ;;  %v10775_v18 = vld [vmem:[%s15042_s4 + $0x42c] ss:$16 sps:$4 sm:$0xff]  }
 0x149   : > { %3877 = vmatprep.mubr.bf16.mxu0 %v8733_v22  ;;  %4041 = vmatprep.mubr.bf16.mxu1 %v8733_v22  ;;  %v10764_v22 = vld [vmem:[%s15042_s4 + $0x400] ss:$16 sps:$4 sm:$0xff]  }
 0x14b   : > { %3848 = vmatpush1.bf16.msra.mxu0 %v10672_v23  ;;  %4012 = vmatpush1.bf16.msra.mxu1 %v10675_v24  ;;  %v10767_v23 = vld [vmem:[%s15042_s4 + $0x408] ss:$16 sps:$4 sm:$0xff]   ;;  %v10772_v24 = vld [vmem:[%s15042_s4 + $0x424] ss:$16 sps:$4 sm:$0xff]  }
 0x14c   : > { %3849 = vmatprep.subr.bf16.mxu0 %v10680_v25  ;;  %4013 = vmatprep.subr.bf16.mxu1 %v10683_v26  ;;  %v8735_v25 = vcombine.high %v13010_v21, %v13010_v21  ;;  %v10770_v26 = vld [vmem:[%s15042_s4 + $0x420] ss:$16 sps:$4 sm:$0xff]  }
 0x14f   : > { %3850 = vmatpush1.bf16.msra.mxu0 %v10678_v27  ;;  %4014 = vmatpush1.bf16.msra.mxu1 %v10681_v28  ;;  %v10773_v27 = vld [vmem:[%s15042_s4 + $0x428] ss:$16 sps:$4 sm:$0xff]   ;;  %v10778_v28 = vld [vmem:[%s15042_s4 + $0x444] ss:$16 sps:$4 sm:$0xff]  }
 0x150   : > { %3851 = vmatprep.subr.bf16.mxu0 %v10686_v29  ;;  %4015 = vmatprep.subr.bf16.mxu1 %v10689_v30  ;;  %v10781_v29 = vld [vmem:[%s15042_s4 + $0x44c] ss:$16 sps:$4 sm:$0xff]   ;;  %v10776_v30 = vld [vmem:[%s15042_s4 + $0x440] ss:$16 sps:$4 sm:$0xff]  }
 0x153   : > { %3852 = vmatpush1.bf16.msra.mxu0 %v10684_v31  ;;  %4016 = vmatpush1.bf16.msra.mxu1 %v10687_v32  ;;  %v10779_v31 = vld [vmem:[%s15042_s4 + $0x448] ss:$16 sps:$4 sm:$0xff]   ;;  %v10784_v32 = vld [vmem:[%s15042_s4 + $0x464] ss:$16 sps:$4 sm:$0xff]  }
 0x154   : > { %3853 = vmatprep.subr.bf16.mxu0 %v10692_v33  ;;  %4017 = vmatprep.subr.bf16.mxu1 %v10695_v34  ;;  %v10787_v33 = vld [vmem:[%s15042_s4 + $0x46c] ss:$16 sps:$4 sm:$0xff]   ;;  %v10782_v34 = vld [vmem:[%s15042_s4 + $0x460] ss:$16 sps:$4 sm:$0xff]  }
 0x157   : > { %3854 = vmatpush1.bf16.msra.mxu0 %v10690_v35  ;;  %4018 = vmatpush1.bf16.msra.mxu1 %v10693_v36  ;;  %v10785_v35 = vld [vmem:[%s15042_s4 + $0x468] ss:$16 sps:$4 sm:$0xff]   ;;  %v10790_v36 = vld [vmem:[%s15042_s4 + $0x484] ss:$16 sps:$4 sm:$0xff]  }
 0x158   : > { %3855 = vmatprep.subr.bf16.mxu0 %v10698_v37  ;;  %4019 = vmatprep.subr.bf16.mxu1 %v10701_v38  ;;  %v10793_v37 = vld [vmem:[%s15042_s4 + $0x48c] ss:$16 sps:$4 sm:$0xff]   ;;  %v10788_v38 = vld [vmem:[%s15042_s4 + $0x480] ss:$16 sps:$4 sm:$0xff]  }
 0x15b   : > { %3856 = vmatpush1.bf16.msra.mxu0 %v10696_v39  ;;  %4020 = vmatpush1.bf16.msra.mxu1 %v10699_v40  ;;  %v10791_v39 = vld [vmem:[%s15042_s4 + $0x488] ss:$16 sps:$4 sm:$0xff]   ;;  %v10796_v40 = vld [vmem:[%s15042_s4 + $0x4a4] ss:$16 sps:$4 sm:$0xff]  }
 0x15c   : > { %3857 = vmatprep.subr.bf16.mxu0 %v10704_v41  ;;  %4021 = vmatprep.subr.bf16.mxu1 %v10707_v42  ;;  %v10799_v41 = vld [vmem:[%s15042_s4 + $0x4ac] ss:$16 sps:$4 sm:$0xff]   ;;  %v10794_v42 = vld [vmem:[%s15042_s4 + $0x4a0] ss:$16 sps:$4 sm:$0xff]  }
 0x15f   : > { %3858 = vmatpush1.bf16.msra.mxu0 %v10702_v43  ;;  %4022 = vmatpush1.bf16.msra.mxu1 %v10705_v44  ;;  %v10797_v43 = vld [vmem:[%s15042_s4 + $0x4a8] ss:$16 sps:$4 sm:$0xff]   ;;  %v10802_v44 = vld [vmem:[%s15042_s4 + $0x4c4] ss:$16 sps:$4 sm:$0xff]  }
 0x160   : > { %3859 = vmatprep.subr.bf16.mxu0 %v10710_v45  ;;  %4023 = vmatprep.subr.bf16.mxu1 %v10713_v46  ;;  %v10805_v45 = vld [vmem:[%s15042_s4 + $0x4cc] ss:$16 sps:$4 sm:$0xff]   ;;  %v10800_v46 = vld [vmem:[%s15042_s4 + $0x4c0] ss:$16 sps:$4 sm:$0xff]  }
 0x163   : > { %3860 = vmatpush1.bf16.msra.mxu0 %v10708_v47  ;;  %4024 = vmatpush1.bf16.msra.mxu1 %v10711_v48  ;;  %v10803_v47 = vld [vmem:[%s15042_s4 + $0x4c8] ss:$16 sps:$4 sm:$0xff]   ;;  %v10808_v48 = vld [vmem:[%s15042_s4 + $0x4e4] ss:$16 sps:$4 sm:$0xff]  }
 0x164   : > { %3861 = vmatprep.subr.bf16.mxu0 %v10716_v49  ;;  %4025 = vmatprep.subr.bf16.mxu1 %v10719_v50  ;;  %v10811_v49 = vld [vmem:[%s15042_s4 + $0x4ec] ss:$16 sps:$4 sm:$0xff]   ;;  %v10806_v50 = vld [vmem:[%s15042_s4 + $0x4e0] ss:$16 sps:$4 sm:$0xff]  }
 0x167   : > { %3862 = vmatpush1.bf16.msra.mxu0 %v10714_v51  ;;  %4026 = vmatpush1.bf16.msra.mxu1 %v10717_v52  ;;  %v10809_v51 = vld [vmem:[%s15042_s4 + $0x4e8] ss:$16 sps:$4 sm:$0xff]   ;;  %v10814_v52 = vld [vmem:[%s15042_s4 + $0x504] ss:$16 sps:$4 sm:$0xff]  }
 0x168   : > { %3863 = vmatprep.subr.bf16.mxu0 %v10722_v53  ;;  %4027 = vmatprep.subr.bf16.mxu1 %v10725_v54  ;;  %v10817_v53 = vld [vmem:[%s15042_s4 + $0x50c] ss:$16 sps:$4 sm:$0xff]   ;;  %v10812_v54 = vld [vmem:[%s15042_s4 + $0x500] ss:$16 sps:$4 sm:$0xff]  }
 0x16b   : > { %3864 = vmatpush1.bf16.msra.mxu0 %v10720_v55  ;;  %4028 = vmatpush1.bf16.msra.mxu1 %v10723_v56  ;;  %v10815_v55 = vld [vmem:[%s15042_s4 + $0x508] ss:$16 sps:$4 sm:$0xff]   ;;  %v10820_v56 = vld [vmem:[%s15042_s4 + $0x524] ss:$16 sps:$4 sm:$0xff]  }
 0x16c   : > { %3865 = vmatprep.subr.bf16.mxu0 %v10728_v57  ;;  %4029 = vmatprep.subr.bf16.mxu1 %v10731_v58  ;;  %v10823_v57 = vld [vmem:[%s15042_s4 + $0x52c] ss:$16 sps:$4 sm:$0xff]   ;;  %v10818_v58 = vld [vmem:[%s15042_s4 + $0x520] ss:$16 sps:$4 sm:$0xff]  }
 0x16f   : > { %3866 = vmatpush1.bf16.msra.mxu0 %v10726_v59  ;;  %4030 = vmatpush1.bf16.msra.mxu1 %v10729_v60  ;;  %v10821_v59 = vld [vmem:[%s15042_s4 + $0x528] ss:$16 sps:$4 sm:$0xff]   ;;  %v10826_v60 = vld [vmem:[%s15042_s4 + $0x544] ss:$16 sps:$4 sm:$0xff]  }
 0x170   : > { %3867 = vmatprep.subr.bf16.mxu0 %v10734_v61  ;;  %4031 = vmatprep.subr.bf16.mxu1 %v10737_v62  ;;  %v10829_v61 = vld [vmem:[%s15042_s4 + $0x54c] ss:$16 sps:$4 sm:$0xff]   ;;  %v10824_v62 = vld [vmem:[%s15042_s4 + $0x540] ss:$16 sps:$4 sm:$0xff]  }
 0x173   : > { %3868 = vmatpush1.bf16.msra.mxu0 %v10732_v63  ;;  %4032 = vmatpush1.bf16.msra.mxu1 %v10735_v0  ;;  %v10827_v63 = vld [vmem:[%s15042_s4 + $0x548] ss:$16 sps:$4 sm:$0xff]   ;;  %v10832_v0 = vld [vmem:[%s15042_s4 + $0x564] ss:$16 sps:$4 sm:$0xff]  }
 0x174   : > { %3869 = vmatprep.subr.bf16.mxu0 %v10740_v1  ;;  %4033 = vmatprep.subr.bf16.mxu1 %v10743_v2  ;;  %v10835_v1 = vld [vmem:[%s15042_s4 + $0x56c] ss:$16 sps:$4 sm:$0xff]   ;;  %v10830_v2 = vld [vmem:[%s15042_s4 + $0x560] ss:$16 sps:$4 sm:$0xff]  }
 0x177   : > { %3870 = vmatpush1.bf16.msra.mxu0 %v10738_v3  ;;  %4034 = vmatpush1.bf16.msra.mxu1 %v10741_v4  ;;  %v10833_v3 = vld [vmem:[%s15042_s4 + $0x568] ss:$16 sps:$4 sm:$0xff]   ;;  %v10838_v4 = vld [vmem:[%s15042_s4 + $0x584] ss:$16 sps:$4 sm:$0xff]  }
 0x178   : > { %3871 = vmatprep.subr.bf16.mxu0 %v10746_v5  ;;  %4035 = vmatprep.subr.bf16.mxu1 %v10749_v6  ;;  %v10841_v5 = vld [vmem:[%s15042_s4 + $0x58c] ss:$16 sps:$4 sm:$0xff]   ;;  %v10836_v6 = vld [vmem:[%s15042_s4 + $0x580] ss:$16 sps:$4 sm:$0xff]  }
 0x17b   : > { %3872 = vmatpush1.bf16.msra.mxu0 %v10744_v7  ;;  %4036 = vmatpush1.bf16.msra.mxu1 %v10747_v8  ;;  %v10839_v7 = vld [vmem:[%s15042_s4 + $0x588] ss:$16 sps:$4 sm:$0xff]   ;;  %v10844_v8 = vld [vmem:[%s15042_s4 + $0x5a4] ss:$16 sps:$4 sm:$0xff]  }
 0x17c   : > { %3873 = vmatprep.subr.bf16.mxu0 %v10752_v9  ;;  %4037 = vmatprep.subr.bf16.mxu1 %v10755_v10  ;;  %v10847_v9 = vld [vmem:[%s15042_s4 + $0x5ac] ss:$16 sps:$4 sm:$0xff]   ;;  %v10842_v10 = vld [vmem:[%s15042_s4 + $0x5a0] ss:$16 sps:$4 sm:$0xff]  }
 0x17f   : > { %3874 = vmatpush1.bf16.msra.mxu0 %v10750_v12  ;;  %4038 = vmatpush1.bf16.msra.mxu1 %v10753_v13  ;;  %v10845_v12 = vld [vmem:[%s15042_s4 + $0x5a8] ss:$16 sps:$4 sm:$0xff]   ;;  %v10850_v13 = vld [vmem:[%s15042_s4 + $0x5c4] ss:$16 sps:$4 sm:$0xff]  }
 0x180   : > { %3875 = vmatprep.subr.bf16.mxu0 %v10758_v15  ;;  %4039 = vmatprep.subr.bf16.mxu1 %v10761_v16  ;;  %v10853_v15 = vld [vmem:[%s15042_s4 + $0x5cc] ss:$16 sps:$4 sm:$0xff]   ;;  %v10848_v16 = vld [vmem:[%s15042_s4 + $0x5c0] ss:$16 sps:$4 sm:$0xff]  }
 0x183   : > { %3876 = vmatpush1.bf16.msra.mxu0 %v10756_v17  ;;  %4040 = vmatpush1.bf16.msra.mxu1 %v10759_v19  ;;  %v10851_v17 = vld [vmem:[%s15042_s4 + $0x5c8] ss:$16 sps:$4 sm:$0xff]   ;;  %v10856_v19 = vld [vmem:[%s15042_s4 + $0x5e4] ss:$16 sps:$4 sm:$0xff]  }
 0x184   : > { %3886 = vmatprep.subr.bf16.mxu0 %v10766_v14  ;;  %4050 = vmatprep.subr.bf16.mxu1 %v10769_v20  ;;  %v10859_v14 = vld [vmem:[%s15042_s4 + $0x5ec] ss:$16 sps:$4 sm:$0xff]   ;;  %v10854_v20 = vld [vmem:[%s15042_s4 + $0x5e0] ss:$16 sps:$4 sm:$0xff]  }
 0x186   : > { %3878 = vmatmul.mubr.bf16.vlgmr.msra.gmra.mrb[0].mxu0 %v8732_v11  ;;  %4042 = vmatmul.mubr.bf16.vlgmr.msra.gmra.mrb[0].mxu1 %v8732_v11  ;;  %v10857_v11 = vld [vmem:[%s15042_s4 + $0x5e8] ss:$16 sps:$4 sm:$0xff]  }
 0x187   : > { %3887 = vmatpush1.bf16.msra.mxu0 %v10764_v22  ;;  %4051 = vmatpush1.bf16.msra.mxu1 %v10767_v23  ;;  %v10864_v22 = vld [vmem:[%s15042_s4 + $0x604] ss:$16 sps:$4 sm:$0xff]   ;;  %v10867_v23 = vld [vmem:[%s15042_s4 + $0x60c] ss:$16 sps:$4 sm:$0xff]  }
 0x188   : > { %3888 = vmatprep.subr.bf16.mxu0 %v10772_v24  ;;  %4052 = vmatprep.subr.bf16.mxu1 %v10775_v18  ;;  %v13209_v24 = vld [vmem:[%s12600_s28 + $0x18] sm:$0xff]  ;;  %v8734_v18 = vcombine.low %v13010_v21, %v13010_v21 }
 0x189   : > { %3918 = vmatprep.mubr.bf16.mxu0 %v8735_v25  ;;  %4082 = vmatprep.mubr.bf16.mxu1 %v8735_v25  ;;  %v10862_v25 = vld [vmem:[%s15042_s4 + $0x600] ss:$16 sps:$4 sm:$0xff]   ;;  %v10873_v21 = vld [vmem:[%s15042_s4 + $0x62c] ss:$16 sps:$4 sm:$0xff]  }
 0x18b   : > { %3889 = vmatpush1.bf16.msra.mxu0 %v10770_v26  ;;  %4053 = vmatpush1.bf16.msra.mxu1 %v10773_v27  ;;  %v10865_v26 = vld [vmem:[%s15042_s4 + $0x608] ss:$16 sps:$4 sm:$0xff]   ;;  %v10870_v27 = vld [vmem:[%s15042_s4 + $0x624] ss:$16 sps:$4 sm:$0xff]  }
 0x18c   : > { %3890 = vmatprep.subr.bf16.mxu0 %v10778_v28  ;;  %4054 = vmatprep.subr.bf16.mxu1 %v10781_v29  ;;  %v8737_v28 = vcombine.high %v13209_v24, %v13209_v24  ;;  %v10868_v29 = vld [vmem:[%s15042_s4 + $0x620] ss:$16 sps:$4 sm:$0xff]  }
 0x18f   : > { %3891 = vmatpush1.bf16.msra.mxu0 %v10776_v30  ;;  %4055 = vmatpush1.bf16.msra.mxu1 %v10779_v31  ;;  %v10871_v30 = vld [vmem:[%s15042_s4 + $0x628] ss:$16 sps:$4 sm:$0xff]   ;;  %v10876_v31 = vld [vmem:[%s15042_s4 + $0x644] ss:$16 sps:$4 sm:$0xff]  }
 0x190   : > { %3892 = vmatprep.subr.bf16.mxu0 %v10784_v32  ;;  %4056 = vmatprep.subr.bf16.mxu1 %v10787_v33  ;;  %v10879_v32 = vld [vmem:[%s15042_s4 + $0x64c] ss:$16 sps:$4 sm:$0xff]   ;;  %v10874_v33 = vld [vmem:[%s15042_s4 + $0x640] ss:$16 sps:$4 sm:$0xff]  }
 0x193   : > { %3893 = vmatpush1.bf16.msra.mxu0 %v10782_v34  ;;  %4057 = vmatpush1.bf16.msra.mxu1 %v10785_v35  ;;  %v10877_v34 = vld [vmem:[%s15042_s4 + $0x648] ss:$16 sps:$4 sm:$0xff]   ;;  %v10882_v35 = vld [vmem:[%s15042_s4 + $0x664] ss:$16 sps:$4 sm:$0xff]  }
 0x194   : > { %3894 = vmatprep.subr.bf16.mxu0 %v10790_v36  ;;  %4058 = vmatprep.subr.bf16.mxu1 %v10793_v37  ;;  %v10885_v36 = vld [vmem:[%s15042_s4 + $0x66c] ss:$16 sps:$4 sm:$0xff]   ;;  %v10880_v37 = vld [vmem:[%s15042_s4 + $0x660] ss:$16 sps:$4 sm:$0xff]  }
 0x197   : > { %3895 = vmatpush1.bf16.msra.mxu0 %v10788_v38  ;;  %4059 = vmatpush1.bf16.msra.mxu1 %v10791_v39  ;;  %v10883_v38 = vld [vmem:[%s15042_s4 + $0x668] ss:$16 sps:$4 sm:$0xff]   ;;  %v10888_v39 = vld [vmem:[%s15042_s4 + $0x684] ss:$16 sps:$4 sm:$0xff]  }
 0x198   : > { %3896 = vmatprep.subr.bf16.mxu0 %v10796_v40  ;;  %4060 = vmatprep.subr.bf16.mxu1 %v10799_v41  ;;  %v10891_v40 = vld [vmem:[%s15042_s4 + $0x68c] ss:$16 sps:$4 sm:$0xff]   ;;  %v10886_v41 = vld [vmem:[%s15042_s4 + $0x680] ss:$16 sps:$4 sm:$0xff]  }
 0x19b   : > { %3897 = vmatpush1.bf16.msra.mxu0 %v10794_v42  ;;  %4061 = vmatpush1.bf16.msra.mxu1 %v10797_v43  ;;  %v10889_v42 = vld [vmem:[%s15042_s4 + $0x688] ss:$16 sps:$4 sm:$0xff]   ;;  %v10894_v43 = vld [vmem:[%s15042_s4 + $0x6a4] ss:$16 sps:$4 sm:$0xff]  }
 0x19c   : > { %3898 = vmatprep.subr.bf16.mxu0 %v10802_v44  ;;  %4062 = vmatprep.subr.bf16.mxu1 %v10805_v45  ;;  %v10897_v44 = vld [vmem:[%s15042_s4 + $0x6ac] ss:$16 sps:$4 sm:$0xff]   ;;  %v10892_v45 = vld [vmem:[%s15042_s4 + $0x6a0] ss:$16 sps:$4 sm:$0xff]  }
 0x19f   : > { %3899 = vmatpush1.bf16.msra.mxu0 %v10800_v46  ;;  %4063 = vmatpush1.bf16.msra.mxu1 %v10803_v47  ;;  %v10895_v46 = vld [vmem:[%s15042_s4 + $0x6a8] ss:$16 sps:$4 sm:$0xff]   ;;  %v10900_v47 = vld [vmem:[%s15042_s4 + $0x6c4] ss:$16 sps:$4 sm:$0xff]  }
 0x1a0   : > { %3900 = vmatprep.subr.bf16.mxu0 %v10808_v48  ;;  %4064 = vmatprep.subr.bf16.mxu1 %v10811_v49  ;;  %v10903_v48 = vld [vmem:[%s15042_s4 + $0x6cc] ss:$16 sps:$4 sm:$0xff]   ;;  %v10898_v49 = vld [vmem:[%s15042_s4 + $0x6c0] ss:$16 sps:$4 sm:$0xff]  }
 0x1a3   : > { %3901 = vmatpush1.bf16.msra.mxu0 %v10806_v50  ;;  %4065 = vmatpush1.bf16.msra.mxu1 %v10809_v51  ;;  %v10901_v50 = vld [vmem:[%s15042_s4 + $0x6c8] ss:$16 sps:$4 sm:$0xff]   ;;  %v10906_v51 = vld [vmem:[%s15042_s4 + $0x6e4] ss:$16 sps:$4 sm:$0xff]  }
 0x1a4   : > { %3902 = vmatprep.subr.bf16.mxu0 %v10814_v52  ;;  %4066 = vmatprep.subr.bf16.mxu1 %v10817_v53  ;;  %v10909_v52 = vld [vmem:[%s15042_s4 + $0x6ec] ss:$16 sps:$4 sm:$0xff]   ;;  %v10904_v53 = vld [vmem:[%s15042_s4 + $0x6e0] ss:$16 sps:$4 sm:$0xff]  }
 0x1a7   : > { %3903 = vmatpush1.bf16.msra.mxu0 %v10812_v54  ;;  %4067 = vmatpush1.bf16.msra.mxu1 %v10815_v55  ;;  %v10907_v54 = vld [vmem:[%s15042_s4 + $0x6e8] ss:$16 sps:$4 sm:$0xff]   ;;  %v10912_v55 = vld [vmem:[%s15042_s4 + $0x704] ss:$16 sps:$4 sm:$0xff]  }
 0x1a8   : > { %3904 = vmatprep.subr.bf16.mxu0 %v10820_v56  ;;  %4068 = vmatprep.subr.bf16.mxu1 %v10823_v57  ;;  %v10915_v56 = vld [vmem:[%s15042_s4 + $0x70c] ss:$16 sps:$4 sm:$0xff]   ;;  %v10910_v57 = vld [vmem:[%s15042_s4 + $0x700] ss:$16 sps:$4 sm:$0xff]  }
 0x1ab   : > { %3905 = vmatpush1.bf16.msra.mxu0 %v10818_v58  ;;  %4069 = vmatpush1.bf16.msra.mxu1 %v10821_v59  ;;  %v10913_v58 = vld [vmem:[%s15042_s4 + $0x708] ss:$16 sps:$4 sm:$0xff]   ;;  %v10918_v59 = vld [vmem:[%s15042_s4 + $0x724] ss:$16 sps:$4 sm:$0xff]  }
 0x1ac   : > { %3906 = vmatprep.subr.bf16.mxu0 %v10826_v60  ;;  %4070 = vmatprep.subr.bf16.mxu1 %v10829_v61  ;;  %v10921_v60 = vld [vmem:[%s15042_s4 + $0x72c] ss:$16 sps:$4 sm:$0xff]   ;;  %v10916_v61 = vld [vmem:[%s15042_s4 + $0x720] ss:$16 sps:$4 sm:$0xff]  }
 0x1af   : > { %3907 = vmatpush1.bf16.msra.mxu0 %v10824_v62  ;;  %4071 = vmatpush1.bf16.msra.mxu1 %v10827_v63  ;;  %v10919_v62 = vld [vmem:[%s15042_s4 + $0x728] ss:$16 sps:$4 sm:$0xff]   ;;  %v10924_v63 = vld [vmem:[%s15042_s4 + $0x744] ss:$16 sps:$4 sm:$0xff]  }
 0x1b0   : > { %3908 = vmatprep.subr.bf16.mxu0 %v10832_v0  ;;  %4072 = vmatprep.subr.bf16.mxu1 %v10835_v1  ;;  %v10927_v0 = vld [vmem:[%s15042_s4 + $0x74c] ss:$16 sps:$4 sm:$0xff]   ;;  %v10922_v1 = vld [vmem:[%s15042_s4 + $0x740] ss:$16 sps:$4 sm:$0xff]  }
 0x1b3   : > { %3909 = vmatpush1.bf16.msra.mxu0 %v10830_v2  ;;  %4073 = vmatpush1.bf16.msra.mxu1 %v10833_v3  ;;  %v10925_v2 = vld [vmem:[%s15042_s4 + $0x748] ss:$16 sps:$4 sm:$0xff]   ;;  %v10930_v3 = vld [vmem:[%s15042_s4 + $0x764] ss:$16 sps:$4 sm:$0xff]  }
 0x1b4   : > { %3910 = vmatprep.subr.bf16.mxu0 %v10838_v4  ;;  %4074 = vmatprep.subr.bf16.mxu1 %v10841_v5  ;;  %v10933_v4 = vld [vmem:[%s15042_s4 + $0x76c] ss:$16 sps:$4 sm:$0xff]   ;;  %v10928_v5 = vld [vmem:[%s15042_s4 + $0x760] ss:$16 sps:$4 sm:$0xff]  }
 0x1b7   : > { %3911 = vmatpush1.bf16.msra.mxu0 %v10836_v6  ;;  %4075 = vmatpush1.bf16.msra.mxu1 %v10839_v7  ;;  %v10931_v6 = vld [vmem:[%s15042_s4 + $0x768] ss:$16 sps:$4 sm:$0xff]   ;;  %v10936_v7 = vld [vmem:[%s15042_s4 + $0x784] ss:$16 sps:$4 sm:$0xff]  }
 0x1b8   : > { %3912 = vmatprep.subr.bf16.mxu0 %v10844_v8  ;;  %4076 = vmatprep.subr.bf16.mxu1 %v10847_v9  ;;  %v10939_v8 = vld [vmem:[%s15042_s4 + $0x78c] ss:$16 sps:$4 sm:$0xff]   ;;  %v10934_v9 = vld [vmem:[%s15042_s4 + $0x780] ss:$16 sps:$4 sm:$0xff]  }
 0x1bb   : > { %3913 = vmatpush1.bf16.msra.mxu0 %v10842_v10  ;;  %4077 = vmatpush1.bf16.msra.mxu1 %v10845_v12  ;;  %v10937_v10 = vld [vmem:[%s15042_s4 + $0x788] ss:$16 sps:$4 sm:$0xff]   ;;  %v10942_v12 = vld [vmem:[%s15042_s4 + $0x7a4] ss:$16 sps:$4 sm:$0xff]  }
 0x1bc   : > { %3914 = vmatprep.subr.bf16.mxu0 %v10850_v13  ;;  %4078 = vmatprep.subr.bf16.mxu1 %v10853_v15  ;;  %v10945_v13 = vld [vmem:[%s15042_s4 + $0x7ac] ss:$16 sps:$4 sm:$0xff]   ;;  %v10940_v15 = vld [vmem:[%s15042_s4 + $0x7a0] ss:$16 sps:$4 sm:$0xff]  }
 0x1bf   : > { %3915 = vmatpush1.bf16.msra.mxu0 %v10848_v16  ;;  %4079 = vmatpush1.bf16.msra.mxu1 %v10851_v17  ;;  %v10943_v16 = vld [vmem:[%s15042_s4 + $0x7a8] ss:$16 sps:$4 sm:$0xff]   ;;  %v10948_v17 = vld [vmem:[%s15042_s4 + $0x7c4] ss:$16 sps:$4 sm:$0xff]  }
 0x1c0   : > { %3916 = vmatprep.subr.bf16.mxu0 %v10856_v19  ;;  %4080 = vmatprep.subr.bf16.mxu1 %v10859_v14  ;;  %v10951_v19 = vld [vmem:[%s15042_s4 + $0x7cc] ss:$16 sps:$4 sm:$0xff]   ;;  %v10946_v14 = vld [vmem:[%s15042_s4 + $0x7c0] ss:$16 sps:$4 sm:$0xff]  }
 0x1c3   : > { %3917 = vmatpush1.bf16.msra.mxu0 %v10854_v20  ;;  %4081 = vmatpush1.bf16.msra.mxu1 %v10857_v11  ;;  %v10949_v20 = vld [vmem:[%s15042_s4 + $0x7c8] ss:$16 sps:$4 sm:$0xff]   ;;  %v10954_v11 = vld [vmem:[%s15042_s4 + $0x7e4] ss:$16 sps:$4 sm:$0xff]  }
 0x1c4   : > { %3927 = vmatprep.subr.bf16.mxu0 %v10864_v22  ;;  %4091 = vmatprep.subr.bf16.mxu1 %v10867_v23  ;;  %v10957_v22 = vld [vmem:[%s15042_s4 + $0x7ec] ss:$16 sps:$4 sm:$0xff]   ;;  %v10952_v23 = vld [vmem:[%s15042_s4 + $0x7e0] ss:$16 sps:$4 sm:$0xff]  }
 0x1c6   : > { %3919 = vmatmul.mubr.bf16.vlgmr.msra.gmra.mrb[0].mxu0 %v8734_v18  ;;  %4083 = vmatmul.mubr.bf16.vlgmr.msra.gmra.mrb[0].mxu1 %v8734_v18  ;;  %v10955_v18 = vld [vmem:[%s15042_s4 + $0x7e8] ss:$16 sps:$4 sm:$0xff]  }
 0x1c7   : > { %3928 = vmatpush1.bf16.msra.mxu0 %v10862_v25  ;;  %4092 = vmatpush1.bf16.msra.mxu1 %v10865_v26  ;;  %v10962_v25 = vld [vmem:[%s15042_s4 + $0x1004] ss:$16 sps:$4 sm:$0xff]   ;;  %v10965_v26 = vld [vmem:[%s15042_s4 + $0x100c] ss:$16 sps:$4 sm:$0xff]  }
 0x1c8   : > { %3929 = vmatprep.subr.bf16.mxu0 %v10870_v27  ;;  %4093 = vmatprep.subr.bf16.mxu1 %v10873_v21  ;;  %v13419_v27 = vld [vmem:[%s13407_s16] sm:$0xff]  ;;  %v8736_v21 = vcombine.low %v13209_v24, %v13209_v24  ;;  %v10971_v24 = vld [vmem:[%s15042_s4 + $0x102c] ss:$16 sps:$4 sm:$0xff]  }
 0x1c9   : > { %3959 = vmatprep.mubr.bf16.mxu0 %v8737_v28  ;;  %4123 = vmatprep.mubr.bf16.mxu1 %v8737_v28  ;;  %v10960_v28 = vld [vmem:[%s15042_s4 + $0x1000] ss:$16 sps:$4 sm:$0xff]  }
 0x1cb   : > { %3930 = vmatpush1.bf16.msra.mxu0 %v10868_v29  ;;  %4094 = vmatpush1.bf16.msra.mxu1 %v10871_v30  ;;  %v10963_v29 = vld [vmem:[%s15042_s4 + $0x1008] ss:$16 sps:$4 sm:$0xff]   ;;  %v10968_v30 = vld [vmem:[%s15042_s4 + $0x1024] ss:$16 sps:$4 sm:$0xff]  }
 0x1cc   : > { %3931 = vmatprep.subr.bf16.mxu0 %v10876_v31  ;;  %4095 = vmatprep.subr.bf16.mxu1 %v10879_v32  ;;  %v9251_v31 = vcombine.high %v13419_v27, %v13419_v27  ;;  %v10966_v32 = vld [vmem:[%s15042_s4 + $0x1020] ss:$16 sps:$4 sm:$0xff]  }
 0x1cf   : > { %3932 = vmatpush1.bf16.msra.mxu0 %v10874_v33  ;;  %4096 = vmatpush1.bf16.msra.mxu1 %v10877_v34  ;;  %v10969_v33 = vld [vmem:[%s15042_s4 + $0x1028] ss:$16 sps:$4 sm:$0xff]   ;;  %v10974_v34 = vld [vmem:[%s15042_s4 + $0x1044] ss:$16 sps:$4 sm:$0xff]  }
 0x1d0   : > { %3933 = vmatprep.subr.bf16.mxu0 %v10882_v35  ;;  %4097 = vmatprep.subr.bf16.mxu1 %v10885_v36  ;;  %v10977_v35 = vld [vmem:[%s15042_s4 + $0x104c] ss:$16 sps:$4 sm:$0xff]   ;;  %v10972_v36 = vld [vmem:[%s15042_s4 + $0x1040] ss:$16 sps:$4 sm:$0xff]  }
 0x1d3   : > { %3934 = vmatpush1.bf16.msra.mxu0 %v10880_v37  ;;  %4098 = vmatpush1.bf16.msra.mxu1 %v10883_v38  ;;  %v10975_v37 = vld [vmem:[%s15042_s4 + $0x1048] ss:$16 sps:$4 sm:$0xff]   ;;  %v10980_v38 = vld [vmem:[%s15042_s4 + $0x1064] ss:$16 sps:$4 sm:$0xff]  }
 0x1d4   : > { %3935 = vmatprep.subr.bf16.mxu0 %v10888_v39  ;;  %4099 = vmatprep.subr.bf16.mxu1 %v10891_v40  ;;  %v10983_v39 = vld [vmem:[%s15042_s4 + $0x106c] ss:$16 sps:$4 sm:$0xff]   ;;  %v10978_v40 = vld [vmem:[%s15042_s4 + $0x1060] ss:$16 sps:$4 sm:$0xff]  }
 0x1d7   : > { %3936 = vmatpush1.bf16.msra.mxu0 %v10886_v41  ;;  %4100 = vmatpush1.bf16.msra.mxu1 %v10889_v42  ;;  %v10981_v41 = vld [vmem:[%s15042_s4 + $0x1068] ss:$16 sps:$4 sm:$0xff]   ;;  %v10986_v42 = vld [vmem:[%s15042_s4 + $0x1084] ss:$16 sps:$4 sm:$0xff]  }
 0x1d8   : > { %3937 = vmatprep.subr.bf16.mxu0 %v10894_v43  ;;  %4101 = vmatprep.subr.bf16.mxu1 %v10897_v44  ;;  %v10989_v43 = vld [vmem:[%s15042_s4 + $0x108c] ss:$16 sps:$4 sm:$0xff]   ;;  %v10984_v44 = vld [vmem:[%s15042_s4 + $0x1080] ss:$16 sps:$4 sm:$0xff]  }
 0x1db   : > { %3938 = vmatpush1.bf16.msra.mxu0 %v10892_v45  ;;  %4102 = vmatpush1.bf16.msra.mxu1 %v10895_v46  ;;  %v10987_v45 = vld [vmem:[%s15042_s4 + $0x1088] ss:$16 sps:$4 sm:$0xff]   ;;  %v10992_v46 = vld [vmem:[%s15042_s4 + $0x10a4] ss:$16 sps:$4 sm:$0xff]  }
 0x1dc   : > { %3939 = vmatprep.subr.bf16.mxu0 %v10900_v47  ;;  %4103 = vmatprep.subr.bf16.mxu1 %v10903_v48  ;;  %v10995_v47 = vld [vmem:[%s15042_s4 + $0x10ac] ss:$16 sps:$4 sm:$0xff]   ;;  %v10990_v48 = vld [vmem:[%s15042_s4 + $0x10a0] ss:$16 sps:$4 sm:$0xff]  }
 0x1df   : > { %3940 = vmatpush1.bf16.msra.mxu0 %v10898_v49  ;;  %4104 = vmatpush1.bf16.msra.mxu1 %v10901_v50  ;;  %v10993_v49 = vld [vmem:[%s15042_s4 + $0x10a8] ss:$16 sps:$4 sm:$0xff]   ;;  %v10998_v50 = vld [vmem:[%s15042_s4 + $0x10c4] ss:$16 sps:$4 sm:$0xff]  }
 0x1e0   : > { %3941 = vmatprep.subr.bf16.mxu0 %v10906_v51  ;;  %4105 = vmatprep.subr.bf16.mxu1 %v10909_v52  ;;  %v11001_v51 = vld [vmem:[%s15042_s4 + $0x10cc] ss:$16 sps:$4 sm:$0xff]   ;;  %v10996_v52 = vld [vmem:[%s15042_s4 + $0x10c0] ss:$16 sps:$4 sm:$0xff]  }
 0x1e3   : > { %3942 = vmatpush1.bf16.msra.mxu0 %v10904_v53  ;;  %4106 = vmatpush1.bf16.msra.mxu1 %v10907_v54  ;;  %v10999_v53 = vld [vmem:[%s15042_s4 + $0x10c8] ss:$16 sps:$4 sm:$0xff]   ;;  %v11004_v54 = vld [vmem:[%s15042_s4 + $0x10e4] ss:$16 sps:$4 sm:$0xff]  }
 0x1e4   : > { %3943 = vmatprep.subr.bf16.mxu0 %v10912_v55  ;;  %4107 = vmatprep.subr.bf16.mxu1 %v10915_v56  ;;  %v11007_v55 = vld [vmem:[%s15042_s4 + $0x10ec] ss:$16 sps:$4 sm:$0xff]   ;;  %v11002_v56 = vld [vmem:[%s15042_s4 + $0x10e0] ss:$16 sps:$4 sm:$0xff]  }
 0x1e7   : > { %3944 = vmatpush1.bf16.msra.mxu0 %v10910_v57  ;;  %4108 = vmatpush1.bf16.msra.mxu1 %v10913_v58  ;;  %v11005_v57 = vld [vmem:[%s15042_s4 + $0x10e8] ss:$16 sps:$4 sm:$0xff]   ;;  %v11010_v58 = vld [vmem:[%s15042_s4 + $0x1104] ss:$16 sps:$4 sm:$0xff]  }
 0x1e8   : > { %3945 = vmatprep.subr.bf16.mxu0 %v10918_v59  ;;  %4109 = vmatprep.subr.bf16.mxu1 %v10921_v60  ;;  %v11013_v59 = vld [vmem:[%s15042_s4 + $0x110c] ss:$16 sps:$4 sm:$0xff]   ;;  %v11008_v60 = vld [vmem:[%s15042_s4 + $0x1100] ss:$16 sps:$4 sm:$0xff]  }
 0x1eb   : > { %3946 = vmatpush1.bf16.msra.mxu0 %v10916_v61  ;;  %4110 = vmatpush1.bf16.msra.mxu1 %v10919_v62  ;;  %v11011_v61 = vld [vmem:[%s15042_s4 + $0x1108] ss:$16 sps:$4 sm:$0xff]   ;;  %v11016_v62 = vld [vmem:[%s15042_s4 + $0x1124] ss:$16 sps:$4 sm:$0xff]  }
 0x1ec   : > { %3947 = vmatprep.subr.bf16.mxu0 %v10924_v63  ;;  %4111 = vmatprep.subr.bf16.mxu1 %v10927_v0  ;;  %v11019_v63 = vld [vmem:[%s15042_s4 + $0x112c] ss:$16 sps:$4 sm:$0xff]   ;;  %v11014_v0 = vld [vmem:[%s15042_s4 + $0x1120] ss:$16 sps:$4 sm:$0xff]  }
 0x1ef   : > { %3948 = vmatpush1.bf16.msra.mxu0 %v10922_v1  ;;  %4112 = vmatpush1.bf16.msra.mxu1 %v10925_v2  ;;  %v11017_v1 = vld [vmem:[%s15042_s4 + $0x1128] ss:$16 sps:$4 sm:$0xff]   ;;  %v11022_v2 = vld [vmem:[%s15042_s4 + $0x1144] ss:$16 sps:$4 sm:$0xff]  }
 0x1f0   : > { %3949 = vmatprep.subr.bf16.mxu0 %v10930_v3  ;;  %4113 = vmatprep.subr.bf16.mxu1 %v10933_v4  ;;  %v11025_v3 = vld [vmem:[%s15042_s4 + $0x114c] ss:$16 sps:$4 sm:$0xff]   ;;  %v11020_v4 = vld [vmem:[%s15042_s4 + $0x1140] ss:$16 sps:$4 sm:$0xff]  }
 0x1f3   : > { %3950 = vmatpush1.bf16.msra.mxu0 %v10928_v5  ;;  %4114 = vmatpush1.bf16.msra.mxu1 %v10931_v6  ;;  %v11023_v5 = vld [vmem:[%s15042_s4 + $0x1148] ss:$16 sps:$4 sm:$0xff]   ;;  %v11028_v6 = vld [vmem:[%s15042_s4 + $0x1164] ss:$16 sps:$4 sm:$0xff]  }
 0x1f4   : > { %3951 = vmatprep.subr.bf16.mxu0 %v10936_v7  ;;  %4115 = vmatprep.subr.bf16.mxu1 %v10939_v8  ;;  %v11031_v7 = vld [vmem:[%s15042_s4 + $0x116c] ss:$16 sps:$4 sm:$0xff]   ;;  %v11026_v8 = vld [vmem:[%s15042_s4 + $0x1160] ss:$16 sps:$4 sm:$0xff]  }
 0x1f7   : > { %3952 = vmatpush1.bf16.msra.mxu0 %v10934_v9  ;;  %4116 = vmatpush1.bf16.msra.mxu1 %v10937_v10  ;;  %v11029_v9 = vld [vmem:[%s15042_s4 + $0x1168] ss:$16 sps:$4 sm:$0xff]   ;;  %v11034_v10 = vld [vmem:[%s15042_s4 + $0x1184] ss:$16 sps:$4 sm:$0xff]  }
 0x1f8   : > { %3953 = vmatprep.subr.bf16.mxu0 %v10942_v12  ;;  %4117 = vmatprep.subr.bf16.mxu1 %v10945_v13  ;;  %v11037_v12 = vld [vmem:[%s15042_s4 + $0x118c] ss:$16 sps:$4 sm:$0xff]   ;;  %v11032_v13 = vld [vmem:[%s15042_s4 + $0x1180] ss:$16 sps:$4 sm:$0xff]  }
 0x1fb   : > { %3954 = vmatpush1.bf16.msra.mxu0 %v10940_v15  ;;  %4118 = vmatpush1.bf16.msra.mxu1 %v10943_v16  ;;  %v11035_v15 = vld [vmem:[%s15042_s4 + $0x1188] ss:$16 sps:$4 sm:$0xff]   ;;  %v11040_v16 = vld [vmem:[%s15042_s4 + $0x11a4] ss:$16 sps:$4 sm:$0xff]  }
 0x1fc   : > { %3955 = vmatprep.subr.bf16.mxu0 %v10948_v17  ;;  %4119 = vmatprep.subr.bf16.mxu1 %v10951_v19  ;;  %v11043_v17 = vld [vmem:[%s15042_s4 + $0x11ac] ss:$16 sps:$4 sm:$0xff]   ;;  %v11038_v19 = vld [vmem:[%s15042_s4 + $0x11a0] ss:$16 sps:$4 sm:$0xff]  }
 0x1ff   : > { %3956 = vmatpush1.bf16.msra.mxu0 %v10946_v14  ;;  %4120 = vmatpush1.bf16.msra.mxu1 %v10949_v20  ;;  %v11041_v14 = vld [vmem:[%s15042_s4 + $0x11a8] ss:$16 sps:$4 sm:$0xff]   ;;  %v11046_v20 = vld [vmem:[%s15042_s4 + $0x11c4] ss:$16 sps:$4 sm:$0xff]  }
 0x200   : > { %3957 = vmatprep.subr.bf16.mxu0 %v10954_v11  ;;  %4121 = vmatprep.subr.bf16.mxu1 %v10957_v22  ;;  %v11049_v11 = vld [vmem:[%s15042_s4 + $0x11cc] ss:$16 sps:$4 sm:$0xff]   ;;  %v11044_v22 = vld [vmem:[%s15042_s4 + $0x11c0] ss:$16 sps:$4 sm:$0xff]  }
 0x203   : > { %3958 = vmatpush1.bf16.msra.mxu0 %v10952_v23  ;;  %4122 = vmatpush1.bf16.msra.mxu1 %v10955_v18  ;;  %v11047_v23 = vld [vmem:[%s15042_s4 + $0x11c8] ss:$16 sps:$4 sm:$0xff]   ;;  %v11052_v18 = vld [vmem:[%s15042_s4 + $0x11e4] ss:$16 sps:$4 sm:$0xff]  }
 0x204   : > { %5701 = vmatprep.subr.bf16.mxu0 %v10962_v25  ;;  %5865 = vmatprep.subr.bf16.mxu1 %v10965_v26  ;;  %v11055_v25 = vld [vmem:[%s15042_s4 + $0x11ec] ss:$16 sps:$4 sm:$0xff]   ;;  %v11050_v26 = vld [vmem:[%s15042_s4 + $0x11e0] ss:$16 sps:$4 sm:$0xff]  }
 0x206   : > { %3960 = vmatmul.mubr.bf16.vlgmr.msra.gmra.mrb[0].mxu0 %v8736_v21  ;;  %4124 = vmatmul.mubr.bf16.vlgmr.msra.gmra.mrb[0].mxu1 %v8736_v21  ;;  %v11053_v21 = vld [vmem:[%s15042_s4 + $0x11e8] ss:$16 sps:$4 sm:$0xff]  }
 0x207   : > { %5702 = vmatpush1.bf16.msra.mxu0 %v10960_v28  ;;  %5866 = vmatpush1.bf16.msra.mxu1 %v10963_v29  ;;  %v11060_v28 = vld [vmem:[%s15042_s4 + $0x1204] ss:$16 sps:$4 sm:$0xff]   ;;  %v11063_v29 = vld [vmem:[%s15042_s4 + $0x120c] ss:$16 sps:$4 sm:$0xff]  }
 0x208   : > { %5703 = vmatprep.subr.bf16.mxu0 %v10968_v30  ;;  %5867 = vmatprep.subr.bf16.mxu1 %v10971_v24  ;;  %v13618_v30 = vld [vmem:[%s13407_s16 + $0x8] sm:$0xff]  ;;  %v9250_v24 = vcombine.low %v13419_v27, %v13419_v27 }
 0x209   : > { %5733 = vmatprep.mubr.bf16.mxu0 %v9251_v31  ;;  %5897 = vmatprep.mubr.bf16.mxu1 %v9251_v31  ;;  %v11058_v31 = vld [vmem:[%s15042_s4 + $0x1200] ss:$16 sps:$4 sm:$0xff]   ;;  %v11069_v27 = vld [vmem:[%s15042_s4 + $0x122c] ss:$16 sps:$4 sm:$0xff]  }
 0x20b   : > { %5704 = vmatpush1.bf16.msra.mxu0 %v10966_v32  ;;  %5868 = vmatpush1.bf16.msra.mxu1 %v10969_v33  ;;  %v11061_v32 = vld [vmem:[%s15042_s4 + $0x1208] ss:$16 sps:$4 sm:$0xff]   ;;  %v11066_v33 = vld [vmem:[%s15042_s4 + $0x1224] ss:$16 sps:$4 sm:$0xff]  }
 0x20c   : > { %5705 = vmatprep.subr.bf16.mxu0 %v10974_v34  ;;  %5869 = vmatprep.subr.bf16.mxu1 %v10977_v35  ;;  %v9253_v34 = vcombine.high %v13618_v30, %v13618_v30  ;;  %v11064_v35 = vld [vmem:[%s15042_s4 + $0x1220] ss:$16 sps:$4 sm:$0xff]  }
 0x20f   : > { %5706 = vmatpush1.bf16.msra.mxu0 %v10972_v36  ;;  %5870 = vmatpush1.bf16.msra.mxu1 %v10975_v37  ;;  %v11067_v36 = vld [vmem:[%s15042_s4 + $0x1228] ss:$16 sps:$4 sm:$0xff]   ;;  %v11072_v37 = vld [vmem:[%s15042_s4 + $0x1244] ss:$16 sps:$4 sm:$0xff]  }
 0x210   : > { %5707 = vmatprep.subr.bf16.mxu0 %v10980_v38  ;;  %5871 = vmatprep.subr.bf16.mxu1 %v10983_v39  ;;  %v11075_v38 = vld [vmem:[%s15042_s4 + $0x124c] ss:$16 sps:$4 sm:$0xff]   ;;  %v11070_v39 = vld [vmem:[%s15042_s4 + $0x1240] ss:$16 sps:$4 sm:$0xff]  }
 0x213   : > { %5708 = vmatpush1.bf16.msra.mxu0 %v10978_v40  ;;  %5872 = vmatpush1.bf16.msra.mxu1 %v10981_v41  ;;  %v11073_v40 = vld [vmem:[%s15042_s4 + $0x1248] ss:$16 sps:$4 sm:$0xff]   ;;  %v11078_v41 = vld [vmem:[%s15042_s4 + $0x1264] ss:$16 sps:$4 sm:$0xff]  }
 0x214   : > { %5709 = vmatprep.subr.bf16.mxu0 %v10986_v42  ;;  %5873 = vmatprep.subr.bf16.mxu1 %v10989_v43  ;;  %v11081_v42 = vld [vmem:[%s15042_s4 + $0x126c] ss:$16 sps:$4 sm:$0xff]   ;;  %v11076_v43 = vld [vmem:[%s15042_s4 + $0x1260] ss:$16 sps:$4 sm:$0xff]  }
 0x217   : > { %5710 = vmatpush1.bf16.msra.mxu0 %v10984_v44  ;;  %5874 = vmatpush1.bf16.msra.mxu1 %v10987_v45  ;;  %v11079_v44 = vld [vmem:[%s15042_s4 + $0x1268] ss:$16 sps:$4 sm:$0xff]   ;;  %v11084_v45 = vld [vmem:[%s15042_s4 + $0x1284] ss:$16 sps:$4 sm:$0xff]  }
 0x218   : > { %5711 = vmatprep.subr.bf16.mxu0 %v10992_v46  ;;  %5875 = vmatprep.subr.bf16.mxu1 %v10995_v47  ;;  %v11087_v46 = vld [vmem:[%s15042_s4 + $0x128c] ss:$16 sps:$4 sm:$0xff]   ;;  %v11082_v47 = vld [vmem:[%s15042_s4 + $0x1280] ss:$16 sps:$4 sm:$0xff]  }
 0x21b   : > { %5712 = vmatpush1.bf16.msra.mxu0 %v10990_v48  ;;  %5876 = vmatpush1.bf16.msra.mxu1 %v10993_v49  ;;  %v11085_v48 = vld [vmem:[%s15042_s4 + $0x1288] ss:$16 sps:$4 sm:$0xff]   ;;  %v11090_v49 = vld [vmem:[%s15042_s4 + $0x12a4] ss:$16 sps:$4 sm:$0xff]  }
 0x21c   : > { %5713 = vmatprep.subr.bf16.mxu0 %v10998_v50  ;;  %5877 = vmatprep.subr.bf16.mxu1 %v11001_v51  ;;  %v11093_v50 = vld [vmem:[%s15042_s4 + $0x12ac] ss:$16 sps:$4 sm:$0xff]   ;;  %v11088_v51 = vld [vmem:[%s15042_s4 + $0x12a0] ss:$16 sps:$4 sm:$0xff]  }
 0x21f   : > { %5714 = vmatpush1.bf16.msra.mxu0 %v10996_v52  ;;  %5878 = vmatpush1.bf16.msra.mxu1 %v10999_v53  ;;  %v11091_v52 = vld [vmem:[%s15042_s4 + $0x12a8] ss:$16 sps:$4 sm:$0xff]   ;;  %v11096_v53 = vld [vmem:[%s15042_s4 + $0x12c4] ss:$16 sps:$4 sm:$0xff]  }
 0x220   : > { %5715 = vmatprep.subr.bf16.mxu0 %v11004_v54  ;;  %5879 = vmatprep.subr.bf16.mxu1 %v11007_v55  ;;  %v11099_v54 = vld [vmem:[%s15042_s4 + $0x12cc] ss:$16 sps:$4 sm:$0xff]   ;;  %v11094_v55 = vld [vmem:[%s15042_s4 + $0x12c0] ss:$16 sps:$4 sm:$0xff]  }
 0x223   : > { %5716 = vmatpush1.bf16.msra.mxu0 %v11002_v56  ;;  %5880 = vmatpush1.bf16.msra.mxu1 %v11005_v57  ;;  %v11097_v56 = vld [vmem:[%s15042_s4 + $0x12c8] ss:$16 sps:$4 sm:$0xff]   ;;  %v11102_v57 = vld [vmem:[%s15042_s4 + $0x12e4] ss:$16 sps:$4 sm:$0xff]  }
 0x224   : > { %5717 = vmatprep.subr.bf16.mxu0 %v11010_v58  ;;  %5881 = vmatprep.subr.bf16.mxu1 %v11013_v59  ;;  %v11105_v58 = vld [vmem:[%s15042_s4 + $0x12ec] ss:$16 sps:$4 sm:$0xff]   ;;  %v11100_v59 = vld [vmem:[%s15042_s4 + $0x12e0] ss:$16 sps:$4 sm:$0xff]  }
 0x227   : > { %5718 = vmatpush1.bf16.msra.mxu0 %v11008_v60  ;;  %5882 = vmatpush1.bf16.msra.mxu1 %v11011_v61  ;;  %v11103_v60 = vld [vmem:[%s15042_s4 + $0x12e8] ss:$16 sps:$4 sm:$0xff]   ;;  %v11108_v61 = vld [vmem:[%s15042_s4 + $0x1304] ss:$16 sps:$4 sm:$0xff]  }
 0x228   : > { %5719 = vmatprep.subr.bf16.mxu0 %v11016_v62  ;;  %5883 = vmatprep.subr.bf16.mxu1 %v11019_v63  ;;  %v11111_v62 = vld [vmem:[%s15042_s4 + $0x130c] ss:$16 sps:$4 sm:$0xff]   ;;  %v11106_v63 = vld [vmem:[%s15042_s4 + $0x1300] ss:$16 sps:$4 sm:$0xff]  }
 0x22b   : > { %5720 = vmatpush1.bf16.msra.mxu0 %v11014_v0  ;;  %5884 = vmatpush1.bf16.msra.mxu1 %v11017_v1  ;;  %v11109_v0 = vld [vmem:[%s15042_s4 + $0x1308] ss:$16 sps:$4 sm:$0xff]   ;;  %v11114_v1 = vld [vmem:[%s15042_s4 + $0x1324] ss:$16 sps:$4 sm:$0xff]  }
 0x22c   : > { %5721 = vmatprep.subr.bf16.mxu0 %v11022_v2  ;;  %5885 = vmatprep.subr.bf16.mxu1 %v11025_v3  ;;  %v11117_v2 = vld [vmem:[%s15042_s4 + $0x132c] ss:$16 sps:$4 sm:$0xff]   ;;  %v11112_v3 = vld [vmem:[%s15042_s4 + $0x1320] ss:$16 sps:$4 sm:$0xff]  }
 0x22f   : > { %5722 = vmatpush1.bf16.msra.mxu0 %v11020_v4  ;;  %5886 = vmatpush1.bf16.msra.mxu1 %v11023_v5  ;;  %v11115_v4 = vld [vmem:[%s15042_s4 + $0x1328] ss:$16 sps:$4 sm:$0xff]   ;;  %v11120_v5 = vld [vmem:[%s15042_s4 + $0x1344] ss:$16 sps:$4 sm:$0xff]  }
 0x230   : > { %5723 = vmatprep.subr.bf16.mxu0 %v11028_v6  ;;  %5887 = vmatprep.subr.bf16.mxu1 %v11031_v7  ;;  %v11123_v6 = vld [vmem:[%s15042_s4 + $0x134c] ss:$16 sps:$4 sm:$0xff]   ;;  %v11118_v7 = vld [vmem:[%s15042_s4 + $0x1340] ss:$16 sps:$4 sm:$0xff]  }
 0x233   : > { %5724 = vmatpush1.bf16.msra.mxu0 %v11026_v8  ;;  %5888 = vmatpush1.bf16.msra.mxu1 %v11029_v9  ;;  %v11121_v8 = vld [vmem:[%s15042_s4 + $0x1348] ss:$16 sps:$4 sm:$0xff]   ;;  %v11126_v9 = vld [vmem:[%s15042_s4 + $0x1364] ss:$16 sps:$4 sm:$0xff]  }
 0x234   : > { %5725 = vmatprep.subr.bf16.mxu0 %v11034_v10  ;;  %5889 = vmatprep.subr.bf16.mxu1 %v11037_v12  ;;  %v11129_v10 = vld [vmem:[%s15042_s4 + $0x136c] ss:$16 sps:$4 sm:$0xff]   ;;  %v11124_v12 = vld [vmem:[%s15042_s4 + $0x1360] ss:$16 sps:$4 sm:$0xff]  }
 0x237   : > { %5726 = vmatpush1.bf16.msra.mxu0 %v11032_v13  ;;  %5890 = vmatpush1.bf16.msra.mxu1 %v11035_v15  ;;  %v11127_v13 = vld [vmem:[%s15042_s4 + $0x1368] ss:$16 sps:$4 sm:$0xff]   ;;  %v11132_v15 = vld [vmem:[%s15042_s4 + $0x1384] ss:$16 sps:$4 sm:$0xff]  }
 0x238   : > { %5727 = vmatprep.subr.bf16.mxu0 %v11040_v16  ;;  %5891 = vmatprep.subr.bf16.mxu1 %v11043_v17  ;;  %v11135_v16 = vld [vmem:[%s15042_s4 + $0x138c] ss:$16 sps:$4 sm:$0xff]   ;;  %v11130_v17 = vld [vmem:[%s15042_s4 + $0x1380] ss:$16 sps:$4 sm:$0xff]  }
 0x23b   : > { %5728 = vmatpush1.bf16.msra.mxu0 %v11038_v19  ;;  %5892 = vmatpush1.bf16.msra.mxu1 %v11041_v14  ;;  %v11133_v19 = vld [vmem:[%s15042_s4 + $0x1388] ss:$16 sps:$4 sm:$0xff]   ;;  %v11138_v14 = vld [vmem:[%s15042_s4 + $0x13a4] ss:$16 sps:$4 sm:$0xff]  }
 0x23c   : > { %5729 = vmatprep.subr.bf16.mxu0 %v11046_v20  ;;  %5893 = vmatprep.subr.bf16.mxu1 %v11049_v11  ;;  %v11141_v20 = vld [vmem:[%s15042_s4 + $0x13ac] ss:$16 sps:$4 sm:$0xff]   ;;  %v11136_v11 = vld [vmem:[%s15042_s4 + $0x13a0] ss:$16 sps:$4 sm:$0xff]  }
 0x23f   : > { %5730 = vmatpush1.bf16.msra.mxu0 %v11044_v22  ;;  %5894 = vmatpush1.bf16.msra.mxu1 %v11047_v23  ;;  %v11139_v22 = vld [vmem:[%s15042_s4 + $0x13a8] ss:$16 sps:$4 sm:$0xff]   ;;  %v11144_v23 = vld [vmem:[%s15042_s4 + $0x13c4] ss:$16 sps:$4 sm:$0xff]  }
 0x240   : > { %5731 = vmatprep.subr.bf16.mxu0 %v11052_v18  ;;  %5895 = vmatprep.subr.bf16.mxu1 %v11055_v25  ;;  %v11147_v18 = vld [vmem:[%s15042_s4 + $0x13cc] ss:$16 sps:$4 sm:$0xff]   ;;  %v11142_v25 = vld [vmem:[%s15042_s4 + $0x13c0] ss:$16 sps:$4 sm:$0xff]  }
 0x243   : > { %5732 = vmatpush1.bf16.msra.mxu0 %v11050_v26  ;;  %5896 = vmatpush1.bf16.msra.mxu1 %v11053_v21  ;;  %v11145_v26 = vld [vmem:[%s15042_s4 + $0x13c8] ss:$16 sps:$4 sm:$0xff]   ;;  %v11150_v21 = vld [vmem:[%s15042_s4 + $0x13e4] ss:$16 sps:$4 sm:$0xff]  }
 0x244   : > { %5742 = vmatprep.subr.bf16.mxu0 %v11060_v28  ;;  %5906 = vmatprep.subr.bf16.mxu1 %v11063_v29  ;;  %v11153_v28 = vld [vmem:[%s15042_s4 + $0x13ec] ss:$16 sps:$4 sm:$0xff]   ;;  %v11148_v29 = vld [vmem:[%s15042_s4 + $0x13e0] ss:$16 sps:$4 sm:$0xff]  }
 0x246   : > { %5734 = vmatmul.mubr.bf16.vlgmr.msra.gmra.mrb[0].mxu0 %v9250_v24  ;;  %5898 = vmatmul.mubr.bf16.vlgmr.msra.gmra.mrb[0].mxu1 %v9250_v24  ;;  %v11151_v24 = vld [vmem:[%s15042_s4 + $0x13e8] ss:$16 sps:$4 sm:$0xff]  }
 0x247   : > { %5743 = vmatpush1.bf16.msra.mxu0 %v11058_v31  ;;  %5907 = vmatpush1.bf16.msra.mxu1 %v11061_v32  ;;  %v11158_v31 = vld [vmem:[%s15042_s4 + $0x1404] ss:$16 sps:$4 sm:$0xff]   ;;  %v11161_v32 = vld [vmem:[%s15042_s4 + $0x140c] ss:$16 sps:$4 sm:$0xff]  }
 0x248   : > { %5744 = vmatprep.subr.bf16.mxu0 %v11066_v33  ;;  %5908 = vmatprep.subr.bf16.mxu1 %v11069_v27  ;;  %v9252_v33 = vcombine.low %v13618_v30, %v13618_v30  ;;  %v13819_v27 = vld [vmem:[%s13407_s16 + $0x10] sm:$0xff]  ;;  %v11167_v30 = vld [vmem:[%s15042_s4 + $0x142c] ss:$16 sps:$4 sm:$0xff]  }
 0x249   : > { %5774 = vmatprep.mubr.bf16.mxu0 %v9253_v34  ;;  %5938 = vmatprep.mubr.bf16.mxu1 %v9253_v34  ;;  %v11156_v34 = vld [vmem:[%s15042_s4 + $0x1400] ss:$16 sps:$4 sm:$0xff]  }
 0x24b   : > { %5745 = vmatpush1.bf16.msra.mxu0 %v11064_v35  ;;  %5909 = vmatpush1.bf16.msra.mxu1 %v11067_v36  ;;  %v11159_v35 = vld [vmem:[%s15042_s4 + $0x1408] ss:$16 sps:$4 sm:$0xff]   ;;  %v11164_v36 = vld [vmem:[%s15042_s4 + $0x1424] ss:$16 sps:$4 sm:$0xff]  }
 0x24c   : > { %5746 = vmatprep.subr.bf16.mxu0 %v11072_v37  ;;  %5910 = vmatprep.subr.bf16.mxu1 %v11075_v38  ;;  %v9255_v37 = vcombine.high %v13819_v27, %v13819_v27  ;;  %v11162_v38 = vld [vmem:[%s15042_s4 + $0x1420] ss:$16 sps:$4 sm:$0xff]  }
 0x24f   : > { %5747 = vmatpush1.bf16.msra.mxu0 %v11070_v39  ;;  %5911 = vmatpush1.bf16.msra.mxu1 %v11073_v40  ;;  %v11165_v39 = vld [vmem:[%s15042_s4 + $0x1428] ss:$16 sps:$4 sm:$0xff]   ;;  %v11170_v40 = vld [vmem:[%s15042_s4 + $0x1444] ss:$16 sps:$4 sm:$0xff]  }
 0x250   : > { %5748 = vmatprep.subr.bf16.mxu0 %v11078_v41  ;;  %5912 = vmatprep.subr.bf16.mxu1 %v11081_v42  ;;  %v11173_v41 = vld [vmem:[%s15042_s4 + $0x144c] ss:$16 sps:$4 sm:$0xff]   ;;  %v11168_v42 = vld [vmem:[%s15042_s4 + $0x1440] ss:$16 sps:$4 sm:$0xff]  }
 0x253   : > { %5749 = vmatpush1.bf16.msra.mxu0 %v11076_v43  ;;  %5913 = vmatpush1.bf16.msra.mxu1 %v11079_v44  ;;  %v11171_v43 = vld [vmem:[%s15042_s4 + $0x1448] ss:$16 sps:$4 sm:$0xff]   ;;  %v11176_v44 = vld [vmem:[%s15042_s4 + $0x1464] ss:$16 sps:$4 sm:$0xff]  }
 0x254   : > { %5750 = vmatprep.subr.bf16.mxu0 %v11084_v45  ;;  %5914 = vmatprep.subr.bf16.mxu1 %v11087_v46  ;;  %v11179_v45 = vld [vmem:[%s15042_s4 + $0x146c] ss:$16 sps:$4 sm:$0xff]   ;;  %v11174_v46 = vld [vmem:[%s15042_s4 + $0x1460] ss:$16 sps:$4 sm:$0xff]  }
 0x257   : > { %5751 = vmatpush1.bf16.msra.mxu0 %v11082_v47  ;;  %5915 = vmatpush1.bf16.msra.mxu1 %v11085_v48  ;;  %v11177_v47 = vld [vmem:[%s15042_s4 + $0x1468] ss:$16 sps:$4 sm:$0xff]   ;;  %v11182_v48 = vld [vmem:[%s15042_s4 + $0x1484] ss:$16 sps:$4 sm:$0xff]  }
 0x258   : > { %5752 = vmatprep.subr.bf16.mxu0 %v11090_v49  ;;  %5916 = vmatprep.subr.bf16.mxu1 %v11093_v50  ;;  %v11185_v49 = vld [vmem:[%s15042_s4 + $0x148c] ss:$16 sps:$4 sm:$0xff]   ;;  %v11180_v50 = vld [vmem:[%s15042_s4 + $0x1480] ss:$16 sps:$4 sm:$0xff]  }
 0x25b   : > { %5753 = vmatpush1.bf16.msra.mxu0 %v11088_v51  ;;  %5917 = vmatpush1.bf16.msra.mxu1 %v11091_v52  ;;  %v11183_v51 = vld [vmem:[%s15042_s4 + $0x1488] ss:$16 sps:$4 sm:$0xff]   ;;  %v11188_v52 = vld [vmem:[%s15042_s4 + $0x14a4] ss:$16 sps:$4 sm:$0xff]  }
 0x25c   : > { %5754 = vmatprep.subr.bf16.mxu0 %v11096_v53  ;;  %5918 = vmatprep.subr.bf16.mxu1 %v11099_v54  ;;  %v11191_v53 = vld [vmem:[%s15042_s4 + $0x14ac] ss:$16 sps:$4 sm:$0xff]   ;;  %v11186_v54 = vld [vmem:[%s15042_s4 + $0x14a0] ss:$16 sps:$4 sm:$0xff]  }
 0x25f   : > { %5755 = vmatpush1.bf16.msra.mxu0 %v11094_v55  ;;  %5919 = vmatpush1.bf16.msra.mxu1 %v11097_v56  ;;  %v11189_v55 = vld [vmem:[%s15042_s4 + $0x14a8] ss:$16 sps:$4 sm:$0xff]   ;;  %v11194_v56 = vld [vmem:[%s15042_s4 + $0x14c4] ss:$16 sps:$4 sm:$0xff]  }
 0x260   : > { %5756 = vmatprep.subr.bf16.mxu0 %v11102_v57  ;;  %5920 = vmatprep.subr.bf16.mxu1 %v11105_v58  ;;  %v11197_v57 = vld [vmem:[%s15042_s4 + $0x14cc] ss:$16 sps:$4 sm:$0xff]   ;;  %v11192_v58 = vld [vmem:[%s15042_s4 + $0x14c0] ss:$16 sps:$4 sm:$0xff]  }
 0x263   : > { %5757 = vmatpush1.bf16.msra.mxu0 %v11100_v59  ;;  %5921 = vmatpush1.bf16.msra.mxu1 %v11103_v60  ;;  %v11195_v59 = vld [vmem:[%s15042_s4 + $0x14c8] ss:$16 sps:$4 sm:$0xff]   ;;  %v11200_v60 = vld [vmem:[%s15042_s4 + $0x14e4] ss:$16 sps:$4 sm:$0xff]  }
 0x264   : > { %5758 = vmatprep.subr.bf16.mxu0 %v11108_v61  ;;  %5922 = vmatprep.subr.bf16.mxu1 %v11111_v62  ;;  %v11203_v61 = vld [vmem:[%s15042_s4 + $0x14ec] ss:$16 sps:$4 sm:$0xff]   ;;  %v11198_v62 = vld [vmem:[%s15042_s4 + $0x14e0] ss:$16 sps:$4 sm:$0xff]  }
 0x267   : > { %5759 = vmatpush1.bf16.msra.mxu0 %v11106_v63  ;;  %5923 = vmatpush1.bf16.msra.mxu1 %v11109_v0  ;;  %v11201_v63 = vld [vmem:[%s15042_s4 + $0x14e8] ss:$16 sps:$4 sm:$0xff]   ;;  %v11206_v0 = vld [vmem:[%s15042_s4 + $0x1504] ss:$16 sps:$4 sm:$0xff]  }
 0x268   : > { %5760 = vmatprep.subr.bf16.mxu0 %v11114_v1  ;;  %5924 = vmatprep.subr.bf16.mxu1 %v11117_v2  ;;  %v11209_v1 = vld [vmem:[%s15042_s4 + $0x150c] ss:$16 sps:$4 sm:$0xff]   ;;  %v11204_v2 = vld [vmem:[%s15042_s4 + $0x1500] ss:$16 sps:$4 sm:$0xff]  }
 0x26b   : > { %5761 = vmatpush1.bf16.msra.mxu0 %v11112_v3  ;;  %5925 = vmatpush1.bf16.msra.mxu1 %v11115_v4  ;;  %v11207_v3 = vld [vmem:[%s15042_s4 + $0x1508] ss:$16 sps:$4 sm:$0xff]   ;;  %v11212_v4 = vld [vmem:[%s15042_s4 + $0x1524] ss:$16 sps:$4 sm:$0xff]  }
 0x26c   : > { %5762 = vmatprep.subr.bf16.mxu0 %v11120_v5  ;;  %5926 = vmatprep.subr.bf16.mxu1 %v11123_v6  ;;  %v11215_v5 = vld [vmem:[%s15042_s4 + $0x152c] ss:$16 sps:$4 sm:$0xff]   ;;  %v11210_v6 = vld [vmem:[%s15042_s4 + $0x1520] ss:$16 sps:$4 sm:$0xff]  }
 0x26f   : > { %5763 = vmatpush1.bf16.msra.mxu0 %v11118_v7  ;;  %5927 = vmatpush1.bf16.msra.mxu1 %v11121_v8  ;;  %v11213_v7 = vld [vmem:[%s15042_s4 + $0x1528] ss:$16 sps:$4 sm:$0xff]   ;;  %v11218_v8 = vld [vmem:[%s15042_s4 + $0x1544] ss:$16 sps:$4 sm:$0xff]  }
 0x270   : > { %5764 = vmatprep.subr.bf16.mxu0 %v11126_v9  ;;  %5928 = vmatprep.subr.bf16.mxu1 %v11129_v10  ;;  %v11221_v9 = vld [vmem:[%s15042_s4 + $0x154c] ss:$16 sps:$4 sm:$0xff]   ;;  %v11216_v10 = vld [vmem:[%s15042_s4 + $0x1540] ss:$16 sps:$4 sm:$0xff]  }
 0x273   : > { %5765 = vmatpush1.bf16.msra.mxu0 %v11124_v12  ;;  %5929 = vmatpush1.bf16.msra.mxu1 %v11127_v13  ;;  %v11219_v12 = vld [vmem:[%s15042_s4 + $0x1548] ss:$16 sps:$4 sm:$0xff]   ;;  %v11224_v13 = vld [vmem:[%s15042_s4 + $0x1564] ss:$16 sps:$4 sm:$0xff]  }
 0x274   : > { %5766 = vmatprep.subr.bf16.mxu0 %v11132_v15  ;;  %5930 = vmatprep.subr.bf16.mxu1 %v11135_v16  ;;  %v11227_v15 = vld [vmem:[%s15042_s4 + $0x156c] ss:$16 sps:$4 sm:$0xff]   ;;  %v11222_v16 = vld [vmem:[%s15042_s4 + $0x1560] ss:$16 sps:$4 sm:$0xff]  }
 0x277   : > { %5767 = vmatpush1.bf16.msra.mxu0 %v11130_v17  ;;  %5931 = vmatpush1.bf16.msra.mxu1 %v11133_v19  ;;  %v11225_v17 = vld [vmem:[%s15042_s4 + $0x1568] ss:$16 sps:$4 sm:$0xff]   ;;  %v11230_v19 = vld [vmem:[%s15042_s4 + $0x1584] ss:$16 sps:$4 sm:$0xff]  }
 0x278   : > { %5768 = vmatprep.subr.bf16.mxu0 %v11138_v14  ;;  %5932 = vmatprep.subr.bf16.mxu1 %v11141_v20  ;;  %v11233_v14 = vld [vmem:[%s15042_s4 + $0x158c] ss:$16 sps:$4 sm:$0xff]   ;;  %v11228_v20 = vld [vmem:[%s15042_s4 + $0x1580] ss:$16 sps:$4 sm:$0xff]  }
 0x27b   : > { %5769 = vmatpush1.bf16.msra.mxu0 %v11136_v11  ;;  %5933 = vmatpush1.bf16.msra.mxu1 %v11139_v22  ;;  %v11231_v11 = vld [vmem:[%s15042_s4 + $0x1588] ss:$16 sps:$4 sm:$0xff]   ;;  %v11236_v22 = vld [vmem:[%s15042_s4 + $0x15a4] ss:$16 sps:$4 sm:$0xff]  }
 0x27c   : > { %5770 = vmatprep.subr.bf16.mxu0 %v11144_v23  ;;  %5934 = vmatprep.subr.bf16.mxu1 %v11147_v18  ;;  %v11239_v23 = vld [vmem:[%s15042_s4 + $0x15ac] ss:$16 sps:$4 sm:$0xff]   ;;  %v11234_v18 = vld [vmem:[%s15042_s4 + $0x15a0] ss:$16 sps:$4 sm:$0xff]  }
 0x27f   : > { %5771 = vmatpush1.bf16.msra.mxu0 %v11142_v25  ;;  %5935 = vmatpush1.bf16.msra.mxu1 %v11145_v26  ;;  %v11237_v25 = vld [vmem:[%s15042_s4 + $0x15a8] ss:$16 sps:$4 sm:$0xff]   ;;  %v11242_v26 = vld [vmem:[%s15042_s4 + $0x15c4] ss:$16 sps:$4 sm:$0xff]  }
 0x280   : > { %5772 = vmatprep.subr.bf16.mxu0 %v11150_v21  ;;  %5936 = vmatprep.subr.bf16.mxu1 %v11153_v28  ;;  %v11245_v21 = vld [vmem:[%s15042_s4 + $0x15cc] ss:$16 sps:$4 sm:$0xff]   ;;  %v11240_v28 = vld [vmem:[%s15042_s4 + $0x15c0] ss:$16 sps:$4 sm:$0xff]  }
 0x283   : > { %5773 = vmatpush1.bf16.msra.mxu0 %v11148_v29  ;;  %5937 = vmatpush1.bf16.msra.mxu1 %v11151_v24  ;;  %v11243_v29 = vld [vmem:[%s15042_s4 + $0x15c8] ss:$16 sps:$4 sm:$0xff]   ;;  %v11248_v24 = vld [vmem:[%s15042_s4 + $0x15e4] ss:$16 sps:$4 sm:$0xff]  }
 0x284   : > { %5783 = vmatprep.subr.bf16.mxu0 %v11158_v31  ;;  %5947 = vmatprep.subr.bf16.mxu1 %v11161_v32  ;;  %v11251_v31 = vld [vmem:[%s15042_s4 + $0x15ec] ss:$16 sps:$4 sm:$0xff]   ;;  %v11246_v32 = vld [vmem:[%s15042_s4 + $0x15e0] ss:$16 sps:$4 sm:$0xff]  }
 0x286   : > { %5775 = vmatmul.mubr.bf16.vlgmr.msra.gmra.mrb[0].mxu0 %v9252_v33  ;;  %5939 = vmatmul.mubr.bf16.vlgmr.msra.gmra.mrb[0].mxu1 %v9252_v33  ;;  %v11249_v33 = vld [vmem:[%s15042_s4 + $0x15e8] ss:$16 sps:$4 sm:$0xff]  }
 0x287   : > { %5784 = vmatpush1.bf16.msra.mxu0 %v11156_v34  ;;  %5948 = vmatpush1.bf16.msra.mxu1 %v11159_v35  ;;  %v11256_v34 = vld [vmem:[%s15042_s4 + $0x1604] ss:$16 sps:$4 sm:$0xff]   ;;  %v11259_v35 = vld [vmem:[%s15042_s4 + $0x160c] ss:$16 sps:$4 sm:$0xff]  }
 0x288   : > { %5785 = vmatprep.subr.bf16.mxu0 %v11164_v36  ;;  %5949 = vmatprep.subr.bf16.mxu1 %v11167_v30  ;;  %v9254_v36 = vcombine.low %v13819_v27, %v13819_v27  ;;  %v14018_v30 = vld [vmem:[%s13407_s16 + $0x18] sm:$0xff] }
 0x289   : > { %5815 = vmatprep.mubr.bf16.mxu0 %v9255_v37  ;;  %5979 = vmatprep.mubr.bf16.mxu1 %v9255_v37  ;;  %v11254_v37 = vld [vmem:[%s15042_s4 + $0x1600] ss:$16 sps:$4 sm:$0xff]   ;;  %v11265_v27 = vld [vmem:[%s15042_s4 + $0x162c] ss:$16 sps:$4 sm:$0xff]  }
 0x28b   : > { %5786 = vmatpush1.bf16.msra.mxu0 %v11162_v38  ;;  %5950 = vmatpush1.bf16.msra.mxu1 %v11165_v39  ;;  %v11257_v38 = vld [vmem:[%s15042_s4 + $0x1608] ss:$16 sps:$4 sm:$0xff]   ;;  %v11262_v39 = vld [vmem:[%s15042_s4 + $0x1624] ss:$16 sps:$4 sm:$0xff]  }
 0x28c   : > { %5787 = vmatprep.subr.bf16.mxu0 %v11170_v40  ;;  %5951 = vmatprep.subr.bf16.mxu1 %v11173_v41  ;;  %v9257_v40 = vcombine.high %v14018_v30, %v14018_v30  ;;  %v11260_v41 = vld [vmem:[%s15042_s4 + $0x1620] ss:$16 sps:$4 sm:$0xff]  }
 0x28f   : > { %5788 = vmatpush1.bf16.msra.mxu0 %v11168_v42  ;;  %5952 = vmatpush1.bf16.msra.mxu1 %v11171_v43  ;;  %v11263_v42 = vld [vmem:[%s15042_s4 + $0x1628] ss:$16 sps:$4 sm:$0xff]   ;;  %v11268_v43 = vld [vmem:[%s15042_s4 + $0x1644] ss:$16 sps:$4 sm:$0xff]  }
 0x290   : > { %5789 = vmatprep.subr.bf16.mxu0 %v11176_v44  ;;  %5953 = vmatprep.subr.bf16.mxu1 %v11179_v45  ;;  %v11271_v44 = vld [vmem:[%s15042_s4 + $0x164c] ss:$16 sps:$4 sm:$0xff]   ;;  %v11266_v45 = vld [vmem:[%s15042_s4 + $0x1640] ss:$16 sps:$4 sm:$0xff]  }
 0x293   : > { %5790 = vmatpush1.bf16.msra.mxu0 %v11174_v46  ;;  %5954 = vmatpush1.bf16.msra.mxu1 %v11177_v47  ;;  %v11269_v46 = vld [vmem:[%s15042_s4 + $0x1648] ss:$16 sps:$4 sm:$0xff]   ;;  %v11274_v47 = vld [vmem:[%s15042_s4 + $0x1664] ss:$16 sps:$4 sm:$0xff]  }
 0x294   : > { %5791 = vmatprep.subr.bf16.mxu0 %v11182_v48  ;;  %5955 = vmatprep.subr.bf16.mxu1 %v11185_v49  ;;  %v11277_v48 = vld [vmem:[%s15042_s4 + $0x166c] ss:$16 sps:$4 sm:$0xff]   ;;  %v11272_v49 = vld [vmem:[%s15042_s4 + $0x1660] ss:$16 sps:$4 sm:$0xff]  }
 0x297   : > { %5792 = vmatpush1.bf16.msra.mxu0 %v11180_v50  ;;  %5956 = vmatpush1.bf16.msra.mxu1 %v11183_v51  ;;  %v11275_v50 = vld [vmem:[%s15042_s4 + $0x1668] ss:$16 sps:$4 sm:$0xff]   ;;  %v11280_v51 = vld [vmem:[%s15042_s4 + $0x1684] ss:$16 sps:$4 sm:$0xff]  }
 0x298   : > { %5793 = vmatprep.subr.bf16.mxu0 %v11188_v52  ;;  %5957 = vmatprep.subr.bf16.mxu1 %v11191_v53  ;;  %v11283_v52 = vld [vmem:[%s15042_s4 + $0x168c] ss:$16 sps:$4 sm:$0xff]   ;;  %v11278_v53 = vld [vmem:[%s15042_s4 + $0x1680] ss:$16 sps:$4 sm:$0xff]  }
 0x29b   : > { %5794 = vmatpush1.bf16.msra.mxu0 %v11186_v54  ;;  %5958 = vmatpush1.bf16.msra.mxu1 %v11189_v55  ;;  %v11281_v54 = vld [vmem:[%s15042_s4 + $0x1688] ss:$16 sps:$4 sm:$0xff]   ;;  %v11286_v55 = vld [vmem:[%s15042_s4 + $0x16a4] ss:$16 sps:$4 sm:$0xff]  }
 0x29c   : > { %5795 = vmatprep.subr.bf16.mxu0 %v11194_v56  ;;  %5959 = vmatprep.subr.bf16.mxu1 %v11197_v57  ;;  %v11289_v56 = vld [vmem:[%s15042_s4 + $0x16ac] ss:$16 sps:$4 sm:$0xff]   ;;  %v11284_v57 = vld [vmem:[%s15042_s4 + $0x16a0] ss:$16 sps:$4 sm:$0xff]  }
 0x29f   : > { %5796 = vmatpush1.bf16.msra.mxu0 %v11192_v58  ;;  %5960 = vmatpush1.bf16.msra.mxu1 %v11195_v59  ;;  %v11287_v58 = vld [vmem:[%s15042_s4 + $0x16a8] ss:$16 sps:$4 sm:$0xff]   ;;  %v11292_v59 = vld [vmem:[%s15042_s4 + $0x16c4] ss:$16 sps:$4 sm:$0xff]  }
 0x2a0   : > { %5797 = vmatprep.subr.bf16.mxu0 %v11200_v60  ;;  %5961 = vmatprep.subr.bf16.mxu1 %v11203_v61  ;;  %v11295_v60 = vld [vmem:[%s15042_s4 + $0x16cc] ss:$16 sps:$4 sm:$0xff]   ;;  %v11290_v61 = vld [vmem:[%s15042_s4 + $0x16c0] ss:$16 sps:$4 sm:$0xff]  }
 0x2a3   : > { %5798 = vmatpush1.bf16.msra.mxu0 %v11198_v62  ;;  %5962 = vmatpush1.bf16.msra.mxu1 %v11201_v63  ;;  %v11293_v62 = vld [vmem:[%s15042_s4 + $0x16c8] ss:$16 sps:$4 sm:$0xff]   ;;  %v11298_v63 = vld [vmem:[%s15042_s4 + $0x16e4] ss:$16 sps:$4 sm:$0xff]  }
 0x2a4   : > { %5799 = vmatprep.subr.bf16.mxu0 %v11206_v0  ;;  %5963 = vmatprep.subr.bf16.mxu1 %v11209_v1  ;;  %v11301_v0 = vld [vmem:[%s15042_s4 + $0x16ec] ss:$16 sps:$4 sm:$0xff]   ;;  %v11296_v1 = vld [vmem:[%s15042_s4 + $0x16e0] ss:$16 sps:$4 sm:$0xff]  }
 0x2a7   : > { %5800 = vmatpush1.bf16.msra.mxu0 %v11204_v2  ;;  %5964 = vmatpush1.bf16.msra.mxu1 %v11207_v3  ;;  %v11299_v2 = vld [vmem:[%s15042_s4 + $0x16e8] ss:$16 sps:$4 sm:$0xff]   ;;  %v11304_v3 = vld [vmem:[%s15042_s4 + $0x1704] ss:$16 sps:$4 sm:$0xff]  }
 0x2a8   : > { %5801 = vmatprep.subr.bf16.mxu0 %v11212_v4  ;;  %5965 = vmatprep.subr.bf16.mxu1 %v11215_v5  ;;  %v11307_v4 = vld [vmem:[%s15042_s4 + $0x170c] ss:$16 sps:$4 sm:$0xff]   ;;  %v11302_v5 = vld [vmem:[%s15042_s4 + $0x1700] ss:$16 sps:$4 sm:$0xff]  }
 0x2ab   : > { %5802 = vmatpush1.bf16.msra.mxu0 %v11210_v6  ;;  %5966 = vmatpush1.bf16.msra.mxu1 %v11213_v7  ;;  %v11305_v6 = vld [vmem:[%s15042_s4 + $0x1708] ss:$16 sps:$4 sm:$0xff]   ;;  %v11310_v7 = vld [vmem:[%s15042_s4 + $0x1724] ss:$16 sps:$4 sm:$0xff]  }
 0x2ac   : > { %5803 = vmatprep.subr.bf16.mxu0 %v11218_v8  ;;  %5967 = vmatprep.subr.bf16.mxu1 %v11221_v9  ;;  %v11313_v8 = vld [vmem:[%s15042_s4 + $0x172c] ss:$16 sps:$4 sm:$0xff]   ;;  %v11308_v9 = vld [vmem:[%s15042_s4 + $0x1720] ss:$16 sps:$4 sm:$0xff]  }
 0x2af   : > { %5804 = vmatpush1.bf16.msra.mxu0 %v11216_v10  ;;  %5968 = vmatpush1.bf16.msra.mxu1 %v11219_v12  ;;  %v11311_v10 = vld [vmem:[%s15042_s4 + $0x1728] ss:$16 sps:$4 sm:$0xff]   ;;  %v11316_v12 = vld [vmem:[%s15042_s4 + $0x1744] ss:$16 sps:$4 sm:$0xff]  }
 0x2b0   : > { %5805 = vmatprep.subr.bf16.mxu0 %v11224_v13  ;;  %5969 = vmatprep.subr.bf16.mxu1 %v11227_v15  ;;  %v11319_v13 = vld [vmem:[%s15042_s4 + $0x174c] ss:$16 sps:$4 sm:$0xff]   ;;  %v11314_v15 = vld [vmem:[%s15042_s4 + $0x1740] ss:$16 sps:$4 sm:$0xff]  }
 0x2b3   : > { %5806 = vmatpush1.bf16.msra.mxu0 %v11222_v16  ;;  %5970 = vmatpush1.bf16.msra.mxu1 %v11225_v17  ;;  %v11317_v16 = vld [vmem:[%s15042_s4 + $0x1748] ss:$16 sps:$4 sm:$0xff]   ;;  %v11322_v17 = vld [vmem:[%s15042_s4 + $0x1764] ss:$16 sps:$4 sm:$0xff]  }
 0x2b4   : > { %5807 = vmatprep.subr.bf16.mxu0 %v11230_v19  ;;  %5971 = vmatprep.subr.bf16.mxu1 %v11233_v14  ;;  %v11325_v19 = vld [vmem:[%s15042_s4 + $0x176c] ss:$16 sps:$4 sm:$0xff]   ;;  %v11320_v14 = vld [vmem:[%s15042_s4 + $0x1760] ss:$16 sps:$4 sm:$0xff]  }
 0x2b7   : > { %5808 = vmatpush1.bf16.msra.mxu0 %v11228_v20  ;;  %5972 = vmatpush1.bf16.msra.mxu1 %v11231_v11  ;;  %v11323_v20 = vld [vmem:[%s15042_s4 + $0x1768] ss:$16 sps:$4 sm:$0xff]   ;;  %v11328_v11 = vld [vmem:[%s15042_s4 + $0x1784] ss:$16 sps:$4 sm:$0xff]  }
 0x2b8   : > { %5809 = vmatprep.subr.bf16.mxu0 %v11236_v22  ;;  %5973 = vmatprep.subr.bf16.mxu1 %v11239_v23  ;;  %v11331_v22 = vld [vmem:[%s15042_s4 + $0x178c] ss:$16 sps:$4 sm:$0xff]   ;;  %v11326_v23 = vld [vmem:[%s15042_s4 + $0x1780] ss:$16 sps:$4 sm:$0xff]  }
 0x2bb   : > { %5810 = vmatpush1.bf16.msra.mxu0 %v11234_v18  ;;  %5974 = vmatpush1.bf16.msra.mxu1 %v11237_v25  ;;  %v11329_v18 = vld [vmem:[%s15042_s4 + $0x1788] ss:$16 sps:$4 sm:$0xff]   ;;  %v11334_v25 = vld [vmem:[%s15042_s4 + $0x17a4] ss:$16 sps:$4 sm:$0xff]  }
 0x2bc   : > { %5811 = vmatprep.subr.bf16.mxu0 %v11242_v26  ;;  %5975 = vmatprep.subr.bf16.mxu1 %v11245_v21  ;;  %v11337_v26 = vld [vmem:[%s15042_s4 + $0x17ac] ss:$16 sps:$4 sm:$0xff]   ;;  %v11332_v21 = vld [vmem:[%s15042_s4 + $0x17a0] ss:$16 sps:$4 sm:$0xff]  }
 0x2bf   : > { %5812 = vmatpush1.bf16.msra.mxu0 %v11240_v28  ;;  %5976 = vmatpush1.bf16.msra.mxu1 %v11243_v29  ;;  %v11335_v28 = vld [vmem:[%s15042_s4 + $0x17a8] ss:$16 sps:$4 sm:$0xff]   ;;  %v11340_v29 = vld [vmem:[%s15042_s4 + $0x17c4] ss:$16 sps:$4 sm:$0xff]  }
 0x2c0   : > { %5813 = vmatprep.subr.bf16.mxu0 %v11248_v24  ;;  %5977 = vmatprep.subr.bf16.mxu1 %v11251_v31  ;;  %v11343_v24 = vld [vmem:[%s15042_s4 + $0x17cc] ss:$16 sps:$4 sm:$0xff]   ;;  %v11338_v31 = vld [vmem:[%s15042_s4 + $0x17c0] ss:$16 sps:$4 sm:$0xff]  }
 0x2c3   : > { %5814 = vmatpush1.bf16.msra.mxu0 %v11246_v32  ;;  %5978 = vmatpush1.bf16.msra.mxu1 %v11249_v33  ;;  %v11341_v32 = vld [vmem:[%s15042_s4 + $0x17c8] ss:$16 sps:$4 sm:$0xff]   ;;  %v11346_v33 = vld [vmem:[%s15042_s4 + $0x17e4] ss:$16 sps:$4 sm:$0xff]  }
 0x2c4   : > { %5824 = vmatprep.subr.bf16.mxu0 %v11256_v34  ;;  %5988 = vmatprep.subr.bf16.mxu1 %v11259_v35  ;;  %v11349_v34 = vld [vmem:[%s15042_s4 + $0x17ec] ss:$16 sps:$4 sm:$0xff]   ;;  %v11344_v35 = vld [vmem:[%s15042_s4 + $0x17e0] ss:$16 sps:$4 sm:$0xff]  }
 0x2c6   : > { %5816 = vmatmul.mubr.bf16.vlgmr.msra.gmra.mrb[0].mxu0 %v9254_v36  ;;  %5980 = vmatmul.mubr.bf16.vlgmr.msra.gmra.mrb[0].mxu1 %v9254_v36  ;;  %v11347_v36 = vld [vmem:[%s15042_s4 + $0x17e8] ss:$16 sps:$4 sm:$0xff]  }
 0x2c7   : > { %5825 = vmatpush1.bf16.msra.mxu0 %v11254_v37  ;;  %5989 = vmatpush1.bf16.msra.mxu1 %v11257_v38  ;;  %v11354_v37 = vld [vmem:[%s15042_s4 + $0x1804] ss:$16 sps:$4 sm:$0xff]   ;;  %v11357_v38 = vld [vmem:[%s15042_s4 + $0x180c] ss:$16 sps:$4 sm:$0xff]  }
 0x2c8   : > { %5826 = vmatprep.subr.bf16.mxu0 %v11262_v39  ;;  %5990 = vmatprep.subr.bf16.mxu1 %v11265_v27  ;;  %v9256_v39 = vcombine.low %v14018_v30, %v14018_v30  ;;  %v14224_v27 = vld [vmem:[%s14213_s27] sm:$0xff]  ;;  %v11363_v30 = vld [vmem:[%s15042_s4 + $0x182c] ss:$16 sps:$4 sm:$0xff]  }
 0x2c9   : > { %5856 = vmatprep.mubr.bf16.mxu0 %v9257_v40  ;;  %6020 = vmatprep.mubr.bf16.mxu1 %v9257_v40  ;;  %v11352_v40 = vld [vmem:[%s15042_s4 + $0x1800] ss:$16 sps:$4 sm:$0xff]  }
 0x2cb   : > { %5827 = vmatpush1.bf16.msra.mxu0 %v11260_v41  ;;  %5991 = vmatpush1.bf16.msra.mxu1 %v11263_v42  ;;  %v11355_v41 = vld [vmem:[%s15042_s4 + $0x1808] ss:$16 sps:$4 sm:$0xff]   ;;  %v11360_v42 = vld [vmem:[%s15042_s4 + $0x1824] ss:$16 sps:$4 sm:$0xff]  }
 0x2cc   : > { %5828 = vmatprep.subr.bf16.mxu0 %v11268_v43  ;;  %5992 = vmatprep.subr.bf16.mxu1 %v11271_v44  ;;  %v9771_v43 = vcombine.high %v14224_v27, %v14224_v27  ;;  %v11358_v44 = vld [vmem:[%s15042_s4 + $0x1820] ss:$16 sps:$4 sm:$0xff]  }
 0x2cf   : > { %5829 = vmatpush1.bf16.msra.mxu0 %v11266_v45  ;;  %5993 = vmatpush1.bf16.msra.mxu1 %v11269_v46  ;;  %v11361_v45 = vld [vmem:[%s15042_s4 + $0x1828] ss:$16 sps:$4 sm:$0xff]   ;;  %v11366_v46 = vld [vmem:[%s15042_s4 + $0x1844] ss:$16 sps:$4 sm:$0xff]  }
 0x2d0   : > { %5830 = vmatprep.subr.bf16.mxu0 %v11274_v47  ;;  %5994 = vmatprep.subr.bf16.mxu1 %v11277_v48  ;;  %v11369_v47 = vld [vmem:[%s15042_s4 + $0x184c] ss:$16 sps:$4 sm:$0xff]   ;;  %v11364_v48 = vld [vmem:[%s15042_s4 + $0x1840] ss:$16 sps:$4 sm:$0xff]  }
 0x2d3   : > { %5831 = vmatpush1.bf16.msra.mxu0 %v11272_v49  ;;  %5995 = vmatpush1.bf16.msra.mxu1 %v11275_v50  ;;  %v11367_v49 = vld [vmem:[%s15042_s4 + $0x1848] ss:$16 sps:$4 sm:$0xff]   ;;  %v11372_v50 = vld [vmem:[%s15042_s4 + $0x1864] ss:$16 sps:$4 sm:$0xff]  }
 0x2d4   : > { %5832 = vmatprep.subr.bf16.mxu0 %v11280_v51  ;;  %5996 = vmatprep.subr.bf16.mxu1 %v11283_v52  ;;  %v11375_v51 = vld [vmem:[%s15042_s4 + $0x186c] ss:$16 sps:$4 sm:$0xff]   ;;  %v11370_v52 = vld [vmem:[%s15042_s4 + $0x1860] ss:$16 sps:$4 sm:$0xff]  }
 0x2d7   : > { %5833 = vmatpush1.bf16.msra.mxu0 %v11278_v53  ;;  %5997 = vmatpush1.bf16.msra.mxu1 %v11281_v54  ;;  %v11373_v53 = vld [vmem:[%s15042_s4 + $0x1868] ss:$16 sps:$4 sm:$0xff]   ;;  %v11378_v54 = vld [vmem:[%s15042_s4 + $0x1884] ss:$16 sps:$4 sm:$0xff]  }
 0x2d8   : > { %5834 = vmatprep.subr.bf16.mxu0 %v11286_v55  ;;  %5998 = vmatprep.subr.bf16.mxu1 %v11289_v56  ;;  %v11381_v55 = vld [vmem:[%s15042_s4 + $0x188c] ss:$16 sps:$4 sm:$0xff]   ;;  %v11376_v56 = vld [vmem:[%s15042_s4 + $0x1880] ss:$16 sps:$4 sm:$0xff]  }
 0x2db   : > { %5835 = vmatpush1.bf16.msra.mxu0 %v11284_v57  ;;  %5999 = vmatpush1.bf16.msra.mxu1 %v11287_v58  ;;  %v11379_v57 = vld [vmem:[%s15042_s4 + $0x1888] ss:$16 sps:$4 sm:$0xff]   ;;  %v11384_v58 = vld [vmem:[%s15042_s4 + $0x18a4] ss:$16 sps:$4 sm:$0xff]  }
 0x2dc   : > { %5836 = vmatprep.subr.bf16.mxu0 %v11292_v59  ;;  %6000 = vmatprep.subr.bf16.mxu1 %v11295_v60  ;;  %v11387_v59 = vld [vmem:[%s15042_s4 + $0x18ac] ss:$16 sps:$4 sm:$0xff]   ;;  %v11382_v60 = vld [vmem:[%s15042_s4 + $0x18a0] ss:$16 sps:$4 sm:$0xff]  }
 0x2df   : > { %5837 = vmatpush1.bf16.msra.mxu0 %v11290_v61  ;;  %6001 = vmatpush1.bf16.msra.mxu1 %v11293_v62  ;;  %v11385_v61 = vld [vmem:[%s15042_s4 + $0x18a8] ss:$16 sps:$4 sm:$0xff]   ;;  %v11390_v62 = vld [vmem:[%s15042_s4 + $0x18c4] ss:$16 sps:$4 sm:$0xff]  }
 0x2e0   : > { %5838 = vmatprep.subr.bf16.mxu0 %v11298_v63  ;;  %6002 = vmatprep.subr.bf16.mxu1 %v11301_v0  ;;  %v11393_v63 = vld [vmem:[%s15042_s4 + $0x18cc] ss:$16 sps:$4 sm:$0xff]   ;;  %v11388_v0 = vld [vmem:[%s15042_s4 + $0x18c0] ss:$16 sps:$4 sm:$0xff]  }
 0x2e3   : > { %5839 = vmatpush1.bf16.msra.mxu0 %v11296_v1  ;;  %6003 = vmatpush1.bf16.msra.mxu1 %v11299_v2  ;;  %v11391_v1 = vld [vmem:[%s15042_s4 + $0x18c8] ss:$16 sps:$4 sm:$0xff]   ;;  %v11396_v2 = vld [vmem:[%s15042_s4 + $0x18e4] ss:$16 sps:$4 sm:$0xff]  }
 0x2e4   : > { %5840 = vmatprep.subr.bf16.mxu0 %v11304_v3  ;;  %6004 = vmatprep.subr.bf16.mxu1 %v11307_v4  ;;  %v11399_v3 = vld [vmem:[%s15042_s4 + $0x18ec] ss:$16 sps:$4 sm:$0xff]   ;;  %v11394_v4 = vld [vmem:[%s15042_s4 + $0x18e0] ss:$16 sps:$4 sm:$0xff]  }
 0x2e7   : > { %5841 = vmatpush1.bf16.msra.mxu0 %v11302_v5  ;;  %6005 = vmatpush1.bf16.msra.mxu1 %v11305_v6  ;;  %v11397_v5 = vld [vmem:[%s15042_s4 + $0x18e8] ss:$16 sps:$4 sm:$0xff]   ;;  %v11402_v6 = vld [vmem:[%s15042_s4 + $0x1904] ss:$16 sps:$4 sm:$0xff]  }
 0x2e8   : > { %5842 = vmatprep.subr.bf16.mxu0 %v11310_v7  ;;  %6006 = vmatprep.subr.bf16.mxu1 %v11313_v8  ;;  %v11405_v7 = vld [vmem:[%s15042_s4 + $0x190c] ss:$16 sps:$4 sm:$0xff]   ;;  %v11400_v8 = vld [vmem:[%s15042_s4 + $0x1900] ss:$16 sps:$4 sm:$0xff]  }
 0x2eb   : > { %5843 = vmatpush1.bf16.msra.mxu0 %v11308_v9  ;;  %6007 = vmatpush1.bf16.msra.mxu1 %v11311_v10  ;;  %v11403_v9 = vld [vmem:[%s15042_s4 + $0x1908] ss:$16 sps:$4 sm:$0xff]   ;;  %v11408_v10 = vld [vmem:[%s15042_s4 + $0x1924] ss:$16 sps:$4 sm:$0xff]  }
 0x2ec   : > { %5844 = vmatprep.subr.bf16.mxu0 %v11316_v12  ;;  %6008 = vmatprep.subr.bf16.mxu1 %v11319_v13  ;;  %v11411_v12 = vld [vmem:[%s15042_s4 + $0x192c] ss:$16 sps:$4 sm:$0xff]   ;;  %v11406_v13 = vld [vmem:[%s15042_s4 + $0x1920] ss:$16 sps:$4 sm:$0xff]  }
 0x2ef   : > { %5845 = vmatpush1.bf16.msra.mxu0 %v11314_v15  ;;  %6009 = vmatpush1.bf16.msra.mxu1 %v11317_v16  ;;  %v11409_v15 = vld [vmem:[%s15042_s4 + $0x1928] ss:$16 sps:$4 sm:$0xff]   ;;  %v11414_v16 = vld [vmem:[%s15042_s4 + $0x1944] ss:$16 sps:$4 sm:$0xff]  }
 0x2f0   : > { %5846 = vmatprep.subr.bf16.mxu0 %v11322_v17  ;;  %6010 = vmatprep.subr.bf16.mxu1 %v11325_v19  ;;  %v11417_v17 = vld [vmem:[%s15042_s4 + $0x194c] ss:$16 sps:$4 sm:$0xff]   ;;  %v11412_v19 = vld [vmem:[%s15042_s4 + $0x1940] ss:$16 sps:$4 sm:$0xff]  }
 0x2f3   : > { %5847 = vmatpush1.bf16.msra.mxu0 %v11320_v14  ;;  %6011 = vmatpush1.bf16.msra.mxu1 %v11323_v20  ;;  %v11415_v14 = vld [vmem:[%s15042_s4 + $0x1948] ss:$16 sps:$4 sm:$0xff]   ;;  %v11420_v20 = vld [vmem:[%s15042_s4 + $0x1964] ss:$16 sps:$4 sm:$0xff]  }
 0x2f4   : > { %5848 = vmatprep.subr.bf16.mxu0 %v11328_v11  ;;  %6012 = vmatprep.subr.bf16.mxu1 %v11331_v22  ;;  %v11423_v11 = vld [vmem:[%s15042_s4 + $0x196c] ss:$16 sps:$4 sm:$0xff]   ;;  %v11418_v22 = vld [vmem:[%s15042_s4 + $0x1960] ss:$16 sps:$4 sm:$0xff]  }
 0x2f7   : > { %5849 = vmatpush1.bf16.msra.mxu0 %v11326_v23  ;;  %6013 = vmatpush1.bf16.msra.mxu1 %v11329_v18  ;;  %v11421_v23 = vld [vmem:[%s15042_s4 + $0x1968] ss:$16 sps:$4 sm:$0xff]   ;;  %v11426_v18 = vld [vmem:[%s15042_s4 + $0x1984] ss:$16 sps:$4 sm:$0xff]  }
 0x2f8   : > { %5850 = vmatprep.subr.bf16.mxu0 %v11334_v25  ;;  %6014 = vmatprep.subr.bf16.mxu1 %v11337_v26  ;;  %v11429_v25 = vld [vmem:[%s15042_s4 + $0x198c] ss:$16 sps:$4 sm:$0xff]   ;;  %v11424_v26 = vld [vmem:[%s15042_s4 + $0x1980] ss:$16 sps:$4 sm:$0xff]  }
 0x2fb   : > { %5851 = vmatpush1.bf16.msra.mxu0 %v11332_v21  ;;  %6015 = vmatpush1.bf16.msra.mxu1 %v11335_v28  ;;  %v11427_v21 = vld [vmem:[%s15042_s4 + $0x1988] ss:$16 sps:$4 sm:$0xff]   ;;  %v11432_v28 = vld [vmem:[%s15042_s4 + $0x19a4] ss:$16 sps:$4 sm:$0xff]  }
 0x2fc   : > { %5852 = vmatprep.subr.bf16.mxu0 %v11340_v29  ;;  %6016 = vmatprep.subr.bf16.mxu1 %v11343_v24  ;;  %v11435_v29 = vld [vmem:[%s15042_s4 + $0x19ac] ss:$16 sps:$4 sm:$0xff]   ;;  %v11430_v24 = vld [vmem:[%s15042_s4 + $0x19a0] ss:$16 sps:$4 sm:$0xff]  }
 0x2ff   : > { %5853 = vmatpush1.bf16.msra.mxu0 %v11338_v31  ;;  %6017 = vmatpush1.bf16.msra.mxu1 %v11341_v32  ;;  %v11433_v31 = vld [vmem:[%s15042_s4 + $0x19a8] ss:$16 sps:$4 sm:$0xff]   ;;  %v11438_v32 = vld [vmem:[%s15042_s4 + $0x19c4] ss:$16 sps:$4 sm:$0xff]  }
 0x300   : > { %5854 = vmatprep.subr.bf16.mxu0 %v11346_v33  ;;  %6018 = vmatprep.subr.bf16.mxu1 %v11349_v34  ;;  %v11441_v33 = vld [vmem:[%s15042_s4 + $0x19cc] ss:$16 sps:$4 sm:$0xff]   ;;  %v11436_v34 = vld [vmem:[%s15042_s4 + $0x19c0] ss:$16 sps:$4 sm:$0xff]  }
 0x303   : > { %5855 = vmatpush1.bf16.msra.mxu0 %v11344_v35  ;;  %6019 = vmatpush1.bf16.msra.mxu1 %v11347_v36  ;;  %v11439_v35 = vld [vmem:[%s15042_s4 + $0x19c8] ss:$16 sps:$4 sm:$0xff]   ;;  %v11444_v36 = vld [vmem:[%s15042_s4 + $0x19e4] ss:$16 sps:$4 sm:$0xff]  }
 0x304   : > { %7602 = vmatprep.subr.bf16.mxu0 %v11354_v37  ;;  %7766 = vmatprep.subr.bf16.mxu1 %v11357_v38  ;;  %v11447_v37 = vld [vmem:[%s15042_s4 + $0x19ec] ss:$16 sps:$4 sm:$0xff]   ;;  %v11442_v38 = vld [vmem:[%s15042_s4 + $0x19e0] ss:$16 sps:$4 sm:$0xff]  }
 0x306   : > { %5857 = vmatmul.mubr.bf16.vlgmr.msra.gmra.mrb[0].mxu0 %v9256_v39  ;;  %6021 = vmatmul.mubr.bf16.vlgmr.msra.gmra.mrb[0].mxu1 %v9256_v39  ;;  %v11445_v39 = vld [vmem:[%s15042_s4 + $0x19e8] ss:$16 sps:$4 sm:$0xff]  }
 0x307   : > { %7603 = vmatpush1.bf16.msra.mxu0 %v11352_v40  ;;  %7767 = vmatpush1.bf16.msra.mxu1 %v11355_v41  ;;  %v11452_v40 = vld [vmem:[%s15042_s4 + $0x1a04] ss:$16 sps:$4 sm:$0xff]   ;;  %v11455_v41 = vld [vmem:[%s15042_s4 + $0x1a0c] ss:$16 sps:$4 sm:$0xff]  }
 0x308   : > { %7604 = vmatprep.subr.bf16.mxu0 %v11360_v42  ;;  %7768 = vmatprep.subr.bf16.mxu1 %v11363_v30  ;;  %v9770_v42 = vcombine.low %v14224_v27, %v14224_v27  ;;  %v14423_v30 = vld [vmem:[%s14213_s27 + $0x8] sm:$0xff] }
 0x309   : > { %7634 = vmatprep.mubr.bf16.mxu0 %v9771_v43  ;;  %7798 = vmatprep.mubr.bf16.mxu1 %v9771_v43  ;;  %v11450_v43 = vld [vmem:[%s15042_s4 + $0x1a00] ss:$16 sps:$4 sm:$0xff]   ;;  %v11461_v27 = vld [vmem:[%s15042_s4 + $0x1a2c] ss:$16 sps:$4 sm:$0xff]  }
 0x30b   : > { %7605 = vmatpush1.bf16.msra.mxu0 %v11358_v44  ;;  %7769 = vmatpush1.bf16.msra.mxu1 %v11361_v45  ;;  %v11453_v44 = vld [vmem:[%s15042_s4 + $0x1a08] ss:$16 sps:$4 sm:$0xff]   ;;  %v11458_v45 = vld [vmem:[%s15042_s4 + $0x1a24] ss:$16 sps:$4 sm:$0xff]  }
 0x30c   : > { %7606 = vmatprep.subr.bf16.mxu0 %v11366_v46  ;;  %7770 = vmatprep.subr.bf16.mxu1 %v11369_v47  ;;  %v9773_v46 = vcombine.high %v14423_v30, %v14423_v30  ;;  %v11456_v47 = vld [vmem:[%s15042_s4 + $0x1a20] ss:$16 sps:$4 sm:$0xff]  }
 0x30f   : > { %7607 = vmatpush1.bf16.msra.mxu0 %v11364_v48  ;;  %7771 = vmatpush1.bf16.msra.mxu1 %v11367_v49  ;;  %v11459_v48 = vld [vmem:[%s15042_s4 + $0x1a28] ss:$16 sps:$4 sm:$0xff]   ;;  %v11464_v49 = vld [vmem:[%s15042_s4 + $0x1a44] ss:$16 sps:$4 sm:$0xff]  }
 0x310   : > { %7608 = vmatprep.subr.bf16.mxu0 %v11372_v50  ;;  %7772 = vmatprep.subr.bf16.mxu1 %v11375_v51  ;;  %v11467_v50 = vld [vmem:[%s15042_s4 + $0x1a4c] ss:$16 sps:$4 sm:$0xff]   ;;  %v11462_v51 = vld [vmem:[%s15042_s4 + $0x1a40] ss:$16 sps:$4 sm:$0xff]  }
 0x313   : > { %7609 = vmatpush1.bf16.msra.mxu0 %v11370_v52  ;;  %7773 = vmatpush1.bf16.msra.mxu1 %v11373_v53  ;;  %v11465_v52 = vld [vmem:[%s15042_s4 + $0x1a48] ss:$16 sps:$4 sm:$0xff]   ;;  %v11470_v53 = vld [vmem:[%s15042_s4 + $0x1a64] ss:$16 sps:$4 sm:$0xff]  }
 0x314   : > { %7610 = vmatprep.subr.bf16.mxu0 %v11378_v54  ;;  %7774 = vmatprep.subr.bf16.mxu1 %v11381_v55  ;;  %v11473_v54 = vld [vmem:[%s15042_s4 + $0x1a6c] ss:$16 sps:$4 sm:$0xff]   ;;  %v11468_v55 = vld [vmem:[%s15042_s4 + $0x1a60] ss:$16 sps:$4 sm:$0xff]  }
 0x317   : > { %7611 = vmatpush1.bf16.msra.mxu0 %v11376_v56  ;;  %7775 = vmatpush1.bf16.msra.mxu1 %v11379_v57  ;;  %v11471_v56 = vld [vmem:[%s15042_s4 + $0x1a68] ss:$16 sps:$4 sm:$0xff]   ;;  %v11476_v57 = vld [vmem:[%s15042_s4 + $0x1a84] ss:$16 sps:$4 sm:$0xff]  }
 0x318   : > { %7612 = vmatprep.subr.bf16.mxu0 %v11384_v58  ;;  %7776 = vmatprep.subr.bf16.mxu1 %v11387_v59  ;;  %v11479_v58 = vld [vmem:[%s15042_s4 + $0x1a8c] ss:$16 sps:$4 sm:$0xff]   ;;  %v11474_v59 = vld [vmem:[%s15042_s4 + $0x1a80] ss:$16 sps:$4 sm:$0xff]  }
 0x31b   : > { %7613 = vmatpush1.bf16.msra.mxu0 %v11382_v60  ;;  %7777 = vmatpush1.bf16.msra.mxu1 %v11385_v61  ;;  %v11477_v60 = vld [vmem:[%s15042_s4 + $0x1a88] ss:$16 sps:$4 sm:$0xff]   ;;  %v11482_v61 = vld [vmem:[%s15042_s4 + $0x1aa4] ss:$16 sps:$4 sm:$0xff]  }
 0x31c   : > { %7614 = vmatprep.subr.bf16.mxu0 %v11390_v62  ;;  %7778 = vmatprep.subr.bf16.mxu1 %v11393_v63  ;;  %v11485_v62 = vld [vmem:[%s15042_s4 + $0x1aac] ss:$16 sps:$4 sm:$0xff]   ;;  %v11480_v63 = vld [vmem:[%s15042_s4 + $0x1aa0] ss:$16 sps:$4 sm:$0xff]  }
 0x31f   : > { %7615 = vmatpush1.bf16.msra.mxu0 %v11388_v0  ;;  %7779 = vmatpush1.bf16.msra.mxu1 %v11391_v1  ;;  %v11483_v0 = vld [vmem:[%s15042_s4 + $0x1aa8] ss:$16 sps:$4 sm:$0xff]   ;;  %v11488_v1 = vld [vmem:[%s15042_s4 + $0x1ac4] ss:$16 sps:$4 sm:$0xff]  }
 0x320   : > { %7616 = vmatprep.subr.bf16.mxu0 %v11396_v2  ;;  %7780 = vmatprep.subr.bf16.mxu1 %v11399_v3  ;;  %v11491_v2 = vld [vmem:[%s15042_s4 + $0x1acc] ss:$16 sps:$4 sm:$0xff]   ;;  %v11486_v3 = vld [vmem:[%s15042_s4 + $0x1ac0] ss:$16 sps:$4 sm:$0xff]  }
 0x323   : > { %7617 = vmatpush1.bf16.msra.mxu0 %v11394_v4  ;;  %7781 = vmatpush1.bf16.msra.mxu1 %v11397_v5  ;;  %v11489_v4 = vld [vmem:[%s15042_s4 + $0x1ac8] ss:$16 sps:$4 sm:$0xff]   ;;  %v11494_v5 = vld [vmem:[%s15042_s4 + $0x1ae4] ss:$16 sps:$4 sm:$0xff]  }
 0x324   : > { %7618 = vmatprep.subr.bf16.mxu0 %v11402_v6  ;;  %7782 = vmatprep.subr.bf16.mxu1 %v11405_v7  ;;  %v11497_v6 = vld [vmem:[%s15042_s4 + $0x1aec] ss:$16 sps:$4 sm:$0xff]   ;;  %v11492_v7 = vld [vmem:[%s15042_s4 + $0x1ae0] ss:$16 sps:$4 sm:$0xff]  }
 0x327   : > { %7619 = vmatpush1.bf16.msra.mxu0 %v11400_v8  ;;  %7783 = vmatpush1.bf16.msra.mxu1 %v11403_v9  ;;  %v11495_v8 = vld [vmem:[%s15042_s4 + $0x1ae8] ss:$16 sps:$4 sm:$0xff]   ;;  %v11500_v9 = vld [vmem:[%s15042_s4 + $0x1b04] ss:$16 sps:$4 sm:$0xff]  }
 0x328   : > { %7620 = vmatprep.subr.bf16.mxu0 %v11408_v10  ;;  %7784 = vmatprep.subr.bf16.mxu1 %v11411_v12  ;;  %v11503_v10 = vld [vmem:[%s15042_s4 + $0x1b0c] ss:$16 sps:$4 sm:$0xff]   ;;  %v11498_v12 = vld [vmem:[%s15042_s4 + $0x1b00] ss:$16 sps:$4 sm:$0xff]  }
 0x32b   : > { %7621 = vmatpush1.bf16.msra.mxu0 %v11406_v13  ;;  %7785 = vmatpush1.bf16.msra.mxu1 %v11409_v15  ;;  %v11501_v13 = vld [vmem:[%s15042_s4 + $0x1b08] ss:$16 sps:$4 sm:$0xff]   ;;  %v11506_v15 = vld [vmem:[%s15042_s4 + $0x1b24] ss:$16 sps:$4 sm:$0xff]  }
 0x32c   : > { %7622 = vmatprep.subr.bf16.mxu0 %v11414_v16  ;;  %7786 = vmatprep.subr.bf16.mxu1 %v11417_v17  ;;  %v11509_v16 = vld [vmem:[%s15042_s4 + $0x1b2c] ss:$16 sps:$4 sm:$0xff]   ;;  %v11504_v17 = vld [vmem:[%s15042_s4 + $0x1b20] ss:$16 sps:$4 sm:$0xff]  }
 0x32f   : > { %7623 = vmatpush1.bf16.msra.mxu0 %v11412_v19  ;;  %7787 = vmatpush1.bf16.msra.mxu1 %v11415_v14  ;;  %v11507_v19 = vld [vmem:[%s15042_s4 + $0x1b28] ss:$16 sps:$4 sm:$0xff]   ;;  %v11512_v14 = vld [vmem:[%s15042_s4 + $0x1b44] ss:$16 sps:$4 sm:$0xff]  }
 0x330   : > { %7624 = vmatprep.subr.bf16.mxu0 %v11420_v20  ;;  %7788 = vmatprep.subr.bf16.mxu1 %v11423_v11  ;;  %v11515_v20 = vld [vmem:[%s15042_s4 + $0x1b4c] ss:$16 sps:$4 sm:$0xff]   ;;  %v11510_v11 = vld [vmem:[%s15042_s4 + $0x1b40] ss:$16 sps:$4 sm:$0xff]  }
 0x333   : > { %7625 = vmatpush1.bf16.msra.mxu0 %v11418_v22  ;;  %7789 = vmatpush1.bf16.msra.mxu1 %v11421_v23  ;;  %v11513_v22 = vld [vmem:[%s15042_s4 + $0x1b48] ss:$16 sps:$4 sm:$0xff]   ;;  %v11518_v23 = vld [vmem:[%s15042_s4 + $0x1b64] ss:$16 sps:$4 sm:$0xff]  }
 0x334   : > { %7626 = vmatprep.subr.bf16.mxu0 %v11426_v18  ;;  %7790 = vmatprep.subr.bf16.mxu1 %v11429_v25  ;;  %v11521_v18 = vld [vmem:[%s15042_s4 + $0x1b6c] ss:$16 sps:$4 sm:$0xff]   ;;  %v11516_v25 = vld [vmem:[%s15042_s4 + $0x1b60] ss:$16 sps:$4 sm:$0xff]  }
 0x337   : > { %7627 = vmatpush1.bf16.msra.mxu0 %v11424_v26  ;;  %7791 = vmatpush1.bf16.msra.mxu1 %v11427_v21  ;;  %v11519_v26 = vld [vmem:[%s15042_s4 + $0x1b68] ss:$16 sps:$4 sm:$0xff]   ;;  %v11524_v21 = vld [vmem:[%s15042_s4 + $0x1b84] ss:$16 sps:$4 sm:$0xff]  }
 0x338   : > { %7628 = vmatprep.subr.bf16.mxu0 %v11432_v28  ;;  %7792 = vmatprep.subr.bf16.mxu1 %v11435_v29  ;;  %v11527_v28 = vld [vmem:[%s15042_s4 + $0x1b8c] ss:$16 sps:$4 sm:$0xff]   ;;  %v11522_v29 = vld [vmem:[%s15042_s4 + $0x1b80] ss:$16 sps:$4 sm:$0xff]  }
 0x33b   : > { %7629 = vmatpush1.bf16.msra.mxu0 %v11430_v24  ;;  %7793 = vmatpush1.bf16.msra.mxu1 %v11433_v31  ;;  %v11525_v24 = vld [vmem:[%s15042_s4 + $0x1b88] ss:$16 sps:$4 sm:$0xff]   ;;  %v11530_v31 = vld [vmem:[%s15042_s4 + $0x1ba4] ss:$16 sps:$4 sm:$0xff]  }
 0x33c   : > { %7630 = vmatprep.subr.bf16.mxu0 %v11438_v32  ;;  %7794 = vmatprep.subr.bf16.mxu1 %v11441_v33  ;;  %v11533_v32 = vld [vmem:[%s15042_s4 + $0x1bac] ss:$16 sps:$4 sm:$0xff]   ;;  %v11528_v33 = vld [vmem:[%s15042_s4 + $0x1ba0] ss:$16 sps:$4 sm:$0xff]  }
 0x33f   : > { %7631 = vmatpush1.bf16.msra.mxu0 %v11436_v34  ;;  %7795 = vmatpush1.bf16.msra.mxu1 %v11439_v35  ;;  %v11531_v34 = vld [vmem:[%s15042_s4 + $0x1ba8] ss:$16 sps:$4 sm:$0xff]   ;;  %v11536_v35 = vld [vmem:[%s15042_s4 + $0x1bc4] ss:$16 sps:$4 sm:$0xff]  }
 0x340   : > { %7632 = vmatprep.subr.bf16.mxu0 %v11444_v36  ;;  %7796 = vmatprep.subr.bf16.mxu1 %v11447_v37  ;;  %v11539_v36 = vld [vmem:[%s15042_s4 + $0x1bcc] ss:$16 sps:$4 sm:$0xff]   ;;  %v11534_v37 = vld [vmem:[%s15042_s4 + $0x1bc0] ss:$16 sps:$4 sm:$0xff]  }
 0x343   : > { %7633 = vmatpush1.bf16.msra.mxu0 %v11442_v38  ;;  %7797 = vmatpush1.bf16.msra.mxu1 %v11445_v39  ;;  %v11537_v38 = vld [vmem:[%s15042_s4 + $0x1bc8] ss:$16 sps:$4 sm:$0xff]   ;;  %v11542_v39 = vld [vmem:[%s15042_s4 + $0x1be4] ss:$16 sps:$4 sm:$0xff]  }
 0x344   : > { %7643 = vmatprep.subr.bf16.mxu0 %v11452_v40  ;;  %7807 = vmatprep.subr.bf16.mxu1 %v11455_v41  ;;  %v11545_v40 = vld [vmem:[%s15042_s4 + $0x1bec] ss:$16 sps:$4 sm:$0xff]   ;;  %v11540_v41 = vld [vmem:[%s15042_s4 + $0x1be0] ss:$16 sps:$4 sm:$0xff]  }
 0x346   : > { %7635 = vmatmul.mubr.bf16.vlgmr.msra.gmra.mrb[0].mxu0 %v9770_v42  ;;  %7799 = vmatmul.mubr.bf16.vlgmr.msra.gmra.mrb[0].mxu1 %v9770_v42  ;;  %v11543_v42 = vld [vmem:[%s15042_s4 + $0x1be8] ss:$16 sps:$4 sm:$0xff]  }
 0x347   : > { %7644 = vmatpush1.bf16.msra.mxu0 %v11450_v43  ;;  %7808 = vmatpush1.bf16.msra.mxu1 %v11453_v44  ;;  %v11550_v43 = vld [vmem:[%s15042_s4 + $0x1c04] ss:$16 sps:$4 sm:$0xff]   ;;  %v11553_v44 = vld [vmem:[%s15042_s4 + $0x1c0c] ss:$16 sps:$4 sm:$0xff]  }
 0x348   : > { %7645 = vmatprep.subr.bf16.mxu0 %v11458_v45  ;;  %7809 = vmatprep.subr.bf16.mxu1 %v11461_v27  ;;  %v9772_v45 = vcombine.low %v14423_v30, %v14423_v30  ;;  %v14622_v27 = vld [vmem:[%s14213_s27 + $0x10] sm:$0xff]  ;;  %v11559_v30 = vld [vmem:[%s15042_s4 + $0x1c2c] ss:$16 sps:$4 sm:$0xff]  }
 0x349   : > { %7675 = vmatprep.mubr.bf16.mxu0 %v9773_v46  ;;  %7839 = vmatprep.mubr.bf16.mxu1 %v9773_v46  ;;  %v11548_v46 = vld [vmem:[%s15042_s4 + $0x1c00] ss:$16 sps:$4 sm:$0xff]  }
 0x34b   : > { %7646 = vmatpush1.bf16.msra.mxu0 %v11456_v47  ;;  %7810 = vmatpush1.bf16.msra.mxu1 %v11459_v48  ;;  %v11551_v47 = vld [vmem:[%s15042_s4 + $0x1c08] ss:$16 sps:$4 sm:$0xff]   ;;  %v11556_v48 = vld [vmem:[%s15042_s4 + $0x1c24] ss:$16 sps:$4 sm:$0xff]  }
 0x34c   : > { %7647 = vmatprep.subr.bf16.mxu0 %v11464_v49  ;;  %7811 = vmatprep.subr.bf16.mxu1 %v11467_v50  ;;  %v9775_v49 = vcombine.high %v14622_v27, %v14622_v27  ;;  %v11554_v50 = vld [vmem:[%s15042_s4 + $0x1c20] ss:$16 sps:$4 sm:$0xff]  }
 0x34f   : > { %7648 = vmatpush1.bf16.msra.mxu0 %v11462_v51  ;;  %7812 = vmatpush1.bf16.msra.mxu1 %v11465_v52  ;;  %v11557_v51 = vld [vmem:[%s15042_s4 + $0x1c28] ss:$16 sps:$4 sm:$0xff]   ;;  %v11562_v52 = vld [vmem:[%s15042_s4 + $0x1c44] ss:$16 sps:$4 sm:$0xff]  }
 0x350   : > { %7649 = vmatprep.subr.bf16.mxu0 %v11470_v53  ;;  %7813 = vmatprep.subr.bf16.mxu1 %v11473_v54  ;;  %v11565_v53 = vld [vmem:[%s15042_s4 + $0x1c4c] ss:$16 sps:$4 sm:$0xff]   ;;  %v11560_v54 = vld [vmem:[%s15042_s4 + $0x1c40] ss:$16 sps:$4 sm:$0xff]  }
 0x353   : > { %7650 = vmatpush1.bf16.msra.mxu0 %v11468_v55  ;;  %7814 = vmatpush1.bf16.msra.mxu1 %v11471_v56  ;;  %v11563_v55 = vld [vmem:[%s15042_s4 + $0x1c48] ss:$16 sps:$4 sm:$0xff]   ;;  %v11568_v56 = vld [vmem:[%s15042_s4 + $0x1c64] ss:$16 sps:$4 sm:$0xff]  }
 0x354   : > { %7651 = vmatprep.subr.bf16.mxu0 %v11476_v57  ;;  %7815 = vmatprep.subr.bf16.mxu1 %v11479_v58  ;;  %v11571_v57 = vld [vmem:[%s15042_s4 + $0x1c6c] ss:$16 sps:$4 sm:$0xff]   ;;  %v11566_v58 = vld [vmem:[%s15042_s4 + $0x1c60] ss:$16 sps:$4 sm:$0xff]  }
 0x357   : > { %7652 = vmatpush1.bf16.msra.mxu0 %v11474_v59  ;;  %7816 = vmatpush1.bf16.msra.mxu1 %v11477_v60  ;;  %v11569_v59 = vld [vmem:[%s15042_s4 + $0x1c68] ss:$16 sps:$4 sm:$0xff]   ;;  %v11574_v60 = vld [vmem:[%s15042_s4 + $0x1c84] ss:$16 sps:$4 sm:$0xff]  }
 0x358   : > { %7653 = vmatprep.subr.bf16.mxu0 %v11482_v61  ;;  %7817 = vmatprep.subr.bf16.mxu1 %v11485_v62  ;;  %v11577_v61 = vld [vmem:[%s15042_s4 + $0x1c8c] ss:$16 sps:$4 sm:$0xff]   ;;  %v11572_v62 = vld [vmem:[%s15042_s4 + $0x1c80] ss:$16 sps:$4 sm:$0xff]  }
 0x35b   : > { %7654 = vmatpush1.bf16.msra.mxu0 %v11480_v63  ;;  %7818 = vmatpush1.bf16.msra.mxu1 %v11483_v0  ;;  %v11575_v63 = vld [vmem:[%s15042_s4 + $0x1c88] ss:$16 sps:$4 sm:$0xff]   ;;  %v11580_v0 = vld [vmem:[%s15042_s4 + $0x1ca4] ss:$16 sps:$4 sm:$0xff]  }
 0x35c   : > { %7655 = vmatprep.subr.bf16.mxu0 %v11488_v1  ;;  %7819 = vmatprep.subr.bf16.mxu1 %v11491_v2  ;;  %v11583_v1 = vld [vmem:[%s15042_s4 + $0x1cac] ss:$16 sps:$4 sm:$0xff]   ;;  %v11578_v2 = vld [vmem:[%s15042_s4 + $0x1ca0] ss:$16 sps:$4 sm:$0xff]  }
 0x35f   : > { %7656 = vmatpush1.bf16.msra.mxu0 %v11486_v3  ;;  %7820 = vmatpush1.bf16.msra.mxu1 %v11489_v4  ;;  %v11581_v3 = vld [vmem:[%s15042_s4 + $0x1ca8] ss:$16 sps:$4 sm:$0xff]   ;;  %v11586_v4 = vld [vmem:[%s15042_s4 + $0x1cc4] ss:$16 sps:$4 sm:$0xff]  }
 0x360   : > { %7657 = vmatprep.subr.bf16.mxu0 %v11494_v5  ;;  %7821 = vmatprep.subr.bf16.mxu1 %v11497_v6  ;;  %v11589_v5 = vld [vmem:[%s15042_s4 + $0x1ccc] ss:$16 sps:$4 sm:$0xff]   ;;  %v11584_v6 = vld [vmem:[%s15042_s4 + $0x1cc0] ss:$16 sps:$4 sm:$0xff]  }
 0x363   : > { %7658 = vmatpush1.bf16.msra.mxu0 %v11492_v7  ;;  %7822 = vmatpush1.bf16.msra.mxu1 %v11495_v8  ;;  %v11587_v7 = vld [vmem:[%s15042_s4 + $0x1cc8] ss:$16 sps:$4 sm:$0xff]   ;;  %v11592_v8 = vld [vmem:[%s15042_s4 + $0x1ce4] ss:$16 sps:$4 sm:$0xff]  }
 0x364   : > { %7659 = vmatprep.subr.bf16.mxu0 %v11500_v9  ;;  %7823 = vmatprep.subr.bf16.mxu1 %v11503_v10  ;;  %v11595_v9 = vld [vmem:[%s15042_s4 + $0x1cec] ss:$16 sps:$4 sm:$0xff]   ;;  %v11590_v10 = vld [vmem:[%s15042_s4 + $0x1ce0] ss:$16 sps:$4 sm:$0xff]  }
 0x367   : > { %7660 = vmatpush1.bf16.msra.mxu0 %v11498_v12  ;;  %7824 = vmatpush1.bf16.msra.mxu1 %v11501_v13  ;;  %v11593_v12 = vld [vmem:[%s15042_s4 + $0x1ce8] ss:$16 sps:$4 sm:$0xff]   ;;  %v11598_v13 = vld [vmem:[%s15042_s4 + $0x1d04] ss:$16 sps:$4 sm:$0xff]  }
 0x368   : > { %7661 = vmatprep.subr.bf16.mxu0 %v11506_v15  ;;  %7825 = vmatprep.subr.bf16.mxu1 %v11509_v16  ;;  %v11601_v15 = vld [vmem:[%s15042_s4 + $0x1d0c] ss:$16 sps:$4 sm:$0xff]   ;;  %v11596_v16 = vld [vmem:[%s15042_s4 + $0x1d00] ss:$16 sps:$4 sm:$0xff]  }
 0x36b   : > { %7662 = vmatpush1.bf16.msra.mxu0 %v11504_v17  ;;  %7826 = vmatpush1.bf16.msra.mxu1 %v11507_v19  ;;  %v11599_v17 = vld [vmem:[%s15042_s4 + $0x1d08] ss:$16 sps:$4 sm:$0xff]   ;;  %v11604_v19 = vld [vmem:[%s15042_s4 + $0x1d24] ss:$16 sps:$4 sm:$0xff]  }
 0x36c   : > { %7663 = vmatprep.subr.bf16.mxu0 %v11512_v14  ;;  %7827 = vmatprep.subr.bf16.mxu1 %v11515_v20  ;;  %v11607_v14 = vld [vmem:[%s15042_s4 + $0x1d2c] ss:$16 sps:$4 sm:$0xff]   ;;  %v11602_v20 = vld [vmem:[%s15042_s4 + $0x1d20] ss:$16 sps:$4 sm:$0xff]  }
 0x36f   : > { %7664 = vmatpush1.bf16.msra.mxu0 %v11510_v11  ;;  %7828 = vmatpush1.bf16.msra.mxu1 %v11513_v22  ;;  %v11605_v11 = vld [vmem:[%s15042_s4 + $0x1d28] ss:$16 sps:$4 sm:$0xff]   ;;  %v11610_v22 = vld [vmem:[%s15042_s4 + $0x1d44] ss:$16 sps:$4 sm:$0xff]  }
 0x370   : > { %7665 = vmatprep.subr.bf16.mxu0 %v11518_v23  ;;  %7829 = vmatprep.subr.bf16.mxu1 %v11521_v18  ;;  %v11613_v23 = vld [vmem:[%s15042_s4 + $0x1d4c] ss:$16 sps:$4 sm:$0xff]   ;;  %v11608_v18 = vld [vmem:[%s15042_s4 + $0x1d40] ss:$16 sps:$4 sm:$0xff]  }
 0x373   : > { %7666 = vmatpush1.bf16.msra.mxu0 %v11516_v25  ;;  %7830 = vmatpush1.bf16.msra.mxu1 %v11519_v26  ;;  %v11611_v25 = vld [vmem:[%s15042_s4 + $0x1d48] ss:$16 sps:$4 sm:$0xff]   ;;  %v11616_v26 = vld [vmem:[%s15042_s4 + $0x1d64] ss:$16 sps:$4 sm:$0xff]  }
 0x374   : > { %7667 = vmatprep.subr.bf16.mxu0 %v11524_v21  ;;  %7831 = vmatprep.subr.bf16.mxu1 %v11527_v28  ;;  %v11619_v21 = vld [vmem:[%s15042_s4 + $0x1d6c] ss:$16 sps:$4 sm:$0xff]   ;;  %v11614_v28 = vld [vmem:[%s15042_s4 + $0x1d60] ss:$16 sps:$4 sm:$0xff]  }
 0x377   : > { %7668 = vmatpush1.bf16.msra.mxu0 %v11522_v29  ;;  %7832 = vmatpush1.bf16.msra.mxu1 %v11525_v24  ;;  %v11617_v29 = vld [vmem:[%s15042_s4 + $0x1d68] ss:$16 sps:$4 sm:$0xff]   ;;  %v11622_v24 = vld [vmem:[%s15042_s4 + $0x1d84] ss:$16 sps:$4 sm:$0xff]  }
 0x378   : > { %7669 = vmatprep.subr.bf16.mxu0 %v11530_v31  ;;  %7833 = vmatprep.subr.bf16.mxu1 %v11533_v32  ;;  %v11625_v31 = vld [vmem:[%s15042_s4 + $0x1d8c] ss:$16 sps:$4 sm:$0xff]   ;;  %v11620_v32 = vld [vmem:[%s15042_s4 + $0x1d80] ss:$16 sps:$4 sm:$0xff]  }
 0x37b   : > { %7670 = vmatpush1.bf16.msra.mxu0 %v11528_v33  ;;  %7834 = vmatpush1.bf16.msra.mxu1 %v11531_v34  ;;  %v11623_v33 = vld [vmem:[%s15042_s4 + $0x1d88] ss:$16 sps:$4 sm:$0xff]   ;;  %v11628_v34 = vld [vmem:[%s15042_s4 + $0x1da4] ss:$16 sps:$4 sm:$0xff]  }
 0x37c   : > { %7671 = vmatprep.subr.bf16.mxu0 %v11536_v35  ;;  %7835 = vmatprep.subr.bf16.mxu1 %v11539_v36  ;;  %v11631_v35 = vld [vmem:[%s15042_s4 + $0x1dac] ss:$16 sps:$4 sm:$0xff]   ;;  %v11626_v36 = vld [vmem:[%s15042_s4 + $0x1da0] ss:$16 sps:$4 sm:$0xff]  }
 0x37f   : > { %7672 = vmatpush1.bf16.msra.mxu0 %v11534_v37  ;;  %7836 = vmatpush1.bf16.msra.mxu1 %v11537_v38  ;;  %v11629_v37 = vld [vmem:[%s15042_s4 + $0x1da8] ss:$16 sps:$4 sm:$0xff]   ;;  %v11634_v38 = vld [vmem:[%s15042_s4 + $0x1dc4] ss:$16 sps:$4 sm:$0xff]  }
 0x380   : > { %7673 = vmatprep.subr.bf16.mxu0 %v11542_v39  ;;  %7837 = vmatprep.subr.bf16.mxu1 %v11545_v40  ;;  %v11637_v39 = vld [vmem:[%s15042_s4 + $0x1dcc] ss:$16 sps:$4 sm:$0xff]   ;;  %v11632_v40 = vld [vmem:[%s15042_s4 + $0x1dc0] ss:$16 sps:$4 sm:$0xff]  }
 0x383   : > { %7674 = vmatpush1.bf16.msra.mxu0 %v11540_v41  ;;  %7838 = vmatpush1.bf16.msra.mxu1 %v11543_v42  ;;  %v11635_v41 = vld [vmem:[%s15042_s4 + $0x1dc8] ss:$16 sps:$4 sm:$0xff]   ;;  %v11640_v42 = vld [vmem:[%s15042_s4 + $0x1de4] ss:$16 sps:$4 sm:$0xff]  }
 0x384   : > { %7684 = vmatprep.subr.bf16.mxu0 %v11550_v43  ;;  %7848 = vmatprep.subr.bf16.mxu1 %v11553_v44  ;;  %v11643_v43 = vld [vmem:[%s15042_s4 + $0x1dec] ss:$16 sps:$4 sm:$0xff]   ;;  %v11638_v44 = vld [vmem:[%s15042_s4 + $0x1de0] ss:$16 sps:$4 sm:$0xff]  }
 0x386   : > { %7676 = vmatmul.mubr.bf16.vlgmr.msra.gmra.mrb[0].mxu0 %v9772_v45  ;;  %7840 = vmatmul.mubr.bf16.vlgmr.msra.gmra.mrb[0].mxu1 %v9772_v45  ;;  %v11641_v45 = vld [vmem:[%s15042_s4 + $0x1de8] ss:$16 sps:$4 sm:$0xff]  }
 0x387   : > { %7685 = vmatpush1.bf16.msra.mxu0 %v11548_v46  ;;  %7849 = vmatpush1.bf16.msra.mxu1 %v11551_v47  ;;  %v11648_v46 = vld [vmem:[%s15042_s4 + $0x1e04] ss:$16 sps:$4 sm:$0xff]   ;;  %v11651_v47 = vld [vmem:[%s15042_s4 + $0x1e0c] ss:$16 sps:$4 sm:$0xff]  }
 0x388   : > { %7686 = vmatprep.subr.bf16.mxu0 %v11556_v48  ;;  %7850 = vmatprep.subr.bf16.mxu1 %v11559_v30  ;;  %v9774_v48 = vcombine.low %v14622_v27, %v14622_v27  ;;  %v14821_v30 = vld [vmem:[%s14213_s27 + $0x18] sm:$0xff] }
 0x389   : > { %7716 = vmatprep.mubr.bf16.mxu0 %v9775_v49  ;;  %7880 = vmatprep.mubr.bf16.mxu1 %v9775_v49  ;;  %v11646_v49 = vld [vmem:[%s15042_s4 + $0x1e00] ss:$16 sps:$4 sm:$0xff]   ;;  %v11657_v27 = vld [vmem:[%s15042_s4 + $0x1e2c] ss:$16 sps:$4 sm:$0xff]  }
 0x38b   : > { %7687 = vmatpush1.bf16.msra.mxu0 %v11554_v50  ;;  %7851 = vmatpush1.bf16.msra.mxu1 %v11557_v51  ;;  %v11649_v50 = vld [vmem:[%s15042_s4 + $0x1e08] ss:$16 sps:$4 sm:$0xff]   ;;  %v11654_v51 = vld [vmem:[%s15042_s4 + $0x1e24] ss:$16 sps:$4 sm:$0xff]  }
 0x38c   : > { %7688 = vmatprep.subr.bf16.mxu0 %v11562_v52  ;;  %7852 = vmatprep.subr.bf16.mxu1 %v11565_v53  ;;  %v9777_v52 = vcombine.high %v14821_v30, %v14821_v30  ;;  %v11652_v53 = vld [vmem:[%s15042_s4 + $0x1e20] ss:$16 sps:$4 sm:$0xff]  }
 0x38f   : > { %7689 = vmatpush1.bf16.msra.mxu0 %v11560_v54  ;;  %7853 = vmatpush1.bf16.msra.mxu1 %v11563_v55  ;;  %v11655_v54 = vld [vmem:[%s15042_s4 + $0x1e28] ss:$16 sps:$4 sm:$0xff]   ;;  %v11660_v55 = vld [vmem:[%s15042_s4 + $0x1e44] ss:$16 sps:$4 sm:$0xff]  }
 0x390   : > { %7690 = vmatprep.subr.bf16.mxu0 %v11568_v56  ;;  %7854 = vmatprep.subr.bf16.mxu1 %v11571_v57  ;;  %v11663_v56 = vld [vmem:[%s15042_s4 + $0x1e4c] ss:$16 sps:$4 sm:$0xff]   ;;  %v11658_v57 = vld [vmem:[%s15042_s4 + $0x1e40] ss:$16 sps:$4 sm:$0xff]  }
 0x393   : > { %7691 = vmatpush1.bf16.msra.mxu0 %v11566_v58  ;;  %7855 = vmatpush1.bf16.msra.mxu1 %v11569_v59  ;;  %v11661_v58 = vld [vmem:[%s15042_s4 + $0x1e48] ss:$16 sps:$4 sm:$0xff]   ;;  %v11666_v59 = vld [vmem:[%s15042_s4 + $0x1e64] ss:$16 sps:$4 sm:$0xff]  }
 0x394   : > { %7692 = vmatprep.subr.bf16.mxu0 %v11574_v60  ;;  %7856 = vmatprep.subr.bf16.mxu1 %v11577_v61  ;;  %v11669_v60 = vld [vmem:[%s15042_s4 + $0x1e6c] ss:$16 sps:$4 sm:$0xff]   ;;  %v11664_v61 = vld [vmem:[%s15042_s4 + $0x1e60] ss:$16 sps:$4 sm:$0xff]  }
 0x397   : > { %7693 = vmatpush1.bf16.msra.mxu0 %v11572_v62  ;;  %7857 = vmatpush1.bf16.msra.mxu1 %v11575_v63  ;;  %v11667_v62 = vld [vmem:[%s15042_s4 + $0x1e68] ss:$16 sps:$4 sm:$0xff]   ;;  %v11672_v63 = vld [vmem:[%s15042_s4 + $0x1e84] ss:$16 sps:$4 sm:$0xff]  }
 0x398   : > { %7694 = vmatprep.subr.bf16.mxu0 %v11580_v0  ;;  %7858 = vmatprep.subr.bf16.mxu1 %v11583_v1  ;;  %v11675_v0 = vld [vmem:[%s15042_s4 + $0x1e8c] ss:$16 sps:$4 sm:$0xff]   ;;  %v11670_v1 = vld [vmem:[%s15042_s4 + $0x1e80] ss:$16 sps:$4 sm:$0xff]  }
 0x39b   : > { %7695 = vmatpush1.bf16.msra.mxu0 %v11578_v2  ;;  %7859 = vmatpush1.bf16.msra.mxu1 %v11581_v3  ;;  %v11673_v2 = vld [vmem:[%s15042_s4 + $0x1e88] ss:$16 sps:$4 sm:$0xff]   ;;  %v11678_v3 = vld [vmem:[%s15042_s4 + $0x1ea4] ss:$16 sps:$4 sm:$0xff]  }
 0x39c   : > { %7696 = vmatprep.subr.bf16.mxu0 %v11586_v4  ;;  %7860 = vmatprep.subr.bf16.mxu1 %v11589_v5  ;;  %v11681_v4 = vld [vmem:[%s15042_s4 + $0x1eac] ss:$16 sps:$4 sm:$0xff]   ;;  %v11676_v5 = vld [vmem:[%s15042_s4 + $0x1ea0] ss:$16 sps:$4 sm:$0xff]  }
 0x39f   : > { %7697 = vmatpush1.bf16.msra.mxu0 %v11584_v6  ;;  %7861 = vmatpush1.bf16.msra.mxu1 %v11587_v7  ;;  %v11679_v6 = vld [vmem:[%s15042_s4 + $0x1ea8] ss:$16 sps:$4 sm:$0xff]   ;;  %v11684_v7 = vld [vmem:[%s15042_s4 + $0x1ec4] ss:$16 sps:$4 sm:$0xff]  }
 0x3a0   : > { %7698 = vmatprep.subr.bf16.mxu0 %v11592_v8  ;;  %7862 = vmatprep.subr.bf16.mxu1 %v11595_v9  ;;  %v11687_v8 = vld [vmem:[%s15042_s4 + $0x1ecc] ss:$16 sps:$4 sm:$0xff]   ;;  %v11682_v9 = vld [vmem:[%s15042_s4 + $0x1ec0] ss:$16 sps:$4 sm:$0xff]  }
 0x3a3   : > { %7699 = vmatpush1.bf16.msra.mxu0 %v11590_v10  ;;  %7863 = vmatpush1.bf16.msra.mxu1 %v11593_v12  ;;  %v11685_v10 = vld [vmem:[%s15042_s4 + $0x1ec8] ss:$16 sps:$4 sm:$0xff]   ;;  %v11690_v12 = vld [vmem:[%s15042_s4 + $0x1ee4] ss:$16 sps:$4 sm:$0xff]  }
 0x3a4   : > { %7700 = vmatprep.subr.bf16.mxu0 %v11598_v13  ;;  %7864 = vmatprep.subr.bf16.mxu1 %v11601_v15  ;;  %v11693_v13 = vld [vmem:[%s15042_s4 + $0x1eec] ss:$16 sps:$4 sm:$0xff]   ;;  %v11688_v15 = vld [vmem:[%s15042_s4 + $0x1ee0] ss:$16 sps:$4 sm:$0xff]  }
 0x3a7   : > { %7701 = vmatpush1.bf16.msra.mxu0 %v11596_v16  ;;  %7865 = vmatpush1.bf16.msra.mxu1 %v11599_v17  ;;  %v11691_v16 = vld [vmem:[%s15042_s4 + $0x1ee8] ss:$16 sps:$4 sm:$0xff]   ;;  %v11696_v17 = vld [vmem:[%s15042_s4 + $0x1f04] ss:$16 sps:$4 sm:$0xff]  }
 0x3a8   : > { %7702 = vmatprep.subr.bf16.mxu0 %v11604_v19  ;;  %7866 = vmatprep.subr.bf16.mxu1 %v11607_v14  ;;  %v11699_v19 = vld [vmem:[%s15042_s4 + $0x1f0c] ss:$16 sps:$4 sm:$0xff]   ;;  %v11694_v14 = vld [vmem:[%s15042_s4 + $0x1f00] ss:$16 sps:$4 sm:$0xff]  }
 0x3ab   : > { %7703 = vmatpush1.bf16.msra.mxu0 %v11602_v20  ;;  %7867 = vmatpush1.bf16.msra.mxu1 %v11605_v11  ;;  %v11697_v20 = vld [vmem:[%s15042_s4 + $0x1f08] ss:$16 sps:$4 sm:$0xff]   ;;  %v11702_v11 = vld [vmem:[%s15042_s4 + $0x1f24] ss:$16 sps:$4 sm:$0xff]  }
 0x3ac   : > { %7704 = vmatprep.subr.bf16.mxu0 %v11610_v22  ;;  %7868 = vmatprep.subr.bf16.mxu1 %v11613_v23  ;;  %v11705_v22 = vld [vmem:[%s15042_s4 + $0x1f2c] ss:$16 sps:$4 sm:$0xff]   ;;  %v11700_v23 = vld [vmem:[%s15042_s4 + $0x1f20] ss:$16 sps:$4 sm:$0xff]  }
 0x3af   : > { %7705 = vmatpush1.bf16.msra.mxu0 %v11608_v18  ;;  %7869 = vmatpush1.bf16.msra.mxu1 %v11611_v25  ;;  %v11703_v18 = vld [vmem:[%s15042_s4 + $0x1f28] ss:$16 sps:$4 sm:$0xff]   ;;  %v11708_v25 = vld [vmem:[%s15042_s4 + $0x1f44] ss:$16 sps:$4 sm:$0xff]  }
 0x3b0   : > { %7706 = vmatprep.subr.bf16.mxu0 %v11616_v26  ;;  %7870 = vmatprep.subr.bf16.mxu1 %v11619_v21  ;;  %v11711_v26 = vld [vmem:[%s15042_s4 + $0x1f4c] ss:$16 sps:$4 sm:$0xff]   ;;  %v11706_v21 = vld [vmem:[%s15042_s4 + $0x1f40] ss:$16 sps:$4 sm:$0xff]  }
 0x3b3   : > { %7707 = vmatpush1.bf16.msra.mxu0 %v11614_v28  ;;  %7871 = vmatpush1.bf16.msra.mxu1 %v11617_v29  ;;  %v11709_v28 = vld [vmem:[%s15042_s4 + $0x1f48] ss:$16 sps:$4 sm:$0xff]   ;;  %v11714_v29 = vld [vmem:[%s15042_s4 + $0x1f64] ss:$16 sps:$4 sm:$0xff]  }
 0x3b4   : > { %7708 = vmatprep.subr.bf16.mxu0 %v11622_v24  ;;  %7872 = vmatprep.subr.bf16.mxu1 %v11625_v31  ;;  %v11717_v24 = vld [vmem:[%s15042_s4 + $0x1f6c] ss:$16 sps:$4 sm:$0xff]   ;;  %v11712_v31 = vld [vmem:[%s15042_s4 + $0x1f60] ss:$16 sps:$4 sm:$0xff]  }
 0x3b7   : > { %7709 = vmatpush1.bf16.msra.mxu0 %v11620_v32  ;;  %7873 = vmatpush1.bf16.msra.mxu1 %v11623_v33  ;;  %v11715_v32 = vld [vmem:[%s15042_s4 + $0x1f68] ss:$16 sps:$4 sm:$0xff]   ;;  %v11720_v33 = vld [vmem:[%s15042_s4 + $0x1f84] ss:$16 sps:$4 sm:$0xff]  }
 0x3b8   : > { %7710 = vmatprep.subr.bf16.mxu0 %v11628_v34  ;;  %7874 = vmatprep.subr.bf16.mxu1 %v11631_v35  ;;  %v11723_v34 = vld [vmem:[%s15042_s4 + $0x1f8c] ss:$16 sps:$4 sm:$0xff]   ;;  %v11718_v35 = vld [vmem:[%s15042_s4 + $0x1f80] ss:$16 sps:$4 sm:$0xff]  }
 0x3bb   : > { %7711 = vmatpush1.bf16.msra.mxu0 %v11626_v36  ;;  %7875 = vmatpush1.bf16.msra.mxu1 %v11629_v37  ;;  %v11721_v36 = vld [vmem:[%s15042_s4 + $0x1f88] ss:$16 sps:$4 sm:$0xff]   ;;  %v11726_v37 = vld [vmem:[%s15042_s4 + $0x1fa4] ss:$16 sps:$4 sm:$0xff]  }
 0x3bc   : > { %7712 = vmatprep.subr.bf16.mxu0 %v11634_v38  ;;  %7876 = vmatprep.subr.bf16.mxu1 %v11637_v39  ;;  %v11729_v38 = vld [vmem:[%s15042_s4 + $0x1fac] ss:$16 sps:$4 sm:$0xff]   ;;  %v11724_v39 = vld [vmem:[%s15042_s4 + $0x1fa0] ss:$16 sps:$4 sm:$0xff]  }
 0x3bf   : > { %7713 = vmatpush1.bf16.msra.mxu0 %v11632_v40  ;;  %7877 = vmatpush1.bf16.msra.mxu1 %v11635_v41  ;;  %v11727_v40 = vld [vmem:[%s15042_s4 + $0x1fa8] ss:$16 sps:$4 sm:$0xff]   ;;  %v11732_v41 = vld [vmem:[%s15042_s4 + $0x1fc4] ss:$16 sps:$4 sm:$0xff]  }
 0x3c0   : > { %7714 = vmatprep.subr.bf16.mxu0 %v11640_v42  ;;  %7878 = vmatprep.subr.bf16.mxu1 %v11643_v43  ;;  %v11735_v42 = vld [vmem:[%s15042_s4 + $0x1fcc] ss:$16 sps:$4 sm:$0xff]   ;;  %v11730_v43 = vld [vmem:[%s15042_s4 + $0x1fc0] ss:$16 sps:$4 sm:$0xff]  }
 0x3c3   : > { %7715 = vmatpush1.bf16.msra.mxu0 %v11638_v44  ;;  %7879 = vmatpush1.bf16.msra.mxu1 %v11641_v45  ;;  %v11733_v44 = vld [vmem:[%s15042_s4 + $0x1fc8] ss:$16 sps:$4 sm:$0xff]   ;;  %v11738_v45 = vld [vmem:[%s15042_s4 + $0x1fe4] ss:$16 sps:$4 sm:$0xff]  }
 0x3c4   : > { %7725 = vmatprep.subr.bf16.mxu0 %v11648_v46  ;;  %7889 = vmatprep.subr.bf16.mxu1 %v11651_v47  ;;  %v11741_v46 = vld [vmem:[%s15042_s4 + $0x1fec] ss:$16 sps:$4 sm:$0xff]   ;;  %v11736_v47 = vld [vmem:[%s15042_s4 + $0x1fe0] ss:$16 sps:$4 sm:$0xff]  }
 0x3c6   : > { %7717 = vmatmul.mubr.bf16.vlgmr.msra.gmra.mrb[0].mxu0 %v9774_v48  ;;  %7881 = vmatmul.mubr.bf16.vlgmr.msra.gmra.mrb[0].mxu1 %v9774_v48  ;;  %v11739_v48 = vld [vmem:[%s15042_s4 + $0x1fe8] ss:$16 sps:$4 sm:$0xff]  }
 0x3c7   : > { %7726 = vmatpush1.bf16.msra.mxu0 %v11646_v49  ;;  %7890 = vmatpush1.bf16.msra.mxu1 %v11649_v50  ;;  %v9776_v49 = vcombine.low %v14821_v30, %v14821_v30  ;;  %v11752_v50 = vmov 1966171168  }
 0x3c8   : > { %7727 = vmatprep.subr.bf16.mxu0 %v11654_v51  ;;  %7891 = vmatprep.subr.bf16.mxu1 %v11657_v27  ;;  %v7983_v51 = vunpack.c.l.s4 %v11752_v50  ;;  %v7985_v27 = vlaneseq }
 0x3c9   : > { %7757 = vmatprep.mubr.bf16.mxu0 %v9777_v52  ;;  %7921 = vmatprep.mubr.bf16.mxu1 %v9777_v52 }
 0x3ca   : > { %v7984_v52 = vunpack.c.0.s8 %v7983_v51  ;;  %vm8007_vm0 = vcmp.lt.s32.totalorder %v7985_v27, 512 }
 0x3cb   : > { %7728 = vmatpush1.bf16.msra.mxu0 %v11652_v53  ;;  %7892 = vmatpush1.bf16.msra.mxu1 %v11655_v54  ;;  %v7986_v53 = vshrl.u32 %v7985_v27, 7 }
 0x3cc   : > { %7729 = vmatprep.subr.bf16.mxu0 %v11660_v55  ;;  %7893 = vmatprep.subr.bf16.mxu1 %v11663_v56 }
 0x3cd   : > { %v15019_v56 = vsub.s32 %v7984_v52, %v7986_v53 }
 0x3cf   : > { %7730 = vmatpush1.bf16.msra.mxu0 %v11658_v57  ;;  %7894 = vmatpush1.bf16.msra.mxu1 %v11661_v58 }
 0x3d0   : > { %7731 = vmatprep.subr.bf16.mxu0 %v11666_v59  ;;  %7895 = vmatprep.subr.bf16.mxu1 %v11669_v60 }
 0x3d3   : > { %7732 = vmatpush1.bf16.msra.mxu0 %v11664_v61  ;;  %7896 = vmatpush1.bf16.msra.mxu1 %v11667_v62 }
 0x3d4   : > { %7733 = vmatprep.subr.bf16.mxu0 %v11672_v63  ;;  %7897 = vmatprep.subr.bf16.mxu1 %v11675_v0 }
 0x3d7   : > { %7734 = vmatpush1.bf16.msra.mxu0 %v11670_v1  ;;  %7898 = vmatpush1.bf16.msra.mxu1 %v11673_v2 }
 0x3d8   : > { %7735 = vmatprep.subr.bf16.mxu0 %v11678_v3  ;;  %7899 = vmatprep.subr.bf16.mxu1 %v11681_v4 }
 0x3db   : > { %7736 = vmatpush1.bf16.msra.mxu0 %v11676_v5  ;;  %7900 = vmatpush1.bf16.msra.mxu1 %v11679_v6 }
 0x3dc   : > { %7737 = vmatprep.subr.bf16.mxu0 %v11684_v7  ;;  %7901 = vmatprep.subr.bf16.mxu1 %v11687_v8 }
 0x3df   : > { %7738 = vmatpush1.bf16.msra.mxu0 %v11682_v9  ;;  %7902 = vmatpush1.bf16.msra.mxu1 %v11685_v10 }
 0x3e0   : > { %7739 = vmatprep.subr.bf16.mxu0 %v11690_v12  ;;  %7903 = vmatprep.subr.bf16.mxu1 %v11693_v13 }
 0x3e3   : > { %7740 = vmatpush1.bf16.msra.mxu0 %v11688_v15  ;;  %7904 = vmatpush1.bf16.msra.mxu1 %v11691_v16 }
 0x3e4   : > { %7741 = vmatprep.subr.bf16.mxu0 %v11696_v17  ;;  %7905 = vmatprep.subr.bf16.mxu1 %v11699_v19 }
 0x3e7   : > { %7742 = vmatpush1.bf16.msra.mxu0 %v11694_v14  ;;  %7906 = vmatpush1.bf16.msra.mxu1 %v11697_v20 }
 0x3e8   : > { %7743 = vmatprep.subr.bf16.mxu0 %v11702_v11  ;;  %7907 = vmatprep.subr.bf16.mxu1 %v11705_v22 }
 0x3eb   : > { %7744 = vmatpush1.bf16.msra.mxu0 %v11700_v23  ;;  %7908 = vmatpush1.bf16.msra.mxu1 %v11703_v18 }
 0x3ec   : > { %7745 = vmatprep.subr.bf16.mxu0 %v11708_v25  ;;  %7909 = vmatprep.subr.bf16.mxu1 %v11711_v26 }
 0x3ef   : > { %7746 = vmatpush1.bf16.msra.mxu0 %v11706_v21  ;;  %7910 = vmatpush1.bf16.msra.mxu1 %v11709_v28 }
 0x3f0   : > { %7747 = vmatprep.subr.bf16.mxu0 %v11714_v29  ;;  %7911 = vmatprep.subr.bf16.mxu1 %v11717_v24 }
 0x3f3   : > { %7748 = vmatpush1.bf16.msra.mxu0 %v11712_v31  ;;  %7912 = vmatpush1.bf16.msra.mxu1 %v11715_v32 }
 0x3f4   : > { %7749 = vmatprep.subr.bf16.mxu0 %v11720_v33  ;;  %7913 = vmatprep.subr.bf16.mxu1 %v11723_v34 }
 0x3f7   : > { %7750 = vmatpush1.bf16.msra.mxu0 %v11718_v35  ;;  %7914 = vmatpush1.bf16.msra.mxu1 %v11721_v36 }
 0x3f8   : > { %7751 = vmatprep.subr.bf16.mxu0 %v11726_v37  ;;  %7915 = vmatprep.subr.bf16.mxu1 %v11729_v38 }
 0x3fb   : > { %7752 = vmatpush1.bf16.msra.mxu0 %v11724_v39  ;;  %7916 = vmatpush1.bf16.msra.mxu1 %v11727_v40 }
 0x3fc   : > { %7753 = vmatprep.subr.bf16.mxu0 %v11732_v41  ;;  %7917 = vmatprep.subr.bf16.mxu1 %v11735_v42 }
 0x3ff   : > { %7754 = vmatpush1.bf16.msra.mxu0 %v11730_v43  ;;  %7918 = vmatpush1.bf16.msra.mxu1 %v11733_v44 }
 0x400   : > { %7755 = vmatprep.subr.bf16.mxu0 %v11738_v45  ;;  %7919 = vmatprep.subr.bf16.mxu1 %v11741_v46 }
 0x403   : > { %7756 = vmatpush1.bf16.msra.mxu0 %v11736_v47  ;;  %7920 = vmatpush1.bf16.msra.mxu1 %v11739_v48 }
 0x406   : > { %7758 = vmatmul.mubr.bf16.vlgmr.msra.gmra.mrb[0].mxu0 %v9776_v49  ;;  %7922 = vmatmul.mubr.bf16.vlgmr.msra.gmra.mrb[0].mxu1 %v9776_v49 }
 0x4d9   : > { %v7759_v54 = vpop.f32.mrb[0].mxu0  ;;  %v7923_v55 = vpop.f32.mrb[0].mxu1 }
 0x4da   : > { %v7952_v30 = vrot.slane %v7759_v54, 4  ;;  %v8010_v57 = vmul.f32 %v7759_v54, %v7759_v54  ;;  %v7964_v58 = vrot.slane %v7923_v55, 4  ;;  %v8012_v59 = vmul.f32 %v7923_v55, %v7923_v55  ;;  %v7761_v60 = vpop.f32.mrb[1].mxu0  ;;  %v7925_v61 = vpop.f32.mrb[1].mxu1 }
 0x4db   : > { %v10045_v62 = vpack.c.bf16 %v7761_v60, %v7759_v54  ;;  %v7958_v63 = vrot.slane %v7761_v60, 4  ;;  %v8011_v0 = vmul.f32 %v7761_v60, %v7761_v60  ;;  %v10046_v1 = vpack.c.bf16 %v7925_v61, %v7923_v55  ;;  %v7763_v2 = vpop.f32.mrb[2].mxu0  ;;  %v7927_v3 = vpop.f32.mrb[2].mxu1 }
 0x4dc   : > { %v7953_v4 = vadd.f32 %v7952_v30, %v7759_v54  ;;  %v8014_v5 = vrot.slane %v8010_v57, 4  ;;  %v7965_v6 = vadd.f32 %v7964_v58, %v7923_v55  ;;  %v8026_v7 = vrot.slane %v8012_v59, 4  ;;  %v7764_v8 = vpop.f32.mrb[3].mxu0  ;;  %v7928_v9 = vpop.f32.mrb[3].mxu1 }
 0x4dd   : > { %7950 = vst [vmem:[%s333_s19] sm:$0xff] %v10045_v62  ;;  %v7959_v10 = vadd.f32 %v7958_v63, %v7761_v60  ;;  %v8020_v12 = vrot.slane %v8011_v0, 4  ;;  %7951 = vst [vmem:[%s333_s19 + $0x8] sm:$0xff] %v10046_v1  ;;  %v7970_v13 = vrot.slane %v7925_v61, 4  ;;  %v8013_v15 = vmul.f32 %v7925_v61, %v7925_v61 }
 0x4de   : > { %v7954_v16 = vrot.slane %v7953_v4, 2  ;;  %v8015_v17 = vadd.f32 %v8014_v5, %v8010_v57  ;;  %v7966_v19 = vrot.slane %v7965_v6, 2  ;;  %v8027_v14 = vadd.f32 %v8026_v7, %v8012_v59 }
 0x4df   : > { %v7960_v20 = vrot.slane %v7959_v10, 2  ;;  %v8021_v11 = vadd.f32 %v8020_v12, %v8011_v0  ;;  %v7971_v22 = vadd.f32 %v7970_v13, %v7925_v61  ;;  %v8032_v23 = vrot.slane %v8013_v15, 4 }
 0x4e0   : > { %v7955_v18 = vadd.f32 %v7954_v16, %v7953_v4  ;;  %v8016_v25 = vrot.slane %v8015_v17, 2  ;;  %v7967_v26 = vadd.f32 %v7966_v19, %v7965_v6  ;;  %v8028_v21 = vrot.slane %v8027_v14, 2 }
 0x4e1   : > { %v7961_v28 = vadd.f32 %v7960_v20, %v7959_v10  ;;  %v8022_v29 = vrot.slane %v8021_v11, 2  ;;  %v7972_v24 = vrot.slane %v7971_v22, 2  ;;  %v8033_v31 = vadd.f32 %v8032_v23, %v8013_v15 }
 0x4e2   : > { %v7956_v32 = vrot.slane %v7955_v18, 1  ;;  %v8017_v33 = vadd.f32 %v8016_v25, %v8015_v17  ;;  %v7968_v34 = vrot.slane %v7967_v26, 1  ;;  %v8029_v35 = vadd.f32 %v8028_v21, %v8027_v14 }
 0x4e3   : > { %v7962_v36 = vrot.slane %v7961_v28, 1  ;;  %v8023_v37 = vadd.f32 %v8022_v29, %v8021_v11  ;;  %v7973_v38 = vadd.f32 %v7972_v24, %v7971_v22  ;;  %v8034_v39 = vrot.slane %v8033_v31, 2 }
 0x4e4   : > { %v7957_v40 = vadd.f32 %v7956_v32, %v7955_v18  ;;  %v8018_v41 = vrot.slane %v8017_v33, 1  ;;  %v7969_v42 = vadd.f32 %v7968_v34, %v7967_v26  ;;  %v8030_v43 = vrot.slane %v8029_v35, 1 }
 0x4e5   : > { %v7963_v44 = vadd.f32 %v7962_v36, %v7961_v28  ;;  %v8024_v45 = vrot.slane %v8023_v37, 1  ;;  %v7974_v46 = vrot.slane %v7973_v38, 1  ;;  %v8035_v47 = vadd.f32 %v8034_v39, %v8033_v31 }
 0x4e6   : > { %v8019_v48 = vadd.f32 %v8018_v41, %v8017_v33  ;;  %v8031_v49 = vadd.f32 %v8030_v43, %v8029_v35 }
 0x4e7   : > { %v7980_v50 = vcombine.low %v7957_v40, %v7963_v44  ;;  %v8025_v51 = vadd.f32 %v8024_v45, %v8023_v37  ;;  %v7975_v52 = vadd.f32 %v7974_v46, %v7973_v38  ;;  %v8036_v53 = vrot.slane %v8035_v47, 1 }
 0x4e9   : > { %v7988_v54 = vrot.slane %v7980_v50, %v15019_v56  ;;  %v8042_v55 = vcombine.low %v8019_v48, %v8025_v51  ;;  %v7981_v30 = vcombine.low %v7969_v42, %v7975_v52  ;;  %v8037_v57 = vadd.f32 %v8036_v53, %v8035_v47 }
 0x4eb   : > { %v8050_v58 = vrot.slane %v8042_v55, %v15019_v56  ;;  %v7995_v59 = vrot.slane %v7981_v30, %v15019_v56  ;;  %v8043_v60 = vcombine.low %v8031_v49, %v8037_v57 }
 0x4ed   : > { %v7996_v61 = vcombine.low %v7988_v54, %v7995_v59  ;;  %v8057_v62 = vrot.slane %v8043_v60, %v15019_v56 }
 0x4ef   : > { %v8003_v63 = vrot.slane %v7996_v61, %v15019_v56  ;;  %v8058_v0 = vcombine.low %v8050_v58, %v8057_v62 }
 0x4f1   : > { %8009 = vst.msk [vmem:[%s338_s15] ss:$2 sm:$0xf] %vm8007_vm0, %v8003_v63  ;;  %v8065_v1 = vrot.slane %v8058_v0, %v15019_v56 }
 0x4f3   : > { %10036 = vst.msk [vmem:[%s338_s15 + $0x1] ss:$2 sm:$0xf] %vm8007_vm0, %v8065_v1 }
 0x4f4 PF: > { %s17_s21 = sadd.s32 1, %s11750_s21  }
 0x4f5   : > { %p14_p6 = scmp.ge.s32.totalorder %s17_s21, 6  }
 0x4f7   :  { %16 = sbr.rel (!%p14_p6) target bundleno = 1 (0x1), region = 95 }

</bundles_post_ra>
